<compile_context>
chip_gen: v7x
topology: tpu7x:2x2x1
jax: 0.10.0
libtpu: 0.0.40
codegen_flags: <defaults>
</compile_context>

<pallas_src>
import jax
import jax.numpy as jnp
from jax.experimental import pallas as pl
from jax.experimental.pallas import tpu as pltpu

LRELU_SLOPE = 0.2
BN_EPS = 1e-5


def _round_up(x, m):
    return (x + m - 1) // m * m


def _vmem_limit_bytes(tm, tk, tn, in_bytes=2, out_bytes=2):
    """Right-sized VMEM request from the actual tile working set:
    double-buffered activation / weight / output tiles + f32 accumulator
    scratch + shift row + compiler slack.  Capped at 48 MiB (v7x-safe)."""
    need = (2 * tm * tk * in_bytes      # bf16 activation tiles (double buffered)
            + 2 * tk * tn * in_bytes    # bf16 weight tiles (streamed over K)
            + 2 * tm * tn * out_bytes   # output tiles (double buffered)
            + tm * tn * 4               # f32 accumulator scratch
            + 2 * tn * 4)               # f32 shift / bias row
    return int(min(max(need + (2 << 20), 16 << 20), 48 << 20))


# ----------------------------------------------------------------------------
# Kernels
# ----------------------------------------------------------------------------
def _conv_gemm_kernel(x_ref, w_ref, shift_ref, o_ref, acc_ref):
    """One (row-tile, N-tile) block of LeakyReLU_{0.2}(patches @ W' + shift),
    accumulated over the innermost K grid axis.

    x_ref     : (TM, TK)  bf16  im2col patches
    w_ref     : (TK, TN)  bf16  conv weights with BN scale pre-folded
    shift_ref : (1, TN)   f32   folded conv-bias + BatchNorm shift
    o_ref     : (TM, TN)  bf16  layer output
    acc_ref   : (TM, TN)  f32   VMEM accumulator (persists across K steps)
    """
    k = pl.program_id(2)

    @pl.when(k == 0)
    def _():
        acc_ref[...] = jnp.zeros_like(acc_ref)

    acc_ref[...] += jnp.dot(x_ref[...], w_ref[...],
                            preferred_element_type=jnp.float32)

    @pl.when(k == pl.num_programs(2) - 1)
    def _():
        y = acc_ref[...] + shift_ref[...]
        y = jnp.where(y > 0, y, LRELU_SLOPE * y)
        o_ref[...] = y.astype(o_ref.dtype)


def _head_kernel(x_ref, w_ref, b_ref, o_ref, acc_ref):
    """Final 4x4x1024 -> 1 conv + Sigmoid as a K-tiled MXU matmul against a
    lane-dense (TK, 128) weight (column 0 = real filter, rest zero).

    x_ref : (TM, TK) bf16,  w_ref : (TK, 128) bf16,  b_ref : (1, 128) f32,
    o_ref : (TM, 128) f32 (column 0 holds the probability), acc_ref f32 scratch.
    """
    k = pl.program_id(1)

    @pl.when(k == 0)
    def _():
        acc_ref[...] = jnp.zeros_like(acc_ref)

    acc_ref[...] += jnp.dot(x_ref[...], w_ref[...],
                            preferred_element_type=jnp.float32)

    @pl.when(k == pl.num_programs(1) - 1)
    def _():
        logit = acc_ref[...] + b_ref[...]
        o_ref[...] = 1.0 / (1.0 + jnp.exp(-logit))        # exact sigmoid


# ----------------------------------------------------------------------------
# Wrapper (layout plumbing only; all conv arithmetic runs in the kernels above)
# ----------------------------------------------------------------------------
def _im2col(x_nhwc, kh, kw, stride, pad):
    """Patch matrix (B*OH*OW, KH*KW*C) built with pure slicing/stacking."""
    # TODO(synk): long term the im2col patch matrix should not be materialized
    # in HBM (drive the conv as a sum over (kh,kw) taps inside the kernel).
    if pad:
        x_nhwc = jnp.pad(x_nhwc, ((0, 0), (pad, pad), (pad, pad), (0, 0)))
    b, hp, wp, c = x_nhwc.shape
    oh = (hp - kh) // stride + 1
    ow = (wp - kw) // stride + 1
    taps = []
    for i in range(kh):
        for j in range(kw):
            taps.append(jax.lax.slice(
                x_nhwc,
                (0, i, j, 0),
                (b, i + stride * (oh - 1) + 1, j + stride * (ow - 1) + 1, c),
                (1, stride, stride, 1)))
    patches = jnp.stack(taps, axis=3)            # (B, OH, OW, KH*KW, C)
    return patches.reshape(b * oh * ow, kh * kw * c), (b, oh, ow)


def _w_matrix(w_oihw):
    cout, cin, kh, kw = w_oihw.shape
    return jnp.transpose(w_oihw, (2, 3, 1, 0)).reshape(kh * kw * cin, cout)


def _conv_lrelu_block(x_nhwc, w_oihw, bias, bn, stride, pad,
                      *, tm_req, tn_req, tk_req):
    cout, cin, kh, kw = w_oihw.shape
    patches, (b, oh, ow) = _im2col(x_nhwc, kh, kw, stride, pad)
    k = kh * kw * cin

    # TODO(synk): BatchNorm2d is implemented in inference mode (running-stats
    # folded into the weights / shift); training-mode batch statistics are not
    # computed in-kernel.
    w_mat = _w_matrix(w_oihw).astype(jnp.float32)
    if bn is None:
        shift = bias.astype(jnp.float32)
    else:
        gamma, beta, mean, var = bn
        s = (gamma / jnp.sqrt(var + BN_EPS)).astype(jnp.float32)
        w_mat = w_mat * s[None, :]               # fold BN scale into W columns
        shift = (bias - mean) * s + beta
    shift = shift.reshape(1, cout).astype(jnp.float32)

    # K tiling: tk is a lane multiple; pad K up to a multiple of tk.
    tk = min(tk_req, _round_up(k, 128))
    k_pad = _round_up(k, tk)
    if k_pad != k:
        patches = jnp.pad(patches, ((0, 0), (0, k_pad - k)))
        w_mat = jnp.pad(w_mat, ((0, k_pad - k), (0, 0)))

    # Row tiling: tm is a multiple of 16 (bf16 sublane packing); pad rows to tm.
    m = patches.shape[0]
    tm = min(tm_req, _round_up(m, 16))
    m_pad = _round_up(m, tm)
    if m_pad != m:
        patches = jnp.pad(patches, ((0, m_pad - m), (0, 0)))

    tn = min(tn_req, cout)

    patches = patches.astype(jnp.bfloat16)
    w_mat = w_mat.astype(jnp.bfloat16)

    out = pl.pallas_call(
        _conv_gemm_kernel,
        out_shape=jax.ShapeDtypeStruct((m_pad, cout), jnp.bfloat16),
        grid=(m_pad // tm, cout // tn, k_pad // tk),
        in_specs=[
            pl.BlockSpec((tm, tk), lambda i, j, kk: (i, kk)),   # activations
            pl.BlockSpec((tk, tn), lambda i, j, kk: (kk, j)),   # streamed weights
            pl.BlockSpec((1, tn), lambda i, j, kk: (0, j)),     # folded shift
        ],
        out_specs=pl.BlockSpec((tm, tn), lambda i, j, kk: (i, j)),
        scratch_shapes=[pltpu.VMEM((tm, tn), jnp.float32)],
        compiler_params=pltpu.CompilerParams(
            dimension_semantics=("parallel", "parallel", "arbitrary"),
            vmem_limit_bytes=_vmem_limit_bytes(tm, tk, tn),
        ),
    )(patches, w_mat, shift)

    return out[:m].reshape(b, oh, ow, cout)


def _head_block(x_nhwc, w_oihw, bias, *, tk_req=4096):
    cout, cin, kh, kw = w_oihw.shape                         # (1, 1024, 4, 4)
    patches, (b, oh, ow) = _im2col(x_nhwc, kh, kw, stride=1, pad=0)  # OH=OW=1
    k = kh * kw * cin

    tk = min(tk_req, _round_up(k, 128))
    k_pad = _round_up(k, tk)
    if k_pad != k:
        patches = jnp.pad(patches, ((0, 0), (0, k_pad - k)))

    m = patches.shape[0]
    tm = min(128, _round_up(m, 16))
    m_pad = _round_up(m, tm)
    if m_pad != m:
        patches = jnp.pad(patches, ((0, m_pad - m), (0, 0)))
    patches = patches.astype(jnp.bfloat16)

    # Weight padded to a lane-dense (K, 128) matrix: column 0 is the real
    # filter, columns 1..127 are zero.  The output store is then an unmasked
    # 128-lane vst; column 0 is sliced off in the wrapper.
    w_col = _w_matrix(w_oihw).astype(jnp.float32)            # (K, 1)
    w_mat = jnp.pad(w_col, ((0, k_pad - k), (0, 127))).astype(jnp.bfloat16)
    b_row = jnp.broadcast_to(bias.astype(jnp.float32).reshape(1, 1), (1, 128))

    out = pl.pallas_call(
        _head_kernel,
        out_shape=jax.ShapeDtypeStruct((m_pad, 128), jnp.float32),
        grid=(m_pad // tm, k_pad // tk),
        in_specs=[
            pl.BlockSpec((tm, tk), lambda i, kk: (i, kk)),
            pl.BlockSpec((tk, 128), lambda i, kk: (kk, 0)),
            pl.BlockSpec((1, 128), lambda i, kk: (0, 0)),
        ],
        out_specs=pl.BlockSpec((tm, 128), lambda i, kk: (i, 0)),
        scratch_shapes=[pltpu.VMEM((tm, 128), jnp.float32)],
        compiler_params=pltpu.CompilerParams(
            dimension_semantics=("parallel", "arbitrary"),
            vmem_limit_bytes=_vmem_limit_bytes(tm, tk, 128, out_bytes=4),
        ),
    )(patches, w_mat, b_row)

    return out[:m, :1]                                       # (B, 1)


def discriminator_forward(x_nchw, params):
    """Forward pass of the DCGAN Discriminator: (B, C, 32, 32) f32 -> (B, 1, 1, 1)."""
    (w1, b1), (w2, b2, bn2), (w3, b3, bn3), (w4, b4) = params
    x = jnp.transpose(x_nchw, (0, 2, 3, 1)).astype(jnp.float32)   # NHWC

    # Per-layer tiles: layer 1 is HBM-bound (tiny K) -> big row tile; layers
    # 2/3 stream weights over a tiled K axis and split N across grid steps.
    x = _conv_lrelu_block(x, w1, b1, bn=None, stride=2, pad=1,
                          tm_req=512, tn_req=256, tk_req=512)     # (B,16,16, 256)
    x = _conv_lrelu_block(x, w2, b2, bn=bn2, stride=2, pad=1,
                          tm_req=256, tn_req=256, tk_req=2048)    # (B, 8, 8, 512)
    x = _conv_lrelu_block(x, w3, b3, bn=bn3, stride=2, pad=1,
                          tm_req=256, tn_req=512, tk_req=2048)    # (B, 4, 4,1024)
    out = _head_block(x, w4, b4)                                  # (B, 1)
    return out.reshape(-1, 1, 1, 1)


# ----------------------------------------------------------------------------
# Init + pure-JAX reference + self-test
# ----------------------------------------------------------------------------
def init_params(key, channels=3):
    """PyTorch-style init: Conv2d weight/bias ~ U(-1/sqrt(fan_in), 1/sqrt(fan_in));
    BatchNorm stats/affine randomized so the folded-BN path is exercised."""
    ks = jax.random.split(key, 16)

    def conv_init(kw_, kb_, cin, cout, ksz):
        bound = 1.0 / float(cin * ksz * ksz) ** 0.5
        w = jax.random.uniform(kw_, (cout, cin, ksz, ksz), jnp.float32, -bound, bound)
        b_ = jax.random.uniform(kb_, (cout,), jnp.float32, -bound, bound)
        return w, b_

    def bn_init(kg, kb_, km, kv, c):
        gamma = jax.random.uniform(kg, (c,), jnp.float32, 0.5, 1.5)
        beta = 0.1 * jax.random.normal(kb_, (c,), jnp.float32)
        mean = 0.1 * jax.random.normal(km, (c,), jnp.float32)
        var = jax.random.uniform(kv, (c,), jnp.float32, 0.5, 1.5)
        return gamma, beta, mean, var

    w1, b1 = conv_init(ks[0], ks[1], channels, 256, 4)
    w2, b2 = conv_init(ks[2], ks[3], 256, 512, 4)
    bn2 = bn_init(ks[4], ks[5], ks[6], ks[7], 512)
    w3, b3 = conv_init(ks[8], ks[9], 512, 1024, 4)
    bn3 = bn_init(ks[10], ks[11], ks[12], ks[13], 1024)
    w4, b4 = conv_init(ks[14], ks[15], 1024, 1, 4)
    return ((w1, b1), (w2, b2, bn2), (w3, b3, bn3), (w4, b4))


def _reference(x_nchw, params):
    """Independent pure-JAX reference (lax.conv in full f32).  Conv weights are
    rounded to bf16 so the comparison isolates kernel correctness from the
    intended low-precision weight storage (activations/outputs of the Pallas
    path additionally use bf16 storage, covered by the test tolerance)."""
    (w1, b1), (w2, b2, bn2), (w3, b3, bn3), (w4, b4) = params

    def conv(x, w, b_, stride, pad):
        w = w.astype(jnp.bfloat16).astype(jnp.float32)
        y = jax.lax.conv_general_dilated(
            x, w, (stride, stride), ((pad, pad), (pad, pad)),
            dimension_numbers=("NCHW", "OIHW", "NCHW"),
            precision=jax.lax.Precision.HIGHEST)
        return y + b_[None, :, None, None]

    def bn(x, p):
        g, be, m, v = p
        return (x - m[None, :, None, None]) / jnp.sqrt(v[None, :, None, None] + BN_EPS) \
            * g[None, :, None, None] + be[None, :, None, None]

    def lrelu(x):
        return jnp.where(x > 0, x, LRELU_SLOPE * x)

    h = lrelu(conv(x_nchw, w1, b1, 2, 1))
    h = lrelu(bn(conv(h, w2, b2, 2, 1), bn2))
    h = lrelu(bn(conv(h, w3, b3, 2, 1), bn3))
    logit = conv(h, w4, b4, 1, 0)
    return jax.nn.sigmoid(logit)


if __name__ == "__main__":
    key = jax.random.PRNGKey(0)
    pkey, xkey = jax.random.split(key)

    BATCH, CHANNELS = 2, 3            # discriminator topology requires 32x32 inputs
    params = init_params(pkey, channels=CHANNELS)
    x = jax.random.normal(xkey, (BATCH, CHANNELS, 32, 32), jnp.float32)

    fwd = jax.jit(discriminator_forward)
    out = jax.block_until_ready(fwd(x, params))

    ref = _reference(x, params)
    assert out.shape == (BATCH, 1, 1, 1), out.shape
    max_err = float(jnp.max(jnp.abs(out - ref)))
    assert max_err < 1e-2, f"mismatch vs pure-JAX reference: max |diff| = {max_err}"
    print("KERNEL_OK")
</pallas_src>

<mosaic_0001>
module attributes {stable_mosaic.version = 11 : i64} {
  func.func private @main(%arg0: i32) attributes {dimension_semantics = [#tpu.dimension_semantics<core_parallel>], iteration_bounds = array<i64: 2>, tpu.core_type = #tpu.core_type<sc_scalar_subcore>, window_params = []} {
    return
  }
}

module attributes {stable_mosaic.version = 11 : i64} {
  func.func private @main(%arg0: i32) attributes {dimension_semantics = [#tpu.dimension_semantics<core_parallel>], iteration_bounds = array<i64: 2>, tpu.core_type = #tpu.core_type<sc_scalar_subcore>, window_params = []} {
    return
  }
}

module attributes {stable_mosaic.version = 11 : i64} {
  func.func @_conv_gemm_kernel(%arg0: i32, %arg1: i32, %arg2: i32, %arg3: memref<512x128xbf16, #tpu.memory_space<vmem>>, %arg4: memref<128x256xbf16, #tpu.memory_space<vmem>>, %arg5: memref<1x256xf32, #tpu.memory_space<vmem>>, %arg6: memref<512x256xbf16, #tpu.memory_space<vmem>>, %arg7: memref<512x256xf32, #tpu.memory_space<vmem>>) attributes {dimension_semantics = [#tpu.dimension_semantics<parallel>, #tpu.dimension_semantics<parallel>, #tpu.dimension_semantics<arbitrary>], iteration_bounds = array<i64: 1, 1, 1>, scalar_prefetch = 0 : i64, scratch_operands = 1 : i64, tpu.core_type = #tpu.core_type<tc>, window_params = [{transform_indices = @transform_0, window_bounds = array<i64: 512, 128>}, {transform_indices = @transform_1, window_bounds = array<i64: 128, 256>}, {transform_indices = @transform_2, window_bounds = array<i64: 1, 256>}, {transform_indices = @transform_3, window_bounds = array<i64: 512, 256>}]} {
    %c0_i32 = arith.constant 0 : i32
    %0 = arith.cmpi eq, %arg2, %c0_i32 : i32
    %1 = arith.extui %0 : i1 to i32
    %c0_i32_0 = arith.constant 0 : i32
    %2 = arith.cmpi ne, %1, %c0_i32_0 : i32
    scf.if %2 {
      %cst_10 = arith.constant 0.000000e+00 : f32
      %12 = vector.broadcast %cst_10 : f32 to vector<512x256xf32>
      %c0_11 = arith.constant 0 : index
      %c0_12 = arith.constant 0 : index
      %13 = vector.load %arg7[%c0_11, %c0_12] : memref<512x256xf32, #tpu.memory_space<vmem>>, vector<512x256xf32>
      tpu.vector_store %arg7[%c0_11, %c0_12], %12 {strides = array<i32>} : memref<512x256xf32, #tpu.memory_space<vmem>>, vector<512x256xf32>,
    } else {
    }
    %c0 = arith.constant 0 : index
    %c0_1 = arith.constant 0 : index
    %3 = vector.load %arg7[%c0, %c0_1] : memref<512x256xf32, #tpu.memory_space<vmem>>, vector<512x256xf32>
    %c0_2 = arith.constant 0 : index
    %c0_3 = arith.constant 0 : index
    %4 = vector.load %arg3[%c0_2, %c0_3] : memref<512x128xbf16, #tpu.memory_space<vmem>>, vector<512x128xbf16>
    %c0_4 = arith.constant 0 : index
    %c0_5 = arith.constant 0 : index
    %5 = vector.load %arg4[%c0_4, %c0_5] : memref<128x256xbf16, #tpu.memory_space<vmem>>, vector<128x256xbf16>
    %cst = arith.constant dense<0.000000e+00> : vector<512x256xf32>
    %6 = tpu.matmul %4, %5, %cst {dimension_numbers = #tpu.dot_dimension_numbers<[1], [0], [0], [1], [0, 0, 1, 1], [], []>} : vector<512x128xbf16>, vector<128x256xbf16>, vector<512x256xf32> -> vector<512x256xf32>
    %7 = arith.addf %3, %6 : vector<512x256xf32>
    %c0_6 = arith.constant 0 : index
    %c0_7 = arith.constant 0 : index
    %8 = vector.load %arg7[%c0_6, %c0_7] : memref<512x256xf32, #tpu.memory_space<vmem>>, vector<512x256xf32>
    tpu.vector_store %arg7[%c0_6, %c0_7], %7 {strides = array<i32>} : memref<512x256xf32, #tpu.memory_space<vmem>>, vector<512x256xf32>,
    %c0_i32_8 = arith.constant 0 : i32
    %9 = arith.cmpi eq, %arg2, %c0_i32_8 : i32
    %10 = arith.extui %9 : i1 to i32
    %c0_i32_9 = arith.constant 0 : i32
    %11 = arith.cmpi ne, %10, %c0_i32_9 : i32
    scf.if %11 {
      %c0_10 = arith.constant 0 : index
      %c0_11 = arith.constant 0 : index
      %12 = vector.load %arg7[%c0_10, %c0_11] : memref<512x256xf32, #tpu.memory_space<vmem>>, vector<512x256xf32>
      %c0_12 = arith.constant 0 : index
      %c0_13 = arith.constant 0 : index
      %13 = vector.load %arg5[%c0_12, %c0_13] : memref<1x256xf32, #tpu.memory_space<vmem>>, vector<1x256xf32>
      %14 = vector.broadcast %13 : vector<1x256xf32> to vector<512x256xf32>
      %15 = arith.addf %12, %14 : vector<512x256xf32>
      %cst_14 = arith.constant 0.000000e+00 : f32
      %16 = vector.broadcast %cst_14 : f32 to vector<512x256xf32>
      %17 = arith.cmpf ogt, %15, %16 : vector<512x256xf32>
      %cst_15 = arith.constant 2.000000e-01 : f32
      %18 = vector.broadcast %cst_15 : f32 to vector<512x256xf32>
      %19 = arith.mulf %18, %15 : vector<512x256xf32>
      %20 = arith.select %17, %15, %19 : vector<512x256xi1>, vector<512x256xf32>
      %21 = arith.truncf %20 : vector<512x256xf32> to vector<512x256xbf16>
      %c0_16 = arith.constant 0 : index
      %c0_17 = arith.constant 0 : index
      %22 = vector.load %arg6[%c0_16, %c0_17] : memref<512x256xbf16, #tpu.memory_space<vmem>>, vector<512x256xbf16>
      tpu.vector_store %arg6[%c0_16, %c0_17], %21 {strides = array<i32>} : memref<512x256xbf16, #tpu.memory_space<vmem>>, vector<512x256xbf16>,
    } else {
    }
    return
  }
  func.func @transform_0(%arg0: i32, %arg1: i32, %arg2: i32) -> (i32, i32) {
    %c0_i32 = arith.constant 0 : i32
    return %arg0, %arg2 : i32, i32
  }
  func.func @transform_1(%arg0: i32, %arg1: i32, %arg2: i32) -> (i32, i32) {
    %c0_i32 = arith.constant 0 : i32
    return %arg2, %arg1 : i32, i32
  }
  func.func @transform_2(%arg0: i32, %arg1: i32, %arg2: i32) -> (i32, i32) {
    %c0_i32 = arith.constant 0 : i32
    %c0_i32_0 = arith.constant 0 : i32
    return %c0_i32, %arg1 : i32, i32
  }
  func.func @transform_3(%arg0: i32, %arg1: i32, %arg2: i32) -> (i32, i32) {
    %c0_i32 = arith.constant 0 : i32
    return %arg0, %arg1 : i32, i32
  }
}

module attributes {stable_mosaic.version = 11 : i64} {
  func.func @_conv_gemm_kernel(%arg0: i32, %arg1: i32, %arg2: i32, %arg3: memref<128x2048xbf16, #tpu.memory_space<vmem>>, %arg4: memref<2048x256xbf16, #tpu.memory_space<vmem>>, %arg5: memref<1x256xf32, #tpu.memory_space<vmem>>, %arg6: memref<128x256xbf16, #tpu.memory_space<vmem>>, %arg7: memref<128x256xf32, #tpu.memory_space<vmem>>) attributes {dimension_semantics = [#tpu.dimension_semantics<parallel>, #tpu.dimension_semantics<parallel>, #tpu.dimension_semantics<arbitrary>], iteration_bounds = array<i64: 1, 2, 2>, scalar_prefetch = 0 : i64, scratch_operands = 1 : i64, tpu.core_type = #tpu.core_type<tc>, window_params = [{transform_indices = @transform_0, window_bounds = array<i64: 128, 2048>}, {transform_indices = @transform_1, window_bounds = array<i64: 2048, 256>}, {transform_indices = @transform_2, window_bounds = array<i64: 1, 256>}, {transform_indices = @transform_3, window_bounds = array<i64: 128, 256>}]} {
    %c0_i32 = arith.constant 0 : i32
    %0 = arith.cmpi eq, %arg2, %c0_i32 : i32
    %1 = arith.extui %0 : i1 to i32
    %c0_i32_0 = arith.constant 0 : i32
    %2 = arith.cmpi ne, %1, %c0_i32_0 : i32
    scf.if %2 {
      %cst_9 = arith.constant 0.000000e+00 : f32
      %12 = vector.broadcast %cst_9 : f32 to vector<128x256xf32>
      %c0_10 = arith.constant 0 : index
      %c0_11 = arith.constant 0 : index
      %13 = vector.load %arg7[%c0_10, %c0_11] : memref<128x256xf32, #tpu.memory_space<vmem>>, vector<128x256xf32>
      tpu.vector_store %arg7[%c0_10, %c0_11], %12 {strides = array<i32>} : memref<128x256xf32, #tpu.memory_space<vmem>>, vector<128x256xf32>,
    } else {
    }
    %c0 = arith.constant 0 : index
    %c0_1 = arith.constant 0 : index
    %3 = vector.load %arg7[%c0, %c0_1] : memref<128x256xf32, #tpu.memory_space<vmem>>, vector<128x256xf32>
    %c0_2 = arith.constant 0 : index
    %c0_3 = arith.constant 0 : index
    %4 = vector.load %arg3[%c0_2, %c0_3] : memref<128x2048xbf16, #tpu.memory_space<vmem>>, vector<128x2048xbf16>
    %c0_4 = arith.constant 0 : index
    %c0_5 = arith.constant 0 : index
    %5 = vector.load %arg4[%c0_4, %c0_5] : memref<2048x256xbf16, #tpu.memory_space<vmem>>, vector<2048x256xbf16>
    %cst = arith.constant dense<0.000000e+00> : vector<128x256xf32>
    %6 = tpu.matmul %4, %5, %cst {dimension_numbers = #tpu.dot_dimension_numbers<[1], [0], [0], [1], [0, 0, 1, 1], [], []>} : vector<128x2048xbf16>, vector<2048x256xbf16>, vector<128x256xf32> -> vector<128x256xf32>
    %7 = arith.addf %3, %6 : vector<128x256xf32>
    %c0_6 = arith.constant 0 : index
    %c0_7 = arith.constant 0 : index
    %8 = vector.load %arg7[%c0_6, %c0_7] : memref<128x256xf32, #tpu.memory_space<vmem>>, vector<128x256xf32>
    tpu.vector_store %arg7[%c0_6, %c0_7], %7 {strides = array<i32>} : memref<128x256xf32, #tpu.memory_space<vmem>>, vector<128x256xf32>,
    %c1_i32 = arith.constant 1 : i32
    %9 = arith.cmpi eq, %arg2, %c1_i32 : i32
    %10 = arith.extui %9 : i1 to i32
    %c0_i32_8 = arith.constant 0 : i32
    %11 = arith.cmpi ne, %10, %c0_i32_8 : i32
    scf.if %11 {
      %c0_9 = arith.constant 0 : index
      %c0_10 = arith.constant 0 : index
      %12 = vector.load %arg7[%c0_9, %c0_10] : memref<128x256xf32, #tpu.memory_space<vmem>>, vector<128x256xf32>
      %c0_11 = arith.constant 0 : index
      %c0_12 = arith.constant 0 : index
      %13 = vector.load %arg5[%c0_11, %c0_12] : memref<1x256xf32, #tpu.memory_space<vmem>>, vector<1x256xf32>
      %14 = vector.broadcast %13 : vector<1x256xf32> to vector<128x256xf32>
      %15 = arith.addf %12, %14 : vector<128x256xf32>
      %cst_13 = arith.constant 0.000000e+00 : f32
      %16 = vector.broadcast %cst_13 : f32 to vector<128x256xf32>
      %17 = arith.cmpf ogt, %15, %16 : vector<128x256xf32>
      %cst_14 = arith.constant 2.000000e-01 : f32
      %18 = vector.broadcast %cst_14 : f32 to vector<128x256xf32>
      %19 = arith.mulf %18, %15 : vector<128x256xf32>
      %20 = arith.select %17, %15, %19 : vector<128x256xi1>, vector<128x256xf32>
      %21 = arith.truncf %20 : vector<128x256xf32> to vector<128x256xbf16>
      %c0_15 = arith.constant 0 : index
      %c0_16 = arith.constant 0 : index
      %22 = vector.load %arg6[%c0_15, %c0_16] : memref<128x256xbf16, #tpu.memory_space<vmem>>, vector<128x256xbf16>
      tpu.vector_store %arg6[%c0_15, %c0_16], %21 {strides = array<i32>} : memref<128x256xbf16, #tpu.memory_space<vmem>>, vector<128x256xbf16>,
    } else {
    }
    return
  }
  func.func @transform_0(%arg0: i32, %arg1: i32, %arg2: i32) -> (i32, i32) {
    %c0_i32 = arith.constant 0 : i32
    return %arg0, %arg2 : i32, i32
  }
  func.func @transform_1(%arg0: i32, %arg1: i32, %arg2: i32) -> (i32, i32) {
    %c0_i32 = arith.constant 0 : i32
    return %arg2, %arg1 : i32, i32
  }
  func.func @transform_2(%arg0: i32, %arg1: i32, %arg2: i32) -> (i32, i32) {
    %c0_i32 = arith.constant 0 : i32
    %c0_i32_0 = arith.constant 0 : i32
    return %c0_i32, %arg1 : i32, i32
  }
  func.func @transform_3(%arg0: i32, %arg1: i32, %arg2: i32) -> (i32, i32) {
    %c0_i32 = arith.constant 0 : i32
    return %arg0, %arg1 : i32, i32
  }
}

module attributes {stable_mosaic.version = 11 : i64} {
  func.func @_conv_gemm_kernel(%arg0: i32, %arg1: i32, %arg2: i32, %arg3: memref<32x2048xbf16, #tpu.memory_space<vmem>>, %arg4: memref<2048x512xbf16, #tpu.memory_space<vmem>>, %arg5: memref<1x512xf32, #tpu.memory_space<vmem>>, %arg6: memref<32x512xbf16, #tpu.memory_space<vmem>>, %arg7: memref<32x512xf32, #tpu.memory_space<vmem>>) attributes {dimension_semantics = [#tpu.dimension_semantics<parallel>, #tpu.dimension_semantics<parallel>, #tpu.dimension_semantics<arbitrary>], iteration_bounds = array<i64: 1, 2, 4>, scalar_prefetch = 0 : i64, scratch_operands = 1 : i64, tpu.core_type = #tpu.core_type<tc>, window_params = [{transform_indices = @transform_0, window_bounds = array<i64: 32, 2048>}, {transform_indices = @transform_1, window_bounds = array<i64: 2048, 512>}, {transform_indices = @transform_2, window_bounds = array<i64: 1, 512>}, {transform_indices = @transform_3, window_bounds = array<i64: 32, 512>}]} {
    %c0_i32 = arith.constant 0 : i32
    %0 = arith.cmpi eq, %arg2, %c0_i32 : i32
    %1 = arith.extui %0 : i1 to i32
    %c0_i32_0 = arith.constant 0 : i32
    %2 = arith.cmpi ne, %1, %c0_i32_0 : i32
    scf.if %2 {
      %cst_9 = arith.constant 0.000000e+00 : f32
      %12 = vector.broadcast %cst_9 : f32 to vector<32x512xf32>
      %c0_10 = arith.constant 0 : index
      %c0_11 = arith.constant 0 : index
      %13 = vector.load %arg7[%c0_10, %c0_11] : memref<32x512xf32, #tpu.memory_space<vmem>>, vector<32x512xf32>
      tpu.vector_store %arg7[%c0_10, %c0_11], %12 {strides = array<i32>} : memref<32x512xf32, #tpu.memory_space<vmem>>, vector<32x512xf32>,
    } else {
    }
    %c0 = arith.constant 0 : index
    %c0_1 = arith.constant 0 : index
    %3 = vector.load %arg7[%c0, %c0_1] : memref<32x512xf32, #tpu.memory_space<vmem>>, vector<32x512xf32>
    %c0_2 = arith.constant 0 : index
    %c0_3 = arith.constant 0 : index
    %4 = vector.load %arg3[%c0_2, %c0_3] : memref<32x2048xbf16, #tpu.memory_space<vmem>>, vector<32x2048xbf16>
    %c0_4 = arith.constant 0 : index
    %c0_5 = arith.constant 0 : index
    %5 = vector.load %arg4[%c0_4, %c0_5] : memref<2048x512xbf16, #tpu.memory_space<vmem>>, vector<2048x512xbf16>
    %cst = arith.constant dense<0.000000e+00> : vector<32x512xf32>
    %6 = tpu.matmul %4, %5, %cst {dimension_numbers = #tpu.dot_dimension_numbers<[1], [0], [0], [1], [0, 0, 1, 1], [], []>} : vector<32x2048xbf16>, vector<2048x512xbf16>, vector<32x512xf32> -> vector<32x512xf32>
    %7 = arith.addf %3, %6 : vector<32x512xf32>
    %c0_6 = arith.constant 0 : index
    %c0_7 = arith.constant 0 : index
    %8 = vector.load %arg7[%c0_6, %c0_7] : memref<32x512xf32, #tpu.memory_space<vmem>>, vector<32x512xf32>
    tpu.vector_store %arg7[%c0_6, %c0_7], %7 {strides = array<i32>} : memref<32x512xf32, #tpu.memory_space<vmem>>, vector<32x512xf32>,
    %c3_i32 = arith.constant 3 : i32
    %9 = arith.cmpi eq, %arg2, %c3_i32 : i32
    %10 = arith.extui %9 : i1 to i32
    %c0_i32_8 = arith.constant 0 : i32
    %11 = arith.cmpi ne, %10, %c0_i32_8 : i32
    scf.if %11 {
      %c0_9 = arith.constant 0 : index
      %c0_10 = arith.constant 0 : index
      %12 = vector.load %arg7[%c0_9, %c0_10] : memref<32x512xf32, #tpu.memory_space<vmem>>, vector<32x512xf32>
      %c0_11 = arith.constant 0 : index
      %c0_12 = arith.constant 0 : index
      %13 = vector.load %arg5[%c0_11, %c0_12] : memref<1x512xf32, #tpu.memory_space<vmem>>, vector<1x512xf32>
      %14 = vector.broadcast %13 : vector<1x512xf32> to vector<32x512xf32>
      %15 = arith.addf %12, %14 : vector<32x512xf32>
      %cst_13 = arith.constant 0.000000e+00 : f32
      %16 = vector.broadcast %cst_13 : f32 to vector<32x512xf32>
      %17 = arith.cmpf ogt, %15, %16 : vector<32x512xf32>
      %cst_14 = arith.constant 2.000000e-01 : f32
      %18 = vector.broadcast %cst_14 : f32 to vector<32x512xf32>
      %19 = arith.mulf %18, %15 : vector<32x512xf32>
      %20 = arith.select %17, %15, %19 : vector<32x512xi1>, vector<32x512xf32>
      %21 = arith.truncf %20 : vector<32x512xf32> to vector<32x512xbf16>
      %c0_15 = arith.constant 0 : index
      %c0_16 = arith.constant 0 : index
      %22 = vector.load %arg6[%c0_15, %c0_16] : memref<32x512xbf16, #tpu.memory_space<vmem>>, vector<32x512xbf16>
      tpu.vector_store %arg6[%c0_15, %c0_16], %21 {strides = array<i32>} : memref<32x512xbf16, #tpu.memory_space<vmem>>, vector<32x512xbf16>,
    } else {
    }
    return
  }
  func.func @transform_0(%arg0: i32, %arg1: i32, %arg2: i32) -> (i32, i32) {
    %c0_i32 = arith.constant 0 : i32
    return %arg0, %arg2 : i32, i32
  }
  func.func @transform_1(%arg0: i32, %arg1: i32, %arg2: i32) -> (i32, i32) {
    %c0_i32 = arith.constant 0 : i32
    return %arg2, %arg1 : i32, i32
  }
  func.func @transform_2(%arg0: i32, %arg1: i32, %arg2: i32) -> (i32, i32) {
    %c0_i32 = arith.constant 0 : i32
    %c0_i32_0 = arith.constant 0 : i32
    return %c0_i32, %arg1 : i32, i32
  }
  func.func @transform_3(%arg0: i32, %arg1: i32, %arg2: i32) -> (i32, i32) {
    %c0_i32 = arith.constant 0 : i32
    return %arg0, %arg1 : i32, i32
  }
}

module attributes {stable_mosaic.version = 11 : i64} {
  func.func @_head_kernel(%arg0: i32, %arg1: i32, %arg2: memref<16x4096xbf16, #tpu.memory_space<vmem>>, %arg3: memref<4096x128xbf16, #tpu.memory_space<vmem>>, %arg4: memref<1x128xf32, #tpu.memory_space<vmem>>, %arg5: memref<16x128xf32, #tpu.memory_space<vmem>>, %arg6: memref<16x128xf32, #tpu.memory_space<vmem>>) attributes {dimension_semantics = [#tpu.dimension_semantics<parallel>, #tpu.dimension_semantics<arbitrary>], iteration_bounds = array<i64: 1, 4>, scalar_prefetch = 0 : i64, scratch_operands = 1 : i64, tpu.core_type = #tpu.core_type<tc>, window_params = [{transform_indices = @transform_0, window_bounds = array<i64: 16, 4096>}, {transform_indices = @transform_1, window_bounds = array<i64: 4096, 128>}, {pipeline_mode = #tpu.pipeline_mode<synchronous>, transform_indices = @transform_2, window_bounds = array<i64: 1, 128>}, {transform_indices = @transform_3, window_bounds = array<i64: 16, 128>}]} {
    %c0_i32 = arith.constant 0 : i32
    %0 = arith.cmpi eq, %arg1, %c0_i32 : i32
    %1 = arith.extui %0 : i1 to i32
    %c0_i32_0 = arith.constant 0 : i32
    %2 = arith.cmpi ne, %1, %c0_i32_0 : i32
    scf.if %2 {
      %cst_9 = arith.constant 0.000000e+00 : f32
      %12 = vector.broadcast %cst_9 : f32 to vector<16x128xf32>
      %c0_10 = arith.constant 0 : index
      %c0_11 = arith.constant 0 : index
      %13 = vector.load %arg6[%c0_10, %c0_11] : memref<16x128xf32, #tpu.memory_space<vmem>>, vector<16x128xf32>
      tpu.vector_store %arg6[%c0_10, %c0_11], %12 {strides = array<i32>} : memref<16x128xf32, #tpu.memory_space<vmem>>, vector<16x128xf32>,
    } else {
    }
    %c0 = arith.constant 0 : index
    %c0_1 = arith.constant 0 : index
    %3 = vector.load %arg6[%c0, %c0_1] : memref<16x128xf32, #tpu.memory_space<vmem>>, vector<16x128xf32>
    %c0_2 = arith.constant 0 : index
    %c0_3 = arith.constant 0 : index
    %4 = vector.load %arg2[%c0_2, %c0_3] : memref<16x4096xbf16, #tpu.memory_space<vmem>>, vector<16x4096xbf16>
    %c0_4 = arith.constant 0 : index
    %c0_5 = arith.constant 0 : index
    %5 = vector.load %arg3[%c0_4, %c0_5] : memref<4096x128xbf16, #tpu.memory_space<vmem>>, vector<4096x128xbf16>
    %cst = arith.constant dense<0.000000e+00> : vector<16x128xf32>
    %6 = tpu.matmul %4, %5, %cst {dimension_numbers = #tpu.dot_dimension_numbers<[1], [0], [0], [1], [0, 0, 1, 1], [], []>} : vector<16x4096xbf16>, vector<4096x128xbf16>, vector<16x128xf32> -> vector<16x128xf32>
    %7 = arith.addf %3, %6 : vector<16x128xf32>
    %c0_6 = arith.constant 0 : index
    %c0_7 = arith.constant 0 : index
    %8 = vector.load %arg6[%c0_6, %c0_7] : memref<16x128xf32, #tpu.memory_space<vmem>>, vector<16x128xf32>
    tpu.vector_store %arg6[%c0_6, %c0_7], %7 {strides = array<i32>} : memref<16x128xf32, #tpu.memory_space<vmem>>, vector<16x128xf32>,
    %c3_i32 = arith.constant 3 : i32
    %9 = arith.cmpi eq, %arg1, %c3_i32 : i32
    %10 = arith.extui %9 : i1 to i32
    %c0_i32_8 = arith.constant 0 : i32
    %11 = arith.cmpi ne, %10, %c0_i32_8 : i32
    scf.if %11 {
      %c0_9 = arith.constant 0 : index
      %c0_10 = arith.constant 0 : index
      %12 = vector.load %arg6[%c0_9, %c0_10] : memref<16x128xf32, #tpu.memory_space<vmem>>, vector<16x128xf32>
      %c0_11 = arith.constant 0 : index
      %c0_12 = arith.constant 0 : index
      %13 = vector.load %arg4[%c0_11, %c0_12] : memref<1x128xf32, #tpu.memory_space<vmem>>, vector<1x128xf32>
      %14 = vector.broadcast %13 : vector<1x128xf32> to vector<16x128xf32>
      %15 = arith.addf %12, %14 : vector<16x128xf32>
      %cst_13 = arith.constant 0.000000e+00 : f32
      %16 = vector.broadcast %cst_13 : f32 to vector<16x128xf32>
      %17 = arith.subf %16, %15 : vector<16x128xf32>
      %18 = math.exp %17 : vector<16x128xf32>
      %cst_14 = arith.constant 1.000000e+00 : f32
      %19 = vector.broadcast %cst_14 : f32 to vector<16x128xf32>
      %20 = arith.addf %19, %18 : vector<16x128xf32>
      %cst_15 = arith.constant 1.000000e+00 : f32
      %21 = vector.broadcast %cst_15 : f32 to vector<16x128xf32>
      %22 = arith.divf %21, %20 : vector<16x128xf32>
      %c0_16 = arith.constant 0 : index
      %c0_17 = arith.constant 0 : index
      %23 = vector.load %arg5[%c0_16, %c0_17] : memref<16x128xf32, #tpu.memory_space<vmem>>, vector<16x128xf32>
      tpu.vector_store %arg5[%c0_16, %c0_17], %22 {strides = array<i32>} : memref<16x128xf32, #tpu.memory_space<vmem>>, vector<16x128xf32>,
    } else {
    }
    return
  }
  func.func @transform_0(%arg0: i32, %arg1: i32) -> (i32, i32) {
    %c0_i32 = arith.constant 0 : i32
    return %arg0, %arg1 : i32, i32
  }
  func.func @transform_1(%arg0: i32, %arg1: i32) -> (i32, i32) {
    %c0_i32 = arith.constant 0 : i32
    %c0_i32_0 = arith.constant 0 : i32
    return %arg1, %c0_i32 : i32, i32
  }
  func.func @transform_2(%arg0: i32, %arg1: i32) -> (i32, i32) {
    %c0_i32 = arith.constant 0 : i32
    %c0_i32_0 = arith.constant 0 : i32
    %c0_i32_1 = arith.constant 0 : i32
    return %c0_i32, %c0_i32_0 : i32, i32
  }
  func.func @transform_3(%arg0: i32, %arg1: i32) -> (i32, i32) {
    %c0_i32 = arith.constant 0 : i32
    %c0_i32_0 = arith.constant 0 : i32
    return %arg0, %c0_i32 : i32, i32
  }
}

</mosaic_0001>

<bundles_post_ra>
// kernel: discriminator_forward.4
= control target key start
LH: loop header
LB: loop body
LE: loop exit
PB: predicated region body
PF: predicated region fallthrough
CT: control target
= control target key end

     0   :  { %v2592_v1 = vmov 0   ;;  %v1369_v49 = vlaneseq  ;;  %s3252_s1 = inlined_call_operand.vmem [shape: bf16[128,256], index: 1, kind: input, shape index: {}]   ;;  %s3253_s0 = inlined_call_operand.vmem [shape: bf16[512,128], index: 0, kind: input, shape index: {}]   ;;  %s3254_s2 = inlined_call_operand.vmem [shape: f32[1,256], index: 2, kind: input, shape index: {}]   ;;  %s3255_s3 = inlined_call_operand.vmem [shape: bf16[512,256], index: 3, kind: output, shape index: {}]  }
   0x1   :  { %v2536_v0 = vld [vmem:[%s3252_s1 + $0x4] ss:$8 sps:$4 sm:$0xff]   ;;  %659 = vmatprep.mubr.bf16.mxu0 %v2592_v1  ;;  %819 = vmatprep.mubr.bf16.mxu1 %v2592_v1  ;;  %v2538_v2 = vld [vmem:[%s3252_s1] ss:$8 sps:$4 sm:$0xff]   ;;  %v2539_v3 = vld [vmem:[%s3252_s1 + $0x14] ss:$8 sps:$4 sm:$0xff]  }
   0x2   :  { %627 = vmatprep.subr.bf16.mxu0 %v2536_v0  ;;  %2519 = vmatprep.subr.bf16.mxu1 %v2536_v0  ;;  %v2541_v4 = vld [vmem:[%s3252_s1 + $0x10] ss:$8 sps:$4 sm:$0xff]   ;;  %v2542_v5 = vld [vmem:[%s3252_s1 + $0x24] ss:$8 sps:$4 sm:$0xff]   ;;  %v2544_v6 = vld [vmem:[%s3252_s1 + $0x20] ss:$8 sps:$4 sm:$0xff]  }
   0x3   :  { %628 = vmatpush1.bf16.msra.mxu0 %v2538_v2  ;;  %2527 = vmatpush1.bf16.msra.mxu1 %v2538_v2  ;;  %v2545_v7 = vld [vmem:[%s3252_s1 + $0x34] ss:$8 sps:$4 sm:$0xff]   ;;  %v2547_v8 = vld [vmem:[%s3252_s1 + $0x30] ss:$8 sps:$4 sm:$0xff]   ;;  %v2548_v9 = vld [vmem:[%s3252_s1 + $0x44] ss:$8 sps:$4 sm:$0xff]  }
   0x4   :  { %629 = vmatprep.subr.bf16.mxu0 %v2539_v3  ;;  %2520 = vmatprep.subr.bf16.mxu1 %v2539_v3  ;;  %v2550_v10 = vld [vmem:[%s3252_s1 + $0x40] ss:$8 sps:$4 sm:$0xff]   ;;  %v2551_v11 = vld [vmem:[%s3252_s1 + $0x54] ss:$8 sps:$4 sm:$0xff]   ;;  %v2553_v12 = vld [vmem:[%s3252_s1 + $0x50] ss:$8 sps:$4 sm:$0xff]  }
   0x5   :  { %v2554_v13 = vld [vmem:[%s3252_s1 + $0x64] ss:$8 sps:$4 sm:$0xff]   ;;  %v2556_v14 = vld [vmem:[%s3252_s1 + $0x60] ss:$8 sps:$4 sm:$0xff]   ;;  %v2557_v15 = vld [vmem:[%s3252_s1 + $0x74] ss:$8 sps:$4 sm:$0xff]  }
   0x6   :  { %v2559_v16 = vld [vmem:[%s3252_s1 + $0x70] ss:$8 sps:$4 sm:$0xff]   ;;  %v2560_v17 = vld [vmem:[%s3253_s0] sm:$0xff]   ;;  %v2562_v19 = vld [vmem:[%s3253_s0 + $0x8] sm:$0xff]   ;;  %v1370_v50 = vshrl.u32 %v1369_v49, 7 }
   0x7   :  { %630 = vmatpush1.bf16.msra.mxu0 %v2541_v4  ;;  %2528 = vmatpush1.bf16.msra.mxu1 %v2541_v4  ;;  %v2561_v18 = vld [vmem:[%s3253_s0 + $0x80] sm:$0xff]   ;;  %v2563_v20 = vld [vmem:[%s3253_s0 + $0x88] sm:$0xff]   ;;  %v2564_v21 = vld [vmem:[%s3253_s0 + $0x10] sm:$0xff]  }
   0x8   :  { %631 = vmatprep.subr.bf16.mxu0 %v2542_v5  ;;  %2521 = vmatprep.subr.bf16.mxu1 %v2542_v5  ;;  %v2565_v22 = vld [vmem:[%s3253_s0 + $0x90] sm:$0xff]   ;;  %v2566_v23 = vld [vmem:[%s3253_s0 + $0x18] sm:$0xff]   ;;  %v2568_v25 = vld [vmem:[%s3253_s0 + $0x20] sm:$0xff]   ;;  %v1371_v51 = vsub.s32 0, %v1370_v50  ;;  %v1375_v53 = vsub.s32 1, %v1370_v50 }
   0x9   :  { %v2567_v24 = vld [vmem:[%s3253_s0 + $0x98] sm:$0xff]   ;;  %v2569_v26 = vld [vmem:[%s3253_s0 + $0xa0] sm:$0xff]   ;;  %v2570_v27 = vld [vmem:[%s3253_s0 + $0x28] sm:$0xff]  }
   0xa   :  { %v2571_v28 = vld [vmem:[%s3253_s0 + $0xa8] sm:$0xff]   ;;  %v2572_v29 = vld [vmem:[%s3253_s0 + $0x30] sm:$0xff]   ;;  %v2574_v31 = vld [vmem:[%s3253_s0 + $0x38] sm:$0xff]  }
   0xb   :  { %632 = vmatpush1.bf16.msra.mxu0 %v2544_v6  ;;  %2529 = vmatpush1.bf16.msra.mxu1 %v2544_v6  ;;  %v2573_v30 = vld [vmem:[%s3253_s0 + $0xb0] sm:$0xff]   ;;  %v2575_v32 = vld [vmem:[%s3253_s0 + $0xb8] sm:$0xff]   ;;  %v2576_v33 = vld [vmem:[%s3253_s0 + $0x40] sm:$0xff]  }
   0xc   :  { %633 = vmatprep.subr.bf16.mxu0 %v2545_v7  ;;  %2522 = vmatprep.subr.bf16.mxu1 %v2545_v7  ;;  %v2577_v34 = vld [vmem:[%s3253_s0 + $0xc0] sm:$0xff]   ;;  %v2578_v35 = vld [vmem:[%s3253_s0 + $0x48] sm:$0xff]   ;;  %v2580_v37 = vld [vmem:[%s3253_s0 + $0x50] sm:$0xff]  }
   0xd   :  { %v2579_v36 = vld [vmem:[%s3253_s0 + $0xc8] sm:$0xff]   ;;  %v2581_v38 = vld [vmem:[%s3253_s0 + $0xd0] sm:$0xff]   ;;  %v2582_v39 = vld [vmem:[%s3253_s0 + $0x58] sm:$0xff]  }
   0xe   :  { %v2583_v40 = vld [vmem:[%s3253_s0 + $0xd8] sm:$0xff]   ;;  %v2584_v41 = vld [vmem:[%s3253_s0 + $0x60] sm:$0xff]   ;;  %v2586_v43 = vld [vmem:[%s3253_s0 + $0x68] sm:$0xff]  }
   0xf   :  { %634 = vmatpush1.bf16.msra.mxu0 %v2547_v8  ;;  %2530 = vmatpush1.bf16.msra.mxu1 %v2547_v8  ;;  %v2585_v42 = vld [vmem:[%s3253_s0 + $0xe0] sm:$0xff]   ;;  %v2587_v44 = vld [vmem:[%s3253_s0 + $0xe8] sm:$0xff]   ;;  %v2588_v45 = vld [vmem:[%s3253_s0 + $0x70] sm:$0xff]  }
  0x10   :  { %635 = vmatprep.subr.bf16.mxu0 %v2548_v9  ;;  %2523 = vmatprep.subr.bf16.mxu1 %v2548_v9  ;;  %v2589_v46 = vld [vmem:[%s3253_s0 + $0xf0] sm:$0xff]   ;;  %v2590_v47 = vld [vmem:[%s3253_s0 + $0x78] sm:$0xff]   ;;  %v1367_v52 = vld [vmem:[%s3254_s2] sm:$0x3] }
  0x11   :  { %v2591_v48 = vld [vmem:[%s3253_s0 + $0xf8] sm:$0xff]   ;;  %v2792_v54 = vrot.slane %v1367_v52, %v1371_v51  ;;  %v2794_v55 = vrot.slane %v1367_v52, %v1375_v53 }
  0x13   :  { %636 = vmatpush1.bf16.msra.mxu0 %v2550_v10  ;;  %2531 = vmatpush1.bf16.msra.mxu1 %v2550_v10 }
  0x14   :  { %637 = vmatprep.subr.bf16.mxu0 %v2551_v11  ;;  %2524 = vmatprep.subr.bf16.mxu1 %v2551_v11 }
  0x17   :  { %638 = vmatpush1.bf16.msra.mxu0 %v2553_v12  ;;  %2532 = vmatpush1.bf16.msra.mxu1 %v2553_v12 }
  0x18   :  { %639 = vmatprep.subr.bf16.mxu0 %v2554_v13  ;;  %2525 = vmatprep.subr.bf16.mxu1 %v2554_v13 }
  0x1b   :  { %640 = vmatpush1.bf16.msra.mxu0 %v2556_v14  ;;  %2533 = vmatpush1.bf16.msra.mxu1 %v2556_v14 }
  0x1c   :  { %641 = vmatprep.subr.bf16.mxu0 %v2557_v15  ;;  %2526 = vmatprep.subr.bf16.mxu1 %v2557_v15 }
  0x1f   :  { %642 = vmatpush1.bf16.msra.mxu0 %v2559_v16  ;;  %2534 = vmatpush1.bf16.msra.mxu1 %v2559_v16 }
  0x22   :  { %660 = vmatmul.mubr.bf16.vlgmr.msra.gmra.mrb[0].mxu0 %v2560_v17  ;;  %820 = vmatmul.mubr.bf16.vlgmr.msra.gmra.mrb[0].mxu1 %v2561_v18 }
  0x23   :  { %669 = vmatprep.mubr.bf16.mxu0 %v2592_v1  ;;  %829 = vmatprep.mubr.bf16.mxu1 %v2592_v1 }
  0x2a   :  { %670 = vmatmul.mubr.bf16.gmra.mrb[4].mxu0 %v2562_v19  ;;  %830 = vmatmul.mubr.bf16.gmra.mrb[4].mxu1 %v2563_v20 }
  0x2b   :  { %679 = vmatprep.mubr.bf16.mxu0 %v2592_v1  ;;  %839 = vmatprep.mubr.bf16.mxu1 %v2592_v1 }
  0x32   :  { %680 = vmatmul.mubr.bf16.gmra.mrb[8].mxu0 %v2564_v21  ;;  %840 = vmatmul.mubr.bf16.gmra.mrb[8].mxu1 %v2565_v22 }
  0x33   :  { %689 = vmatprep.mubr.bf16.mxu0 %v2592_v1  ;;  %849 = vmatprep.mubr.bf16.mxu1 %v2592_v1 }
  0x3a   :  { %690 = vmatmul.mubr.bf16.gmra.mrb[12].mxu0 %v2566_v23  ;;  %850 = vmatmul.mubr.bf16.gmra.mrb[12].mxu1 %v2567_v24 }
  0x3b   :  { %699 = vmatprep.mubr.bf16.mxu0 %v2592_v1  ;;  %859 = vmatprep.mubr.bf16.mxu1 %v2592_v1 }
  0x42   :  { %700 = vmatmul.mubr.bf16.gmra.mrb[16].mxu0 %v2568_v25  ;;  %860 = vmatmul.mubr.bf16.gmra.mrb[16].mxu1 %v2569_v26 }
  0x43   :  { %709 = vmatprep.mubr.bf16.mxu0 %v2592_v1  ;;  %869 = vmatprep.mubr.bf16.mxu1 %v2592_v1 }
  0x4a   :  { %710 = vmatmul.mubr.bf16.gmra.mrb[20].mxu0 %v2570_v27  ;;  %870 = vmatmul.mubr.bf16.gmra.mrb[20].mxu1 %v2571_v28 }
  0x4b   :  { %719 = vmatprep.mubr.bf16.mxu0 %v2592_v1  ;;  %879 = vmatprep.mubr.bf16.mxu1 %v2592_v1 }
  0x52   :  { %720 = vmatmul.mubr.bf16.gmra.mrb[24].mxu0 %v2572_v29  ;;  %880 = vmatmul.mubr.bf16.gmra.mrb[24].mxu1 %v2573_v30 }
  0x53   :  { %729 = vmatprep.mubr.bf16.mxu0 %v2592_v1  ;;  %889 = vmatprep.mubr.bf16.mxu1 %v2592_v1 }
  0x5a   :  { %730 = vmatmul.mubr.bf16.gmra.mrb[28].mxu0 %v2574_v31  ;;  %890 = vmatmul.mubr.bf16.gmra.mrb[28].mxu1 %v2575_v32 }
  0x5b   :  { %739 = vmatprep.mubr.bf16.mxu0 %v2592_v1  ;;  %899 = vmatprep.mubr.bf16.mxu1 %v2592_v1 }
  0x62   :  { %740 = vmatmul.mubr.bf16.gmra.mrb[32].mxu0 %v2576_v33  ;;  %900 = vmatmul.mubr.bf16.gmra.mrb[32].mxu1 %v2577_v34 }
  0x63   :  { %749 = vmatprep.mubr.bf16.mxu0 %v2592_v1  ;;  %909 = vmatprep.mubr.bf16.mxu1 %v2592_v1 }
  0x6a   :  { %750 = vmatmul.mubr.bf16.gmra.mrb[36].mxu0 %v2578_v35  ;;  %910 = vmatmul.mubr.bf16.gmra.mrb[36].mxu1 %v2579_v36 }
  0x6b   :  { %759 = vmatprep.mubr.bf16.mxu0 %v2592_v1  ;;  %919 = vmatprep.mubr.bf16.mxu1 %v2592_v1 }
  0x72   :  { %760 = vmatmul.mubr.bf16.gmra.mrb[40].mxu0 %v2580_v37  ;;  %920 = vmatmul.mubr.bf16.gmra.mrb[40].mxu1 %v2581_v38 }
  0x73   :  { %769 = vmatprep.mubr.bf16.mxu0 %v2592_v1  ;;  %929 = vmatprep.mubr.bf16.mxu1 %v2592_v1 }
  0x7a   :  { %770 = vmatmul.mubr.bf16.gmra.mrb[44].mxu0 %v2582_v39  ;;  %930 = vmatmul.mubr.bf16.gmra.mrb[44].mxu1 %v2583_v40 }
  0x7b   :  { %779 = vmatprep.mubr.bf16.mxu0 %v2592_v1  ;;  %939 = vmatprep.mubr.bf16.mxu1 %v2592_v1 }
  0x82   :  { %780 = vmatmul.mubr.bf16.gmra.mrb[48].mxu0 %v2584_v41  ;;  %940 = vmatmul.mubr.bf16.gmra.mrb[48].mxu1 %v2585_v42 }
  0x83   :  { %789 = vmatprep.mubr.bf16.mxu0 %v2592_v1  ;;  %949 = vmatprep.mubr.bf16.mxu1 %v2592_v1 }
  0x8a   :  { %790 = vmatmul.mubr.bf16.gmra.mrb[52].mxu0 %v2586_v43  ;;  %950 = vmatmul.mubr.bf16.gmra.mrb[52].mxu1 %v2587_v44 }
  0x8b   :  { %799 = vmatprep.mubr.bf16.mxu0 %v2592_v1  ;;  %959 = vmatprep.mubr.bf16.mxu1 %v2592_v1 }
  0x92   :  { %800 = vmatmul.mubr.bf16.gmra.mrb[56].mxu0 %v2588_v45  ;;  %960 = vmatmul.mubr.bf16.gmra.mrb[56].mxu1 %v2589_v46 }
  0x93   :  { %809 = vmatprep.mubr.bf16.mxu0 %v2592_v1  ;;  %969 = vmatprep.mubr.bf16.mxu1 %v2592_v1 }
  0x9a   :  { %810 = vmatmul.mubr.bf16.gmra.mrb[60].mxu0 %v2590_v47  ;;  %970 = vmatmul.mubr.bf16.gmra.mrb[60].mxu1 %v2591_v48 }
  0xf5   :  { %v661_v56 = vpop.f32.mrb[0].mxu0  ;;  %v821_v57 = vpop.f32.mrb[0].mxu1 }
  0xf6   :  { %v1379_v58 = vadd.f32 %v2792_v54, %v661_v56  ;;  %v1443_v59 = vadd.f32 %v2792_v54, %v821_v57  ;;  %v663_v60 = vpop.f32.mrb[1].mxu0  ;;  %v823_v61 = vpop.f32.mrb[1].mxu1 }
  0xf7   :  { %v1380_v62 = vadd.f32 %v2794_v55, %v663_v60  ;;  %v1444_v63 = vadd.f32 %v2794_v55, %v823_v61  ;;  %v665_v0 = vpop.f32.mrb[2].mxu0  ;;  %v825_v1 = vpop.f32.mrb[2].mxu1 }
  0xf8   :  { %vm1507_vm0 = vcmp.gt.f32.partialorder %v1379_v58, 0.0  ;;  %v1635_v2 = vmul.f32 0.2, %v1379_v58  ;;  %vm1571_vm1 = vcmp.gt.f32.partialorder %v1443_v59, 0.0  ;;  %v1699_v3 = vmul.f32 0.2, %v1443_v59 }
  0xf9   :  { %vm1508_vm2 = vcmp.gt.f32.partialorder %v1380_v62, 0.0  ;;  %v1636_v4 = vmul.f32 0.2, %v1380_v62  ;;  %vm1572_vm3 = vcmp.gt.f32.partialorder %v1444_v63, 0.0  ;;  %v1700_v5 = vmul.f32 0.2, %v1444_v63 }
  0xfa   :  { %v1763_v6 = vsel %vm1507_vm0, %v1379_v58, %v1635_v2  ;;  %v1827_v7 = vsel %vm1571_vm1, %v1443_v59, %v1699_v3  ;;  %v1381_v8 = vadd.f32 %v2792_v54, %v665_v0  ;;  %v1445_v9 = vadd.f32 %v2792_v54, %v825_v1  ;;  %v667_v10 = vpop.f32.mrb[3].mxu0  ;;  %v827_v11 = vpop.f32.mrb[3].mxu1 }
  0xfb   :  { %v1764_v12 = vsel %vm1508_vm2, %v1380_v62, %v1636_v4  ;;  %v1828_v13 = vsel %vm1572_vm3, %v1444_v63, %v1700_v5  ;;  %v1382_v14 = vadd.f32 %v2794_v55, %v667_v10  ;;  %v1446_v15 = vadd.f32 %v2794_v55, %v827_v11 }
  0xfc   :  { %v2455_v16 = vpack.c.bf16 %v1764_v12, %v1763_v6  ;;  %v2487_v17 = vpack.c.bf16 %v1828_v13, %v1827_v7  ;;  %vm1509_vm4 = vcmp.gt.f32.partialorder %v1381_v8, 0.0  ;;  %v1637_v18 = vmul.f32 0.2, %v1381_v8 }
  0xfd   :  { %vm1573_vm5 = vcmp.gt.f32.partialorder %v1445_v9, 0.0  ;;  %v1701_v19 = vmul.f32 0.2, %v1445_v9  ;;  %vm1510_vm6 = vcmp.gt.f32.partialorder %v1382_v14, 0.0  ;;  %v1638_v20 = vmul.f32 0.2, %v1382_v14 }
  0xfe   :  { %2275 = vst [vmem:[%s3255_s3] sm:$0xff] %v2455_v16  ;;  %2307 = vst [vmem:[%s3255_s3 + $0x100] sm:$0xff] %v2487_v17  ;;  %v1765_v21 = vsel %vm1509_vm4, %v1381_v8, %v1637_v18  ;;  %vm1574_vm7 = vcmp.gt.f32.partialorder %v1446_v15, 0.0  ;;  %v1702_v22 = vmul.f32 0.2, %v1446_v15  ;;  %v671_v23 = vpop.f32.mrb[4].mxu0  ;;  %v831_v24 = vpop.f32.mrb[4].mxu1 }
  0xff   :  { %v1829_v25 = vsel %vm1573_vm5, %v1445_v9, %v1701_v19  ;;  %v1766_v26 = vsel %vm1510_vm6, %v1382_v14, %v1638_v20  ;;  %v1383_v27 = vadd.f32 %v2792_v54, %v671_v23  ;;  %v1447_v28 = vadd.f32 %v2792_v54, %v831_v24  ;;  %v673_v29 = vpop.f32.mrb[5].mxu0  ;;  %v833_v30 = vpop.f32.mrb[5].mxu1 }
 0x100   :  { %v2456_v31 = vpack.c.bf16 %v1766_v26, %v1765_v21  ;;  %v1830_v32 = vsel %vm1574_vm7, %v1446_v15, %v1702_v22  ;;  %v1384_v33 = vadd.f32 %v2794_v55, %v673_v29  ;;  %v1448_v34 = vadd.f32 %v2794_v55, %v833_v30  ;;  %v675_v35 = vpop.f32.mrb[6].mxu0  ;;  %v835_v36 = vpop.f32.mrb[6].mxu1 }
 0x101   :  { %v2488_v37 = vpack.c.bf16 %v1830_v32, %v1829_v25  ;;  %vm1511_vm8 = vcmp.gt.f32.partialorder %v1383_v27, 0.0  ;;  %v1639_v38 = vmul.f32 0.2, %v1383_v27  ;;  %vm1575_vm9 = vcmp.gt.f32.partialorder %v1447_v28, 0.0  ;;  %v677_v39 = vpop.f32.mrb[7].mxu0  ;;  %v837_v40 = vpop.f32.mrb[7].mxu1 }
 0x102   :  { %2276 = vst [vmem:[%s3255_s3 + $0x8] sm:$0xff] %v2456_v31  ;;  %v1703_v41 = vmul.f32 0.2, %v1447_v28  ;;  %vm1512_vm10 = vcmp.gt.f32.partialorder %v1384_v33, 0.0  ;;  %v1640_v42 = vmul.f32 0.2, %v1384_v33  ;;  %v1385_v45 = vadd.f32 %v2792_v54, %v675_v35 }
 0x103   :  { %vm1576_vm11 = vcmp.gt.f32.partialorder %v1448_v34, 0.0  ;;  %2308 = vst [vmem:[%s3255_s3 + $0x108] sm:$0xff] %v2488_v37  ;;  %v1767_v43 = vsel %vm1511_vm8, %v1383_v27, %v1639_v38  ;;  %v1704_v44 = vmul.f32 0.2, %v1448_v34  ;;  %v1449_v46 = vadd.f32 %v2792_v54, %v835_v36 }
 0x104   :  { %v1831_v47 = vsel %vm1575_vm9, %v1447_v28, %v1703_v41  ;;  %v1768_v48 = vsel %vm1512_vm10, %v1384_v33, %v1640_v42  ;;  %v1386_v49 = vadd.f32 %v2794_v55, %v677_v39  ;;  %v1450_v50 = vadd.f32 %v2794_v55, %v837_v40 }
 0x105   :  { %v2457_v51 = vpack.c.bf16 %v1768_v48, %v1767_v43  ;;  %v1832_v52 = vsel %vm1576_vm11, %v1448_v34, %v1704_v44  ;;  %vm1513_vm12 = vcmp.gt.f32.partialorder %v1385_v45, 0.0  ;;  %v1641_v53 = vmul.f32 0.2, %v1385_v45  ;;  %v681_v56 = vpop.f32.mrb[8].mxu0  ;;  %v841_v57 = vpop.f32.mrb[8].mxu1 }
 0x106   :  { %v2489_v58 = vpack.c.bf16 %v1832_v52, %v1831_v47  ;;  %vm1577_vm13 = vcmp.gt.f32.partialorder %v1449_v46, 0.0  ;;  %v1705_v59 = vmul.f32 0.2, %v1449_v46  ;;  %vm1514_vm14 = vcmp.gt.f32.partialorder %v1386_v49, 0.0  ;;  %v683_v60 = vpop.f32.mrb[9].mxu0  ;;  %v843_v61 = vpop.f32.mrb[9].mxu1 }
 0x107   :  { %2277 = vst [vmem:[%s3255_s3 + $0x10] sm:$0xff] %v2457_v51  ;;  %v1769_v62 = vsel %vm1513_vm12, %v1385_v45, %v1641_v53  ;;  %v1642_v63 = vmul.f32 0.2, %v1386_v49  ;;  %vm1578_vm15 = vcmp.gt.f32.partialorder %v1450_v50, 0.0  ;;  %v1706_v0 = vmul.f32 0.2, %v1450_v50 }
 0x108   :  { %v685_v1 = vpop.f32.mrb[10].mxu0  ;;  %2309 = vst [vmem:[%s3255_s3 + $0x110] sm:$0xff] %v2489_v58  ;;  %v1833_v2 = vsel %vm1577_vm13, %v1449_v46, %v1705_v59  ;;  %v1387_v3 = vadd.f32 %v2792_v54, %v681_v56  ;;  %v1451_v4 = vadd.f32 %v2792_v54, %v841_v57  ;;  %v1388_v5 = vadd.f32 %v2794_v55, %v683_v60  ;;  %v845_v6 = vpop.f32.mrb[10].mxu1 }
 0x109   :  { %v687_v7 = vpop.f32.mrb[11].mxu0  ;;  %v1770_v8 = vsel %vm1514_vm14, %v1386_v49, %v1642_v63  ;;  %v1834_v9 = vsel %vm1578_vm15, %v1450_v50, %v1706_v0  ;;  %v1452_v10 = vadd.f32 %v2794_v55, %v843_v61  ;;  %v1389_v11 = vadd.f32 %v2792_v54, %v685_v1  ;;  %v847_v12 = vpop.f32.mrb[11].mxu1 }
 0x10a   :  { %v2458_v13 = vpack.c.bf16 %v1770_v8, %v1769_v62  ;;  %v2490_v14 = vpack.c.bf16 %v1834_v9, %v1833_v2  ;;  %vm1515_vm0 = vcmp.gt.f32.partialorder %v1387_v3, 0.0  ;;  %v1643_v15 = vmul.f32 0.2, %v1387_v3 }
 0x10b   :  { %vm1579_vm1 = vcmp.gt.f32.partialorder %v1451_v4, 0.0  ;;  %v1707_v16 = vmul.f32 0.2, %v1451_v4  ;;  %vm1516_vm2 = vcmp.gt.f32.partialorder %v1388_v5, 0.0  ;;  %v1644_v17 = vmul.f32 0.2, %v1388_v5 }
 0x10c   :  { %2278 = vst [vmem:[%s3255_s3 + $0x18] sm:$0xff] %v2458_v13  ;;  %2310 = vst [vmem:[%s3255_s3 + $0x118] sm:$0xff] %v2490_v14  ;;  %v1771_v18 = vsel %vm1515_vm0, %v1387_v3, %v1643_v15  ;;  %vm1580_vm3 = vcmp.gt.f32.partialorder %v1452_v10, 0.0  ;;  %v1708_v19 = vmul.f32 0.2, %v1452_v10  ;;  %vm1517_vm4 = vcmp.gt.f32.partialorder %v1389_v11, 0.0 }
 0x10d   :  { %v1835_v20 = vsel %vm1579_vm1, %v1451_v4, %v1707_v16  ;;  %v1772_v21 = vsel %vm1516_vm2, %v1388_v5, %v1644_v17  ;;  %v1645_v22 = vmul.f32 0.2, %v1389_v11  ;;  %v1453_v23 = vadd.f32 %v2792_v54, %v845_v6  ;;  %v691_v24 = vpop.f32.mrb[12].mxu0  ;;  %v851_v25 = vpop.f32.mrb[12].mxu1 }
 0x10e   :  { %v2459_v26 = vpack.c.bf16 %v1772_v21, %v1771_v18  ;;  %v1836_v27 = vsel %vm1580_vm3, %v1452_v10, %v1708_v19  ;;  %v1390_v28 = vadd.f32 %v2794_v55, %v687_v7  ;;  %v1454_v29 = vadd.f32 %v2794_v55, %v847_v12  ;;  %v693_v30 = vpop.f32.mrb[13].mxu0  ;;  %v853_v31 = vpop.f32.mrb[13].mxu1 }
 0x10f   :  { %v2491_v32 = vpack.c.bf16 %v1836_v27, %v1835_v20  ;;  %v1773_v33 = vsel %vm1517_vm4, %v1389_v11, %v1645_v22  ;;  %vm1581_vm5 = vcmp.gt.f32.partialorder %v1453_v23, 0.0  ;;  %v1709_v34 = vmul.f32 0.2, %v1453_v23  ;;  %v695_v35 = vpop.f32.mrb[14].mxu0  ;;  %v855_v36 = vpop.f32.mrb[14].mxu1 }
 0x110   :  { %2279 = vst [vmem:[%s3255_s3 + $0x20] sm:$0xff] %v2459_v26  ;;  %vm1518_vm6 = vcmp.gt.f32.partialorder %v1390_v28, 0.0  ;;  %v1646_v37 = vmul.f32 0.2, %v1390_v28  ;;  %vm1582_vm7 = vcmp.gt.f32.partialorder %v1454_v29, 0.0  ;;  %v1391_v40 = vadd.f32 %v2792_v54, %v691_v24  ;;  %v697_v43 = vpop.f32.mrb[15].mxu0 }
 0x111   :  { %v1710_v38 = vmul.f32 0.2, %v1454_v29  ;;  %2311 = vst [vmem:[%s3255_s3 + $0x120] sm:$0xff] %v2491_v32  ;;  %v1837_v39 = vsel %vm1581_vm5, %v1453_v23, %v1709_v34  ;;  %v1455_v41 = vadd.f32 %v2792_v54, %v851_v25  ;;  %v1392_v42 = vadd.f32 %v2794_v55, %v693_v30  ;;  %v857_v44 = vpop.f32.mrb[15].mxu1 }
 0x112   :  { %v1774_v45 = vsel %vm1518_vm6, %v1390_v28, %v1646_v37  ;;  %v1456_v47 = vadd.f32 %v2794_v55, %v853_v31  ;;  %v1393_v48 = vadd.f32 %v2792_v54, %v695_v35  ;;  %vm1519_vm8 = vcmp.gt.f32.partialorder %v1391_v40, 0.0 }
 0x113   :  { %v1838_v46 = vsel %vm1582_vm7, %v1454_v29, %v1710_v38  ;;  %v2460_v49 = vpack.c.bf16 %v1774_v45, %v1773_v33  ;;  %v1647_v51 = vmul.f32 0.2, %v1391_v40  ;;  %vm1583_vm9 = vcmp.gt.f32.partialorder %v1455_v41, 0.0 }
 0x114   :  { %v2492_v50 = vpack.c.bf16 %v1838_v46, %v1837_v39  ;;  %v1711_v52 = vmul.f32 0.2, %v1455_v41  ;;  %vm1520_vm10 = vcmp.gt.f32.partialorder %v1392_v42, 0.0  ;;  %v1648_v53 = vmul.f32 0.2, %v1392_v42 }
 0x115   :  { %2280 = vst [vmem:[%s3255_s3 + $0x28] sm:$0xff] %v2460_v49  ;;  %v1775_v56 = vsel %vm1519_vm8, %v1391_v40, %v1647_v51  ;;  %vm1584_vm11 = vcmp.gt.f32.partialorder %v1456_v47, 0.0  ;;  %v1712_v57 = vmul.f32 0.2, %v1456_v47  ;;  %vm1521_vm12 = vcmp.gt.f32.partialorder %v1393_v48, 0.0  ;;  %v701_v58 = vpop.f32.mrb[16].mxu0 }
 0x116   :  { %2312 = vst [vmem:[%s3255_s3 + $0x128] sm:$0xff] %v2492_v50  ;;  %v861_v59 = vpop.f32.mrb[16].mxu1  ;;  %v1839_v60 = vsel %vm1583_vm9, %v1455_v41, %v1711_v52  ;;  %v1776_v61 = vsel %vm1520_vm10, %v1392_v42, %v1648_v53  ;;  %v1649_v62 = vmul.f32 0.2, %v1393_v48  ;;  %v1457_v63 = vadd.f32 %v2792_v54, %v855_v36  ;;  %v703_v0 = vpop.f32.mrb[17].mxu0 }
 0x117   :  { %v863_v1 = vpop.f32.mrb[17].mxu1  ;;  %v2461_v2 = vpack.c.bf16 %v1776_v61, %v1775_v56  ;;  %v1840_v3 = vsel %vm1584_vm11, %v1456_v47, %v1712_v57  ;;  %v1394_v4 = vadd.f32 %v2794_v55, %v697_v43  ;;  %v1458_v5 = vadd.f32 %v2794_v55, %v857_v44  ;;  %v705_v6 = vpop.f32.mrb[18].mxu0 }
 0x118   :  { %v865_v7 = vpop.f32.mrb[18].mxu1  ;;  %v2493_v8 = vpack.c.bf16 %v1840_v3, %v1839_v60  ;;  %v1777_v9 = vsel %vm1521_vm12, %v1393_v48, %v1649_v62  ;;  %vm1585_vm13 = vcmp.gt.f32.partialorder %v1457_v63, 0.0  ;;  %v1713_v10 = vmul.f32 0.2, %v1457_v63  ;;  %v707_v11 = vpop.f32.mrb[19].mxu0 }
 0x119   :  { %v867_v12 = vpop.f32.mrb[19].mxu1  ;;  %2281 = vst [vmem:[%s3255_s3 + $0x30] sm:$0xff] %v2461_v2  ;;  %vm1522_vm14 = vcmp.gt.f32.partialorder %v1394_v4, 0.0  ;;  %v1650_v13 = vmul.f32 0.2, %v1394_v4  ;;  %vm1586_vm15 = vcmp.gt.f32.partialorder %v1458_v5, 0.0  ;;  %v1395_v16 = vadd.f32 %v2792_v54, %v701_v58 }
 0x11a   :  { %v1714_v14 = vmul.f32 0.2, %v1458_v5  ;;  %2313 = vst [vmem:[%s3255_s3 + $0x130] sm:$0xff] %v2493_v8  ;;  %v1841_v15 = vsel %vm1585_vm13, %v1457_v63, %v1713_v10  ;;  %v1459_v17 = vadd.f32 %v2792_v54, %v861_v59  ;;  %v1396_v18 = vadd.f32 %v2794_v55, %v703_v0 }
 0x11b   :  { %v1778_v19 = vsel %vm1522_vm14, %v1394_v4, %v1650_v13  ;;  %v1460_v21 = vadd.f32 %v2794_v55, %v863_v1  ;;  %v1397_v22 = vadd.f32 %v2792_v54, %v705_v6  ;;  %vm1523_vm0 = vcmp.gt.f32.partialorder %v1395_v16, 0.0 }
 0x11c   :  { %v1842_v20 = vsel %vm1586_vm15, %v1458_v5, %v1714_v14  ;;  %v2462_v23 = vpack.c.bf16 %v1778_v19, %v1777_v9  ;;  %v1651_v25 = vmul.f32 0.2, %v1395_v16  ;;  %vm1587_vm1 = vcmp.gt.f32.partialorder %v1459_v17, 0.0 }
 0x11d   :  { %v2494_v24 = vpack.c.bf16 %v1842_v20, %v1841_v15  ;;  %v1715_v26 = vmul.f32 0.2, %v1459_v17  ;;  %vm1524_vm2 = vcmp.gt.f32.partialorder %v1396_v18, 0.0  ;;  %v1652_v27 = vmul.f32 0.2, %v1396_v18  ;;  %v711_v30 = vpop.f32.mrb[20].mxu0 }
 0x11e   :  { %2282 = vst [vmem:[%s3255_s3 + $0x38] sm:$0xff] %v2462_v23  ;;  %v1779_v28 = vsel %vm1523_vm0, %v1395_v16, %v1651_v25  ;;  %vm1588_vm3 = vcmp.gt.f32.partialorder %v1460_v21, 0.0  ;;  %v1716_v29 = vmul.f32 0.2, %v1460_v21  ;;  %vm1525_vm4 = vcmp.gt.f32.partialorder %v1397_v22, 0.0  ;;  %v871_v31 = vpop.f32.mrb[20].mxu1 }
 0x11f   :  { %2314 = vst [vmem:[%s3255_s3 + $0x138] sm:$0xff] %v2494_v24  ;;  %v1843_v32 = vsel %vm1587_vm1, %v1459_v17, %v1715_v26  ;;  %v1780_v33 = vsel %vm1524_vm2, %v1396_v18, %v1652_v27  ;;  %v1653_v34 = vmul.f32 0.2, %v1397_v22  ;;  %v1461_v35 = vadd.f32 %v2792_v54, %v865_v7  ;;  %v713_v36 = vpop.f32.mrb[21].mxu0  ;;  %v873_v37 = vpop.f32.mrb[21].mxu1 }
 0x120   :  { %v2463_v38 = vpack.c.bf16 %v1780_v33, %v1779_v28  ;;  %v1844_v39 = vsel %vm1588_vm3, %v1460_v21, %v1716_v29  ;;  %v1398_v40 = vadd.f32 %v2794_v55, %v707_v11  ;;  %v1462_v41 = vadd.f32 %v2794_v55, %v867_v12  ;;  %v715_v42 = vpop.f32.mrb[22].mxu0  ;;  %v875_v43 = vpop.f32.mrb[22].mxu1 }
 0x121   :  { %v2495_v44 = vpack.c.bf16 %v1844_v39, %v1843_v32  ;;  %v1781_v45 = vsel %vm1525_vm4, %v1397_v22, %v1653_v34  ;;  %vm1589_vm5 = vcmp.gt.f32.partialorder %v1461_v35, 0.0  ;;  %v1717_v46 = vmul.f32 0.2, %v1461_v35  ;;  %v717_v47 = vpop.f32.mrb[23].mxu0  ;;  %v877_v48 = vpop.f32.mrb[23].mxu1 }
 0x122   :  { %2283 = vst [vmem:[%s3255_s3 + $0x40] sm:$0xff] %v2463_v38  ;;  %vm1526_vm6 = vcmp.gt.f32.partialorder %v1398_v40, 0.0  ;;  %v1654_v49 = vmul.f32 0.2, %v1398_v40  ;;  %vm1590_vm7 = vcmp.gt.f32.partialorder %v1462_v41, 0.0  ;;  %v1399_v52 = vadd.f32 %v2792_v54, %v711_v30 }
 0x123   :  { %v1718_v50 = vmul.f32 0.2, %v1462_v41  ;;  %2315 = vst [vmem:[%s3255_s3 + $0x140] sm:$0xff] %v2495_v44  ;;  %v1845_v51 = vsel %vm1589_vm5, %v1461_v35, %v1717_v46  ;;  %v1463_v53 = vadd.f32 %v2792_v54, %v871_v31  ;;  %v1400_v56 = vadd.f32 %v2794_v55, %v713_v36 }
 0x124   :  { %v1782_v57 = vsel %vm1526_vm6, %v1398_v40, %v1654_v49  ;;  %v1464_v59 = vadd.f32 %v2794_v55, %v873_v37  ;;  %v1401_v60 = vadd.f32 %v2792_v54, %v715_v42  ;;  %vm1527_vm8 = vcmp.gt.f32.partialorder %v1399_v52, 0.0 }
 0x125   :  { %v1846_v58 = vsel %vm1590_vm7, %v1462_v41, %v1718_v50  ;;  %v2464_v61 = vpack.c.bf16 %v1782_v57, %v1781_v45  ;;  %v1655_v63 = vmul.f32 0.2, %v1399_v52  ;;  %v721_v0 = vpop.f32.mrb[24].mxu0  ;;  %v881_v1 = vpop.f32.mrb[24].mxu1  ;;  %vm1591_vm9 = vcmp.gt.f32.partialorder %v1463_v53, 0.0 }
 0x126   :  { %v2496_v62 = vpack.c.bf16 %v1846_v58, %v1845_v51  ;;  %v1719_v2 = vmul.f32 0.2, %v1463_v53  ;;  %vm1528_vm10 = vcmp.gt.f32.partialorder %v1400_v56, 0.0  ;;  %v1656_v3 = vmul.f32 0.2, %v1400_v56  ;;  %v723_v6 = vpop.f32.mrb[25].mxu0 }
 0x127   :  { %2284 = vst [vmem:[%s3255_s3 + $0x48] sm:$0xff] %v2464_v61  ;;  %v1783_v4 = vsel %vm1527_vm8, %v1399_v52, %v1655_v63  ;;  %vm1592_vm11 = vcmp.gt.f32.partialorder %v1464_v59, 0.0  ;;  %v1720_v5 = vmul.f32 0.2, %v1464_v59  ;;  %vm1529_vm12 = vcmp.gt.f32.partialorder %v1401_v60, 0.0  ;;  %v883_v7 = vpop.f32.mrb[25].mxu1 }
 0x128   :  { %2316 = vst [vmem:[%s3255_s3 + $0x148] sm:$0xff] %v2496_v62  ;;  %v1847_v8 = vsel %vm1591_vm9, %v1463_v53, %v1719_v2  ;;  %v1784_v9 = vsel %vm1528_vm10, %v1400_v56, %v1656_v3  ;;  %v1657_v10 = vmul.f32 0.2, %v1401_v60  ;;  %v1465_v11 = vadd.f32 %v2792_v54, %v875_v43  ;;  %v725_v12 = vpop.f32.mrb[26].mxu0  ;;  %v885_v13 = vpop.f32.mrb[26].mxu1 }
 0x129   :  { %v2465_v14 = vpack.c.bf16 %v1784_v9, %v1783_v4  ;;  %v1848_v15 = vsel %vm1592_vm11, %v1464_v59, %v1720_v5  ;;  %v1402_v16 = vadd.f32 %v2794_v55, %v717_v47  ;;  %v1466_v17 = vadd.f32 %v2794_v55, %v877_v48  ;;  %v727_v18 = vpop.f32.mrb[27].mxu0  ;;  %v887_v19 = vpop.f32.mrb[27].mxu1 }
 0x12a   :  { %v2497_v20 = vpack.c.bf16 %v1848_v15, %v1847_v8  ;;  %v1785_v21 = vsel %vm1529_vm12, %v1401_v60, %v1657_v10  ;;  %vm1593_vm13 = vcmp.gt.f32.partialorder %v1465_v11, 0.0  ;;  %v1721_v22 = vmul.f32 0.2, %v1465_v11 }
 0x12b   :  { %2285 = vst [vmem:[%s3255_s3 + $0x50] sm:$0xff] %v2465_v14  ;;  %vm1530_vm14 = vcmp.gt.f32.partialorder %v1402_v16, 0.0  ;;  %v1658_v23 = vmul.f32 0.2, %v1402_v16  ;;  %vm1594_vm15 = vcmp.gt.f32.partialorder %v1466_v17, 0.0  ;;  %v1403_v26 = vadd.f32 %v2792_v54, %v721_v0 }
 0x12c   :  { %v1722_v24 = vmul.f32 0.2, %v1466_v17  ;;  %2317 = vst [vmem:[%s3255_s3 + $0x150] sm:$0xff] %v2497_v20  ;;  %v1849_v25 = vsel %vm1593_vm13, %v1465_v11, %v1721_v22  ;;  %v1467_v27 = vadd.f32 %v2792_v54, %v881_v1  ;;  %v1404_v28 = vadd.f32 %v2794_v55, %v723_v6 }
 0x12d   :  { %v1786_v29 = vsel %vm1530_vm14, %v1402_v16, %v1658_v23  ;;  %v1468_v31 = vadd.f32 %v2794_v55, %v883_v7  ;;  %v1405_v32 = vadd.f32 %v2792_v54, %v725_v12  ;;  %v731_v33 = vpop.f32.mrb[28].mxu0  ;;  %v891_v34 = vpop.f32.mrb[28].mxu1  ;;  %vm1531_vm0 = vcmp.gt.f32.partialorder %v1403_v26, 0.0 }
 0x12e   :  { %v1850_v30 = vsel %vm1594_vm15, %v1466_v17, %v1722_v24  ;;  %v2466_v35 = vpack.c.bf16 %v1786_v29, %v1785_v21  ;;  %v1659_v37 = vmul.f32 0.2, %v1403_v26  ;;  %v733_v38 = vpop.f32.mrb[29].mxu0  ;;  %v893_v39 = vpop.f32.mrb[29].mxu1  ;;  %vm1595_vm1 = vcmp.gt.f32.partialorder %v1467_v27, 0.0 }
 0x12f   :  { %v2498_v36 = vpack.c.bf16 %v1850_v30, %v1849_v25  ;;  %v1723_v40 = vmul.f32 0.2, %v1467_v27  ;;  %vm1532_vm2 = vcmp.gt.f32.partialorder %v1404_v28, 0.0  ;;  %v1660_v41 = vmul.f32 0.2, %v1404_v28  ;;  %v735_v44 = vpop.f32.mrb[30].mxu0 }
 0x130   :  { %2286 = vst [vmem:[%s3255_s3 + $0x58] sm:$0xff] %v2466_v35  ;;  %v1787_v42 = vsel %vm1531_vm0, %v1403_v26, %v1659_v37  ;;  %vm1596_vm3 = vcmp.gt.f32.partialorder %v1468_v31, 0.0  ;;  %v1724_v43 = vmul.f32 0.2, %v1468_v31  ;;  %vm1533_vm4 = vcmp.gt.f32.partialorder %v1405_v32, 0.0  ;;  %v895_v45 = vpop.f32.mrb[30].mxu1 }
 0x131   :  { %2318 = vst [vmem:[%s3255_s3 + $0x158] sm:$0xff] %v2498_v36  ;;  %v1851_v46 = vsel %vm1595_vm1, %v1467_v27, %v1723_v40  ;;  %v1788_v47 = vsel %vm1532_vm2, %v1404_v28, %v1660_v41  ;;  %v1661_v48 = vmul.f32 0.2, %v1405_v32  ;;  %v1469_v49 = vadd.f32 %v2792_v54, %v885_v13  ;;  %v737_v50 = vpop.f32.mrb[31].mxu0  ;;  %v897_v51 = vpop.f32.mrb[31].mxu1 }
 0x132   :  { %v2467_v52 = vpack.c.bf16 %v1788_v47, %v1787_v42  ;;  %v1852_v53 = vsel %vm1596_vm3, %v1468_v31, %v1724_v43  ;;  %v1406_v56 = vadd.f32 %v2794_v55, %v727_v18  ;;  %v1470_v57 = vadd.f32 %v2794_v55, %v887_v19 }
 0x133   :  { %v2499_v58 = vpack.c.bf16 %v1852_v53, %v1851_v46  ;;  %v1789_v59 = vsel %vm1533_vm4, %v1405_v32, %v1661_v48  ;;  %vm1597_vm5 = vcmp.gt.f32.partialorder %v1469_v49, 0.0  ;;  %v1725_v60 = vmul.f32 0.2, %v1469_v49 }
 0x134   :  { %2287 = vst [vmem:[%s3255_s3 + $0x60] sm:$0xff] %v2467_v52  ;;  %vm1534_vm6 = vcmp.gt.f32.partialorder %v1406_v56, 0.0  ;;  %v1662_v61 = vmul.f32 0.2, %v1406_v56  ;;  %vm1598_vm7 = vcmp.gt.f32.partialorder %v1470_v57, 0.0  ;;  %v1407_v0 = vadd.f32 %v2792_v54, %v731_v33 }
 0x135   :  { %v1726_v62 = vmul.f32 0.2, %v1470_v57  ;;  %2319 = vst [vmem:[%s3255_s3 + $0x160] sm:$0xff] %v2499_v58  ;;  %v1853_v63 = vsel %vm1597_vm5, %v1469_v49, %v1725_v60  ;;  %v1471_v1 = vadd.f32 %v2792_v54, %v891_v34  ;;  %v1408_v2 = vadd.f32 %v2794_v55, %v733_v38  ;;  %v741_v3 = vpop.f32.mrb[32].mxu0  ;;  %v901_v4 = vpop.f32.mrb[32].mxu1 }
 0x136   :  { %v1790_v5 = vsel %vm1534_vm6, %v1406_v56, %v1662_v61  ;;  %v1472_v7 = vadd.f32 %v2794_v55, %v893_v39  ;;  %v1409_v8 = vadd.f32 %v2792_v54, %v735_v44  ;;  %v743_v9 = vpop.f32.mrb[33].mxu0  ;;  %v903_v10 = vpop.f32.mrb[33].mxu1  ;;  %vm1535_vm8 = vcmp.gt.f32.partialorder %v1407_v0, 0.0 }
 0x137   :  { %v1854_v6 = vsel %vm1598_vm7, %v1470_v57, %v1726_v62  ;;  %v2468_v11 = vpack.c.bf16 %v1790_v5, %v1789_v59  ;;  %v1663_v13 = vmul.f32 0.2, %v1407_v0  ;;  %v745_v14 = vpop.f32.mrb[34].mxu0  ;;  %v2939_v15 = vpop.f32.mrb[34].mxu1  ;;  %vm1599_vm9 = vcmp.gt.f32.partialorder %v1471_v1, 0.0 }
 0x138   :  { %v2500_v12 = vpack.c.bf16 %v1854_v6, %v1853_v63  ;;  %v1727_v16 = vmul.f32 0.2, %v1471_v1  ;;  %vm1536_vm10 = vcmp.gt.f32.partialorder %v1408_v2, 0.0  ;;  %v1664_v17 = vmul.f32 0.2, %v1408_v2  ;;  %v747_v20 = vpop.f32.mrb[35].mxu0 }
 0x139   :  { %2288 = vst [vmem:[%s3255_s3 + $0x68] sm:$0xff] %v2468_v11  ;;  %v1791_v18 = vsel %vm1535_vm8, %v1407_v0, %v1663_v13  ;;  %vm1600_vm11 = vcmp.gt.f32.partialorder %v1472_v7, 0.0  ;;  %v1728_v19 = vmul.f32 0.2, %v1472_v7  ;;  %vm1537_vm12 = vcmp.gt.f32.partialorder %v1409_v8, 0.0  ;;  %v907_v21 = vpop.f32.mrb[35].mxu1 }
 0x13a   :  { %2320 = vst [vmem:[%s3255_s3 + $0x168] sm:$0xff] %v2500_v12  ;;  %v1855_v22 = vsel %vm1599_vm9, %v1471_v1, %v1727_v16  ;;  %v1792_v23 = vsel %vm1536_vm10, %v1408_v2, %v1664_v17  ;;  %v1665_v24 = vmul.f32 0.2, %v1409_v8  ;;  %v1473_v25 = vadd.f32 %v2792_v54, %v895_v45 }
 0x13b   :  { %v2469_v26 = vpack.c.bf16 %v1792_v23, %v1791_v18  ;;  %v1856_v27 = vsel %vm1600_vm11, %v1472_v7, %v1728_v19  ;;  %v1410_v28 = vadd.f32 %v2794_v55, %v737_v50  ;;  %v1474_v29 = vadd.f32 %v2794_v55, %v897_v51 }
 0x13c   :  { %v2501_v30 = vpack.c.bf16 %v1856_v27, %v1855_v22  ;;  %v1793_v31 = vsel %vm1537_vm12, %v1409_v8, %v1665_v24  ;;  %vm1601_vm13 = vcmp.gt.f32.partialorder %v1473_v25, 0.0  ;;  %v1729_v32 = vmul.f32 0.2, %v1473_v25 }
 0x13d   :  { %2289 = vst [vmem:[%s3255_s3 + $0x70] sm:$0xff] %v2469_v26  ;;  %vm1538_vm14 = vcmp.gt.f32.partialorder %v1410_v28, 0.0  ;;  %v1666_v33 = vmul.f32 0.2, %v1410_v28  ;;  %vm1602_vm15 = vcmp.gt.f32.partialorder %v1474_v29, 0.0  ;;  %v1411_v36 = vadd.f32 %v2792_v54, %v741_v3  ;;  %v751_v39 = vpop.f32.mrb[36].mxu0 }
 0x13e   :  { %v1730_v34 = vmul.f32 0.2, %v1474_v29  ;;  %2321 = vst [vmem:[%s3255_s3 + $0x170] sm:$0xff] %v2501_v30  ;;  %v1857_v35 = vsel %vm1601_vm13, %v1473_v25, %v1729_v32  ;;  %v1475_v37 = vadd.f32 %v2792_v54, %v901_v4  ;;  %v1412_v38 = vadd.f32 %v2794_v55, %v743_v9  ;;  %v911_v40 = vpop.f32.mrb[36].mxu1  ;;  %v753_v45 = vpop.f32.mrb[37].mxu0 }
 0x13f   :  { %v1794_v41 = vsel %vm1538_vm14, %v1410_v28, %v1666_v33  ;;  %v1476_v43 = vadd.f32 %v2794_v55, %v903_v10  ;;  %v1413_v44 = vadd.f32 %v2792_v54, %v745_v14  ;;  %v913_v46 = vpop.f32.mrb[37].mxu1  ;;  %vm1539_vm0 = vcmp.gt.f32.partialorder %v1411_v36, 0.0  ;;  %v755_v50 = vpop.f32.mrb[38].mxu0 }
 0x140   :  { %v1858_v42 = vsel %vm1602_vm15, %v1474_v29, %v1730_v34  ;;  %v2470_v47 = vpack.c.bf16 %v1794_v41, %v1793_v31  ;;  %v1667_v49 = vmul.f32 0.2, %v1411_v36  ;;  %v2961_v51 = vpop.f32.mrb[38].mxu1  ;;  %vm1603_vm1 = vcmp.gt.f32.partialorder %v1475_v37, 0.0  ;;  %v757_v58 = vpop.f32.mrb[39].mxu0 }
 0x141   :  { %v2502_v48 = vpack.c.bf16 %v1858_v42, %v1857_v35  ;;  %v1731_v52 = vmul.f32 0.2, %v1475_v37  ;;  %vm1540_vm2 = vcmp.gt.f32.partialorder %v1412_v38, 0.0  ;;  %v1668_v53 = vmul.f32 0.2, %v1412_v38  ;;  %v917_v59 = vpop.f32.mrb[39].mxu1 }
 0x142   :  { %2290 = vst [vmem:[%s3255_s3 + $0x78] sm:$0xff] %v2470_v47  ;;  %v1795_v56 = vsel %vm1539_vm0, %v1411_v36, %v1667_v49  ;;  %vm1604_vm3 = vcmp.gt.f32.partialorder %v1476_v43, 0.0  ;;  %v1732_v57 = vmul.f32 0.2, %v1476_v43  ;;  %vm1541_vm4 = vcmp.gt.f32.partialorder %v1413_v44, 0.0 }
 0x143   :  { %2322 = vst [vmem:[%s3255_s3 + $0x178] sm:$0xff] %v2502_v48  ;;  %v1859_v60 = vsel %vm1603_vm1, %v1475_v37, %v1731_v52  ;;  %v1796_v61 = vsel %vm1540_vm2, %v1412_v38, %v1668_v53  ;;  %v1669_v62 = vmul.f32 0.2, %v1413_v44  ;;  %v1477_v63 = vadd.f32 %v2792_v54, %v2939_v15 }
 0x144   :  { %v2471_v0 = vpack.c.bf16 %v1796_v61, %v1795_v56  ;;  %v1860_v1 = vsel %vm1604_vm3, %v1476_v43, %v1732_v57  ;;  %v1414_v2 = vadd.f32 %v2794_v55, %v747_v20  ;;  %v1478_v3 = vadd.f32 %v2794_v55, %v907_v21 }
 0x145   :  { %v2503_v4 = vpack.c.bf16 %v1860_v1, %v1859_v60  ;;  %v1797_v5 = vsel %vm1541_vm4, %v1413_v44, %v1669_v62  ;;  %vm1605_vm5 = vcmp.gt.f32.partialorder %v1477_v63, 0.0  ;;  %v1733_v6 = vmul.f32 0.2, %v1477_v63  ;;  %v761_v7 = vpop.f32.mrb[40].mxu0  ;;  %v921_v8 = vpop.f32.mrb[40].mxu1 }
 0x146   :  { %2291 = vst [vmem:[%s3255_s3 + $0x80] sm:$0xff] %v2471_v0  ;;  %vm1542_vm6 = vcmp.gt.f32.partialorder %v1414_v2, 0.0  ;;  %v1670_v9 = vmul.f32 0.2, %v1414_v2  ;;  %vm1606_vm7 = vcmp.gt.f32.partialorder %v1478_v3, 0.0  ;;  %v1415_v12 = vadd.f32 %v2792_v54, %v751_v39  ;;  %v763_v15 = vpop.f32.mrb[41].mxu0 }
 0x147   :  { %v1734_v10 = vmul.f32 0.2, %v1478_v3  ;;  %2323 = vst [vmem:[%s3255_s3 + $0x180] sm:$0xff] %v2503_v4  ;;  %v1861_v11 = vsel %vm1605_vm5, %v1477_v63, %v1733_v6  ;;  %v1479_v13 = vadd.f32 %v2792_v54, %v911_v40  ;;  %v1416_v14 = vadd.f32 %v2794_v55, %v753_v45  ;;  %v923_v16 = vpop.f32.mrb[41].mxu1  ;;  %v765_v21 = vpop.f32.mrb[42].mxu0 }
 0x148   :  { %v1798_v17 = vsel %vm1542_vm6, %v1414_v2, %v1670_v9  ;;  %v1480_v19 = vadd.f32 %v2794_v55, %v913_v46  ;;  %v1417_v20 = vadd.f32 %v2792_v54, %v755_v50  ;;  %v2984_v22 = vpop.f32.mrb[42].mxu1  ;;  %vm1543_vm8 = vcmp.gt.f32.partialorder %v1415_v12, 0.0  ;;  %v2986_v26 = vpop.f32.mrb[43].mxu0 }
 0x149   :  { %v1862_v18 = vsel %vm1606_vm7, %v1478_v3, %v1734_v10  ;;  %v2472_v23 = vpack.c.bf16 %v1798_v17, %v1797_v5  ;;  %v1671_v25 = vmul.f32 0.2, %v1415_v12  ;;  %v2988_v27 = vpop.f32.mrb[43].mxu1  ;;  %vm1607_vm9 = vcmp.gt.f32.partialorder %v1479_v13, 0.0 }
 0x14a   :  { %v2504_v24 = vpack.c.bf16 %v1862_v18, %v1861_v11  ;;  %v1735_v28 = vmul.f32 0.2, %v1479_v13  ;;  %vm1544_vm10 = vcmp.gt.f32.partialorder %v1416_v14, 0.0  ;;  %v1672_v29 = vmul.f32 0.2, %v1416_v14 }
 0x14b   :  { %2292 = vst [vmem:[%s3255_s3 + $0x88] sm:$0xff] %v2472_v23  ;;  %v1799_v30 = vsel %vm1543_vm8, %v1415_v12, %v1671_v25  ;;  %vm1608_vm11 = vcmp.gt.f32.partialorder %v1480_v19, 0.0  ;;  %v1736_v31 = vmul.f32 0.2, %v1480_v19  ;;  %vm1545_vm12 = vcmp.gt.f32.partialorder %v1417_v20, 0.0 }
 0x14c   :  { %2324 = vst [vmem:[%s3255_s3 + $0x188] sm:$0xff] %v2504_v24  ;;  %v1863_v32 = vsel %vm1607_vm9, %v1479_v13, %v1735_v28  ;;  %v1800_v33 = vsel %vm1544_vm10, %v1416_v14, %v1672_v29  ;;  %v1673_v34 = vmul.f32 0.2, %v1417_v20  ;;  %v1481_v35 = vadd.f32 %v2792_v54, %v2961_v51 }
 0x14d   :  { %v2473_v36 = vpack.c.bf16 %v1800_v33, %v1799_v30  ;;  %v1864_v37 = vsel %vm1608_vm11, %v1480_v19, %v1736_v31  ;;  %v1418_v38 = vadd.f32 %v2794_v55, %v757_v58  ;;  %v1482_v39 = vadd.f32 %v2794_v55, %v917_v59  ;;  %v3000_v40 = vpop.f32.mrb[44].mxu0  ;;  %v3002_v41 = vpop.f32.mrb[44].mxu1 }
 0x14e   :  { %v2505_v42 = vpack.c.bf16 %v1864_v37, %v1863_v32  ;;  %v1801_v43 = vsel %vm1545_vm12, %v1417_v20, %v1673_v34  ;;  %vm1609_vm13 = vcmp.gt.f32.partialorder %v1481_v35, 0.0  ;;  %v1737_v44 = vmul.f32 0.2, %v1481_v35  ;;  %v773_v45 = vpop.f32.mrb[45].mxu0  ;;  %v3004_v46 = vpop.f32.mrb[45].mxu1 }
 0x14f   :  { %2293 = vst [vmem:[%s3255_s3 + $0x90] sm:$0xff] %v2473_v36  ;;  %vm1546_vm14 = vcmp.gt.f32.partialorder %v1418_v38, 0.0  ;;  %v1674_v47 = vmul.f32 0.2, %v1418_v38  ;;  %vm1610_vm15 = vcmp.gt.f32.partialorder %v1482_v39, 0.0  ;;  %v1419_v50 = vadd.f32 %v2792_v54, %v761_v7  ;;  %v775_v53 = vpop.f32.mrb[46].mxu0 }
 0x150   :  { %v1738_v48 = vmul.f32 0.2, %v1482_v39  ;;  %2325 = vst [vmem:[%s3255_s3 + $0x190] sm:$0xff] %v2505_v42  ;;  %v1865_v49 = vsel %vm1609_vm13, %v1481_v35, %v1737_v44  ;;  %v1483_v51 = vadd.f32 %v2792_v54, %v921_v8  ;;  %v1420_v52 = vadd.f32 %v2794_v55, %v763_v15  ;;  %v3015_v56 = vpop.f32.mrb[46].mxu1  ;;  %v3019_v61 = vpop.f32.mrb[47].mxu0 }
 0x151   :  { %v1802_v57 = vsel %vm1546_vm14, %v1418_v38, %v1674_v47  ;;  %v1484_v59 = vadd.f32 %v2794_v55, %v923_v16  ;;  %v1421_v60 = vadd.f32 %v2792_v54, %v765_v21  ;;  %v3021_v62 = vpop.f32.mrb[47].mxu1  ;;  %vm1547_vm0 = vcmp.gt.f32.partialorder %v1419_v50, 0.0 }
 0x152   :  { %v1866_v58 = vsel %vm1610_vm15, %v1482_v39, %v1738_v48  ;;  %v2474_v63 = vpack.c.bf16 %v1802_v57, %v1801_v43  ;;  %v1675_v1 = vmul.f32 0.2, %v1419_v50  ;;  %vm1611_vm1 = vcmp.gt.f32.partialorder %v1483_v51, 0.0 }
 0x153   :  { %v2506_v0 = vpack.c.bf16 %v1866_v58, %v1865_v49  ;;  %v1739_v2 = vmul.f32 0.2, %v1483_v51  ;;  %vm1548_vm2 = vcmp.gt.f32.partialorder %v1420_v52, 0.0  ;;  %v1676_v3 = vmul.f32 0.2, %v1420_v52 }
 0x154   :  { %2294 = vst [vmem:[%s3255_s3 + $0x98] sm:$0xff] %v2474_v63  ;;  %v1803_v4 = vsel %vm1547_vm0, %v1419_v50, %v1675_v1  ;;  %vm1612_vm3 = vcmp.gt.f32.partialorder %v1484_v59, 0.0  ;;  %v1740_v5 = vmul.f32 0.2, %v1484_v59  ;;  %vm1549_vm4 = vcmp.gt.f32.partialorder %v1421_v60, 0.0 }
 0x155   :  { %2326 = vst [vmem:[%s3255_s3 + $0x198] sm:$0xff] %v2506_v0  ;;  %v1867_v6 = vsel %vm1611_vm1, %v1483_v51, %v1739_v2  ;;  %v1804_v7 = vsel %vm1548_vm2, %v1420_v52, %v1676_v3  ;;  %v1677_v8 = vmul.f32 0.2, %v1421_v60  ;;  %v1485_v9 = vadd.f32 %v2792_v54, %v2984_v22  ;;  %v3031_v10 = vpop.f32.mrb[48].mxu0  ;;  %v3033_v11 = vpop.f32.mrb[48].mxu1 }
 0x156   :  { %v2475_v12 = vpack.c.bf16 %v1804_v7, %v1803_v4  ;;  %v1868_v13 = vsel %vm1612_vm3, %v1484_v59, %v1740_v5  ;;  %v1422_v14 = vadd.f32 %v2794_v55, %v2986_v26  ;;  %v1486_v15 = vadd.f32 %v2794_v55, %v2988_v27  ;;  %v3039_v16 = vpop.f32.mrb[49].mxu0  ;;  %v3041_v17 = vpop.f32.mrb[49].mxu1 }
 0x157   :  { %v2507_v18 = vpack.c.bf16 %v1868_v13, %v1867_v6  ;;  %v1805_v19 = vsel %vm1549_vm4, %v1421_v60, %v1677_v8  ;;  %vm1613_vm5 = vcmp.gt.f32.partialorder %v1485_v9, 0.0  ;;  %v1741_v20 = vmul.f32 0.2, %v1485_v9  ;;  %v3043_v21 = vpop.f32.mrb[50].mxu0  ;;  %v3045_v22 = vpop.f32.mrb[50].mxu1 }
 0x158   :  { %2295 = vst [vmem:[%s3255_s3 + $0xa0] sm:$0xff] %v2475_v12  ;;  %vm1550_vm6 = vcmp.gt.f32.partialorder %v1422_v14, 0.0  ;;  %v1678_v23 = vmul.f32 0.2, %v1422_v14  ;;  %vm1614_vm7 = vcmp.gt.f32.partialorder %v1486_v15, 0.0  ;;  %v1423_v26 = vadd.f32 %v2792_v54, %v3000_v40  ;;  %v3058_v29 = vpop.f32.mrb[51].mxu0 }
 0x159   :  { %v1742_v24 = vmul.f32 0.2, %v1486_v15  ;;  %2327 = vst [vmem:[%s3255_s3 + $0x1a0] sm:$0xff] %v2507_v18  ;;  %v1869_v25 = vsel %vm1613_vm5, %v1485_v9, %v1741_v20  ;;  %v1487_v27 = vadd.f32 %v2792_v54, %v3002_v41  ;;  %v1424_v28 = vadd.f32 %v2794_v55, %v773_v45  ;;  %v3060_v30 = vpop.f32.mrb[51].mxu1 }
 0x15a   :  { %v1806_v31 = vsel %vm1550_vm6, %v1422_v14, %v1678_v23  ;;  %v1488_v33 = vadd.f32 %v2794_v55, %v3004_v46  ;;  %v1425_v34 = vadd.f32 %v2792_v54, %v775_v53  ;;  %vm1551_vm8 = vcmp.gt.f32.partialorder %v1423_v26, 0.0 }
 0x15b   :  { %v1870_v32 = vsel %vm1614_vm7, %v1486_v15, %v1742_v24  ;;  %v2476_v35 = vpack.c.bf16 %v1806_v31, %v1805_v19  ;;  %v1679_v37 = vmul.f32 0.2, %v1423_v26  ;;  %vm1615_vm9 = vcmp.gt.f32.partialorder %v1487_v27, 0.0 }
 0x15c   :  { %v2508_v36 = vpack.c.bf16 %v1870_v32, %v1869_v25  ;;  %v1743_v38 = vmul.f32 0.2, %v1487_v27  ;;  %vm1552_vm10 = vcmp.gt.f32.partialorder %v1424_v28, 0.0  ;;  %v1680_v39 = vmul.f32 0.2, %v1424_v28 }
 0x15d   :  { %2296 = vst [vmem:[%s3255_s3 + $0xa8] sm:$0xff] %v2476_v35  ;;  %v1807_v40 = vsel %vm1551_vm8, %v1423_v26, %v1679_v37  ;;  %vm1616_vm11 = vcmp.gt.f32.partialorder %v1488_v33, 0.0  ;;  %v1744_v41 = vmul.f32 0.2, %v1488_v33  ;;  %vm1553_vm12 = vcmp.gt.f32.partialorder %v1425_v34, 0.0  ;;  %v3071_v42 = vpop.f32.mrb[52].mxu0 }
 0x15e   :  { %2328 = vst [vmem:[%s3255_s3 + $0x1a8] sm:$0xff] %v2508_v36  ;;  %v3073_v43 = vpop.f32.mrb[52].mxu1  ;;  %v1871_v44 = vsel %vm1615_vm9, %v1487_v27, %v1743_v38  ;;  %v1808_v45 = vsel %vm1552_vm10, %v1424_v28, %v1680_v39  ;;  %v1681_v46 = vmul.f32 0.2, %v1425_v34  ;;  %v1489_v47 = vadd.f32 %v2792_v54, %v3015_v56  ;;  %v3077_v48 = vpop.f32.mrb[53].mxu0 }
 0x15f   :  { %v3079_v49 = vpop.f32.mrb[53].mxu1  ;;  %v2477_v50 = vpack.c.bf16 %v1808_v45, %v1807_v40  ;;  %v1872_v51 = vsel %vm1616_vm11, %v1488_v33, %v1744_v41  ;;  %v1426_v52 = vadd.f32 %v2794_v55, %v3019_v61  ;;  %v1490_v53 = vadd.f32 %v2794_v55, %v3021_v62  ;;  %v3085_v57 = vpop.f32.mrb[54].mxu0 }
 0x160   :  { %v3087_v58 = vpop.f32.mrb[54].mxu1  ;;  %v2509_v59 = vpack.c.bf16 %v1872_v51, %v1871_v44  ;;  %v1809_v60 = vsel %vm1553_vm12, %v1425_v34, %v1681_v46  ;;  %vm1617_vm13 = vcmp.gt.f32.partialorder %v1489_v47, 0.0  ;;  %v1745_v56 = vmul.f32 0.2, %v1489_v47  ;;  %v3090_v63 = vpop.f32.mrb[55].mxu0 }
 0x161   :  { %v3092_v0 = vpop.f32.mrb[55].mxu1  ;;  %2297 = vst [vmem:[%s3255_s3 + $0xb0] sm:$0xff] %v2477_v50  ;;  %vm1554_vm14 = vcmp.gt.f32.partialorder %v1426_v52, 0.0  ;;  %v1682_v61 = vmul.f32 0.2, %v1426_v52  ;;  %vm1618_vm15 = vcmp.gt.f32.partialorder %v1490_v53, 0.0  ;;  %v1427_v2 = vadd.f32 %v2792_v54, %v3031_v10 }
 0x162   :  { %v1746_v62 = vmul.f32 0.2, %v1490_v53  ;;  %2329 = vst [vmem:[%s3255_s3 + $0x1b0] sm:$0xff] %v2509_v59  ;;  %v1873_v1 = vsel %vm1617_vm13, %v1489_v47, %v1745_v56  ;;  %v1491_v3 = vadd.f32 %v2792_v54, %v3033_v11  ;;  %v1428_v4 = vadd.f32 %v2794_v55, %v3039_v16 }
 0x163   :  { %v1810_v5 = vsel %vm1554_vm14, %v1426_v52, %v1682_v61  ;;  %v1492_v7 = vadd.f32 %v2794_v55, %v3041_v17  ;;  %v1429_v8 = vadd.f32 %v2792_v54, %v3043_v21  ;;  %vm1555_vm0 = vcmp.gt.f32.partialorder %v1427_v2, 0.0 }
 0x164   :  { %v1874_v6 = vsel %vm1618_vm15, %v1490_v53, %v1746_v62  ;;  %v2478_v9 = vpack.c.bf16 %v1810_v5, %v1809_v60  ;;  %v1683_v13 = vmul.f32 0.2, %v1427_v2  ;;  %vm1619_vm1 = vcmp.gt.f32.partialorder %v1491_v3, 0.0 }
 0x165   :  { %v2510_v12 = vpack.c.bf16 %v1874_v6, %v1873_v1  ;;  %v1747_v10 = vmul.f32 0.2, %v1491_v3  ;;  %vm1556_vm2 = vcmp.gt.f32.partialorder %v1428_v4, 0.0  ;;  %v1684_v14 = vmul.f32 0.2, %v1428_v4  ;;  %v3116_v16 = vpop.f32.mrb[56].mxu0 }
 0x166   :  { %2298 = vst [vmem:[%s3255_s3 + $0xb8] sm:$0xff] %v2478_v9  ;;  %v1811_v11 = vsel %vm1555_vm0, %v1427_v2, %v1683_v13  ;;  %vm1620_vm3 = vcmp.gt.f32.partialorder %v1492_v7, 0.0  ;;  %v1748_v15 = vmul.f32 0.2, %v1492_v7  ;;  %vm1557_vm4 = vcmp.gt.f32.partialorder %v1429_v8, 0.0  ;;  %v3118_v17 = vpop.f32.mrb[56].mxu1 }
 0x167   :  { %2330 = vst [vmem:[%s3255_s3 + $0x1b8] sm:$0xff] %v2510_v12  ;;  %v1875_v18 = vsel %vm1619_vm1, %v1491_v3, %v1747_v10  ;;  %v1812_v19 = vsel %vm1556_vm2, %v1428_v4, %v1684_v14  ;;  %v1685_v20 = vmul.f32 0.2, %v1429_v8  ;;  %v1493_v21 = vadd.f32 %v2792_v54, %v3045_v22  ;;  %v3122_v23 = vpop.f32.mrb[57].mxu0  ;;  %v3124_v24 = vpop.f32.mrb[57].mxu1 }
 0x168   :  { %v2479_v25 = vpack.c.bf16 %v1812_v19, %v1811_v11  ;;  %v1876_v26 = vsel %vm1620_vm3, %v1492_v7, %v1748_v15  ;;  %v1430_v27 = vadd.f32 %v2794_v55, %v3058_v29  ;;  %v1494_v28 = vadd.f32 %v2794_v55, %v3060_v30  ;;  %v3130_v31 = vpop.f32.mrb[58].mxu0  ;;  %v3132_v32 = vpop.f32.mrb[58].mxu1 }
 0x169   :  { %v2511_v33 = vpack.c.bf16 %v1876_v26, %v1875_v18  ;;  %v1813_v34 = vsel %vm1557_vm4, %v1429_v8, %v1685_v20  ;;  %vm1621_vm5 = vcmp.gt.f32.partialorder %v1493_v21, 0.0  ;;  %v1749_v22 = vmul.f32 0.2, %v1493_v21  ;;  %v3135_v35 = vpop.f32.mrb[59].mxu0  ;;  %v3137_v36 = vpop.f32.mrb[59].mxu1 }
 0x16a   :  { %2299 = vst [vmem:[%s3255_s3 + $0xc0] sm:$0xff] %v2479_v25  ;;  %vm1558_vm6 = vcmp.gt.f32.partialorder %v1430_v27, 0.0  ;;  %v1686_v29 = vmul.f32 0.2, %v1430_v27  ;;  %vm1622_vm7 = vcmp.gt.f32.partialorder %v1494_v28, 0.0  ;;  %v1431_v38 = vadd.f32 %v2792_v54, %v3071_v42 }
 0x16b   :  { %v1750_v30 = vmul.f32 0.2, %v1494_v28  ;;  %2331 = vst [vmem:[%s3255_s3 + $0x1c0] sm:$0xff] %v2511_v33  ;;  %v1877_v37 = vsel %vm1621_vm5, %v1493_v21, %v1749_v22  ;;  %v1495_v39 = vadd.f32 %v2792_v54, %v3073_v43  ;;  %v1432_v40 = vadd.f32 %v2794_v55, %v3077_v48 }
 0x16c   :  { %v1814_v41 = vsel %vm1558_vm6, %v1430_v27, %v1686_v29  ;;  %v1496_v45 = vadd.f32 %v2794_v55, %v3079_v49  ;;  %v1433_v46 = vadd.f32 %v2792_v54, %v3085_v57  ;;  %vm1559_vm8 = vcmp.gt.f32.partialorder %v1431_v38, 0.0 }
 0x16d   :  { %v1878_v44 = vsel %vm1622_vm7, %v1494_v28, %v1750_v30  ;;  %v2480_v47 = vpack.c.bf16 %v1814_v41, %v1813_v34  ;;  %v1687_v51 = vmul.f32 0.2, %v1431_v38  ;;  %v3155_v52 = vpop.f32.mrb[60].mxu0  ;;  %v3157_v42 = vpop.f32.mrb[60].mxu1  ;;  %vm1623_vm9 = vcmp.gt.f32.partialorder %v1495_v39, 0.0 }
 0x16e   :  { %v2512_v50 = vpack.c.bf16 %v1878_v44, %v1877_v37  ;;  %v1751_v43 = vmul.f32 0.2, %v1495_v39  ;;  %vm1560_vm10 = vcmp.gt.f32.partialorder %v1432_v40, 0.0  ;;  %v1688_v48 = vmul.f32 0.2, %v1432_v40  ;;  %v3165_v57 = vpop.f32.mrb[61].mxu0 }
 0x16f   :  { %2300 = vst [vmem:[%s3255_s3 + $0xc8] sm:$0xff] %v2480_v47  ;;  %v1815_v49 = vsel %vm1559_vm8, %v1431_v38, %v1687_v51  ;;  %vm1624_vm11 = vcmp.gt.f32.partialorder %v1496_v45, 0.0  ;;  %v1752_v53 = vmul.f32 0.2, %v1496_v45  ;;  %vm1561_vm12 = vcmp.gt.f32.partialorder %v1433_v46, 0.0  ;;  %v3167_v59 = vpop.f32.mrb[61].mxu1 }
 0x170   :  { %2332 = vst [vmem:[%s3255_s3 + $0x1c8] sm:$0xff] %v2512_v50  ;;  %v1879_v60 = vsel %vm1623_vm9, %v1495_v39, %v1751_v43  ;;  %v1816_v56 = vsel %vm1560_vm10, %v1432_v40, %v1688_v48  ;;  %v1689_v61 = vmul.f32 0.2, %v1433_v46  ;;  %v1497_v62 = vadd.f32 %v2792_v54, %v3087_v58  ;;  %v3171_v1 = vpop.f32.mrb[62].mxu0  ;;  %v3173_v2 = vpop.f32.mrb[62].mxu1 }
 0x171   :  { %v2481_v3 = vpack.c.bf16 %v1816_v56, %v1815_v49  ;;  %v1880_v4 = vsel %vm1624_vm11, %v1496_v45, %v1752_v53  ;;  %v1434_v5 = vadd.f32 %v2794_v55, %v3090_v63  ;;  %v1498_v6 = vadd.f32 %v2794_v55, %v3092_v0  ;;  %v3179_v7 = vpop.f32.mrb[63].mxu0  ;;  %v3181_v8 = vpop.f32.mrb[63].mxu1 }
 0x172   :  { %v2513_v9 = vpack.c.bf16 %v1880_v4, %v1879_v60  ;;  %v1817_v12 = vsel %vm1561_vm12, %v1433_v46, %v1689_v61  ;;  %vm1625_vm13 = vcmp.gt.f32.partialorder %v1497_v62, 0.0  ;;  %v1753_v58 = vmul.f32 0.2, %v1497_v62 }
 0x173   :  { %2301 = vst [vmem:[%s3255_s3 + $0xd0] sm:$0xff] %v2481_v3  ;;  %vm1562_vm14 = vcmp.gt.f32.partialorder %v1434_v5, 0.0  ;;  %v1690_v13 = vmul.f32 0.2, %v1434_v5  ;;  %vm1626_vm15 = vcmp.gt.f32.partialorder %v1498_v6, 0.0  ;;  %v1435_v10 = vadd.f32 %v2792_v54, %v3116_v16 }
 0x174   :  { %v1754_v63 = vmul.f32 0.2, %v1498_v6  ;;  %2333 = vst [vmem:[%s3255_s3 + $0x1d0] sm:$0xff] %v2513_v9  ;;  %v1881_v0 = vsel %vm1625_vm13, %v1497_v62, %v1753_v58  ;;  %v1499_v14 = vadd.f32 %v2792_v54, %v3118_v17  ;;  %v1436_v11 = vadd.f32 %v2794_v55, %v3122_v23 }
 0x175   :  { %v1818_v15 = vsel %vm1562_vm14, %v1434_v5, %v1690_v13  ;;  %v1500_v19 = vadd.f32 %v2794_v55, %v3124_v24  ;;  %v1437_v20 = vadd.f32 %v2792_v54, %v3130_v31  ;;  %vm1563_vm0 = vcmp.gt.f32.partialorder %v1435_v10, 0.0 }
 0x176   :  { %v1882_v18 = vsel %vm1626_vm15, %v1498_v6, %v1754_v63  ;;  %v2482_v21 = vpack.c.bf16 %v1818_v15, %v1817_v12  ;;  %v1691_v26 = vmul.f32 0.2, %v1435_v10  ;;  %vm1627_vm1 = vcmp.gt.f32.partialorder %v1499_v14, 0.0 }
 0x177   :  { %v2514_v25 = vpack.c.bf16 %v1882_v18, %v1881_v0  ;;  %v1755_v16 = vmul.f32 0.2, %v1499_v14  ;;  %vm1564_vm2 = vcmp.gt.f32.partialorder %v1436_v11, 0.0  ;;  %v1692_v27 = vmul.f32 0.2, %v1436_v11 }
 0x178   :  { %2302 = vst [vmem:[%s3255_s3 + $0xd8] sm:$0xff] %v2482_v21  ;;  %v1819_v17 = vsel %vm1563_vm0, %v1435_v10, %v1691_v26  ;;  %vm1628_vm3 = vcmp.gt.f32.partialorder %v1500_v19, 0.0  ;;  %v1756_v23 = vmul.f32 0.2, %v1500_v19  ;;  %vm1565_vm4 = vcmp.gt.f32.partialorder %v1437_v20, 0.0 }
 0x179   :  { %2334 = vst [vmem:[%s3255_s3 + $0x1d8] sm:$0xff] %v2514_v25  ;;  %v1883_v24 = vsel %vm1627_vm1, %v1499_v14, %v1755_v16  ;;  %v1820_v28 = vsel %vm1564_vm2, %v1436_v11, %v1692_v27  ;;  %v1693_v31 = vmul.f32 0.2, %v1437_v20  ;;  %v1501_v33 = vadd.f32 %v2792_v54, %v3132_v32 }
 0x17a   :  { %v2483_v34 = vpack.c.bf16 %v1820_v28, %v1819_v17  ;;  %v1884_v22 = vsel %vm1628_vm3, %v1500_v19, %v1756_v23  ;;  %v1438_v29 = vadd.f32 %v2794_v55, %v3135_v35  ;;  %v1502_v30 = vadd.f32 %v2794_v55, %v3137_v36 }
 0x17b   :  { %v2515_v37 = vpack.c.bf16 %v1884_v22, %v1883_v24  ;;  %v1821_v38 = vsel %vm1565_vm4, %v1437_v20, %v1693_v31  ;;  %vm1629_vm5 = vcmp.gt.f32.partialorder %v1501_v33, 0.0  ;;  %v1757_v39 = vmul.f32 0.2, %v1501_v33 }
 0x17c   :  { %2303 = vst [vmem:[%s3255_s3 + $0xe0] sm:$0xff] %v2483_v34  ;;  %vm1566_vm6 = vcmp.gt.f32.partialorder %v1438_v29, 0.0  ;;  %v1694_v40 = vmul.f32 0.2, %v1438_v29  ;;  %vm1630_vm7 = vcmp.gt.f32.partialorder %v1502_v30, 0.0  ;;  %v1439_v36 = vadd.f32 %v2792_v54, %v3155_v52 }
 0x17d   :  { %v1758_v32 = vmul.f32 0.2, %v1502_v30  ;;  %2335 = vst [vmem:[%s3255_s3 + $0x1e0] sm:$0xff] %v2515_v37  ;;  %v1885_v35 = vsel %vm1629_vm5, %v1501_v33, %v1757_v39  ;;  %v1503_v41 = vadd.f32 %v2792_v54, %v3157_v42  ;;  %v1440_v44 = vadd.f32 %v2794_v55, %v3165_v57 }
 0x17e   :  { %v1822_v45 = vsel %vm1566_vm6, %v1438_v29, %v1694_v40  ;;  %v1504_v47 = vadd.f32 %v2794_v55, %v3167_v59  ;;  %v1441_v50 = vadd.f32 %v2792_v54, %v3171_v1  ;;  %vm1567_vm8 = vcmp.gt.f32.partialorder %v1439_v36, 0.0 }
 0x17f   :  { %v1886_v46 = vsel %vm1630_vm7, %v1502_v30, %v1758_v32  ;;  %v2484_v51 = vpack.c.bf16 %v1822_v45, %v1821_v38  ;;  %v1695_v48 = vmul.f32 0.2, %v1439_v36  ;;  %vm1631_vm9 = vcmp.gt.f32.partialorder %v1503_v41, 0.0 }
 0x180   :  { %v2516_v43 = vpack.c.bf16 %v1886_v46, %v1885_v35  ;;  %v1759_v52 = vmul.f32 0.2, %v1503_v41  ;;  %vm1568_vm10 = vcmp.gt.f32.partialorder %v1440_v44, 0.0  ;;  %v1696_v49 = vmul.f32 0.2, %v1440_v44 }
 0x181   :  { %2304 = vst [vmem:[%s3255_s3 + $0xe8] sm:$0xff] %v2484_v51  ;;  %v1823_v42 = vsel %vm1567_vm8, %v1439_v36, %v1695_v48  ;;  %vm1632_vm11 = vcmp.gt.f32.partialorder %v1504_v47, 0.0  ;;  %v1760_v53 = vmul.f32 0.2, %v1504_v47  ;;  %vm1569_vm12 = vcmp.gt.f32.partialorder %v1441_v50, 0.0 }
 0x182   :  { %2336 = vst [vmem:[%s3255_s3 + $0x1e8] sm:$0xff] %v2516_v43  ;;  %v1887_v57 = vsel %vm1631_vm9, %v1503_v41, %v1759_v52  ;;  %v1824_v59 = vsel %vm1568_vm10, %v1440_v44, %v1696_v49  ;;  %v1697_v60 = vmul.f32 0.2, %v1441_v50  ;;  %v1505_v56 = vadd.f32 %v2792_v54, %v3173_v2 }
 0x183   :  { %v2485_v61 = vpack.c.bf16 %v1824_v59, %v1823_v42  ;;  %v1888_v62 = vsel %vm1632_vm11, %v1504_v47, %v1760_v53  ;;  %v1442_v1 = vadd.f32 %v2794_v55, %v3179_v7  ;;  %v1506_v3 = vadd.f32 %v2794_v55, %v3181_v8 }
 0x184   :  { %v2517_v4 = vpack.c.bf16 %v1888_v62, %v1887_v57  ;;  %v1825_v5 = vsel %vm1569_vm12, %v1441_v50, %v1697_v60  ;;  %vm1633_vm13 = vcmp.gt.f32.partialorder %v1505_v56, 0.0  ;;  %v1761_v6 = vmul.f32 0.2, %v1505_v56 }
 0x185   :  { %2305 = vst [vmem:[%s3255_s3 + $0xf0] sm:$0xff] %v2485_v61  ;;  %vm1570_vm14 = vcmp.gt.f32.partialorder %v1442_v1, 0.0  ;;  %v1698_v9 = vmul.f32 0.2, %v1442_v1  ;;  %vm1634_vm15 = vcmp.gt.f32.partialorder %v1506_v3, 0.0 }
 0x186   :  { %v1762_v54 = vmul.f32 0.2, %v1506_v3  ;;  %2337 = vst [vmem:[%s3255_s3 + $0x1f0] sm:$0xff] %v2517_v4  ;;  %v1889_v2 = vsel %vm1633_vm13, %v1505_v56, %v1761_v6 }
 0x187   :  { %v1826_v7 = vsel %vm1570_vm14, %v1442_v1, %v1698_v9 }
 0x188   :  { %v1890_v12 = vsel %vm1634_vm15, %v1506_v3, %v1762_v54  ;;  %v2486_v55 = vpack.c.bf16 %v1826_v7, %v1825_v5 }
 0x189   :  { %v2518_v8 = vpack.c.bf16 %v1890_v12, %v1889_v2 }
 0x18a   :  { %2306 = vst [vmem:[%s3255_s3 + $0xf8] sm:$0xff] %v2486_v55 }
 0x18b   :  { %2338 = vst [vmem:[%s3255_s3 + $0x1f8] sm:$0xff] %v2518_v8 }

// kernel: discriminator_forward.5
= control target key start
LH: loop header
LB: loop body
LE: loop exit
PB: predicated region body
PF: predicated region fallthrough
CT: control target
= control target key end

     0   :  { %s8066_s0 = inlined_call_operand.vmem [shape: bf16[128,4096], index: 0, kind: input, shape index: {}]   ;;  %s8067_s1 = inlined_call_operand.vmem [shape: bf16[4096,512], index: 1, kind: input, shape index: {}]   ;;  %s8068_s2 = inlined_call_operand.vmem [shape: f32[1,512], index: 2, kind: input, shape index: {}]   ;;  %s8069_s3 = inlined_call_operand.vmem [shape: bf16[128,512], index: 3, kind: output, shape index: {}]  }
   0x1   :  { %8071 = sst [smem:[#allocation7_spill]] %s8066_s0 }
   0x2   :  { %8072 = sst [smem:[#allocation8_spill]] %s8067_s1 }
   0x3   :  { %s6659_s12 = smov 0   ;;  %s6661_s13 = smov 0  }
   0x4   :  { %s6663_s14 = smov 0   ;;  %s6665_s15 = smov 0  }
   0x5   :  { %s6667_s16 = smov 0   ;;  %s6669_s17 = smov 0  }
   0x6   :  { %s6671_s18 = smov 0   ;;  %s6673_s19 = smov 0  }
   0x7   :  { %s6675_s20 = smov 0   ;;  %s6677_s21 = smov 0  }
   0x8   :  { %s6679_s22 = smov 0  }
   0x9 LB: > { %s5410_s23 = sadd.s32 4294967295, %s6636_s22   ;;  %s25_s24 = sadd.s32 1, %s6628_s20  ;;  %s6636_s22 = sphi %s6679_s22, %s13_s22   ;;  %s6632_s21 = sphi %s6677_s21, %s8089_s21   ;;  %s6628_s20 = sphi %s6675_s20, %s8088_s20   ;;  %s6624_s19 = sphi %s6673_s19, %s8087_s19   ;;  %s6620_s18 = sphi %s6671_s18, %s8086_s18   ;;  %s6616_s17 = sphi %s6669_s17, %s8085_s17   ;;  %s6612_s16 = sphi %s6667_s16, %s8084_s16   ;;  %s6608_s15 = sphi %s6665_s15, %s8083_s15   ;;  %s6604_s14 = sphi %s6663_s14, %s8082_s14   ;;  %s6600_s13 = sphi %s6661_s13, %s8081_s13   ;;  %s6596_s12 = sphi %s6659_s12, %s8080_s12  }
   0xa   : > { %p26_p0 = scmp.ge.s32.totalorder %s25_s24, 2  ;;  %s28_s25 = sadd.s32 1, %s6632_s21 }
   0xb   : > { %s41_s26 = sadd.s32 1, %s6616_s17  ;;  %p48_p1 = scmp.ne.s32.totalorder %s6616_s17, %s6612_s16 }
   0xc   : > { %s8091_s24 = smov (%p26_p0, %s25_s24), 0  ;;  %s8093_s25 = smov (!%p26_p0, %s28_s25), %s6632_s21 }
   0xd   : > { %s37_s27 = ssub.s32 %s6628_s20, %s8091_s24  ;;  %p49_p2 = scmp.eq.s32.totalorder %s6636_s22, 0 }
   0xe   : > { %p30_p3 = scmp.ge.s32.totalorder %s8093_s25, 2  ;;  %p39_p4 = scmp.eq.s32.totalorder %s37_s27, 0 }
   0xf   : > { %p6726_p5 = por %p49_p2, %p48_p1  ;;  %s69_s29 = sadd.s32 1, %s6608_s15 }
  0x10   : > { %s8095_s25 = smov (%p30_p3, %s8093_s25), 0  ;;  %p76_p6 = scmp.ne.s32.totalorder %s6608_s15, %s6604_s14 }
  0x11   : > { %8074 = sst [smem:[#allocation6_spill]] %s8095_s25  ;;  %s65_s4 = ssub.s32 %s6632_s21, %s8095_s25 }
  0x12   : > { %s6734_s30 = scalar_select %p39_p4, %s6616_s17, %s41_s26  }
  0x13   : > { %s66_s5 = sor.u32 %s65_s4, %s37_s27  ;;  %p121_p7 = scmp.eq.s32.totalorder %s65_s4, 0 }
  0x14   : > { %p67_p8 = scmp.eq.s32.totalorder %s66_s5, 0  ;;  %p6740_p9 = por %p76_p6, %p49_p2 }
  0x15   : > { %s123_s7 = sadd.s32 1, %s6600_s13  ;;  %p133_p10 = scmp.ne.s32.totalorder %s6600_s13, %s6596_s12 }
  0x16   : > { %s6748_s8 = scalar_select %p67_p8, %s6608_s15, %s69_s29  }
  0x17   : > { %s6751_s9 = scalar_select %p121_p7, %s6600_s13, %s123_s7  }
  0x18   : > { %p134_p11 = scmp.eq.s32.totalorder %s5410_s23, 3  ;;  %p5413_p13 = scmp.ge.s32.totalorder %s6636_s22, 4 }
  0x1a   : > { %p6753_p12 = por %p134_p11, %p133_p10  ;;  %156 = sbr.rel (%p5413_p13) target bundleno = 245 (0xf5), region = 16 }
  0x21   : > { %159 = sbr.rel (!%p6726_p5) target bundleno = 107 (0x6b), region = 20  ;;  %s161_s11 = sand.u32 (%p6726_p5), 1, %s6616_s17  }
  0x22   : > { %s5834_s26 = sshll.u32 (%p6726_p5), %s6628_s20, 6  ;;  %s5414_s27 = sshll.u32 (%p6726_p5), %s161_s11, 10 }
  0x23   : > { %s8077_s0 = sld [smem:[#allocation7_spill]] (%p6726_p5)  ;;  %s6770_s23 = scalar_lea.vmem (%p6726_p5), [#allocation3], %s5414_s27 }
  0x29   : > { %s6765_s5 = scalar_lea.vmem %s8077_s0, %s5834_s26 }
  0x2a   : > { %v182_v0 = vld [vmem:[%s6765_s5] sm:$0xff]  ;;  %v184_v1 = vld [vmem:[%s6765_s5 + $0x8] sm:$0xff]  ;;  %v186_v2 = vld [vmem:[%s6765_s5 + $0x10] sm:$0xff] }
  0x2b   : > { %183 = vst [vmem:[%s6770_s23] sm:$0xff] %v182_v0  ;;  %185 = vst [vmem:[%s6770_s23 + $0x8] sm:$0xff] %v184_v1  ;;  %v188_v3 = vld [vmem:[%s6765_s5 + $0x18] sm:$0xff]  ;;  %v190_v4 = vld [vmem:[%s6765_s5 + $0x20] sm:$0xff] }
  0x2c   : > { %187 = vst [vmem:[%s6770_s23 + $0x10] sm:$0xff] %v186_v2  ;;  %v192_v5 = vld [vmem:[%s6765_s5 + $0x28] sm:$0xff]  ;;  %189 = vst [vmem:[%s6770_s23 + $0x18] sm:$0xff] %v188_v3  ;;  %v194_v6 = vld [vmem:[%s6765_s5 + $0x30] sm:$0xff] }
  0x2d   : > { %191 = vst [vmem:[%s6770_s23 + $0x20] sm:$0xff] %v190_v4  ;;  %193 = vst [vmem:[%s6770_s23 + $0x28] sm:$0xff] %v192_v5  ;;  %v196_v7 = vld [vmem:[%s6765_s5 + $0x38] sm:$0xff]  ;;  %v198_v8 = vld [vmem:[%s6765_s5 + $0x80] sm:$0xff] }
  0x2e   : > { %195 = vst [vmem:[%s6770_s23 + $0x30] sm:$0xff] %v194_v6  ;;  %197 = vst [vmem:[%s6770_s23 + $0x38] sm:$0xff] %v196_v7  ;;  %v200_v9 = vld [vmem:[%s6765_s5 + $0x88] sm:$0xff]  ;;  %v202_v10 = vld [vmem:[%s6765_s5 + $0x90] sm:$0xff] }
  0x2f   : > { %199 = vst [vmem:[%s6770_s23 + $0x40] sm:$0xff] %v198_v8  ;;  %v204_v11 = vld [vmem:[%s6765_s5 + $0x98] sm:$0xff]  ;;  %201 = vst [vmem:[%s6770_s23 + $0x48] sm:$0xff] %v200_v9  ;;  %v206_v12 = vld [vmem:[%s6765_s5 + $0xa0] sm:$0xff] }
  0x30   : > { %203 = vst [vmem:[%s6770_s23 + $0x50] sm:$0xff] %v202_v10  ;;  %205 = vst [vmem:[%s6770_s23 + $0x58] sm:$0xff] %v204_v11  ;;  %v208_v13 = vld [vmem:[%s6765_s5 + $0xa8] sm:$0xff]  ;;  %v210_v14 = vld [vmem:[%s6765_s5 + $0xb0] sm:$0xff] }
  0x31   : > { %207 = vst [vmem:[%s6770_s23 + $0x60] sm:$0xff] %v206_v12  ;;  %209 = vst [vmem:[%s6770_s23 + $0x68] sm:$0xff] %v208_v13  ;;  %v212_v15 = vld [vmem:[%s6765_s5 + $0xb8] sm:$0xff]  ;;  %v214_v16 = vld [vmem:[%s6765_s5 + $0x100] sm:$0xff] }
  0x32   : > { %211 = vst [vmem:[%s6770_s23 + $0x70] sm:$0xff] %v210_v14  ;;  %v216_v17 = vld [vmem:[%s6765_s5 + $0x108] sm:$0xff]  ;;  %213 = vst [vmem:[%s6770_s23 + $0x78] sm:$0xff] %v212_v15  ;;  %v218_v18 = vld [vmem:[%s6765_s5 + $0x110] sm:$0xff] }
  0x33   : > { %215 = vst [vmem:[%s6770_s23 + $0x80] sm:$0xff] %v214_v16  ;;  %217 = vst [vmem:[%s6770_s23 + $0x88] sm:$0xff] %v216_v17  ;;  %v220_v19 = vld [vmem:[%s6765_s5 + $0x118] sm:$0xff]  ;;  %v222_v20 = vld [vmem:[%s6765_s5 + $0x120] sm:$0xff] }
  0x34   : > { %219 = vst [vmem:[%s6770_s23 + $0x90] sm:$0xff] %v218_v18  ;;  %221 = vst [vmem:[%s6770_s23 + $0x98] sm:$0xff] %v220_v19  ;;  %v224_v21 = vld [vmem:[%s6765_s5 + $0x128] sm:$0xff]  ;;  %v226_v22 = vld [vmem:[%s6765_s5 + $0x130] sm:$0xff] }
  0x35   : > { %223 = vst [vmem:[%s6770_s23 + $0xa0] sm:$0xff] %v222_v20  ;;  %v228_v23 = vld [vmem:[%s6765_s5 + $0x138] sm:$0xff]  ;;  %225 = vst [vmem:[%s6770_s23 + $0xa8] sm:$0xff] %v224_v21  ;;  %v230_v24 = vld [vmem:[%s6765_s5 + $0x180] sm:$0xff] }
  0x36   : > { %227 = vst [vmem:[%s6770_s23 + $0xb0] sm:$0xff] %v226_v22  ;;  %229 = vst [vmem:[%s6770_s23 + $0xb8] sm:$0xff] %v228_v23  ;;  %v232_v25 = vld [vmem:[%s6765_s5 + $0x188] sm:$0xff]  ;;  %v234_v26 = vld [vmem:[%s6765_s5 + $0x190] sm:$0xff] }
  0x37   : > { %231 = vst [vmem:[%s6770_s23 + $0xc0] sm:$0xff] %v230_v24  ;;  %233 = vst [vmem:[%s6770_s23 + $0xc8] sm:$0xff] %v232_v25  ;;  %v236_v27 = vld [vmem:[%s6765_s5 + $0x198] sm:$0xff]  ;;  %v238_v28 = vld [vmem:[%s6765_s5 + $0x1a0] sm:$0xff] }
  0x38   : > { %235 = vst [vmem:[%s6770_s23 + $0xd0] sm:$0xff] %v234_v26  ;;  %v240_v29 = vld [vmem:[%s6765_s5 + $0x1a8] sm:$0xff]  ;;  %237 = vst [vmem:[%s6770_s23 + $0xd8] sm:$0xff] %v236_v27  ;;  %v242_v30 = vld [vmem:[%s6765_s5 + $0x1b0] sm:$0xff] }
  0x39   : > { %239 = vst [vmem:[%s6770_s23 + $0xe0] sm:$0xff] %v238_v28  ;;  %241 = vst [vmem:[%s6770_s23 + $0xe8] sm:$0xff] %v240_v29  ;;  %v244_v31 = vld [vmem:[%s6765_s5 + $0x1b8] sm:$0xff]  ;;  %v246_v32 = vld [vmem:[%s6765_s5 + $0x200] sm:$0xff] }
  0x3a   : > { %243 = vst [vmem:[%s6770_s23 + $0xf0] sm:$0xff] %v242_v30  ;;  %245 = vst [vmem:[%s6770_s23 + $0xf8] sm:$0xff] %v244_v31  ;;  %v248_v33 = vld [vmem:[%s6765_s5 + $0x208] sm:$0xff]  ;;  %v250_v34 = vld [vmem:[%s6765_s5 + $0x210] sm:$0xff] }
  0x3b   : > { %247 = vst [vmem:[%s6770_s23 + $0x100] sm:$0xff] %v246_v32  ;;  %v252_v35 = vld [vmem:[%s6765_s5 + $0x218] sm:$0xff]  ;;  %249 = vst [vmem:[%s6770_s23 + $0x108] sm:$0xff] %v248_v33  ;;  %v254_v36 = vld [vmem:[%s6765_s5 + $0x220] sm:$0xff] }
  0x3c   : > { %251 = vst [vmem:[%s6770_s23 + $0x110] sm:$0xff] %v250_v34  ;;  %253 = vst [vmem:[%s6770_s23 + $0x118] sm:$0xff] %v252_v35  ;;  %v256_v37 = vld [vmem:[%s6765_s5 + $0x228] sm:$0xff]  ;;  %v258_v38 = vld [vmem:[%s6765_s5 + $0x230] sm:$0xff] }
  0x3d   : > { %255 = vst [vmem:[%s6770_s23 + $0x120] sm:$0xff] %v254_v36  ;;  %257 = vst [vmem:[%s6770_s23 + $0x128] sm:$0xff] %v256_v37  ;;  %v260_v39 = vld [vmem:[%s6765_s5 + $0x238] sm:$0xff]  ;;  %v262_v40 = vld [vmem:[%s6765_s5 + $0x280] sm:$0xff] }
  0x3e   : > { %259 = vst [vmem:[%s6770_s23 + $0x130] sm:$0xff] %v258_v38  ;;  %v264_v41 = vld [vmem:[%s6765_s5 + $0x288] sm:$0xff]  ;;  %261 = vst [vmem:[%s6770_s23 + $0x138] sm:$0xff] %v260_v39  ;;  %v266_v42 = vld [vmem:[%s6765_s5 + $0x290] sm:$0xff] }
  0x3f   : > { %263 = vst [vmem:[%s6770_s23 + $0x140] sm:$0xff] %v262_v40  ;;  %265 = vst [vmem:[%s6770_s23 + $0x148] sm:$0xff] %v264_v41  ;;  %v268_v43 = vld [vmem:[%s6765_s5 + $0x298] sm:$0xff]  ;;  %v270_v44 = vld [vmem:[%s6765_s5 + $0x2a0] sm:$0xff] }
  0x40   : > { %267 = vst [vmem:[%s6770_s23 + $0x150] sm:$0xff] %v266_v42  ;;  %269 = vst [vmem:[%s6770_s23 + $0x158] sm:$0xff] %v268_v43  ;;  %v272_v45 = vld [vmem:[%s6765_s5 + $0x2a8] sm:$0xff]  ;;  %v274_v46 = vld [vmem:[%s6765_s5 + $0x2b0] sm:$0xff] }
  0x41   : > { %271 = vst [vmem:[%s6770_s23 + $0x160] sm:$0xff] %v270_v44  ;;  %v276_v47 = vld [vmem:[%s6765_s5 + $0x2b8] sm:$0xff]  ;;  %273 = vst [vmem:[%s6770_s23 + $0x168] sm:$0xff] %v272_v45  ;;  %v278_v48 = vld [vmem:[%s6765_s5 + $0x300] sm:$0xff] }
  0x42   : > { %275 = vst [vmem:[%s6770_s23 + $0x170] sm:$0xff] %v274_v46  ;;  %277 = vst [vmem:[%s6770_s23 + $0x178] sm:$0xff] %v276_v47  ;;  %v280_v49 = vld [vmem:[%s6765_s5 + $0x308] sm:$0xff]  ;;  %v282_v50 = vld [vmem:[%s6765_s5 + $0x310] sm:$0xff] }
  0x43   : > { %279 = vst [vmem:[%s6770_s23 + $0x180] sm:$0xff] %v278_v48  ;;  %281 = vst [vmem:[%s6770_s23 + $0x188] sm:$0xff] %v280_v49  ;;  %v284_v51 = vld [vmem:[%s6765_s5 + $0x318] sm:$0xff]  ;;  %v286_v52 = vld [vmem:[%s6765_s5 + $0x320] sm:$0xff] }
  0x44   : > { %283 = vst [vmem:[%s6770_s23 + $0x190] sm:$0xff] %v282_v50  ;;  %v288_v53 = vld [vmem:[%s6765_s5 + $0x328] sm:$0xff]  ;;  %285 = vst [vmem:[%s6770_s23 + $0x198] sm:$0xff] %v284_v51  ;;  %v290_v54 = vld [vmem:[%s6765_s5 + $0x330] sm:$0xff] }
  0x45   : > { %287 = vst [vmem:[%s6770_s23 + $0x1a0] sm:$0xff] %v286_v52  ;;  %289 = vst [vmem:[%s6770_s23 + $0x1a8] sm:$0xff] %v288_v53  ;;  %v292_v55 = vld [vmem:[%s6765_s5 + $0x338] sm:$0xff]  ;;  %v294_v56 = vld [vmem:[%s6765_s5 + $0x380] sm:$0xff] }
  0x46   : > { %291 = vst [vmem:[%s6770_s23 + $0x1b0] sm:$0xff] %v290_v54  ;;  %293 = vst [vmem:[%s6770_s23 + $0x1b8] sm:$0xff] %v292_v55  ;;  %v296_v57 = vld [vmem:[%s6765_s5 + $0x388] sm:$0xff]  ;;  %v298_v58 = vld [vmem:[%s6765_s5 + $0x390] sm:$0xff] }
  0x47   : > { %295 = vst [vmem:[%s6770_s23 + $0x1c0] sm:$0xff] %v294_v56  ;;  %v300_v59 = vld [vmem:[%s6765_s5 + $0x398] sm:$0xff]  ;;  %297 = vst [vmem:[%s6770_s23 + $0x1c8] sm:$0xff] %v296_v57  ;;  %v302_v60 = vld [vmem:[%s6765_s5 + $0x3a0] sm:$0xff] }
  0x48   : > { %299 = vst [vmem:[%s6770_s23 + $0x1d0] sm:$0xff] %v298_v58  ;;  %301 = vst [vmem:[%s6770_s23 + $0x1d8] sm:$0xff] %v300_v59  ;;  %v304_v61 = vld [vmem:[%s6765_s5 + $0x3a8] sm:$0xff]  ;;  %v306_v62 = vld [vmem:[%s6765_s5 + $0x3b0] sm:$0xff] }
  0x49   : > { %303 = vst [vmem:[%s6770_s23 + $0x1e0] sm:$0xff] %v302_v60  ;;  %305 = vst [vmem:[%s6770_s23 + $0x1e8] sm:$0xff] %v304_v61  ;;  %v308_v63 = vld [vmem:[%s6765_s5 + $0x3b8] sm:$0xff]  ;;  %v310_v0 = vld [vmem:[%s6765_s5 + $0x400] sm:$0xff] }
  0x4a   : > { %307 = vst [vmem:[%s6770_s23 + $0x1f0] sm:$0xff] %v306_v62  ;;  %v312_v1 = vld [vmem:[%s6765_s5 + $0x408] sm:$0xff]  ;;  %309 = vst [vmem:[%s6770_s23 + $0x1f8] sm:$0xff] %v308_v63  ;;  %v314_v2 = vld [vmem:[%s6765_s5 + $0x410] sm:$0xff] }
  0x4b   : > { %311 = vst [vmem:[%s6770_s23 + $0x200] sm:$0xff] %v310_v0  ;;  %313 = vst [vmem:[%s6770_s23 + $0x208] sm:$0xff] %v312_v1  ;;  %v316_v3 = vld [vmem:[%s6765_s5 + $0x418] sm:$0xff]  ;;  %v318_v4 = vld [vmem:[%s6765_s5 + $0x420] sm:$0xff] }
  0x4c   : > { %315 = vst [vmem:[%s6770_s23 + $0x210] sm:$0xff] %v314_v2  ;;  %317 = vst [vmem:[%s6770_s23 + $0x218] sm:$0xff] %v316_v3  ;;  %v320_v5 = vld [vmem:[%s6765_s5 + $0x428] sm:$0xff]  ;;  %v322_v6 = vld [vmem:[%s6765_s5 + $0x430] sm:$0xff] }
  0x4d   : > { %319 = vst [vmem:[%s6770_s23 + $0x220] sm:$0xff] %v318_v4  ;;  %v324_v7 = vld [vmem:[%s6765_s5 + $0x438] sm:$0xff]  ;;  %321 = vst [vmem:[%s6770_s23 + $0x228] sm:$0xff] %v320_v5  ;;  %v326_v8 = vld [vmem:[%s6765_s5 + $0x480] sm:$0xff] }
  0x4e   : > { %323 = vst [vmem:[%s6770_s23 + $0x230] sm:$0xff] %v322_v6  ;;  %325 = vst [vmem:[%s6770_s23 + $0x238] sm:$0xff] %v324_v7  ;;  %v328_v9 = vld [vmem:[%s6765_s5 + $0x488] sm:$0xff]  ;;  %v330_v10 = vld [vmem:[%s6765_s5 + $0x490] sm:$0xff] }
  0x4f   : > { %327 = vst [vmem:[%s6770_s23 + $0x240] sm:$0xff] %v326_v8  ;;  %329 = vst [vmem:[%s6770_s23 + $0x248] sm:$0xff] %v328_v9  ;;  %v332_v11 = vld [vmem:[%s6765_s5 + $0x498] sm:$0xff]  ;;  %v334_v12 = vld [vmem:[%s6765_s5 + $0x4a0] sm:$0xff] }
  0x50   : > { %331 = vst [vmem:[%s6770_s23 + $0x250] sm:$0xff] %v330_v10  ;;  %v336_v13 = vld [vmem:[%s6765_s5 + $0x4a8] sm:$0xff]  ;;  %333 = vst [vmem:[%s6770_s23 + $0x258] sm:$0xff] %v332_v11  ;;  %v338_v14 = vld [vmem:[%s6765_s5 + $0x4b0] sm:$0xff] }
  0x51   : > { %335 = vst [vmem:[%s6770_s23 + $0x260] sm:$0xff] %v334_v12  ;;  %337 = vst [vmem:[%s6770_s23 + $0x268] sm:$0xff] %v336_v13  ;;  %v340_v15 = vld [vmem:[%s6765_s5 + $0x4b8] sm:$0xff]  ;;  %v342_v16 = vld [vmem:[%s6765_s5 + $0x500] sm:$0xff] }
  0x52   : > { %339 = vst [vmem:[%s6770_s23 + $0x270] sm:$0xff] %v338_v14  ;;  %341 = vst [vmem:[%s6770_s23 + $0x278] sm:$0xff] %v340_v15  ;;  %v344_v17 = vld [vmem:[%s6765_s5 + $0x508] sm:$0xff]  ;;  %v346_v18 = vld [vmem:[%s6765_s5 + $0x510] sm:$0xff] }
  0x53   : > { %343 = vst [vmem:[%s6770_s23 + $0x280] sm:$0xff] %v342_v16  ;;  %v348_v19 = vld [vmem:[%s6765_s5 + $0x518] sm:$0xff]  ;;  %345 = vst [vmem:[%s6770_s23 + $0x288] sm:$0xff] %v344_v17  ;;  %v350_v20 = vld [vmem:[%s6765_s5 + $0x520] sm:$0xff] }
  0x54   : > { %347 = vst [vmem:[%s6770_s23 + $0x290] sm:$0xff] %v346_v18  ;;  %349 = vst [vmem:[%s6770_s23 + $0x298] sm:$0xff] %v348_v19  ;;  %v352_v21 = vld [vmem:[%s6765_s5 + $0x528] sm:$0xff]  ;;  %v354_v22 = vld [vmem:[%s6765_s5 + $0x530] sm:$0xff] }
  0x55   : > { %351 = vst [vmem:[%s6770_s23 + $0x2a0] sm:$0xff] %v350_v20  ;;  %353 = vst [vmem:[%s6770_s23 + $0x2a8] sm:$0xff] %v352_v21  ;;  %v356_v23 = vld [vmem:[%s6765_s5 + $0x538] sm:$0xff]  ;;  %v358_v24 = vld [vmem:[%s6765_s5 + $0x580] sm:$0xff] }
  0x56   : > { %355 = vst [vmem:[%s6770_s23 + $0x2b0] sm:$0xff] %v354_v22  ;;  %v360_v25 = vld [vmem:[%s6765_s5 + $0x588] sm:$0xff]  ;;  %357 = vst [vmem:[%s6770_s23 + $0x2b8] sm:$0xff] %v356_v23  ;;  %v362_v26 = vld [vmem:[%s6765_s5 + $0x590] sm:$0xff] }
  0x57   : > { %359 = vst [vmem:[%s6770_s23 + $0x2c0] sm:$0xff] %v358_v24  ;;  %361 = vst [vmem:[%s6770_s23 + $0x2c8] sm:$0xff] %v360_v25  ;;  %v364_v27 = vld [vmem:[%s6765_s5 + $0x598] sm:$0xff]  ;;  %v366_v28 = vld [vmem:[%s6765_s5 + $0x5a0] sm:$0xff] }
  0x58   : > { %363 = vst [vmem:[%s6770_s23 + $0x2d0] sm:$0xff] %v362_v26  ;;  %365 = vst [vmem:[%s6770_s23 + $0x2d8] sm:$0xff] %v364_v27  ;;  %v368_v29 = vld [vmem:[%s6765_s5 + $0x5a8] sm:$0xff]  ;;  %v370_v30 = vld [vmem:[%s6765_s5 + $0x5b0] sm:$0xff] }
  0x59   : > { %367 = vst [vmem:[%s6770_s23 + $0x2e0] sm:$0xff] %v366_v28  ;;  %v372_v31 = vld [vmem:[%s6765_s5 + $0x5b8] sm:$0xff]  ;;  %369 = vst [vmem:[%s6770_s23 + $0x2e8] sm:$0xff] %v368_v29  ;;  %v374_v32 = vld [vmem:[%s6765_s5 + $0x600] sm:$0xff] }
  0x5a   : > { %371 = vst [vmem:[%s6770_s23 + $0x2f0] sm:$0xff] %v370_v30  ;;  %373 = vst [vmem:[%s6770_s23 + $0x2f8] sm:$0xff] %v372_v31  ;;  %v376_v33 = vld [vmem:[%s6765_s5 + $0x608] sm:$0xff]  ;;  %v378_v34 = vld [vmem:[%s6765_s5 + $0x610] sm:$0xff] }
  0x5b   : > { %375 = vst [vmem:[%s6770_s23 + $0x300] sm:$0xff] %v374_v32  ;;  %377 = vst [vmem:[%s6770_s23 + $0x308] sm:$0xff] %v376_v33  ;;  %v380_v35 = vld [vmem:[%s6765_s5 + $0x618] sm:$0xff]  ;;  %v382_v36 = vld [vmem:[%s6765_s5 + $0x620] sm:$0xff] }
  0x5c   : > { %379 = vst [vmem:[%s6770_s23 + $0x310] sm:$0xff] %v378_v34  ;;  %v384_v37 = vld [vmem:[%s6765_s5 + $0x628] sm:$0xff]  ;;  %381 = vst [vmem:[%s6770_s23 + $0x318] sm:$0xff] %v380_v35  ;;  %v386_v38 = vld [vmem:[%s6765_s5 + $0x630] sm:$0xff] }
  0x5d   : > { %383 = vst [vmem:[%s6770_s23 + $0x320] sm:$0xff] %v382_v36  ;;  %385 = vst [vmem:[%s6770_s23 + $0x328] sm:$0xff] %v384_v37  ;;  %v388_v39 = vld [vmem:[%s6765_s5 + $0x638] sm:$0xff]  ;;  %v390_v40 = vld [vmem:[%s6765_s5 + $0x680] sm:$0xff] }
  0x5e   : > { %387 = vst [vmem:[%s6770_s23 + $0x330] sm:$0xff] %v386_v38  ;;  %389 = vst [vmem:[%s6770_s23 + $0x338] sm:$0xff] %v388_v39  ;;  %v392_v41 = vld [vmem:[%s6765_s5 + $0x688] sm:$0xff]  ;;  %v394_v42 = vld [vmem:[%s6765_s5 + $0x690] sm:$0xff] }
  0x5f   : > { %391 = vst [vmem:[%s6770_s23 + $0x340] sm:$0xff] %v390_v40  ;;  %v396_v43 = vld [vmem:[%s6765_s5 + $0x698] sm:$0xff]  ;;  %393 = vst [vmem:[%s6770_s23 + $0x348] sm:$0xff] %v392_v41  ;;  %v398_v44 = vld [vmem:[%s6765_s5 + $0x6a0] sm:$0xff] }
  0x60   : > { %395 = vst [vmem:[%s6770_s23 + $0x350] sm:$0xff] %v394_v42  ;;  %397 = vst [vmem:[%s6770_s23 + $0x358] sm:$0xff] %v396_v43  ;;  %v400_v45 = vld [vmem:[%s6765_s5 + $0x6a8] sm:$0xff]  ;;  %v402_v46 = vld [vmem:[%s6765_s5 + $0x6b0] sm:$0xff] }
  0x61   : > { %399 = vst [vmem:[%s6770_s23 + $0x360] sm:$0xff] %v398_v44  ;;  %401 = vst [vmem:[%s6770_s23 + $0x368] sm:$0xff] %v400_v45  ;;  %v404_v47 = vld [vmem:[%s6765_s5 + $0x6b8] sm:$0xff]  ;;  %v406_v48 = vld [vmem:[%s6765_s5 + $0x700] sm:$0xff] }
  0x62   : > { %403 = vst [vmem:[%s6770_s23 + $0x370] sm:$0xff] %v402_v46  ;;  %v408_v49 = vld [vmem:[%s6765_s5 + $0x708] sm:$0xff]  ;;  %405 = vst [vmem:[%s6770_s23 + $0x378] sm:$0xff] %v404_v47  ;;  %v410_v50 = vld [vmem:[%s6765_s5 + $0x710] sm:$0xff] }
  0x63   : > { %407 = vst [vmem:[%s6770_s23 + $0x380] sm:$0xff] %v406_v48  ;;  %409 = vst [vmem:[%s6770_s23 + $0x388] sm:$0xff] %v408_v49  ;;  %v412_v51 = vld [vmem:[%s6765_s5 + $0x718] sm:$0xff]  ;;  %v414_v52 = vld [vmem:[%s6765_s5 + $0x720] sm:$0xff] }
  0x64   : > { %411 = vst [vmem:[%s6770_s23 + $0x390] sm:$0xff] %v410_v50  ;;  %413 = vst [vmem:[%s6770_s23 + $0x398] sm:$0xff] %v412_v51  ;;  %v416_v53 = vld [vmem:[%s6765_s5 + $0x728] sm:$0xff]  ;;  %v418_v54 = vld [vmem:[%s6765_s5 + $0x730] sm:$0xff] }
  0x65   : > { %415 = vst [vmem:[%s6770_s23 + $0x3a0] sm:$0xff] %v414_v52  ;;  %v420_v55 = vld [vmem:[%s6765_s5 + $0x738] sm:$0xff]  ;;  %417 = vst [vmem:[%s6770_s23 + $0x3a8] sm:$0xff] %v416_v53  ;;  %v422_v56 = vld [vmem:[%s6765_s5 + $0x780] sm:$0xff] }
  0x66   : > { %419 = vst [vmem:[%s6770_s23 + $0x3b0] sm:$0xff] %v418_v54  ;;  %421 = vst [vmem:[%s6770_s23 + $0x3b8] sm:$0xff] %v420_v55  ;;  %v424_v57 = vld [vmem:[%s6765_s5 + $0x788] sm:$0xff]  ;;  %v426_v58 = vld [vmem:[%s6765_s5 + $0x790] sm:$0xff] }
  0x67   : > { %423 = vst [vmem:[%s6770_s23 + $0x3c0] sm:$0xff] %v422_v56  ;;  %425 = vst [vmem:[%s6770_s23 + $0x3c8] sm:$0xff] %v424_v57  ;;  %v428_v59 = vld [vmem:[%s6765_s5 + $0x798] sm:$0xff]  ;;  %v430_v60 = vld [vmem:[%s6765_s5 + $0x7a0] sm:$0xff] }
  0x68   : > { %427 = vst [vmem:[%s6770_s23 + $0x3d0] sm:$0xff] %v426_v58  ;;  %v432_v61 = vld [vmem:[%s6765_s5 + $0x7a8] sm:$0xff]  ;;  %429 = vst [vmem:[%s6770_s23 + $0x3d8] sm:$0xff] %v428_v59  ;;  %v434_v62 = vld [vmem:[%s6765_s5 + $0x7b0] sm:$0xff] }
  0x69   : > { %431 = vst [vmem:[%s6770_s23 + $0x3e0] sm:$0xff] %v430_v60  ;;  %433 = vst [vmem:[%s6770_s23 + $0x3e8] sm:$0xff] %v432_v61  ;;  %v436_v63 = vld [vmem:[%s6765_s5 + $0x7b8] sm:$0xff] }
  0x6a   : > { %435 = vst [vmem:[%s6770_s23 + $0x3f0] sm:$0xff] %v434_v62  ;;  %437 = vst [vmem:[%s6770_s23 + $0x3f8] sm:$0xff] %v436_v63 }
  0x6b PF: > { %443 = sbr.rel (!%p6740_p9) target bundleno = 245 (0xf5), region = 43  ;;  %s445_s28 = sand.u32 (%p6740_p9), 1, %s6608_s15  }
  0x6c   : > { %s5419_s7 = sshll.u32 (%p6740_p9), %s6632_s21, 1  ;;  %s5417_s11 = sshll.u32 (%p6740_p9), %s445_s28, 11 }
  0x6d   : > { %s5835_s26 = sshll.u32 (%p6740_p9), %s6628_s20, 10  ;;  %s8078_s1 = sld [smem:[#allocation8_spill]] (%p6740_p9) }
  0x6e   : > { %s451_s27 = sadd.s32 (%p6740_p9), %s5835_s26, %s5419_s7  ;;  %s7038_s6 = scalar_lea.vmem (%p6740_p9), [#allocation4], %s5417_s11 }
  0x6f   : > { %s5421_s29 = sshll.u32 (%p6740_p9), %s451_s27, 2 }
  0x73   : > { %s7033_s25 = scalar_lea.vmem %s8078_s1, %s5421_s29 }
  0x74   : > { %v991_v0 = vld [vmem:[%s7033_s25] sm:$0xff]  ;;  %v993_v1 = vld [vmem:[%s7033_s25 + $0x10] sm:$0xff] }
  0x75   : > { %v995_v2 = vld [vmem:[%s7033_s25 + $0x20] sm:$0xff]  ;;  %992 = vst [vmem:[%s7038_s6] sm:$0xff] %v991_v0  ;;  %994 = vst [vmem:[%s7038_s6 + $0x8] sm:$0xff] %v993_v1  ;;  %v997_v3 = vld [vmem:[%s7033_s25 + $0x30] sm:$0xff] }
  0x76   : > { %996 = vst [vmem:[%s7038_s6 + $0x10] sm:$0xff] %v995_v2  ;;  %v999_v4 = vld [vmem:[%s7033_s25 + $0x40] sm:$0xff]  ;;  %v1001_v5 = vld [vmem:[%s7033_s25 + $0x50] sm:$0xff]  ;;  %998 = vst [vmem:[%s7038_s6 + $0x18] sm:$0xff] %v997_v3 }
  0x77   : > { %1000 = vst [vmem:[%s7038_s6 + $0x20] sm:$0xff] %v999_v4  ;;  %1002 = vst [vmem:[%s7038_s6 + $0x28] sm:$0xff] %v1001_v5  ;;  %v1003_v6 = vld [vmem:[%s7033_s25 + $0x60] sm:$0xff]  ;;  %v1005_v7 = vld [vmem:[%s7033_s25 + $0x70] sm:$0xff] }
  0x78   : > { %v1007_v8 = vld [vmem:[%s7033_s25 + $0x80] sm:$0xff]  ;;  %1004 = vst [vmem:[%s7038_s6 + $0x30] sm:$0xff] %v1003_v6  ;;  %1006 = vst [vmem:[%s7038_s6 + $0x38] sm:$0xff] %v1005_v7  ;;  %v1009_v9 = vld [vmem:[%s7033_s25 + $0x90] sm:$0xff] }
  0x79   : > { %1008 = vst [vmem:[%s7038_s6 + $0x40] sm:$0xff] %v1007_v8  ;;  %v1011_v10 = vld [vmem:[%s7033_s25 + $0xa0] sm:$0xff]  ;;  %v1013_v11 = vld [vmem:[%s7033_s25 + $0xb0] sm:$0xff]  ;;  %1010 = vst [vmem:[%s7038_s6 + $0x48] sm:$0xff] %v1009_v9 }
  0x7a   : > { %1012 = vst [vmem:[%s7038_s6 + $0x50] sm:$0xff] %v1011_v10  ;;  %1014 = vst [vmem:[%s7038_s6 + $0x58] sm:$0xff] %v1013_v11  ;;  %v1015_v12 = vld [vmem:[%s7033_s25 + $0xc0] sm:$0xff]  ;;  %v1017_v13 = vld [vmem:[%s7033_s25 + $0xd0] sm:$0xff] }
  0x7b   : > { %v1019_v14 = vld [vmem:[%s7033_s25 + $0xe0] sm:$0xff]  ;;  %1016 = vst [vmem:[%s7038_s6 + $0x60] sm:$0xff] %v1015_v12  ;;  %1018 = vst [vmem:[%s7038_s6 + $0x68] sm:$0xff] %v1017_v13  ;;  %v1021_v15 = vld [vmem:[%s7033_s25 + $0xf0] sm:$0xff] }
  0x7c   : > { %1020 = vst [vmem:[%s7038_s6 + $0x70] sm:$0xff] %v1019_v14  ;;  %v1023_v16 = vld [vmem:[%s7033_s25 + $0x100] sm:$0xff]  ;;  %v1025_v17 = vld [vmem:[%s7033_s25 + $0x110] sm:$0xff]  ;;  %1022 = vst [vmem:[%s7038_s6 + $0x78] sm:$0xff] %v1021_v15 }
  0x7d   : > { %1024 = vst [vmem:[%s7038_s6 + $0x80] sm:$0xff] %v1023_v16  ;;  %1026 = vst [vmem:[%s7038_s6 + $0x88] sm:$0xff] %v1025_v17  ;;  %v1027_v18 = vld [vmem:[%s7033_s25 + $0x120] sm:$0xff]  ;;  %v1029_v19 = vld [vmem:[%s7033_s25 + $0x130] sm:$0xff] }
  0x7e   : > { %v1031_v20 = vld [vmem:[%s7033_s25 + $0x140] sm:$0xff]  ;;  %1028 = vst [vmem:[%s7038_s6 + $0x90] sm:$0xff] %v1027_v18  ;;  %1030 = vst [vmem:[%s7038_s6 + $0x98] sm:$0xff] %v1029_v19  ;;  %v1033_v21 = vld [vmem:[%s7033_s25 + $0x150] sm:$0xff] }
  0x7f   : > { %1032 = vst [vmem:[%s7038_s6 + $0xa0] sm:$0xff] %v1031_v20  ;;  %v1035_v22 = vld [vmem:[%s7033_s25 + $0x160] sm:$0xff]  ;;  %v1037_v23 = vld [vmem:[%s7033_s25 + $0x170] sm:$0xff]  ;;  %1034 = vst [vmem:[%s7038_s6 + $0xa8] sm:$0xff] %v1033_v21 }
  0x80   : > { %1036 = vst [vmem:[%s7038_s6 + $0xb0] sm:$0xff] %v1035_v22  ;;  %1038 = vst [vmem:[%s7038_s6 + $0xb8] sm:$0xff] %v1037_v23  ;;  %v1039_v24 = vld [vmem:[%s7033_s25 + $0x180] sm:$0xff]  ;;  %v1041_v25 = vld [vmem:[%s7033_s25 + $0x190] sm:$0xff] }
  0x81   : > { %v1043_v26 = vld [vmem:[%s7033_s25 + $0x1a0] sm:$0xff]  ;;  %1040 = vst [vmem:[%s7038_s6 + $0xc0] sm:$0xff] %v1039_v24  ;;  %1042 = vst [vmem:[%s7038_s6 + $0xc8] sm:$0xff] %v1041_v25  ;;  %v1045_v27 = vld [vmem:[%s7033_s25 + $0x1b0] sm:$0xff] }
  0x82   : > { %1044 = vst [vmem:[%s7038_s6 + $0xd0] sm:$0xff] %v1043_v26  ;;  %v1047_v28 = vld [vmem:[%s7033_s25 + $0x1c0] sm:$0xff]  ;;  %v1049_v29 = vld [vmem:[%s7033_s25 + $0x1d0] sm:$0xff]  ;;  %1046 = vst [vmem:[%s7038_s6 + $0xd8] sm:$0xff] %v1045_v27 }
  0x83   : > { %1048 = vst [vmem:[%s7038_s6 + $0xe0] sm:$0xff] %v1047_v28  ;;  %1050 = vst [vmem:[%s7038_s6 + $0xe8] sm:$0xff] %v1049_v29  ;;  %v1051_v30 = vld [vmem:[%s7033_s25 + $0x1e0] sm:$0xff]  ;;  %v1053_v31 = vld [vmem:[%s7033_s25 + $0x1f0] sm:$0xff] }
  0x84   : > { %v1055_v32 = vld [vmem:[%s7033_s25 + $0x200] sm:$0xff]  ;;  %1052 = vst [vmem:[%s7038_s6 + $0xf0] sm:$0xff] %v1051_v30  ;;  %1054 = vst [vmem:[%s7038_s6 + $0xf8] sm:$0xff] %v1053_v31  ;;  %v1057_v33 = vld [vmem:[%s7033_s25 + $0x210] sm:$0xff] }
  0x85   : > { %1056 = vst [vmem:[%s7038_s6 + $0x100] sm:$0xff] %v1055_v32  ;;  %v1059_v34 = vld [vmem:[%s7033_s25 + $0x220] sm:$0xff]  ;;  %v1061_v35 = vld [vmem:[%s7033_s25 + $0x230] sm:$0xff]  ;;  %1058 = vst [vmem:[%s7038_s6 + $0x108] sm:$0xff] %v1057_v33 }
  0x86   : > { %1060 = vst [vmem:[%s7038_s6 + $0x110] sm:$0xff] %v1059_v34  ;;  %1062 = vst [vmem:[%s7038_s6 + $0x118] sm:$0xff] %v1061_v35  ;;  %v1063_v36 = vld [vmem:[%s7033_s25 + $0x240] sm:$0xff]  ;;  %v1065_v37 = vld [vmem:[%s7033_s25 + $0x250] sm:$0xff] }
  0x87   : > { %v1067_v38 = vld [vmem:[%s7033_s25 + $0x260] sm:$0xff]  ;;  %1064 = vst [vmem:[%s7038_s6 + $0x120] sm:$0xff] %v1063_v36  ;;  %1066 = vst [vmem:[%s7038_s6 + $0x128] sm:$0xff] %v1065_v37  ;;  %v1069_v39 = vld [vmem:[%s7033_s25 + $0x270] sm:$0xff] }
  0x88   : > { %1068 = vst [vmem:[%s7038_s6 + $0x130] sm:$0xff] %v1067_v38  ;;  %v1071_v40 = vld [vmem:[%s7033_s25 + $0x280] sm:$0xff]  ;;  %v1073_v41 = vld [vmem:[%s7033_s25 + $0x290] sm:$0xff]  ;;  %1070 = vst [vmem:[%s7038_s6 + $0x138] sm:$0xff] %v1069_v39 }
  0x89   : > { %1072 = vst [vmem:[%s7038_s6 + $0x140] sm:$0xff] %v1071_v40  ;;  %1074 = vst [vmem:[%s7038_s6 + $0x148] sm:$0xff] %v1073_v41  ;;  %v1075_v42 = vld [vmem:[%s7033_s25 + $0x2a0] sm:$0xff]  ;;  %v1077_v43 = vld [vmem:[%s7033_s25 + $0x2b0] sm:$0xff] }
  0x8a   : > { %v1079_v44 = vld [vmem:[%s7033_s25 + $0x2c0] sm:$0xff]  ;;  %1076 = vst [vmem:[%s7038_s6 + $0x150] sm:$0xff] %v1075_v42  ;;  %1078 = vst [vmem:[%s7038_s6 + $0x158] sm:$0xff] %v1077_v43  ;;  %v1081_v45 = vld [vmem:[%s7033_s25 + $0x2d0] sm:$0xff] }
  0x8b   : > { %1080 = vst [vmem:[%s7038_s6 + $0x160] sm:$0xff] %v1079_v44  ;;  %v1083_v46 = vld [vmem:[%s7033_s25 + $0x2e0] sm:$0xff]  ;;  %v1085_v47 = vld [vmem:[%s7033_s25 + $0x2f0] sm:$0xff]  ;;  %1082 = vst [vmem:[%s7038_s6 + $0x168] sm:$0xff] %v1081_v45 }
  0x8c   : > { %1084 = vst [vmem:[%s7038_s6 + $0x170] sm:$0xff] %v1083_v46  ;;  %1086 = vst [vmem:[%s7038_s6 + $0x178] sm:$0xff] %v1085_v47  ;;  %v1087_v48 = vld [vmem:[%s7033_s25 + $0x300] sm:$0xff]  ;;  %v1089_v49 = vld [vmem:[%s7033_s25 + $0x310] sm:$0xff] }
  0x8d   : > { %v1091_v50 = vld [vmem:[%s7033_s25 + $0x320] sm:$0xff]  ;;  %1088 = vst [vmem:[%s7038_s6 + $0x180] sm:$0xff] %v1087_v48  ;;  %1090 = vst [vmem:[%s7038_s6 + $0x188] sm:$0xff] %v1089_v49  ;;  %v1093_v51 = vld [vmem:[%s7033_s25 + $0x330] sm:$0xff] }
  0x8e   : > { %1092 = vst [vmem:[%s7038_s6 + $0x190] sm:$0xff] %v1091_v50  ;;  %v1095_v52 = vld [vmem:[%s7033_s25 + $0x340] sm:$0xff]  ;;  %v1097_v53 = vld [vmem:[%s7033_s25 + $0x350] sm:$0xff]  ;;  %1094 = vst [vmem:[%s7038_s6 + $0x198] sm:$0xff] %v1093_v51 }
  0x8f   : > { %1096 = vst [vmem:[%s7038_s6 + $0x1a0] sm:$0xff] %v1095_v52  ;;  %1098 = vst [vmem:[%s7038_s6 + $0x1a8] sm:$0xff] %v1097_v53  ;;  %v1099_v54 = vld [vmem:[%s7033_s25 + $0x360] sm:$0xff]  ;;  %v1101_v55 = vld [vmem:[%s7033_s25 + $0x370] sm:$0xff] }
  0x90   : > { %v1103_v56 = vld [vmem:[%s7033_s25 + $0x380] sm:$0xff]  ;;  %1100 = vst [vmem:[%s7038_s6 + $0x1b0] sm:$0xff] %v1099_v54  ;;  %1102 = vst [vmem:[%s7038_s6 + $0x1b8] sm:$0xff] %v1101_v55  ;;  %v1105_v57 = vld [vmem:[%s7033_s25 + $0x390] sm:$0xff] }
  0x91   : > { %1104 = vst [vmem:[%s7038_s6 + $0x1c0] sm:$0xff] %v1103_v56  ;;  %v1107_v58 = vld [vmem:[%s7033_s25 + $0x3a0] sm:$0xff]  ;;  %v1109_v59 = vld [vmem:[%s7033_s25 + $0x3b0] sm:$0xff]  ;;  %1106 = vst [vmem:[%s7038_s6 + $0x1c8] sm:$0xff] %v1105_v57 }
  0x92   : > { %1108 = vst [vmem:[%s7038_s6 + $0x1d0] sm:$0xff] %v1107_v58  ;;  %1110 = vst [vmem:[%s7038_s6 + $0x1d8] sm:$0xff] %v1109_v59  ;;  %v1111_v60 = vld [vmem:[%s7033_s25 + $0x3c0] sm:$0xff]  ;;  %v1113_v61 = vld [vmem:[%s7033_s25 + $0x3d0] sm:$0xff] }
  0x93   : > { %v1115_v62 = vld [vmem:[%s7033_s25 + $0x3e0] sm:$0xff]  ;;  %1112 = vst [vmem:[%s7038_s6 + $0x1e0] sm:$0xff] %v1111_v60  ;;  %1114 = vst [vmem:[%s7038_s6 + $0x1e8] sm:$0xff] %v1113_v61  ;;  %v1117_v63 = vld [vmem:[%s7033_s25 + $0x3f0] sm:$0xff] }
  0x94   : > { %1116 = vst [vmem:[%s7038_s6 + $0x1f0] sm:$0xff] %v1115_v62  ;;  %v1119_v0 = vld [vmem:[%s7033_s25 + $0x400] sm:$0xff]  ;;  %v1121_v1 = vld [vmem:[%s7033_s25 + $0x410] sm:$0xff]  ;;  %1118 = vst [vmem:[%s7038_s6 + $0x1f8] sm:$0xff] %v1117_v63 }
  0x95   : > { %1120 = vst [vmem:[%s7038_s6 + $0x200] sm:$0xff] %v1119_v0  ;;  %1122 = vst [vmem:[%s7038_s6 + $0x208] sm:$0xff] %v1121_v1  ;;  %v1123_v2 = vld [vmem:[%s7033_s25 + $0x420] sm:$0xff]  ;;  %v1125_v3 = vld [vmem:[%s7033_s25 + $0x430] sm:$0xff] }
  0x96   : > { %v1127_v4 = vld [vmem:[%s7033_s25 + $0x440] sm:$0xff]  ;;  %1124 = vst [vmem:[%s7038_s6 + $0x210] sm:$0xff] %v1123_v2  ;;  %1126 = vst [vmem:[%s7038_s6 + $0x218] sm:$0xff] %v1125_v3  ;;  %v1129_v5 = vld [vmem:[%s7033_s25 + $0x450] sm:$0xff] }
  0x97   : > { %1128 = vst [vmem:[%s7038_s6 + $0x220] sm:$0xff] %v1127_v4  ;;  %v1131_v6 = vld [vmem:[%s7033_s25 + $0x460] sm:$0xff]  ;;  %v1133_v7 = vld [vmem:[%s7033_s25 + $0x470] sm:$0xff]  ;;  %1130 = vst [vmem:[%s7038_s6 + $0x228] sm:$0xff] %v1129_v5 }
  0x98   : > { %1132 = vst [vmem:[%s7038_s6 + $0x230] sm:$0xff] %v1131_v6  ;;  %1134 = vst [vmem:[%s7038_s6 + $0x238] sm:$0xff] %v1133_v7  ;;  %v1135_v8 = vld [vmem:[%s7033_s25 + $0x480] sm:$0xff]  ;;  %v1137_v9 = vld [vmem:[%s7033_s25 + $0x490] sm:$0xff] }
  0x99   : > { %v1139_v10 = vld [vmem:[%s7033_s25 + $0x4a0] sm:$0xff]  ;;  %1136 = vst [vmem:[%s7038_s6 + $0x240] sm:$0xff] %v1135_v8  ;;  %1138 = vst [vmem:[%s7038_s6 + $0x248] sm:$0xff] %v1137_v9  ;;  %v1141_v11 = vld [vmem:[%s7033_s25 + $0x4b0] sm:$0xff] }
  0x9a   : > { %1140 = vst [vmem:[%s7038_s6 + $0x250] sm:$0xff] %v1139_v10  ;;  %v1143_v12 = vld [vmem:[%s7033_s25 + $0x4c0] sm:$0xff]  ;;  %v1145_v13 = vld [vmem:[%s7033_s25 + $0x4d0] sm:$0xff]  ;;  %1142 = vst [vmem:[%s7038_s6 + $0x258] sm:$0xff] %v1141_v11 }
  0x9b   : > { %1144 = vst [vmem:[%s7038_s6 + $0x260] sm:$0xff] %v1143_v12  ;;  %1146 = vst [vmem:[%s7038_s6 + $0x268] sm:$0xff] %v1145_v13  ;;  %v1147_v14 = vld [vmem:[%s7033_s25 + $0x4e0] sm:$0xff]  ;;  %v1149_v15 = vld [vmem:[%s7033_s25 + $0x4f0] sm:$0xff] }
  0x9c   : > { %v1151_v16 = vld [vmem:[%s7033_s25 + $0x500] sm:$0xff]  ;;  %1148 = vst [vmem:[%s7038_s6 + $0x270] sm:$0xff] %v1147_v14  ;;  %1150 = vst [vmem:[%s7038_s6 + $0x278] sm:$0xff] %v1149_v15  ;;  %v1153_v17 = vld [vmem:[%s7033_s25 + $0x510] sm:$0xff] }
  0x9d   : > { %1152 = vst [vmem:[%s7038_s6 + $0x280] sm:$0xff] %v1151_v16  ;;  %v1155_v18 = vld [vmem:[%s7033_s25 + $0x520] sm:$0xff]  ;;  %v1157_v19 = vld [vmem:[%s7033_s25 + $0x530] sm:$0xff]  ;;  %1154 = vst [vmem:[%s7038_s6 + $0x288] sm:$0xff] %v1153_v17 }
  0x9e   : > { %1156 = vst [vmem:[%s7038_s6 + $0x290] sm:$0xff] %v1155_v18  ;;  %1158 = vst [vmem:[%s7038_s6 + $0x298] sm:$0xff] %v1157_v19  ;;  %v1159_v20 = vld [vmem:[%s7033_s25 + $0x540] sm:$0xff]  ;;  %v1161_v21 = vld [vmem:[%s7033_s25 + $0x550] sm:$0xff] }
  0x9f   : > { %v1163_v22 = vld [vmem:[%s7033_s25 + $0x560] sm:$0xff]  ;;  %1160 = vst [vmem:[%s7038_s6 + $0x2a0] sm:$0xff] %v1159_v20  ;;  %1162 = vst [vmem:[%s7038_s6 + $0x2a8] sm:$0xff] %v1161_v21  ;;  %v1165_v23 = vld [vmem:[%s7033_s25 + $0x570] sm:$0xff] }
  0xa0   : > { %1164 = vst [vmem:[%s7038_s6 + $0x2b0] sm:$0xff] %v1163_v22  ;;  %v1167_v24 = vld [vmem:[%s7033_s25 + $0x580] sm:$0xff]  ;;  %v1169_v25 = vld [vmem:[%s7033_s25 + $0x590] sm:$0xff]  ;;  %1166 = vst [vmem:[%s7038_s6 + $0x2b8] sm:$0xff] %v1165_v23 }
  0xa1   : > { %1168 = vst [vmem:[%s7038_s6 + $0x2c0] sm:$0xff] %v1167_v24  ;;  %1170 = vst [vmem:[%s7038_s6 + $0x2c8] sm:$0xff] %v1169_v25  ;;  %v1171_v26 = vld [vmem:[%s7033_s25 + $0x5a0] sm:$0xff]  ;;  %v1173_v27 = vld [vmem:[%s7033_s25 + $0x5b0] sm:$0xff] }
  0xa2   : > { %v1175_v28 = vld [vmem:[%s7033_s25 + $0x5c0] sm:$0xff]  ;;  %1172 = vst [vmem:[%s7038_s6 + $0x2d0] sm:$0xff] %v1171_v26  ;;  %1174 = vst [vmem:[%s7038_s6 + $0x2d8] sm:$0xff] %v1173_v27  ;;  %v1177_v29 = vld [vmem:[%s7033_s25 + $0x5d0] sm:$0xff] }
  0xa3   : > { %1176 = vst [vmem:[%s7038_s6 + $0x2e0] sm:$0xff] %v1175_v28  ;;  %v1179_v30 = vld [vmem:[%s7033_s25 + $0x5e0] sm:$0xff]  ;;  %v1181_v31 = vld [vmem:[%s7033_s25 + $0x5f0] sm:$0xff]  ;;  %1178 = vst [vmem:[%s7038_s6 + $0x2e8] sm:$0xff] %v1177_v29 }
  0xa4   : > { %1180 = vst [vmem:[%s7038_s6 + $0x2f0] sm:$0xff] %v1179_v30  ;;  %1182 = vst [vmem:[%s7038_s6 + $0x2f8] sm:$0xff] %v1181_v31  ;;  %v1183_v32 = vld [vmem:[%s7033_s25 + $0x600] sm:$0xff]  ;;  %v1185_v33 = vld [vmem:[%s7033_s25 + $0x610] sm:$0xff] }
  0xa5   : > { %v1187_v34 = vld [vmem:[%s7033_s25 + $0x620] sm:$0xff]  ;;  %1184 = vst [vmem:[%s7038_s6 + $0x300] sm:$0xff] %v1183_v32  ;;  %1186 = vst [vmem:[%s7038_s6 + $0x308] sm:$0xff] %v1185_v33  ;;  %v1189_v35 = vld [vmem:[%s7033_s25 + $0x630] sm:$0xff] }
  0xa6   : > { %1188 = vst [vmem:[%s7038_s6 + $0x310] sm:$0xff] %v1187_v34  ;;  %v1191_v36 = vld [vmem:[%s7033_s25 + $0x640] sm:$0xff]  ;;  %v1193_v37 = vld [vmem:[%s7033_s25 + $0x650] sm:$0xff]  ;;  %1190 = vst [vmem:[%s7038_s6 + $0x318] sm:$0xff] %v1189_v35 }
  0xa7   : > { %1192 = vst [vmem:[%s7038_s6 + $0x320] sm:$0xff] %v1191_v36  ;;  %1194 = vst [vmem:[%s7038_s6 + $0x328] sm:$0xff] %v1193_v37  ;;  %v1195_v38 = vld [vmem:[%s7033_s25 + $0x660] sm:$0xff]  ;;  %v1197_v39 = vld [vmem:[%s7033_s25 + $0x670] sm:$0xff] }
  0xa8   : > { %v1199_v40 = vld [vmem:[%s7033_s25 + $0x680] sm:$0xff]  ;;  %1196 = vst [vmem:[%s7038_s6 + $0x330] sm:$0xff] %v1195_v38  ;;  %1198 = vst [vmem:[%s7038_s6 + $0x338] sm:$0xff] %v1197_v39  ;;  %v1201_v41 = vld [vmem:[%s7033_s25 + $0x690] sm:$0xff] }
  0xa9   : > { %1200 = vst [vmem:[%s7038_s6 + $0x340] sm:$0xff] %v1199_v40  ;;  %v1203_v42 = vld [vmem:[%s7033_s25 + $0x6a0] sm:$0xff]  ;;  %v1205_v43 = vld [vmem:[%s7033_s25 + $0x6b0] sm:$0xff]  ;;  %1202 = vst [vmem:[%s7038_s6 + $0x348] sm:$0xff] %v1201_v41 }
  0xaa   : > { %1204 = vst [vmem:[%s7038_s6 + $0x350] sm:$0xff] %v1203_v42  ;;  %1206 = vst [vmem:[%s7038_s6 + $0x358] sm:$0xff] %v1205_v43  ;;  %v1207_v44 = vld [vmem:[%s7033_s25 + $0x6c0] sm:$0xff]  ;;  %v1209_v45 = vld [vmem:[%s7033_s25 + $0x6d0] sm:$0xff] }
  0xab   : > { %v1211_v46 = vld [vmem:[%s7033_s25 + $0x6e0] sm:$0xff]  ;;  %1208 = vst [vmem:[%s7038_s6 + $0x360] sm:$0xff] %v1207_v44  ;;  %1210 = vst [vmem:[%s7038_s6 + $0x368] sm:$0xff] %v1209_v45  ;;  %v1213_v47 = vld [vmem:[%s7033_s25 + $0x6f0] sm:$0xff] }
  0xac   : > { %1212 = vst [vmem:[%s7038_s6 + $0x370] sm:$0xff] %v1211_v46  ;;  %v1215_v48 = vld [vmem:[%s7033_s25 + $0x700] sm:$0xff]  ;;  %v1217_v49 = vld [vmem:[%s7033_s25 + $0x710] sm:$0xff]  ;;  %1214 = vst [vmem:[%s7038_s6 + $0x378] sm:$0xff] %v1213_v47 }
  0xad   : > { %1216 = vst [vmem:[%s7038_s6 + $0x380] sm:$0xff] %v1215_v48  ;;  %1218 = vst [vmem:[%s7038_s6 + $0x388] sm:$0xff] %v1217_v49  ;;  %v1219_v50 = vld [vmem:[%s7033_s25 + $0x720] sm:$0xff]  ;;  %v1221_v51 = vld [vmem:[%s7033_s25 + $0x730] sm:$0xff] }
  0xae   : > { %v1223_v52 = vld [vmem:[%s7033_s25 + $0x740] sm:$0xff]  ;;  %1220 = vst [vmem:[%s7038_s6 + $0x390] sm:$0xff] %v1219_v50  ;;  %1222 = vst [vmem:[%s7038_s6 + $0x398] sm:$0xff] %v1221_v51  ;;  %v1225_v53 = vld [vmem:[%s7033_s25 + $0x750] sm:$0xff] }
  0xaf   : > { %1224 = vst [vmem:[%s7038_s6 + $0x3a0] sm:$0xff] %v1223_v52  ;;  %v1227_v54 = vld [vmem:[%s7033_s25 + $0x760] sm:$0xff]  ;;  %v1229_v55 = vld [vmem:[%s7033_s25 + $0x770] sm:$0xff]  ;;  %1226 = vst [vmem:[%s7038_s6 + $0x3a8] sm:$0xff] %v1225_v53 }
  0xb0   : > { %1228 = vst [vmem:[%s7038_s6 + $0x3b0] sm:$0xff] %v1227_v54  ;;  %1230 = vst [vmem:[%s7038_s6 + $0x3b8] sm:$0xff] %v1229_v55  ;;  %v1231_v56 = vld [vmem:[%s7033_s25 + $0x780] sm:$0xff]  ;;  %v1233_v57 = vld [vmem:[%s7033_s25 + $0x790] sm:$0xff] }
  0xb1   : > { %v1235_v58 = vld [vmem:[%s7033_s25 + $0x7a0] sm:$0xff]  ;;  %1232 = vst [vmem:[%s7038_s6 + $0x3c0] sm:$0xff] %v1231_v56  ;;  %1234 = vst [vmem:[%s7038_s6 + $0x3c8] sm:$0xff] %v1233_v57  ;;  %v1237_v59 = vld [vmem:[%s7033_s25 + $0x7b0] sm:$0xff] }
  0xb2   : > { %1236 = vst [vmem:[%s7038_s6 + $0x3d0] sm:$0xff] %v1235_v58  ;;  %v1239_v60 = vld [vmem:[%s7033_s25 + $0x7c0] sm:$0xff]  ;;  %v1241_v61 = vld [vmem:[%s7033_s25 + $0x7d0] sm:$0xff]  ;;  %1238 = vst [vmem:[%s7038_s6 + $0x3d8] sm:$0xff] %v1237_v59 }
  0xb3   : > { %1240 = vst [vmem:[%s7038_s6 + $0x3e0] sm:$0xff] %v1239_v60  ;;  %1242 = vst [vmem:[%s7038_s6 + $0x3e8] sm:$0xff] %v1241_v61  ;;  %v1243_v62 = vld [vmem:[%s7033_s25 + $0x7e0] sm:$0xff]  ;;  %v1245_v63 = vld [vmem:[%s7033_s25 + $0x7f0] sm:$0xff] }
  0xb4   : > { %v1247_v0 = vld [vmem:[%s7033_s25 + $0x800] sm:$0xff]  ;;  %1244 = vst [vmem:[%s7038_s6 + $0x3f0] sm:$0xff] %v1243_v62  ;;  %1246 = vst [vmem:[%s7038_s6 + $0x3f8] sm:$0xff] %v1245_v63  ;;  %v1249_v1 = vld [vmem:[%s7033_s25 + $0x810] sm:$0xff] }
  0xb5   : > { %1248 = vst [vmem:[%s7038_s6 + $0x400] sm:$0xff] %v1247_v0  ;;  %v1251_v2 = vld [vmem:[%s7033_s25 + $0x820] sm:$0xff]  ;;  %v1253_v3 = vld [vmem:[%s7033_s25 + $0x830] sm:$0xff]  ;;  %1250 = vst [vmem:[%s7038_s6 + $0x408] sm:$0xff] %v1249_v1 }
  0xb6   : > { %1252 = vst [vmem:[%s7038_s6 + $0x410] sm:$0xff] %v1251_v2  ;;  %1254 = vst [vmem:[%s7038_s6 + $0x418] sm:$0xff] %v1253_v3  ;;  %v1255_v4 = vld [vmem:[%s7033_s25 + $0x840] sm:$0xff]  ;;  %v1257_v5 = vld [vmem:[%s7033_s25 + $0x850] sm:$0xff] }
  0xb7   : > { %v1259_v6 = vld [vmem:[%s7033_s25 + $0x860] sm:$0xff]  ;;  %1256 = vst [vmem:[%s7038_s6 + $0x420] sm:$0xff] %v1255_v4  ;;  %1258 = vst [vmem:[%s7038_s6 + $0x428] sm:$0xff] %v1257_v5  ;;  %v1261_v7 = vld [vmem:[%s7033_s25 + $0x870] sm:$0xff] }
  0xb8   : > { %1260 = vst [vmem:[%s7038_s6 + $0x430] sm:$0xff] %v1259_v6  ;;  %v1263_v8 = vld [vmem:[%s7033_s25 + $0x880] sm:$0xff]  ;;  %v1265_v9 = vld [vmem:[%s7033_s25 + $0x890] sm:$0xff]  ;;  %1262 = vst [vmem:[%s7038_s6 + $0x438] sm:$0xff] %v1261_v7 }
  0xb9   : > { %1264 = vst [vmem:[%s7038_s6 + $0x440] sm:$0xff] %v1263_v8  ;;  %1266 = vst [vmem:[%s7038_s6 + $0x448] sm:$0xff] %v1265_v9  ;;  %v1267_v10 = vld [vmem:[%s7033_s25 + $0x8a0] sm:$0xff]  ;;  %v1269_v11 = vld [vmem:[%s7033_s25 + $0x8b0] sm:$0xff] }
  0xba   : > { %v1271_v12 = vld [vmem:[%s7033_s25 + $0x8c0] sm:$0xff]  ;;  %1268 = vst [vmem:[%s7038_s6 + $0x450] sm:$0xff] %v1267_v10  ;;  %1270 = vst [vmem:[%s7038_s6 + $0x458] sm:$0xff] %v1269_v11  ;;  %v1273_v13 = vld [vmem:[%s7033_s25 + $0x8d0] sm:$0xff] }
  0xbb   : > { %1272 = vst [vmem:[%s7038_s6 + $0x460] sm:$0xff] %v1271_v12  ;;  %v1275_v14 = vld [vmem:[%s7033_s25 + $0x8e0] sm:$0xff]  ;;  %v1277_v15 = vld [vmem:[%s7033_s25 + $0x8f0] sm:$0xff]  ;;  %1274 = vst [vmem:[%s7038_s6 + $0x468] sm:$0xff] %v1273_v13 }
  0xbc   : > { %1276 = vst [vmem:[%s7038_s6 + $0x470] sm:$0xff] %v1275_v14  ;;  %1278 = vst [vmem:[%s7038_s6 + $0x478] sm:$0xff] %v1277_v15  ;;  %v1279_v16 = vld [vmem:[%s7033_s25 + $0x900] sm:$0xff]  ;;  %v1281_v17 = vld [vmem:[%s7033_s25 + $0x910] sm:$0xff] }
  0xbd   : > { %v1283_v18 = vld [vmem:[%s7033_s25 + $0x920] sm:$0xff]  ;;  %1280 = vst [vmem:[%s7038_s6 + $0x480] sm:$0xff] %v1279_v16  ;;  %1282 = vst [vmem:[%s7038_s6 + $0x488] sm:$0xff] %v1281_v17  ;;  %v1285_v19 = vld [vmem:[%s7033_s25 + $0x930] sm:$0xff] }
  0xbe   : > { %1284 = vst [vmem:[%s7038_s6 + $0x490] sm:$0xff] %v1283_v18  ;;  %v1287_v20 = vld [vmem:[%s7033_s25 + $0x940] sm:$0xff]  ;;  %v1289_v21 = vld [vmem:[%s7033_s25 + $0x950] sm:$0xff]  ;;  %1286 = vst [vmem:[%s7038_s6 + $0x498] sm:$0xff] %v1285_v19 }
  0xbf   : > { %1288 = vst [vmem:[%s7038_s6 + $0x4a0] sm:$0xff] %v1287_v20  ;;  %1290 = vst [vmem:[%s7038_s6 + $0x4a8] sm:$0xff] %v1289_v21  ;;  %v1291_v22 = vld [vmem:[%s7033_s25 + $0x960] sm:$0xff]  ;;  %v1293_v23 = vld [vmem:[%s7033_s25 + $0x970] sm:$0xff] }
  0xc0   : > { %v1295_v24 = vld [vmem:[%s7033_s25 + $0x980] sm:$0xff]  ;;  %1292 = vst [vmem:[%s7038_s6 + $0x4b0] sm:$0xff] %v1291_v22  ;;  %1294 = vst [vmem:[%s7038_s6 + $0x4b8] sm:$0xff] %v1293_v23  ;;  %v1297_v25 = vld [vmem:[%s7033_s25 + $0x990] sm:$0xff] }
  0xc1   : > { %1296 = vst [vmem:[%s7038_s6 + $0x4c0] sm:$0xff] %v1295_v24  ;;  %v1299_v26 = vld [vmem:[%s7033_s25 + $0x9a0] sm:$0xff]  ;;  %v1301_v27 = vld [vmem:[%s7033_s25 + $0x9b0] sm:$0xff]  ;;  %1298 = vst [vmem:[%s7038_s6 + $0x4c8] sm:$0xff] %v1297_v25 }
  0xc2   : > { %1300 = vst [vmem:[%s7038_s6 + $0x4d0] sm:$0xff] %v1299_v26  ;;  %1302 = vst [vmem:[%s7038_s6 + $0x4d8] sm:$0xff] %v1301_v27  ;;  %v1303_v28 = vld [vmem:[%s7033_s25 + $0x9c0] sm:$0xff]  ;;  %v1305_v29 = vld [vmem:[%s7033_s25 + $0x9d0] sm:$0xff] }
  0xc3   : > { %v1307_v30 = vld [vmem:[%s7033_s25 + $0x9e0] sm:$0xff]  ;;  %1304 = vst [vmem:[%s7038_s6 + $0x4e0] sm:$0xff] %v1303_v28  ;;  %1306 = vst [vmem:[%s7038_s6 + $0x4e8] sm:$0xff] %v1305_v29  ;;  %v1309_v31 = vld [vmem:[%s7033_s25 + $0x9f0] sm:$0xff] }
  0xc4   : > { %1308 = vst [vmem:[%s7038_s6 + $0x4f0] sm:$0xff] %v1307_v30  ;;  %v1311_v32 = vld [vmem:[%s7033_s25 + $0xa00] sm:$0xff]  ;;  %v1313_v33 = vld [vmem:[%s7033_s25 + $0xa10] sm:$0xff]  ;;  %1310 = vst [vmem:[%s7038_s6 + $0x4f8] sm:$0xff] %v1309_v31 }
  0xc5   : > { %1312 = vst [vmem:[%s7038_s6 + $0x500] sm:$0xff] %v1311_v32  ;;  %1314 = vst [vmem:[%s7038_s6 + $0x508] sm:$0xff] %v1313_v33  ;;  %v1315_v34 = vld [vmem:[%s7033_s25 + $0xa20] sm:$0xff]  ;;  %v1317_v35 = vld [vmem:[%s7033_s25 + $0xa30] sm:$0xff] }
  0xc6   : > { %v1319_v36 = vld [vmem:[%s7033_s25 + $0xa40] sm:$0xff]  ;;  %1316 = vst [vmem:[%s7038_s6 + $0x510] sm:$0xff] %v1315_v34  ;;  %1318 = vst [vmem:[%s7038_s6 + $0x518] sm:$0xff] %v1317_v35  ;;  %v1321_v37 = vld [vmem:[%s7033_s25 + $0xa50] sm:$0xff] }
  0xc7   : > { %1320 = vst [vmem:[%s7038_s6 + $0x520] sm:$0xff] %v1319_v36  ;;  %v1323_v38 = vld [vmem:[%s7033_s25 + $0xa60] sm:$0xff]  ;;  %v1325_v39 = vld [vmem:[%s7033_s25 + $0xa70] sm:$0xff]  ;;  %1322 = vst [vmem:[%s7038_s6 + $0x528] sm:$0xff] %v1321_v37 }
  0xc8   : > { %1324 = vst [vmem:[%s7038_s6 + $0x530] sm:$0xff] %v1323_v38  ;;  %1326 = vst [vmem:[%s7038_s6 + $0x538] sm:$0xff] %v1325_v39  ;;  %v1327_v40 = vld [vmem:[%s7033_s25 + $0xa80] sm:$0xff]  ;;  %v1329_v41 = vld [vmem:[%s7033_s25 + $0xa90] sm:$0xff] }
  0xc9   : > { %v1331_v42 = vld [vmem:[%s7033_s25 + $0xaa0] sm:$0xff]  ;;  %1328 = vst [vmem:[%s7038_s6 + $0x540] sm:$0xff] %v1327_v40  ;;  %1330 = vst [vmem:[%s7038_s6 + $0x548] sm:$0xff] %v1329_v41  ;;  %v1333_v43 = vld [vmem:[%s7033_s25 + $0xab0] sm:$0xff] }
  0xca   : > { %1332 = vst [vmem:[%s7038_s6 + $0x550] sm:$0xff] %v1331_v42  ;;  %v1335_v44 = vld [vmem:[%s7033_s25 + $0xac0] sm:$0xff]  ;;  %v1337_v45 = vld [vmem:[%s7033_s25 + $0xad0] sm:$0xff]  ;;  %1334 = vst [vmem:[%s7038_s6 + $0x558] sm:$0xff] %v1333_v43 }
  0xcb   : > { %1336 = vst [vmem:[%s7038_s6 + $0x560] sm:$0xff] %v1335_v44  ;;  %1338 = vst [vmem:[%s7038_s6 + $0x568] sm:$0xff] %v1337_v45  ;;  %v1339_v46 = vld [vmem:[%s7033_s25 + $0xae0] sm:$0xff]  ;;  %v1341_v47 = vld [vmem:[%s7033_s25 + $0xaf0] sm:$0xff] }
  0xcc   : > { %v1343_v48 = vld [vmem:[%s7033_s25 + $0xb00] sm:$0xff]  ;;  %1340 = vst [vmem:[%s7038_s6 + $0x570] sm:$0xff] %v1339_v46  ;;  %1342 = vst [vmem:[%s7038_s6 + $0x578] sm:$0xff] %v1341_v47  ;;  %v1345_v49 = vld [vmem:[%s7033_s25 + $0xb10] sm:$0xff] }
  0xcd   : > { %1344 = vst [vmem:[%s7038_s6 + $0x580] sm:$0xff] %v1343_v48  ;;  %v1347_v50 = vld [vmem:[%s7033_s25 + $0xb20] sm:$0xff]  ;;  %v1349_v51 = vld [vmem:[%s7033_s25 + $0xb30] sm:$0xff]  ;;  %1346 = vst [vmem:[%s7038_s6 + $0x588] sm:$0xff] %v1345_v49 }
  0xce   : > { %1348 = vst [vmem:[%s7038_s6 + $0x590] sm:$0xff] %v1347_v50  ;;  %1350 = vst [vmem:[%s7038_s6 + $0x598] sm:$0xff] %v1349_v51  ;;  %v1351_v52 = vld [vmem:[%s7033_s25 + $0xb40] sm:$0xff]  ;;  %v1353_v53 = vld [vmem:[%s7033_s25 + $0xb50] sm:$0xff] }
  0xcf   : > { %v1355_v54 = vld [vmem:[%s7033_s25 + $0xb60] sm:$0xff]  ;;  %1352 = vst [vmem:[%s7038_s6 + $0x5a0] sm:$0xff] %v1351_v52  ;;  %1354 = vst [vmem:[%s7038_s6 + $0x5a8] sm:$0xff] %v1353_v53  ;;  %v1357_v55 = vld [vmem:[%s7033_s25 + $0xb70] sm:$0xff] }
  0xd0   : > { %1356 = vst [vmem:[%s7038_s6 + $0x5b0] sm:$0xff] %v1355_v54  ;;  %v1359_v56 = vld [vmem:[%s7033_s25 + $0xb80] sm:$0xff]  ;;  %v1361_v57 = vld [vmem:[%s7033_s25 + $0xb90] sm:$0xff]  ;;  %1358 = vst [vmem:[%s7038_s6 + $0x5b8] sm:$0xff] %v1357_v55 }
  0xd1   : > { %1360 = vst [vmem:[%s7038_s6 + $0x5c0] sm:$0xff] %v1359_v56  ;;  %1362 = vst [vmem:[%s7038_s6 + $0x5c8] sm:$0xff] %v1361_v57  ;;  %v1363_v58 = vld [vmem:[%s7033_s25 + $0xba0] sm:$0xff]  ;;  %v1365_v59 = vld [vmem:[%s7033_s25 + $0xbb0] sm:$0xff] }
  0xd2   : > { %v1367_v60 = vld [vmem:[%s7033_s25 + $0xbc0] sm:$0xff]  ;;  %1364 = vst [vmem:[%s7038_s6 + $0x5d0] sm:$0xff] %v1363_v58  ;;  %1366 = vst [vmem:[%s7038_s6 + $0x5d8] sm:$0xff] %v1365_v59  ;;  %v1369_v61 = vld [vmem:[%s7033_s25 + $0xbd0] sm:$0xff] }
  0xd3   : > { %1368 = vst [vmem:[%s7038_s6 + $0x5e0] sm:$0xff] %v1367_v60  ;;  %v1371_v62 = vld [vmem:[%s7033_s25 + $0xbe0] sm:$0xff]  ;;  %v1373_v63 = vld [vmem:[%s7033_s25 + $0xbf0] sm:$0xff]  ;;  %1370 = vst [vmem:[%s7038_s6 + $0x5e8] sm:$0xff] %v1369_v61 }
  0xd4   : > { %1372 = vst [vmem:[%s7038_s6 + $0x5f0] sm:$0xff] %v1371_v62  ;;  %1374 = vst [vmem:[%s7038_s6 + $0x5f8] sm:$0xff] %v1373_v63  ;;  %v1375_v0 = vld [vmem:[%s7033_s25 + $0xc00] sm:$0xff]  ;;  %v1377_v1 = vld [vmem:[%s7033_s25 + $0xc10] sm:$0xff] }
  0xd5   : > { %v1379_v2 = vld [vmem:[%s7033_s25 + $0xc20] sm:$0xff]  ;;  %1376 = vst [vmem:[%s7038_s6 + $0x600] sm:$0xff] %v1375_v0  ;;  %1378 = vst [vmem:[%s7038_s6 + $0x608] sm:$0xff] %v1377_v1  ;;  %v1381_v3 = vld [vmem:[%s7033_s25 + $0xc30] sm:$0xff] }
  0xd6   : > { %1380 = vst [vmem:[%s7038_s6 + $0x610] sm:$0xff] %v1379_v2  ;;  %v1383_v4 = vld [vmem:[%s7033_s25 + $0xc40] sm:$0xff]  ;;  %v1385_v5 = vld [vmem:[%s7033_s25 + $0xc50] sm:$0xff]  ;;  %1382 = vst [vmem:[%s7038_s6 + $0x618] sm:$0xff] %v1381_v3 }
  0xd7   : > { %1384 = vst [vmem:[%s7038_s6 + $0x620] sm:$0xff] %v1383_v4  ;;  %1386 = vst [vmem:[%s7038_s6 + $0x628] sm:$0xff] %v1385_v5  ;;  %v1387_v6 = vld [vmem:[%s7033_s25 + $0xc60] sm:$0xff]  ;;  %v1389_v7 = vld [vmem:[%s7033_s25 + $0xc70] sm:$0xff] }
  0xd8   : > { %v1391_v8 = vld [vmem:[%s7033_s25 + $0xc80] sm:$0xff]  ;;  %1388 = vst [vmem:[%s7038_s6 + $0x630] sm:$0xff] %v1387_v6  ;;  %1390 = vst [vmem:[%s7038_s6 + $0x638] sm:$0xff] %v1389_v7  ;;  %v1393_v9 = vld [vmem:[%s7033_s25 + $0xc90] sm:$0xff] }
  0xd9   : > { %1392 = vst [vmem:[%s7038_s6 + $0x640] sm:$0xff] %v1391_v8  ;;  %v1395_v10 = vld [vmem:[%s7033_s25 + $0xca0] sm:$0xff]  ;;  %v1397_v11 = vld [vmem:[%s7033_s25 + $0xcb0] sm:$0xff]  ;;  %1394 = vst [vmem:[%s7038_s6 + $0x648] sm:$0xff] %v1393_v9 }
  0xda   : > { %1396 = vst [vmem:[%s7038_s6 + $0x650] sm:$0xff] %v1395_v10  ;;  %1398 = vst [vmem:[%s7038_s6 + $0x658] sm:$0xff] %v1397_v11  ;;  %v1399_v12 = vld [vmem:[%s7033_s25 + $0xcc0] sm:$0xff]  ;;  %v1401_v13 = vld [vmem:[%s7033_s25 + $0xcd0] sm:$0xff] }
  0xdb   : > { %v1403_v14 = vld [vmem:[%s7033_s25 + $0xce0] sm:$0xff]  ;;  %1400 = vst [vmem:[%s7038_s6 + $0x660] sm:$0xff] %v1399_v12  ;;  %1402 = vst [vmem:[%s7038_s6 + $0x668] sm:$0xff] %v1401_v13  ;;  %v1405_v15 = vld [vmem:[%s7033_s25 + $0xcf0] sm:$0xff] }
  0xdc   : > { %1404 = vst [vmem:[%s7038_s6 + $0x670] sm:$0xff] %v1403_v14  ;;  %v1407_v16 = vld [vmem:[%s7033_s25 + $0xd00] sm:$0xff]  ;;  %v1409_v17 = vld [vmem:[%s7033_s25 + $0xd10] sm:$0xff]  ;;  %1406 = vst [vmem:[%s7038_s6 + $0x678] sm:$0xff] %v1405_v15 }
  0xdd   : > { %1408 = vst [vmem:[%s7038_s6 + $0x680] sm:$0xff] %v1407_v16  ;;  %1410 = vst [vmem:[%s7038_s6 + $0x688] sm:$0xff] %v1409_v17  ;;  %v1411_v18 = vld [vmem:[%s7033_s25 + $0xd20] sm:$0xff]  ;;  %v1413_v19 = vld [vmem:[%s7033_s25 + $0xd30] sm:$0xff] }
  0xde   : > { %v1415_v20 = vld [vmem:[%s7033_s25 + $0xd40] sm:$0xff]  ;;  %1412 = vst [vmem:[%s7038_s6 + $0x690] sm:$0xff] %v1411_v18  ;;  %1414 = vst [vmem:[%s7038_s6 + $0x698] sm:$0xff] %v1413_v19  ;;  %v1417_v21 = vld [vmem:[%s7033_s25 + $0xd50] sm:$0xff] }
  0xdf   : > { %1416 = vst [vmem:[%s7038_s6 + $0x6a0] sm:$0xff] %v1415_v20  ;;  %v1419_v22 = vld [vmem:[%s7033_s25 + $0xd60] sm:$0xff]  ;;  %v1421_v23 = vld [vmem:[%s7033_s25 + $0xd70] sm:$0xff]  ;;  %1418 = vst [vmem:[%s7038_s6 + $0x6a8] sm:$0xff] %v1417_v21 }
  0xe0   : > { %1420 = vst [vmem:[%s7038_s6 + $0x6b0] sm:$0xff] %v1419_v22  ;;  %1422 = vst [vmem:[%s7038_s6 + $0x6b8] sm:$0xff] %v1421_v23  ;;  %v1423_v24 = vld [vmem:[%s7033_s25 + $0xd80] sm:$0xff]  ;;  %v1425_v25 = vld [vmem:[%s7033_s25 + $0xd90] sm:$0xff] }
  0xe1   : > { %v1427_v26 = vld [vmem:[%s7033_s25 + $0xda0] sm:$0xff]  ;;  %1424 = vst [vmem:[%s7038_s6 + $0x6c0] sm:$0xff] %v1423_v24  ;;  %1426 = vst [vmem:[%s7038_s6 + $0x6c8] sm:$0xff] %v1425_v25  ;;  %v1429_v27 = vld [vmem:[%s7033_s25 + $0xdb0] sm:$0xff] }
  0xe2   : > { %1428 = vst [vmem:[%s7038_s6 + $0x6d0] sm:$0xff] %v1427_v26  ;;  %v1431_v28 = vld [vmem:[%s7033_s25 + $0xdc0] sm:$0xff]  ;;  %v1433_v29 = vld [vmem:[%s7033_s25 + $0xdd0] sm:$0xff]  ;;  %1430 = vst [vmem:[%s7038_s6 + $0x6d8] sm:$0xff] %v1429_v27 }
  0xe3   : > { %1432 = vst [vmem:[%s7038_s6 + $0x6e0] sm:$0xff] %v1431_v28  ;;  %1434 = vst [vmem:[%s7038_s6 + $0x6e8] sm:$0xff] %v1433_v29  ;;  %v1435_v30 = vld [vmem:[%s7033_s25 + $0xde0] sm:$0xff]  ;;  %v1437_v31 = vld [vmem:[%s7033_s25 + $0xdf0] sm:$0xff] }
  0xe4   : > { %v1439_v32 = vld [vmem:[%s7033_s25 + $0xe00] sm:$0xff]  ;;  %1436 = vst [vmem:[%s7038_s6 + $0x6f0] sm:$0xff] %v1435_v30  ;;  %1438 = vst [vmem:[%s7038_s6 + $0x6f8] sm:$0xff] %v1437_v31  ;;  %v1441_v33 = vld [vmem:[%s7033_s25 + $0xe10] sm:$0xff] }
  0xe5   : > { %1440 = vst [vmem:[%s7038_s6 + $0x700] sm:$0xff] %v1439_v32  ;;  %v1443_v34 = vld [vmem:[%s7033_s25 + $0xe20] sm:$0xff]  ;;  %v1445_v35 = vld [vmem:[%s7033_s25 + $0xe30] sm:$0xff]  ;;  %1442 = vst [vmem:[%s7038_s6 + $0x708] sm:$0xff] %v1441_v33 }
  0xe6   : > { %1444 = vst [vmem:[%s7038_s6 + $0x710] sm:$0xff] %v1443_v34  ;;  %1446 = vst [vmem:[%s7038_s6 + $0x718] sm:$0xff] %v1445_v35  ;;  %v1447_v36 = vld [vmem:[%s7033_s25 + $0xe40] sm:$0xff]  ;;  %v1449_v37 = vld [vmem:[%s7033_s25 + $0xe50] sm:$0xff] }
  0xe7   : > { %v1451_v38 = vld [vmem:[%s7033_s25 + $0xe60] sm:$0xff]  ;;  %1448 = vst [vmem:[%s7038_s6 + $0x720] sm:$0xff] %v1447_v36  ;;  %1450 = vst [vmem:[%s7038_s6 + $0x728] sm:$0xff] %v1449_v37  ;;  %v1453_v39 = vld [vmem:[%s7033_s25 + $0xe70] sm:$0xff] }
  0xe8   : > { %1452 = vst [vmem:[%s7038_s6 + $0x730] sm:$0xff] %v1451_v38  ;;  %v1455_v40 = vld [vmem:[%s7033_s25 + $0xe80] sm:$0xff]  ;;  %v1457_v41 = vld [vmem:[%s7033_s25 + $0xe90] sm:$0xff]  ;;  %1454 = vst [vmem:[%s7038_s6 + $0x738] sm:$0xff] %v1453_v39 }
  0xe9   : > { %1456 = vst [vmem:[%s7038_s6 + $0x740] sm:$0xff] %v1455_v40  ;;  %1458 = vst [vmem:[%s7038_s6 + $0x748] sm:$0xff] %v1457_v41  ;;  %v1459_v42 = vld [vmem:[%s7033_s25 + $0xea0] sm:$0xff]  ;;  %v1461_v43 = vld [vmem:[%s7033_s25 + $0xeb0] sm:$0xff] }
  0xea   : > { %v1463_v44 = vld [vmem:[%s7033_s25 + $0xec0] sm:$0xff]  ;;  %1460 = vst [vmem:[%s7038_s6 + $0x750] sm:$0xff] %v1459_v42  ;;  %1462 = vst [vmem:[%s7038_s6 + $0x758] sm:$0xff] %v1461_v43  ;;  %v1465_v45 = vld [vmem:[%s7033_s25 + $0xed0] sm:$0xff] }
  0xeb   : > { %1464 = vst [vmem:[%s7038_s6 + $0x760] sm:$0xff] %v1463_v44  ;;  %v1467_v46 = vld [vmem:[%s7033_s25 + $0xee0] sm:$0xff]  ;;  %v1469_v47 = vld [vmem:[%s7033_s25 + $0xef0] sm:$0xff]  ;;  %1466 = vst [vmem:[%s7038_s6 + $0x768] sm:$0xff] %v1465_v45 }
  0xec   : > { %1468 = vst [vmem:[%s7038_s6 + $0x770] sm:$0xff] %v1467_v46  ;;  %1470 = vst [vmem:[%s7038_s6 + $0x778] sm:$0xff] %v1469_v47  ;;  %v1471_v48 = vld [vmem:[%s7033_s25 + $0xf00] sm:$0xff]  ;;  %v1473_v49 = vld [vmem:[%s7033_s25 + $0xf10] sm:$0xff] }
  0xed   : > { %v1475_v50 = vld [vmem:[%s7033_s25 + $0xf20] sm:$0xff]  ;;  %1472 = vst [vmem:[%s7038_s6 + $0x780] sm:$0xff] %v1471_v48  ;;  %1474 = vst [vmem:[%s7038_s6 + $0x788] sm:$0xff] %v1473_v49  ;;  %v1477_v51 = vld [vmem:[%s7033_s25 + $0xf30] sm:$0xff] }
  0xee   : > { %1476 = vst [vmem:[%s7038_s6 + $0x790] sm:$0xff] %v1475_v50  ;;  %v1479_v52 = vld [vmem:[%s7033_s25 + $0xf40] sm:$0xff]  ;;  %v1481_v53 = vld [vmem:[%s7033_s25 + $0xf50] sm:$0xff]  ;;  %1478 = vst [vmem:[%s7038_s6 + $0x798] sm:$0xff] %v1477_v51 }
  0xef   : > { %1480 = vst [vmem:[%s7038_s6 + $0x7a0] sm:$0xff] %v1479_v52  ;;  %1482 = vst [vmem:[%s7038_s6 + $0x7a8] sm:$0xff] %v1481_v53  ;;  %v1483_v54 = vld [vmem:[%s7033_s25 + $0xf60] sm:$0xff]  ;;  %v1485_v55 = vld [vmem:[%s7033_s25 + $0xf70] sm:$0xff] }
  0xf0   : > { %v1487_v56 = vld [vmem:[%s7033_s25 + $0xf80] sm:$0xff]  ;;  %1484 = vst [vmem:[%s7038_s6 + $0x7b0] sm:$0xff] %v1483_v54  ;;  %1486 = vst [vmem:[%s7038_s6 + $0x7b8] sm:$0xff] %v1485_v55  ;;  %v1489_v57 = vld [vmem:[%s7033_s25 + $0xf90] sm:$0xff] }
  0xf1   : > { %1488 = vst [vmem:[%s7038_s6 + $0x7c0] sm:$0xff] %v1487_v56  ;;  %v1491_v58 = vld [vmem:[%s7033_s25 + $0xfa0] sm:$0xff]  ;;  %v1493_v59 = vld [vmem:[%s7033_s25 + $0xfb0] sm:$0xff]  ;;  %1490 = vst [vmem:[%s7038_s6 + $0x7c8] sm:$0xff] %v1489_v57 }
  0xf2   : > { %1492 = vst [vmem:[%s7038_s6 + $0x7d0] sm:$0xff] %v1491_v58  ;;  %1494 = vst [vmem:[%s7038_s6 + $0x7d8] sm:$0xff] %v1493_v59  ;;  %v1495_v60 = vld [vmem:[%s7033_s25 + $0xfc0] sm:$0xff]  ;;  %v1497_v61 = vld [vmem:[%s7033_s25 + $0xfd0] sm:$0xff] }
  0xf3   : > { %v1499_v62 = vld [vmem:[%s7033_s25 + $0xfe0] sm:$0xff]  ;;  %1496 = vst [vmem:[%s7038_s6 + $0x7e0] sm:$0xff] %v1495_v60  ;;  %1498 = vst [vmem:[%s7038_s6 + $0x7e8] sm:$0xff] %v1497_v61  ;;  %v1501_v63 = vld [vmem:[%s7033_s25 + $0xff0] sm:$0xff] }
  0xf4   : > { %1500 = vst [vmem:[%s7038_s6 + $0x7f0] sm:$0xff] %v1499_v62  ;;  %1502 = vst [vmem:[%s7038_s6 + $0x7f8] sm:$0xff] %v1501_v63 }
  0xf5 PF: > { %p5422_p0 = scmp.ge.s32.totalorder %s6636_s22, 1  ;;  %p1515_p1 = scmp.lt.s32.totalorder %s6636_s22, 5 }
  0xf7   : > { %p1516_p2 = pnand %p5422_p0, %p1515_p1 }
  0xf8   : > { %s1522_s0 = sand.u32 (!%p1516_p2), 1, %s6612_s16   ;;  %s1529_s5 = sand.u32 (!%p1516_p2), 1, %s6604_s14  }
  0xf9   : > { %1519 = sbr.rel (%p1516_p2) target bundleno = 844 (0x34c), region = 85  ;;  %s5423_s23 = sshll.u32 (!%p1516_p2), %s1522_s0, 10 }
  0xfa   : > { %s5424_s28 = sshll.u32 (!%p1516_p2), %s1529_s5, 11  ;;  %s1556_s7 = sand.u32 (!%p1516_p2), 1, %s6596_s12  }
  0xfb   : > { %s5426_s11 = sshll.u32 (!%p1516_p2), %s6624_s19, 1  ;;  %s5425_s25 = sshll.u32 (!%p1516_p2), %s1556_s7, 7 }
  0xfc   : > { %p1564_p3 = scmp.lt.s32.totalorder (!%p1516_p2), %s5426_s11, 3  ;;  %s7561_s4 = scalar_lea.vmem (!%p1516_p2), [#allocation3], %s5423_s23 }
  0xfd   : > { %s7563_s6 = scalar_lea.vmem (!%p1516_p2), [#allocation4], %s5424_s28  ;;  %s7565_s1 = scalar_lea.vmem (!%p1516_p2), [#allocation5], %s5425_s25 }
  0xfe   : > { %p5427_p4 = scmp.ne.s32.totalorder (!%p1516_p2), %s6620_s18, 0 }
 0x100   : > { %s8097_s11 = smov (!%p1564_p3, %s5426_s11), 3  ;;  %1573 = sbr.rel (%p5427_p4) target bundleno = 274 (0x112), region = 97 }
 0x101   : > { %s1566_s29 = scalar_lea.vmem %s8068_s2, %s8097_s11  ;;  %v6638_v0 = vmov (!%p5427_p4), 0.0  }
 0x102   : > { %1574 = vst [vmem:[#allocation2] sm:$0xff] (!%p5427_p4), %v6638_v0  ;;  %1575 = vst [vmem:[#allocation2 + $0x8] sm:$0xff] (!%p5427_p4), %v6638_v0 }
 0x103   : > { %1576 = vst [vmem:[#allocation2 + $0x10] sm:$0xff] (!%p5427_p4), %v6638_v0  ;;  %1577 = vst [vmem:[#allocation2 + $0x18] sm:$0xff] (!%p5427_p4), %v6638_v0 }
 0x104   : > { %1578 = vst [vmem:[#allocation2 + $0x20] sm:$0xff] (!%p5427_p4), %v6638_v0  ;;  %1579 = vst [vmem:[#allocation2 + $0x28] sm:$0xff] (!%p5427_p4), %v6638_v0 }
 0x105   : > { %1580 = vst [vmem:[#allocation2 + $0x30] sm:$0xff] (!%p5427_p4), %v6638_v0  ;;  %1581 = vst [vmem:[#allocation2 + $0x38] sm:$0xff] (!%p5427_p4), %v6638_v0 }
 0x106   : > { %1582 = vst [vmem:[#allocation2 + $0x40] sm:$0xff] (!%p5427_p4), %v6638_v0  ;;  %1583 = vst [vmem:[#allocation2 + $0x48] sm:$0xff] (!%p5427_p4), %v6638_v0 }
 0x107   : > { %1584 = vst [vmem:[#allocation2 + $0x50] sm:$0xff] %v6638_v0  ;;  %1585 = vst [vmem:[#allocation2 + $0x58] sm:$0xff] %v6638_v0 }
 0x108   : > { %1586 = vst [vmem:[#allocation2 + $0x60] sm:$0xff] %v6638_v0  ;;  %1587 = vst [vmem:[#allocation2 + $0x68] sm:$0xff] %v6638_v0 }
 0x109   : > { %1588 = vst [vmem:[#allocation2 + $0x70] sm:$0xff] %v6638_v0  ;;  %1589 = vst [vmem:[#allocation2 + $0x78] sm:$0xff] %v6638_v0 }
 0x10a   : > { %1590 = vst [vmem:[#allocation2 + $0x80] sm:$0xff] %v6638_v0  ;;  %1591 = vst [vmem:[#allocation2 + $0x88] sm:$0xff] %v6638_v0 }
 0x10b   : > { %1592 = vst [vmem:[#allocation2 + $0x90] sm:$0xff] %v6638_v0  ;;  %1593 = vst [vmem:[#allocation2 + $0x98] sm:$0xff] %v6638_v0 }
 0x10c   : > { %1594 = vst [vmem:[#allocation2 + $0xa0] sm:$0xff] %v6638_v0  ;;  %1595 = vst [vmem:[#allocation2 + $0xa8] sm:$0xff] %v6638_v0 }
 0x10d   : > { %1596 = vst [vmem:[#allocation2 + $0xb0] sm:$0xff] %v6638_v0  ;;  %1597 = vst [vmem:[#allocation2 + $0xb8] sm:$0xff] %v6638_v0 }
 0x10e   : > { %1598 = vst [vmem:[#allocation2 + $0xc0] sm:$0xff] %v6638_v0  ;;  %1599 = vst [vmem:[#allocation2 + $0xc8] sm:$0xff] %v6638_v0 }
 0x10f   : > { %1600 = vst [vmem:[#allocation2 + $0xd0] sm:$0xff] %v6638_v0  ;;  %1601 = vst [vmem:[#allocation2 + $0xd8] sm:$0xff] %v6638_v0 }
 0x110   : > { %1602 = vst [vmem:[#allocation2 + $0xe0] sm:$0xff] %v6638_v0  ;;  %1603 = vst [vmem:[#allocation2 + $0xe8] sm:$0xff] %v6638_v0 }
 0x111   : > { %1604 = vst [vmem:[#allocation2 + $0xf0] sm:$0xff] %v6638_v0  ;;  %1605 = vst [vmem:[#allocation2 + $0xf8] sm:$0xff] %v6638_v0 }
 0x112 PF: > { %v6166_v1 = vld [vmem:[%s7563_s6 + $0x4] ss:$8 sps:$4 sm:$0xff]   ;;  %v6170_v3 = vld [vmem:[%s7563_s6] ss:$8 sps:$4 sm:$0xff]   ;;  %v6172_v5 = vld [vmem:[%s7563_s6 + $0x14] ss:$8 sps:$4 sm:$0xff]  }
 0x113   : > { %v6168_v2 = vld [vmem:[%s7563_s6 + $0x404] ss:$8 sps:$4 sm:$0xff]   ;;  %3942 = vmatprep.subr.bf16.mxu1 %v6166_v1  ;;  %v6171_v4 = vld [vmem:[%s7563_s6 + $0x400] ss:$8 sps:$4 sm:$0xff]   ;;  %v6174_v6 = vld [vmem:[%s7563_s6 + $0x414] ss:$8 sps:$4 sm:$0xff]  }
 0x114   : > { %4394 = vmatprep.subr.bf16.mxu0 %v6168_v2  ;;  %3943 = vmatpush1.bf16.msra.mxu1 %v6170_v3  ;;  %v6176_v7 = vld [vmem:[%s7563_s6 + $0x10] ss:$8 sps:$4 sm:$0xff]   ;;  %v6178_v9 = vld [vmem:[%s7563_s6 + $0x24] ss:$8 sps:$4 sm:$0xff]   ;;  %v6182_v11 = vld [vmem:[%s7563_s6 + $0x20] ss:$8 sps:$4 sm:$0xff]  }
 0x115   : > { %4395 = vmatpush1.bf16.msra.mxu0 %v6171_v4  ;;  %3944 = vmatprep.subr.bf16.mxu1 %v6172_v5  ;;  %v6177_v8 = vld [vmem:[%s7563_s6 + $0x410] ss:$8 sps:$4 sm:$0xff]   ;;  %v6180_v10 = vld [vmem:[%s7563_s6 + $0x424] ss:$8 sps:$4 sm:$0xff]   ;;  %v6183_v12 = vld [vmem:[%s7563_s6 + $0x420] ss:$8 sps:$4 sm:$0xff]  }
 0x116   : > { %4396 = vmatprep.subr.bf16.mxu0 %v6174_v6  ;;  %v6184_v13 = vld [vmem:[%s7563_s6 + $0x34] ss:$8 sps:$4 sm:$0xff]   ;;  %v6188_v15 = vld [vmem:[%s7563_s6 + $0x30] ss:$8 sps:$4 sm:$0xff]   ;;  %v6190_v17 = vld [vmem:[%s7563_s6 + $0x44] ss:$8 sps:$4 sm:$0xff]  }
 0x117   : > { %v6186_v14 = vld [vmem:[%s7563_s6 + $0x434] ss:$8 sps:$4 sm:$0xff]   ;;  %v6189_v16 = vld [vmem:[%s7563_s6 + $0x430] ss:$8 sps:$4 sm:$0xff]   ;;  %v6192_v18 = vld [vmem:[%s7563_s6 + $0x444] ss:$8 sps:$4 sm:$0xff]  }
 0x118   : > { %3945 = vmatpush1.bf16.msra.mxu1 %v6176_v7  ;;  %v6194_v19 = vld [vmem:[%s7563_s6 + $0x40] ss:$8 sps:$4 sm:$0xff]   ;;  %v6196_v21 = vld [vmem:[%s7563_s6 + $0x54] ss:$8 sps:$4 sm:$0xff]   ;;  %v6200_v23 = vld [vmem:[%s7563_s6 + $0x50] ss:$8 sps:$4 sm:$0xff]  }
 0x119   : > { %4397 = vmatpush1.bf16.msra.mxu0 %v6177_v8  ;;  %3946 = vmatprep.subr.bf16.mxu1 %v6178_v9  ;;  %v6195_v20 = vld [vmem:[%s7563_s6 + $0x440] ss:$8 sps:$4 sm:$0xff]   ;;  %v6198_v22 = vld [vmem:[%s7563_s6 + $0x454] ss:$8 sps:$4 sm:$0xff]   ;;  %v6201_v24 = vld [vmem:[%s7563_s6 + $0x450] ss:$8 sps:$4 sm:$0xff]  }
 0x11a   : > { %4398 = vmatprep.subr.bf16.mxu0 %v6180_v10  ;;  %v6202_v25 = vld [vmem:[%s7563_s6 + $0x64] ss:$8 sps:$4 sm:$0xff]   ;;  %v6206_v27 = vld [vmem:[%s7563_s6 + $0x60] ss:$8 sps:$4 sm:$0xff]   ;;  %v6208_v29 = vld [vmem:[%s7563_s6 + $0x74] ss:$8 sps:$4 sm:$0xff]  }
 0x11b   : > { %v6204_v26 = vld [vmem:[%s7563_s6 + $0x464] ss:$8 sps:$4 sm:$0xff]   ;;  %v6207_v28 = vld [vmem:[%s7563_s6 + $0x460] ss:$8 sps:$4 sm:$0xff]   ;;  %v6210_v30 = vld [vmem:[%s7563_s6 + $0x474] ss:$8 sps:$4 sm:$0xff]  }
 0x11c   : > { %3947 = vmatpush1.bf16.msra.mxu1 %v6182_v11  ;;  %v6212_v31 = vld [vmem:[%s7563_s6 + $0x70] ss:$8 sps:$4 sm:$0xff]   ;;  %v6214_v33 = vld [vmem:[%s7563_s6 + $0x84] ss:$8 sps:$4 sm:$0xff]   ;;  %v6218_v35 = vld [vmem:[%s7563_s6 + $0x80] ss:$8 sps:$4 sm:$0xff]  }
 0x11d   : > { %4399 = vmatpush1.bf16.msra.mxu0 %v6183_v12  ;;  %3948 = vmatprep.subr.bf16.mxu1 %v6184_v13  ;;  %v6213_v32 = vld [vmem:[%s7563_s6 + $0x470] ss:$8 sps:$4 sm:$0xff]   ;;  %v6216_v34 = vld [vmem:[%s7563_s6 + $0x484] ss:$8 sps:$4 sm:$0xff]   ;;  %v6219_v36 = vld [vmem:[%s7563_s6 + $0x480] ss:$8 sps:$4 sm:$0xff]  }
 0x11e   : > { %4400 = vmatprep.subr.bf16.mxu0 %v6186_v14  ;;  %v6220_v37 = vld [vmem:[%s7563_s6 + $0x94] ss:$8 sps:$4 sm:$0xff]   ;;  %v6224_v39 = vld [vmem:[%s7563_s6 + $0x90] ss:$8 sps:$4 sm:$0xff]   ;;  %v6226_v41 = vld [vmem:[%s7563_s6 + $0xa4] ss:$8 sps:$4 sm:$0xff]  }
 0x11f   : > { %v6222_v38 = vld [vmem:[%s7563_s6 + $0x494] ss:$8 sps:$4 sm:$0xff]   ;;  %v6225_v40 = vld [vmem:[%s7563_s6 + $0x490] ss:$8 sps:$4 sm:$0xff]   ;;  %v6228_v42 = vld [vmem:[%s7563_s6 + $0x4a4] ss:$8 sps:$4 sm:$0xff]  }
 0x120   : > { %3949 = vmatpush1.bf16.msra.mxu1 %v6188_v15  ;;  %v6230_v43 = vld [vmem:[%s7563_s6 + $0xa0] ss:$8 sps:$4 sm:$0xff]   ;;  %v6232_v45 = vld [vmem:[%s7563_s6 + $0xb4] ss:$8 sps:$4 sm:$0xff]   ;;  %v6236_v47 = vld [vmem:[%s7563_s6 + $0xb0] ss:$8 sps:$4 sm:$0xff]  }
 0x121   : > { %4401 = vmatpush1.bf16.msra.mxu0 %v6189_v16  ;;  %3950 = vmatprep.subr.bf16.mxu1 %v6190_v17  ;;  %v6231_v44 = vld [vmem:[%s7563_s6 + $0x4a0] ss:$8 sps:$4 sm:$0xff]   ;;  %v6234_v46 = vld [vmem:[%s7563_s6 + $0x4b4] ss:$8 sps:$4 sm:$0xff]   ;;  %v6237_v48 = vld [vmem:[%s7563_s6 + $0x4b0] ss:$8 sps:$4 sm:$0xff]  }
 0x122   : > { %4402 = vmatprep.subr.bf16.mxu0 %v6192_v18  ;;  %v1638_v49 = vld [vmem:[%s7561_s4] sm:$0xff]  ;;  %v6244_v59 = vld [vmem:[%s7563_s6 + $0xd4] ss:$8 sps:$4 sm:$0xff]   ;;  %v6248_v61 = vld [vmem:[%s7563_s6 + $0xd0] ss:$8 sps:$4 sm:$0xff]   ;;  %p5812_p5 = scmp.ne.s32.totalorder %s6620_s18, 1 }
 0x123   : > { %v1646_v50 = vld [vmem:[%s7561_s4 + $0x40] sm:$0xff]  ;;  %v6246_v60 = vld [vmem:[%s7563_s6 + $0x4d4] ss:$8 sps:$4 sm:$0xff]   ;;  %v6249_v62 = vld [vmem:[%s7563_s6 + $0x4d0] ss:$8 sps:$4 sm:$0xff]  }
 0x124   : > { %3951 = vmatpush1.bf16.msra.mxu1 %v6194_v19  ;;  %v1642_v51 = vld [vmem:[%s7561_s4 + $0x20] sm:$0xff]  ;;  %v5429_v54 = vcombine.high %v1638_v49, %v1646_v50  ;;  %v6256_v3 = vld [vmem:[%s7563_s6 + $0xf4] ss:$8 sps:$4 sm:$0xff]   ;;  %v6260_v5 = vld [vmem:[%s7563_s6 + $0xf0] ss:$8 sps:$4 sm:$0xff]   ;;  %v5428_v12 = vcombine.low %v1638_v49, %v1646_v50 }
 0x125   : > { %4403 = vmatpush1.bf16.msra.mxu0 %v6195_v20  ;;  %3952 = vmatprep.subr.bf16.mxu1 %v6196_v21  ;;  %v1650_v52 = vld [vmem:[%s7561_s4 + $0x60] sm:$0xff]  ;;  %v6258_v4 = vld [vmem:[%s7563_s6 + $0x4f4] ss:$8 sps:$4 sm:$0xff]   ;;  %v6261_v6 = vld [vmem:[%s7563_s6 + $0x4f0] ss:$8 sps:$4 sm:$0xff]  }
 0x126   : > { %4404 = vmatprep.subr.bf16.mxu0 %v6198_v22  ;;  %v6238_v53 = vld [vmem:[%s7563_s6 + $0xc4] ss:$8 sps:$4 sm:$0xff]   ;;  %v5437_v56 = vcombine.high %v1642_v51, %v1650_v52  ;;  %3974 = vmatprep.mubr.bf16.mxu1 %v5429_v54  ;;  %v6242_v57 = vld [vmem:[%s7563_s6 + $0xc0] ss:$8 sps:$4 sm:$0xff]   ;;  %v5436_v13 = vcombine.low %v1642_v51, %v1650_v52  ;;  %v6270_v17 = vld [vmem:[%s7563_s6 + $0x114] ss:$8 sps:$4 sm:$0xff]  }
 0x127   : > { %v6240_v55 = vld [vmem:[%s7563_s6 + $0x4c4] ss:$8 sps:$4 sm:$0xff]   ;;  %v6243_v58 = vld [vmem:[%s7563_s6 + $0x4c0] ss:$8 sps:$4 sm:$0xff]   ;;  %v6273_v18 = vld [vmem:[%s7563_s6 + $0x514] ss:$8 sps:$4 sm:$0xff]  }
 0x128   : > { %3953 = vmatpush1.bf16.msra.mxu1 %v6200_v23  ;;  %4426 = vmatprep.mubr.bf16.mxu0 %v5437_v56  ;;  %v6250_v63 = vld [vmem:[%s7563_s6 + $0xe4] ss:$8 sps:$4 sm:$0xff]   ;;  %v6254_v1 = vld [vmem:[%s7563_s6 + $0xe0] ss:$8 sps:$4 sm:$0xff]   ;;  %v6268_v21 = vld [vmem:[%s7563_s6 + $0x110] ss:$8 sps:$4 sm:$0xff]  }
 0x129   : > { %4405 = vmatpush1.bf16.msra.mxu0 %v6201_v24  ;;  %3954 = vmatprep.subr.bf16.mxu1 %v6202_v25  ;;  %v6252_v0 = vld [vmem:[%s7563_s6 + $0x4e4] ss:$8 sps:$4 sm:$0xff]   ;;  %v6255_v2 = vld [vmem:[%s7563_s6 + $0x4e0] ss:$8 sps:$4 sm:$0xff]   ;;  %v6271_v22 = vld [vmem:[%s7563_s6 + $0x510] ss:$8 sps:$4 sm:$0xff]  }
 0x12a   : > { %4406 = vmatprep.subr.bf16.mxu0 %v6204_v26  ;;  %v6264_v7 = vld [vmem:[%s7563_s6 + $0x104] ss:$8 sps:$4 sm:$0xff]   ;;  %v6262_v9 = vld [vmem:[%s7563_s6 + $0x100] ss:$8 sps:$4 sm:$0xff]   ;;  %v6294_v49 = vld [vmem:[%s7563_s6 + $0x154] ss:$8 sps:$4 sm:$0xff]  }
 0x12b   : > { %v6267_v8 = vld [vmem:[%s7563_s6 + $0x504] ss:$8 sps:$4 sm:$0xff]   ;;  %v6265_v10 = vld [vmem:[%s7563_s6 + $0x500] ss:$8 sps:$4 sm:$0xff]   ;;  %v6297_v50 = vld [vmem:[%s7563_s6 + $0x554] ss:$8 sps:$4 sm:$0xff]  }
 0x12c   : > { %3955 = vmatpush1.bf16.msra.mxu1 %v6206_v27  ;;  %v1654_v11 = vld [vmem:[%s7561_s4 + $0x80] sm:$0xff]  ;;  %v6295_v54 = vld [vmem:[%s7563_s6 + $0x550] ss:$8 sps:$4 sm:$0xff]  }
 0x12d   : > { %4407 = vmatpush1.bf16.msra.mxu0 %v6207_v28  ;;  %3956 = vmatprep.subr.bf16.mxu1 %v6208_v29  ;;  %v1662_v14 = vld [vmem:[%s7561_s4 + $0xc0] sm:$0xff] }
 0x12e   : > { %4408 = vmatprep.subr.bf16.mxu0 %v6210_v30  ;;  %v1658_v15 = vld [vmem:[%s7561_s4 + $0xa0] sm:$0xff]  ;;  %v5445_v19 = vcombine.high %v1654_v11, %v1662_v14  ;;  %v5444_v29 = vcombine.low %v1654_v11, %v1662_v14 }
 0x12f   : > { %v1666_v16 = vld [vmem:[%s7561_s4 + $0xe0] sm:$0xff] }
 0x130   : > { %3957 = vmatpush1.bf16.msra.mxu1 %v6212_v31  ;;  %v5453_v20 = vcombine.high %v1658_v15, %v1666_v16  ;;  %v6276_v23 = vld [vmem:[%s7563_s6 + $0x124] ss:$8 sps:$4 sm:$0xff]   ;;  %v6274_v25 = vld [vmem:[%s7563_s6 + $0x120] ss:$8 sps:$4 sm:$0xff]   ;;  %v5452_v30 = vcombine.low %v1658_v15, %v1666_v16 }
 0x131   : > { %4409 = vmatpush1.bf16.msra.mxu0 %v6213_v32  ;;  %3958 = vmatprep.subr.bf16.mxu1 %v6214_v33  ;;  %v6279_v24 = vld [vmem:[%s7563_s6 + $0x524] ss:$8 sps:$4 sm:$0xff]   ;;  %v6277_v26 = vld [vmem:[%s7563_s6 + $0x520] ss:$8 sps:$4 sm:$0xff]   ;;  %v6282_v33 = vld [vmem:[%s7563_s6 + $0x134] ss:$8 sps:$4 sm:$0xff]  }
 0x132   : > { %4410 = vmatprep.subr.bf16.mxu0 %v6216_v34  ;;  %v1670_v27 = vld [vmem:[%s7561_s4 + $0x100] sm:$0xff]  ;;  %v6285_v34 = vld [vmem:[%s7563_s6 + $0x534] ss:$8 sps:$4 sm:$0xff]  }
 0x133   : > { %v1678_v28 = vld [vmem:[%s7561_s4 + $0x140] sm:$0xff] }
 0x134   : > { %3959 = vmatpush1.bf16.msra.mxu1 %v6218_v35  ;;  %v1674_v31 = vld [vmem:[%s7561_s4 + $0x120] sm:$0xff]  ;;  %v5461_v35 = vcombine.high %v1670_v27, %v1678_v28 }
 0x135   : > { %4411 = vmatpush1.bf16.msra.mxu0 %v6219_v36  ;;  %3960 = vmatprep.subr.bf16.mxu1 %v6220_v37  ;;  %v1682_v32 = vld [vmem:[%s7561_s4 + $0x160] sm:$0xff]  ;;  %v6280_v37 = vld [vmem:[%s7563_s6 + $0x130] ss:$8 sps:$4 sm:$0xff]  }
 0x136   : > { %4412 = vmatprep.subr.bf16.mxu0 %v6222_v38  ;;  %v5469_v36 = vcombine.high %v1674_v31, %v1682_v32  ;;  %v6283_v38 = vld [vmem:[%s7563_s6 + $0x530] ss:$8 sps:$4 sm:$0xff]   ;;  %v6303_v56 = vld [vmem:[%s7563_s6 + $0x564] ss:$8 sps:$4 sm:$0xff]   ;;  %v6310_v15 = vld [vmem:[%s7563_s6 + $0x180] ss:$8 sps:$4 sm:$0xff]  }
 0x137   : > { %v1730_v14 = vld [vmem:[%s7561_s4 + $0x2e0] sm:$0xff] }
 0x138   : > { %3961 = vmatpush1.bf16.msra.mxu1 %v6224_v39  ;;  %v6288_v39 = vld [vmem:[%s7563_s6 + $0x144] ss:$8 sps:$4 sm:$0xff]   ;;  %v6313_v16 = vld [vmem:[%s7563_s6 + $0x580] ss:$8 sps:$4 sm:$0xff]  }
 0x139   : > { %4413 = vmatpush1.bf16.msra.mxu0 %v6225_v40  ;;  %3962 = vmatprep.subr.bf16.mxu1 %v6226_v41  ;;  %v6291_v40 = vld [vmem:[%s7563_s6 + $0x544] ss:$8 sps:$4 sm:$0xff]   ;;  %v6286_v41 = vld [vmem:[%s7563_s6 + $0x140] ss:$8 sps:$4 sm:$0xff]  }
 0x13a   : > { %4414 = vmatprep.subr.bf16.mxu0 %v6228_v42  ;;  %v6289_v42 = vld [vmem:[%s7563_s6 + $0x540] ss:$8 sps:$4 sm:$0xff]  }
 0x13c   : > { %3963 = vmatpush1.bf16.msra.mxu1 %v6230_v43  ;;  %v1686_v43 = vld [vmem:[%s7561_s4 + $0x180] sm:$0xff] }
 0x13d   : > { %4415 = vmatpush1.bf16.msra.mxu0 %v6231_v44  ;;  %3964 = vmatprep.subr.bf16.mxu1 %v6232_v45  ;;  %v1694_v44 = vld [vmem:[%s7561_s4 + $0x1c0] sm:$0xff]  ;;  %v5460_v45 = vcombine.low %v1670_v27, %v1678_v28 }
 0x13e   : > { %4416 = vmatprep.subr.bf16.mxu0 %v6234_v46  ;;  %v5468_v46 = vcombine.low %v1674_v31, %v1682_v32  ;;  %v5477_v51 = vcombine.high %v1686_v43, %v1694_v44  ;;  %v1734_v27 = vld [vmem:[%s7561_s4 + $0x300] sm:$0xff] }
 0x13f   : > { %v1738_v31 = vld [vmem:[%s7561_s4 + $0x320] sm:$0xff] }
 0x140   : > { %3965 = vmatpush1.bf16.msra.mxu1 %v6236_v47  ;;  %v1690_v47 = vld [vmem:[%s7561_s4 + $0x1a0] sm:$0xff] }
 0x141   : > { %4417 = vmatpush1.bf16.msra.mxu0 %v6237_v48  ;;  %3966 = vmatprep.subr.bf16.mxu1 %v6238_v53  ;;  %v1698_v48 = vld [vmem:[%s7561_s4 + $0x1e0] sm:$0xff]  ;;  %v6292_v53 = vld [vmem:[%s7563_s6 + $0x150] ss:$8 sps:$4 sm:$0xff]  }
 0x142   : > { %4418 = vmatprep.subr.bf16.mxu0 %v6240_v55  ;;  %v5485_v52 = vcombine.high %v1690_v47, %v1698_v48  ;;  %v6300_v55 = vld [vmem:[%s7563_s6 + $0x164] ss:$8 sps:$4 sm:$0xff]  }
 0x143   : > { %v1746_v32 = vld [vmem:[%s7561_s4 + $0x360] sm:$0xff] }
 0x144   : > { %3967 = vmatpush1.bf16.msra.mxu1 %v6242_v57  ;;  %v6298_v57 = vld [vmem:[%s7563_s6 + $0x160] ss:$8 sps:$4 sm:$0xff]  }
 0x145   : > { %4419 = vmatpush1.bf16.msra.mxu0 %v6243_v58  ;;  %3968 = vmatprep.subr.bf16.mxu1 %v6244_v59  ;;  %v1702_v58 = vld [vmem:[%s7561_s4 + $0x200] sm:$0xff] }
 0x146   : > { %4420 = vmatprep.subr.bf16.mxu0 %v6246_v60  ;;  %v1710_v59 = vld [vmem:[%s7561_s4 + $0x240] sm:$0xff]  ;;  %v5476_v60 = vcombine.low %v1686_v43, %v1694_v44 }
 0x147   : > { %v5492_v11 = vcombine.low %v1702_v58, %v1710_v59  ;;  %v1750_v43 = vld [vmem:[%s7561_s4 + $0x380] sm:$0xff] }
 0x148   : > { %3969 = vmatpush1.bf16.msra.mxu1 %v6248_v61  ;;  %v5484_v61 = vcombine.low %v1690_v47, %v1698_v48  ;;  %v1758_v44 = vld [vmem:[%s7561_s4 + $0x3c0] sm:$0xff] }
 0x149   : > { %4421 = vmatpush1.bf16.msra.mxu0 %v6249_v62  ;;  %3970 = vmatprep.subr.bf16.mxu1 %v6250_v63  ;;  %v1706_v62 = vld [vmem:[%s7561_s4 + $0x220] sm:$0xff] }
 0x14a   : > { %4422 = vmatprep.subr.bf16.mxu0 %v6252_v0  ;;  %v1714_v63 = vld [vmem:[%s7561_s4 + $0x260] sm:$0xff] }
 0x14b   : > { %v6301_v0 = vld [vmem:[%s7563_s6 + $0x560] ss:$8 sps:$4 sm:$0xff]  }
 0x14c   : > { %3971 = vmatpush1.bf16.msra.mxu1 %v6254_v1  ;;  %v6306_v1 = vld [vmem:[%s7563_s6 + $0x174] ss:$8 sps:$4 sm:$0xff]   ;;  %v1754_v47 = vld [vmem:[%s7561_s4 + $0x3a0] sm:$0xff] }
 0x14d   : > { %4423 = vmatpush1.bf16.msra.mxu0 %v6255_v2  ;;  %3972 = vmatprep.subr.bf16.mxu1 %v6256_v3  ;;  %v6309_v2 = vld [vmem:[%s7563_s6 + $0x574] ss:$8 sps:$4 sm:$0xff]   ;;  %v5493_v3 = vcombine.high %v1702_v58, %v1710_v59  ;;  %v1762_v48 = vld [vmem:[%s7561_s4 + $0x3e0] sm:$0xff]  ;;  %v1639_v59 = vld [vmem:[%s7561_s4 + $0x8] sm:$0xff] }
 0x14e   : > { %4424 = vmatprep.subr.bf16.mxu0 %v6258_v4  ;;  %v5501_v4 = vcombine.high %v1706_v62, %v1714_v63  ;;  %v6349_v58 = vld [vmem:[%s7563_s6 + $0x5e0] ss:$8 sps:$4 sm:$0xff]  }
 0x150   : > { %3973 = vmatpush1.bf16.msra.mxu1 %v6260_v5  ;;  %v6304_v5 = vld [vmem:[%s7563_s6 + $0x170] ss:$8 sps:$4 sm:$0xff]  }
 0x151   : > { %4425 = vmatpush1.bf16.msra.mxu0 %v6261_v6  ;;  %4055 = vmatprep.subr.bf16.mxu1 %v6264_v7  ;;  %v6307_v6 = vld [vmem:[%s7563_s6 + $0x570] ss:$8 sps:$4 sm:$0xff]   ;;  %v6312_v7 = vld [vmem:[%s7563_s6 + $0x184] ss:$8 sps:$4 sm:$0xff]  }
 0x152   : > { %4507 = vmatprep.subr.bf16.mxu0 %v6267_v8  ;;  %v6315_v8 = vld [vmem:[%s7563_s6 + $0x584] ss:$8 sps:$4 sm:$0xff]  }
 0x153   : > { %3975 = vmatmul.mubr.bf16.vlgmr.msra.gmra.mrb[0].mxu1 %v5428_v12  ;;  %v5500_v12 = vcombine.low %v1706_v62, %v1714_v63  ;;  %v5548_v62 = vcombine.low %v1754_v47, %v1762_v48  ;;  %v1643_v63 = vld [vmem:[%s7561_s4 + $0x28] sm:$0xff] }
 0x154   : > { %4427 = vmatmul.mubr.bf16.vlgmr.msra.gmra.mrb[0].mxu0 %v5436_v13  ;;  %4056 = vmatpush1.bf16.msra.mxu1 %v6262_v9  ;;  %v1718_v9 = vld [vmem:[%s7561_s4 + $0x280] sm:$0xff] }
 0x155   : > { %4508 = vmatpush1.bf16.msra.mxu0 %v6265_v10  ;;  %4057 = vmatprep.subr.bf16.mxu1 %v6270_v17  ;;  %v1726_v10 = vld [vmem:[%s7561_s4 + $0x2c0] sm:$0xff]  ;;  %v6318_v17 = vld [vmem:[%s7563_s6 + $0x194] ss:$8 sps:$4 sm:$0xff]  }
 0x156   : > { %4509 = vmatprep.subr.bf16.mxu0 %v6273_v18  ;;  %3984 = vmatprep.mubr.bf16.mxu1 %v5445_v19  ;;  %v1722_v13 = vld [vmem:[%s7561_s4 + $0x2a0] sm:$0xff]  ;;  %v6321_v18 = vld [vmem:[%s7563_s6 + $0x594] ss:$8 sps:$4 sm:$0xff]   ;;  %v5509_v19 = vcombine.high %v1718_v9, %v1726_v10  ;;  %v5508_v28 = vcombine.low %v1718_v9, %v1726_v10  ;;  %v1655_v10 = vld [vmem:[%s7561_s4 + $0x88] sm:$0xff] }
 0x157   : > { %4436 = vmatprep.mubr.bf16.mxu0 %v5453_v20  ;;  %v5517_v20 = vcombine.high %v1722_v13, %v1730_v14  ;;  %v6358_v9 = vld [vmem:[%s7563_s6 + $0x200] ss:$8 sps:$4 sm:$0xff]  }
 0x158   : > { %4058 = vmatpush1.bf16.msra.mxu1 %v6268_v21  ;;  %v6316_v21 = vld [vmem:[%s7563_s6 + $0x190] ss:$8 sps:$4 sm:$0xff]  }
 0x159   : > { %4510 = vmatpush1.bf16.msra.mxu0 %v6271_v22  ;;  %4059 = vmatprep.subr.bf16.mxu1 %v6276_v23  ;;  %v6319_v22 = vld [vmem:[%s7563_s6 + $0x590] ss:$8 sps:$4 sm:$0xff]   ;;  %v6324_v23 = vld [vmem:[%s7563_s6 + $0x1a4] ss:$8 sps:$4 sm:$0xff]  }
 0x15a   : > { %4511 = vmatprep.subr.bf16.mxu0 %v6279_v24  ;;  %v6327_v24 = vld [vmem:[%s7563_s6 + $0x5a4] ss:$8 sps:$4 sm:$0xff]  }
 0x15b   : > { %3985 = vmatmul.mubr.bf16.gmra.mrb[4].mxu1 %v5444_v29  ;;  %v5516_v29 = vcombine.low %v1722_v13, %v1730_v14  ;;  %v1659_v14 = vld [vmem:[%s7561_s4 + $0xa8] sm:$0xff] }
 0x15c   : > { %4437 = vmatmul.mubr.bf16.gmra.mrb[4].mxu0 %v5452_v30  ;;  %4060 = vmatpush1.bf16.msra.mxu1 %v6274_v25  ;;  %v6322_v25 = vld [vmem:[%s7563_s6 + $0x1a0] ss:$8 sps:$4 sm:$0xff]  }
 0x15d   : > { %4512 = vmatpush1.bf16.msra.mxu0 %v6277_v26  ;;  %4061 = vmatprep.subr.bf16.mxu1 %v6282_v33  ;;  %v6325_v26 = vld [vmem:[%s7563_s6 + $0x5a0] ss:$8 sps:$4 sm:$0xff]   ;;  %v6330_v33 = vld [vmem:[%s7563_s6 + $0x1b4] ss:$8 sps:$4 sm:$0xff]  }
 0x15e   : > { %4513 = vmatprep.subr.bf16.mxu0 %v6285_v34  ;;  %3994 = vmatprep.mubr.bf16.mxu1 %v5461_v35  ;;  %v1742_v30 = vld [vmem:[%s7561_s4 + $0x340] sm:$0xff]  ;;  %v6333_v34 = vld [vmem:[%s7563_s6 + $0x5b4] ss:$8 sps:$4 sm:$0xff]  }
 0x15f   : > { %4446 = vmatprep.mubr.bf16.mxu0 %v5469_v36  ;;  %v5525_v35 = vcombine.high %v1734_v27, %v1742_v30  ;;  %v5533_v36 = vcombine.high %v1738_v31, %v1746_v32 }
 0x160   : > { %4062 = vmatpush1.bf16.msra.mxu1 %v6280_v37  ;;  %v6328_v37 = vld [vmem:[%s7563_s6 + $0x1b0] ss:$8 sps:$4 sm:$0xff]  }
 0x161   : > { %4514 = vmatpush1.bf16.msra.mxu0 %v6283_v38  ;;  %4063 = vmatprep.subr.bf16.mxu1 %v6288_v39  ;;  %v6331_v38 = vld [vmem:[%s7563_s6 + $0x5b0] ss:$8 sps:$4 sm:$0xff]   ;;  %v6336_v39 = vld [vmem:[%s7563_s6 + $0x1c4] ss:$8 sps:$4 sm:$0xff]  }
 0x162   : > { %4515 = vmatprep.subr.bf16.mxu0 %v6291_v40  ;;  %v6339_v40 = vld [vmem:[%s7563_s6 + $0x5c4] ss:$8 sps:$4 sm:$0xff]  }
 0x163   : > { %3995 = vmatmul.mubr.bf16.gmra.mrb[8].mxu1 %v5460_v45  ;;  %v5524_v45 = vcombine.low %v1734_v27, %v1742_v30  ;;  %v1683_v30 = vld [vmem:[%s7561_s4 + $0x168] sm:$0xff] }
 0x164   : > { %4447 = vmatmul.mubr.bf16.gmra.mrb[8].mxu0 %v5468_v46  ;;  %4064 = vmatpush1.bf16.msra.mxu1 %v6286_v41  ;;  %v6334_v41 = vld [vmem:[%s7563_s6 + $0x1c0] ss:$8 sps:$4 sm:$0xff]   ;;  %v5532_v46 = vcombine.low %v1738_v31, %v1746_v32 }
 0x165   : > { %4516 = vmatpush1.bf16.msra.mxu0 %v6289_v42  ;;  %4065 = vmatprep.subr.bf16.mxu1 %v6294_v49  ;;  %v6337_v42 = vld [vmem:[%s7563_s6 + $0x5c0] ss:$8 sps:$4 sm:$0xff]   ;;  %v6342_v49 = vld [vmem:[%s7563_s6 + $0x1d4] ss:$8 sps:$4 sm:$0xff]  }
 0x166   : > { %4517 = vmatprep.subr.bf16.mxu0 %v6297_v50  ;;  %4004 = vmatprep.mubr.bf16.mxu1 %v5477_v51  ;;  %v6345_v50 = vld [vmem:[%s7563_s6 + $0x5d4] ss:$8 sps:$4 sm:$0xff]   ;;  %v5541_v51 = vcombine.high %v1750_v43, %v1758_v44  ;;  %v6370_v31 = vld [vmem:[%s7563_s6 + $0x220] ss:$8 sps:$4 sm:$0xff]  }
 0x167   : > { %4456 = vmatprep.mubr.bf16.mxu0 %v5485_v52  ;;  %v5549_v52 = vcombine.high %v1754_v47, %v1762_v48  ;;  %v6373_v32 = vld [vmem:[%s7563_s6 + $0x620] ss:$8 sps:$4 sm:$0xff]  }
 0x168   : > { %4066 = vmatpush1.bf16.msra.mxu1 %v6292_v53  ;;  %v6340_v53 = vld [vmem:[%s7563_s6 + $0x1d0] ss:$8 sps:$4 sm:$0xff]   ;;  %v1691_v47 = vld [vmem:[%s7561_s4 + $0x1a8] sm:$0xff] }
 0x169   : > { %4518 = vmatpush1.bf16.msra.mxu0 %v6295_v54  ;;  %4067 = vmatprep.subr.bf16.mxu1 %v6300_v55  ;;  %v6343_v54 = vld [vmem:[%s7563_s6 + $0x5d0] ss:$8 sps:$4 sm:$0xff]   ;;  %v6348_v55 = vld [vmem:[%s7563_s6 + $0x1e4] ss:$8 sps:$4 sm:$0xff]  }
 0x16a   : > { %4519 = vmatprep.subr.bf16.mxu0 %v6303_v56  ;;  %v6351_v56 = vld [vmem:[%s7563_s6 + $0x5e4] ss:$8 sps:$4 sm:$0xff]  }
 0x16b   : > { %4005 = vmatmul.mubr.bf16.gmra.mrb[12].mxu1 %v5476_v60  ;;  %v1647_v60 = vld [vmem:[%s7561_s4 + $0x48] sm:$0xff] }
 0x16c   : > { %4457 = vmatmul.mubr.bf16.gmra.mrb[12].mxu0 %v5484_v61  ;;  %4068 = vmatpush1.bf16.msra.mxu1 %v6298_v57  ;;  %v6346_v57 = vld [vmem:[%s7563_s6 + $0x1e0] ss:$8 sps:$4 sm:$0xff]   ;;  %v5540_v61 = vcombine.low %v1750_v43, %v1758_v44 }
 0x16d   : > { %4520 = vmatpush1.bf16.msra.mxu0 %v6301_v0  ;;  %4069 = vmatprep.subr.bf16.mxu1 %v6306_v1  ;;  %v1651_v0 = vld [vmem:[%s7561_s4 + $0x68] sm:$0xff]  ;;  %v6354_v1 = vld [vmem:[%s7563_s6 + $0x1f4] ss:$8 sps:$4 sm:$0xff]  }
 0x16e   : > { %4521 = vmatprep.subr.bf16.mxu0 %v6309_v2  ;;  %4014 = vmatprep.mubr.bf16.mxu1 %v5493_v3  ;;  %v6357_v2 = vld [vmem:[%s7563_s6 + $0x5f4] ss:$8 sps:$4 sm:$0xff]   ;;  %v5431_v3 = vcombine.high %v1639_v59, %v1647_v60  ;;  %v5438_v13 = vcombine.low %v1643_v63, %v1651_v0  ;;  %v1687_v43 = vld [vmem:[%s7561_s4 + $0x188] sm:$0xff] }
 0x16f   : > { %4466 = vmatprep.mubr.bf16.mxu0 %v5501_v4  ;;  %v5439_v4 = vcombine.high %v1643_v63, %v1651_v0  ;;  %v1699_v48 = vld [vmem:[%s7561_s4 + $0x1e8] sm:$0xff] }
 0x170   : > { %4070 = vmatpush1.bf16.msra.mxu1 %v6304_v5  ;;  %v6352_v5 = vld [vmem:[%s7563_s6 + $0x1f0] ss:$8 sps:$4 sm:$0xff]   ;;  %v1707_v63 = vld [vmem:[%s7561_s4 + $0x228] sm:$0xff] }
 0x171   : > { %4522 = vmatpush1.bf16.msra.mxu0 %v6307_v6  ;;  %4071 = vmatprep.subr.bf16.mxu1 %v6312_v7  ;;  %v6355_v6 = vld [vmem:[%s7563_s6 + $0x5f0] ss:$8 sps:$4 sm:$0xff]   ;;  %v6360_v7 = vld [vmem:[%s7563_s6 + $0x204] ss:$8 sps:$4 sm:$0xff]  }
 0x172   : > { %4523 = vmatprep.subr.bf16.mxu0 %v6315_v8  ;;  %v6363_v8 = vld [vmem:[%s7563_s6 + $0x604] ss:$8 sps:$4 sm:$0xff]  }
 0x173   : > { %4015 = vmatmul.mubr.bf16.gmra.mrb[16].mxu1 %v5492_v11  ;;  %v1663_v11 = vld [vmem:[%s7561_s4 + $0xc8] sm:$0xff] }
 0x174   : > { %4467 = vmatmul.mubr.bf16.gmra.mrb[16].mxu0 %v5500_v12  ;;  %4072 = vmatpush1.bf16.msra.mxu1 %v6310_v15  ;;  %v5430_v12 = vcombine.low %v1639_v59, %v1647_v60  ;;  %v1667_v15 = vld [vmem:[%s7561_s4 + $0xe8] sm:$0xff]  ;;  %v5446_v27 = vcombine.low %v1655_v10, %v1663_v11 }
 0x175   : > { %4524 = vmatpush1.bf16.msra.mxu0 %v6313_v16  ;;  %4073 = vmatprep.subr.bf16.mxu1 %v6318_v17  ;;  %v6361_v16 = vld [vmem:[%s7563_s6 + $0x600] ss:$8 sps:$4 sm:$0xff]   ;;  %v6366_v17 = vld [vmem:[%s7563_s6 + $0x214] ss:$8 sps:$4 sm:$0xff]  }
 0x176   : > { %4525 = vmatprep.subr.bf16.mxu0 %v6321_v18  ;;  %4024 = vmatprep.mubr.bf16.mxu1 %v5509_v19  ;;  %v6369_v18 = vld [vmem:[%s7563_s6 + $0x614] ss:$8 sps:$4 sm:$0xff]   ;;  %v5447_v19 = vcombine.high %v1655_v10, %v1663_v11  ;;  %v1703_v59 = vld [vmem:[%s7561_s4 + $0x208] sm:$0xff] }
 0x177   : > { %4476 = vmatprep.mubr.bf16.mxu0 %v5517_v20  ;;  %v5455_v20 = vcombine.high %v1659_v14, %v1667_v15  ;;  %v1711_v60 = vld [vmem:[%s7561_s4 + $0x248] sm:$0xff] }
 0x178   : > { %4074 = vmatpush1.bf16.msra.mxu1 %v6316_v21  ;;  %v6364_v21 = vld [vmem:[%s7563_s6 + $0x210] ss:$8 sps:$4 sm:$0xff]   ;;  %v1715_v0 = vld [vmem:[%s7561_s4 + $0x268] sm:$0xff] }
 0x179   : > { %4526 = vmatpush1.bf16.msra.mxu0 %v6319_v22  ;;  %4075 = vmatprep.subr.bf16.mxu1 %v6324_v23  ;;  %v6367_v22 = vld [vmem:[%s7563_s6 + $0x610] ss:$8 sps:$4 sm:$0xff]   ;;  %v6372_v23 = vld [vmem:[%s7563_s6 + $0x224] ss:$8 sps:$4 sm:$0xff]   ;;  %v6409_v10 = vld [vmem:[%s7563_s6 + $0x680] ss:$8 sps:$4 sm:$0xff]  }
 0x17a   : > { %4527 = vmatprep.subr.bf16.mxu0 %v6327_v24  ;;  %v6375_v24 = vld [vmem:[%s7563_s6 + $0x624] ss:$8 sps:$4 sm:$0xff]  }
 0x17b   : > { %4025 = vmatmul.mubr.bf16.gmra.mrb[20].mxu1 %v5508_v28  ;;  %v5454_v28 = vcombine.low %v1659_v14, %v1667_v15  ;;  %v1719_v11 = vld [vmem:[%s7561_s4 + $0x288] sm:$0xff]  ;;  %v5502_v14 = vcombine.low %v1707_v63, %v1715_v0 }
 0x17c   : > { %4477 = vmatmul.mubr.bf16.gmra.mrb[20].mxu0 %v5516_v29  ;;  %4076 = vmatpush1.bf16.msra.mxu1 %v6322_v25  ;;  %v1671_v25 = vld [vmem:[%s7561_s4 + $0x108] sm:$0xff] }
 0x17d   : > { %4528 = vmatpush1.bf16.msra.mxu0 %v6325_v26  ;;  %4077 = vmatprep.subr.bf16.mxu1 %v6330_v33  ;;  %v1679_v26 = vld [vmem:[%s7561_s4 + $0x148] sm:$0xff]  ;;  %v6378_v33 = vld [vmem:[%s7563_s6 + $0x234] ss:$8 sps:$4 sm:$0xff]  }
 0x17e   : > { %4529 = vmatprep.subr.bf16.mxu0 %v6333_v34  ;;  %4034 = vmatprep.mubr.bf16.mxu1 %v5525_v35  ;;  %v1675_v29 = vld [vmem:[%s7561_s4 + $0x128] sm:$0xff]  ;;  %v6381_v34 = vld [vmem:[%s7563_s6 + $0x634] ss:$8 sps:$4 sm:$0xff]   ;;  %v5463_v35 = vcombine.high %v1671_v25, %v1679_v26  ;;  %v5462_v44 = vcombine.low %v1671_v25, %v1679_v26 }
 0x17f   : > { %4486 = vmatprep.mubr.bf16.mxu0 %v5533_v36  ;;  %v5471_v36 = vcombine.high %v1675_v29, %v1683_v30  ;;  %v1723_v15 = vld [vmem:[%s7561_s4 + $0x2a8] sm:$0xff] }
 0x180   : > { %4078 = vmatpush1.bf16.msra.mxu1 %v6328_v37  ;;  %v6376_v37 = vld [vmem:[%s7563_s6 + $0x230] ss:$8 sps:$4 sm:$0xff]   ;;  %v6418_v25 = vld [vmem:[%s7563_s6 + $0x2a0] ss:$8 sps:$4 sm:$0xff]  }
 0x181   : > { %4530 = vmatpush1.bf16.msra.mxu0 %v6331_v38  ;;  %4079 = vmatprep.subr.bf16.mxu1 %v6336_v39  ;;  %v6379_v38 = vld [vmem:[%s7563_s6 + $0x630] ss:$8 sps:$4 sm:$0xff]   ;;  %v6384_v39 = vld [vmem:[%s7563_s6 + $0x244] ss:$8 sps:$4 sm:$0xff]  }
 0x182   : > { %4531 = vmatprep.subr.bf16.mxu0 %v6339_v40  ;;  %v6387_v40 = vld [vmem:[%s7563_s6 + $0x644] ss:$8 sps:$4 sm:$0xff]  }
 0x183   : > { %4035 = vmatmul.mubr.bf16.gmra.mrb[24].mxu1 %v5524_v45  ;;  %v5470_v45 = vcombine.low %v1675_v29, %v1683_v30  ;;  %v1735_v26 = vld [vmem:[%s7561_s4 + $0x308] sm:$0xff] }
 0x184   : > { %4487 = vmatmul.mubr.bf16.gmra.mrb[24].mxu0 %v5532_v46  ;;  %4080 = vmatpush1.bf16.msra.mxu1 %v6334_v41  ;;  %v6382_v41 = vld [vmem:[%s7563_s6 + $0x240] ss:$8 sps:$4 sm:$0xff]  }
 0x185   : > { %4532 = vmatpush1.bf16.msra.mxu0 %v6337_v42  ;;  %4081 = vmatprep.subr.bf16.mxu1 %v6342_v49  ;;  %v6385_v42 = vld [vmem:[%s7563_s6 + $0x640] ss:$8 sps:$4 sm:$0xff]   ;;  %v6390_v49 = vld [vmem:[%s7563_s6 + $0x254] ss:$8 sps:$4 sm:$0xff]  }
 0x186   : > { %4533 = vmatprep.subr.bf16.mxu0 %v6345_v50  ;;  %4044 = vmatprep.mubr.bf16.mxu1 %v5541_v51  ;;  %v1695_v46 = vld [vmem:[%s7561_s4 + $0x1c8] sm:$0xff]  ;;  %v6393_v50 = vld [vmem:[%s7563_s6 + $0x654] ss:$8 sps:$4 sm:$0xff]  }
 0x187   : > { %4496 = vmatprep.mubr.bf16.mxu0 %v5549_v52  ;;  %v5479_v51 = vcombine.high %v1687_v43, %v1695_v46  ;;  %v5487_v52 = vcombine.high %v1691_v47, %v1699_v48  ;;  %v1739_v30 = vld [vmem:[%s7561_s4 + $0x328] sm:$0xff] }
 0x188   : > { %4082 = vmatpush1.bf16.msra.mxu1 %v6340_v53  ;;  %v6388_v53 = vld [vmem:[%s7563_s6 + $0x250] ss:$8 sps:$4 sm:$0xff]  }
 0x189   : > { %4534 = vmatpush1.bf16.msra.mxu0 %v6343_v54  ;;  %4083 = vmatprep.subr.bf16.mxu1 %v6348_v55  ;;  %v6391_v54 = vld [vmem:[%s7563_s6 + $0x650] ss:$8 sps:$4 sm:$0xff]   ;;  %v6396_v55 = vld [vmem:[%s7563_s6 + $0x264] ss:$8 sps:$4 sm:$0xff]  }
 0x18a   : > { %4535 = vmatprep.subr.bf16.mxu0 %v6351_v56  ;;  %v6399_v56 = vld [vmem:[%s7563_s6 + $0x664] ss:$8 sps:$4 sm:$0xff]  }
 0x18b   : > { %4045 = vmatmul.mubr.bf16.gmra.mrb[28].mxu1 %v5540_v61  ;;  %v5478_v61 = vcombine.low %v1687_v43, %v1695_v46  ;;  %v1763_v46 = vld [vmem:[%s7561_s4 + $0x3e8] sm:$0xff] }
 0x18c   : > { %4497 = vmatmul.mubr.bf16.gmra.mrb[28].mxu0 %v5548_v62  ;;  %4084 = vmatpush1.bf16.msra.mxu1 %v6346_v57  ;;  %v6394_v57 = vld [vmem:[%s7563_s6 + $0x260] ss:$8 sps:$4 sm:$0xff]   ;;  %v5486_v62 = vcombine.low %v1691_v47, %v1699_v48 }
 0x18d   : > { %4536 = vmatpush1.bf16.msra.mxu0 %v6349_v58  ;;  %4085 = vmatprep.subr.bf16.mxu1 %v6354_v1  ;;  %v6397_v58 = vld [vmem:[%s7563_s6 + $0x660] ss:$8 sps:$4 sm:$0xff]   ;;  %v6402_v1 = vld [vmem:[%s7563_s6 + $0x274] ss:$8 sps:$4 sm:$0xff]  }
 0x18e   : > { %4537 = vmatprep.subr.bf16.mxu0 %v6357_v2  ;;  %4087 = vmatprep.mubr.bf16.mxu1 %v5431_v3  ;;  %v6405_v2 = vld [vmem:[%s7563_s6 + $0x674] ss:$8 sps:$4 sm:$0xff]   ;;  %v5495_v3 = vcombine.high %v1703_v59, %v1711_v60  ;;  %v6430_v47 = vld [vmem:[%s7563_s6 + $0x2c0] ss:$8 sps:$4 sm:$0xff]  }
 0x18f   : > { %4539 = vmatprep.mubr.bf16.mxu0 %v5439_v4  ;;  %v5503_v4 = vcombine.high %v1707_v63, %v1715_v0  ;;  %v6433_v48 = vld [vmem:[%s7563_s6 + $0x6c0] ss:$8 sps:$4 sm:$0xff]   ;;  %v1644_v63 = vld [vmem:[%s7561_s4 + $0x30] sm:$0xff] }
 0x190   : > { %4086 = vmatpush1.bf16.msra.mxu1 %v6352_v5  ;;  %v6400_v5 = vld [vmem:[%s7563_s6 + $0x270] ss:$8 sps:$4 sm:$0xff]  }
 0x191   : > { %4538 = vmatpush1.bf16.msra.mxu0 %v6355_v6  ;;  %4168 = vmatprep.subr.bf16.mxu1 %v6360_v7  ;;  %v6403_v6 = vld [vmem:[%s7563_s6 + $0x670] ss:$8 sps:$4 sm:$0xff]   ;;  %v6408_v7 = vld [vmem:[%s7563_s6 + $0x284] ss:$8 sps:$4 sm:$0xff]  }
 0x192   : > { %4620 = vmatprep.subr.bf16.mxu0 %v6363_v8  ;;  %v6411_v8 = vld [vmem:[%s7563_s6 + $0x684] ss:$8 sps:$4 sm:$0xff]   ;;  %v1652_v0 = vld [vmem:[%s7561_s4 + $0x70] sm:$0xff] }
 0x193   : > { %4088 = vmatmul.mubr.bf16.vlgmr.msra.gmra.mrb[0].mxu1 %v5430_v12  ;;  %v1727_v12 = vld [vmem:[%s7561_s4 + $0x2c8] sm:$0xff] }
 0x194   : > { %4540 = vmatmul.mubr.bf16.vlgmr.msra.gmra.mrb[0].mxu0 %v5438_v13  ;;  %4169 = vmatpush1.bf16.msra.mxu1 %v6358_v9  ;;  %v6406_v9 = vld [vmem:[%s7563_s6 + $0x280] ss:$8 sps:$4 sm:$0xff]   ;;  %v5494_v13 = vcombine.low %v1703_v59, %v1711_v60  ;;  %v1640_v59 = vld [vmem:[%s7561_s4 + $0x10] sm:$0xff] }
 0x195   : > { %4621 = vmatpush1.bf16.msra.mxu0 %v6361_v16  ;;  %4170 = vmatprep.subr.bf16.mxu1 %v6366_v17  ;;  %v1731_v16 = vld [vmem:[%s7561_s4 + $0x2e8] sm:$0xff]  ;;  %v6414_v17 = vld [vmem:[%s7563_s6 + $0x294] ss:$8 sps:$4 sm:$0xff]  }
 0x196   : > { %4622 = vmatprep.subr.bf16.mxu0 %v6369_v18  ;;  %4097 = vmatprep.mubr.bf16.mxu1 %v5447_v19  ;;  %v6417_v18 = vld [vmem:[%s7563_s6 + $0x694] ss:$8 sps:$4 sm:$0xff]   ;;  %v5511_v19 = vcombine.high %v1719_v11, %v1727_v12  ;;  %v5518_v29 = vcombine.low %v1723_v15, %v1731_v16 }
 0x197   : > { %4549 = vmatprep.mubr.bf16.mxu0 %v5455_v20  ;;  %v5519_v20 = vcombine.high %v1723_v15, %v1731_v16  ;;  %v1660_v15 = vld [vmem:[%s7561_s4 + $0xb0] sm:$0xff] }
 0x198   : > { %4171 = vmatpush1.bf16.msra.mxu1 %v6364_v21  ;;  %v6412_v21 = vld [vmem:[%s7563_s6 + $0x290] ss:$8 sps:$4 sm:$0xff]  }
 0x199   : > { %4623 = vmatpush1.bf16.msra.mxu0 %v6367_v22  ;;  %4172 = vmatprep.subr.bf16.mxu1 %v6372_v23  ;;  %v6415_v22 = vld [vmem:[%s7563_s6 + $0x690] ss:$8 sps:$4 sm:$0xff]   ;;  %v6420_v23 = vld [vmem:[%s7563_s6 + $0x2a4] ss:$8 sps:$4 sm:$0xff]  }
 0x19a   : > { %4624 = vmatprep.subr.bf16.mxu0 %v6375_v24  ;;  %v6423_v24 = vld [vmem:[%s7563_s6 + $0x6a4] ss:$8 sps:$4 sm:$0xff]   ;;  %v1668_v16 = vld [vmem:[%s7561_s4 + $0xf0] sm:$0xff] }
 0x19b   : > { %4098 = vmatmul.mubr.bf16.gmra.mrb[4].mxu1 %v5446_v27  ;;  %v1743_v27 = vld [vmem:[%s7561_s4 + $0x348] sm:$0xff] }
 0x19c   : > { %4550 = vmatmul.mubr.bf16.gmra.mrb[4].mxu0 %v5454_v28  ;;  %4173 = vmatpush1.bf16.msra.mxu1 %v6370_v31  ;;  %v5510_v28 = vcombine.low %v1719_v11, %v1727_v12  ;;  %v1747_v31 = vld [vmem:[%s7561_s4 + $0x368] sm:$0xff]  ;;  %v5526_v43 = vcombine.low %v1735_v26, %v1743_v27  ;;  %v1656_v11 = vld [vmem:[%s7561_s4 + $0x90] sm:$0xff] }
 0x19d   : > { %4625 = vmatpush1.bf16.msra.mxu0 %v6373_v32  ;;  %4174 = vmatprep.subr.bf16.mxu1 %v6378_v33  ;;  %v6421_v32 = vld [vmem:[%s7563_s6 + $0x6a0] ss:$8 sps:$4 sm:$0xff]   ;;  %v6426_v33 = vld [vmem:[%s7563_s6 + $0x2b4] ss:$8 sps:$4 sm:$0xff]  }
 0x19e   : > { %4626 = vmatprep.subr.bf16.mxu0 %v6381_v34  ;;  %4107 = vmatprep.mubr.bf16.mxu1 %v5463_v35  ;;  %v6429_v34 = vld [vmem:[%s7563_s6 + $0x6b4] ss:$8 sps:$4 sm:$0xff]   ;;  %v5527_v35 = vcombine.high %v1735_v26, %v1743_v27  ;;  %v6469_v26 = vld [vmem:[%s7563_s6 + $0x720] ss:$8 sps:$4 sm:$0xff]  }
 0x19f   : > { %4559 = vmatprep.mubr.bf16.mxu0 %v5471_v36  ;;  %v5535_v36 = vcombine.high %v1739_v30, %v1747_v31  ;;  %v1664_v12 = vld [vmem:[%s7561_s4 + $0xd0] sm:$0xff] }
 0x1a0   : > { %4175 = vmatpush1.bf16.msra.mxu1 %v6376_v37  ;;  %v6424_v37 = vld [vmem:[%s7563_s6 + $0x2b0] ss:$8 sps:$4 sm:$0xff]  }
 0x1a1   : > { %4627 = vmatpush1.bf16.msra.mxu0 %v6379_v38  ;;  %4176 = vmatprep.subr.bf16.mxu1 %v6384_v39  ;;  %v6427_v38 = vld [vmem:[%s7563_s6 + $0x6b0] ss:$8 sps:$4 sm:$0xff]   ;;  %v6432_v39 = vld [vmem:[%s7563_s6 + $0x2c4] ss:$8 sps:$4 sm:$0xff]  }
 0x1a2   : > { %4628 = vmatprep.subr.bf16.mxu0 %v6387_v40  ;;  %v6435_v40 = vld [vmem:[%s7563_s6 + $0x6c4] ss:$8 sps:$4 sm:$0xff]   ;;  %v1672_v27 = vld [vmem:[%s7561_s4 + $0x110] sm:$0xff] }
 0x1a3   : > { %4108 = vmatmul.mubr.bf16.gmra.mrb[8].mxu1 %v5462_v44  ;;  %v5534_v44 = vcombine.low %v1739_v30, %v1747_v31  ;;  %v5456_v30 = vcombine.low %v1660_v15, %v1668_v16  ;;  %v1676_v31 = vld [vmem:[%s7561_s4 + $0x130] sm:$0xff] }
 0x1a4   : > { %4560 = vmatmul.mubr.bf16.gmra.mrb[8].mxu0 %v5470_v45  ;;  %4177 = vmatpush1.bf16.msra.mxu1 %v6382_v41  ;;  %v1751_v41 = vld [vmem:[%s7561_s4 + $0x388] sm:$0xff] }
 0x1a5   : > { %4629 = vmatpush1.bf16.msra.mxu0 %v6385_v42  ;;  %4178 = vmatprep.subr.bf16.mxu1 %v6390_v49  ;;  %v1759_v42 = vld [vmem:[%s7561_s4 + $0x3c8] sm:$0xff]  ;;  %v6438_v49 = vld [vmem:[%s7563_s6 + $0x2d4] ss:$8 sps:$4 sm:$0xff]  }
 0x1a6   : > { %4630 = vmatprep.subr.bf16.mxu0 %v6393_v50  ;;  %4117 = vmatprep.mubr.bf16.mxu1 %v5479_v51  ;;  %v1755_v45 = vld [vmem:[%s7561_s4 + $0x3a8] sm:$0xff]  ;;  %v6441_v50 = vld [vmem:[%s7563_s6 + $0x6d4] ss:$8 sps:$4 sm:$0xff]   ;;  %v5543_v51 = vcombine.high %v1751_v41, %v1759_v42  ;;  %v5542_v60 = vcombine.low %v1751_v41, %v1759_v42 }
 0x1a7   : > { %4569 = vmatprep.mubr.bf16.mxu0 %v5487_v52  ;;  %v5551_v52 = vcombine.high %v1755_v45, %v1763_v46  ;;  %v1688_v41 = vld [vmem:[%s7561_s4 + $0x190] sm:$0xff] }
 0x1a8   : > { %4179 = vmatpush1.bf16.msra.mxu1 %v6388_v53  ;;  %v6436_v53 = vld [vmem:[%s7563_s6 + $0x2d0] ss:$8 sps:$4 sm:$0xff]  }
 0x1a9   : > { %4631 = vmatpush1.bf16.msra.mxu0 %v6391_v54  ;;  %4180 = vmatprep.subr.bf16.mxu1 %v6396_v55  ;;  %v6439_v54 = vld [vmem:[%s7563_s6 + $0x6d0] ss:$8 sps:$4 sm:$0xff]   ;;  %v6444_v55 = vld [vmem:[%s7563_s6 + $0x2e4] ss:$8 sps:$4 sm:$0xff]  }
 0x1aa   : > { %4632 = vmatprep.subr.bf16.mxu0 %v6399_v56  ;;  %v6447_v56 = vld [vmem:[%s7563_s6 + $0x6e4] ss:$8 sps:$4 sm:$0xff]  }
 0x1ab   : > { %4118 = vmatmul.mubr.bf16.gmra.mrb[12].mxu1 %v5478_v61  ;;  %v5550_v61 = vcombine.low %v1755_v45, %v1763_v46  ;;  %v1692_v45 = vld [vmem:[%s7561_s4 + $0x1b0] sm:$0xff] }
 0x1ac   : > { %4570 = vmatmul.mubr.bf16.gmra.mrb[12].mxu0 %v5486_v62  ;;  %4181 = vmatpush1.bf16.msra.mxu1 %v6394_v57  ;;  %v6442_v57 = vld [vmem:[%s7563_s6 + $0x2e0] ss:$8 sps:$4 sm:$0xff]   ;;  %v1648_v62 = vld [vmem:[%s7561_s4 + $0x50] sm:$0xff] }
 0x1ad   : > { %4633 = vmatpush1.bf16.msra.mxu0 %v6397_v58  ;;  %4182 = vmatprep.subr.bf16.mxu1 %v6402_v1  ;;  %v6445_v58 = vld [vmem:[%s7563_s6 + $0x6e0] ss:$8 sps:$4 sm:$0xff]   ;;  %v6450_v1 = vld [vmem:[%s7563_s6 + $0x2f4] ss:$8 sps:$4 sm:$0xff]  }
 0x1ae   : > { %4634 = vmatprep.subr.bf16.mxu0 %v6405_v2  ;;  %4127 = vmatprep.mubr.bf16.mxu1 %v5495_v3  ;;  %v6453_v2 = vld [vmem:[%s7563_s6 + $0x6f4] ss:$8 sps:$4 sm:$0xff]   ;;  %v5433_v3 = vcombine.high %v1640_v59, %v1648_v62 }
 0x1af   : > { %4579 = vmatprep.mubr.bf16.mxu0 %v5503_v4  ;;  %v5441_v4 = vcombine.high %v1644_v63, %v1652_v0  ;;  %v1700_v46 = vld [vmem:[%s7561_s4 + $0x1f0] sm:$0xff] }
 0x1b0   : > { %4183 = vmatpush1.bf16.msra.mxu1 %v6400_v5  ;;  %v6448_v5 = vld [vmem:[%s7563_s6 + $0x2f0] ss:$8 sps:$4 sm:$0xff]  }
 0x1b1   : > { %4635 = vmatpush1.bf16.msra.mxu0 %v6403_v6  ;;  %4184 = vmatprep.subr.bf16.mxu1 %v6408_v7  ;;  %v6451_v6 = vld [vmem:[%s7563_s6 + $0x6f0] ss:$8 sps:$4 sm:$0xff]   ;;  %v6456_v7 = vld [vmem:[%s7563_s6 + $0x304] ss:$8 sps:$4 sm:$0xff]  }
 0x1b2   : > { %4636 = vmatprep.subr.bf16.mxu0 %v6411_v8  ;;  %v6459_v8 = vld [vmem:[%s7563_s6 + $0x704] ss:$8 sps:$4 sm:$0xff]  }
 0x1b3   : > { %4128 = vmatmul.mubr.bf16.gmra.mrb[16].mxu1 %v5494_v13  ;;  %v5432_v13 = vcombine.low %v1640_v59, %v1648_v62  ;;  %v5488_v59 = vcombine.low %v1692_v45, %v1700_v46  ;;  %v1716_v62 = vld [vmem:[%s7561_s4 + $0x270] sm:$0xff] }
 0x1b4   : > { %4580 = vmatmul.mubr.bf16.gmra.mrb[16].mxu0 %v5502_v14  ;;  %4185 = vmatpush1.bf16.msra.mxu1 %v6406_v9  ;;  %v6454_v9 = vld [vmem:[%s7563_s6 + $0x300] ss:$8 sps:$4 sm:$0xff]   ;;  %v5440_v14 = vcombine.low %v1644_v63, %v1652_v0 }
 0x1b5   : > { %4637 = vmatpush1.bf16.msra.mxu0 %v6409_v10  ;;  %4186 = vmatprep.subr.bf16.mxu1 %v6414_v17  ;;  %v6457_v10 = vld [vmem:[%s7563_s6 + $0x700] ss:$8 sps:$4 sm:$0xff]   ;;  %v6462_v17 = vld [vmem:[%s7563_s6 + $0x314] ss:$8 sps:$4 sm:$0xff]  }
 0x1b6   : > { %4638 = vmatprep.subr.bf16.mxu0 %v6417_v18  ;;  %4137 = vmatprep.mubr.bf16.mxu1 %v5511_v19  ;;  %v6465_v18 = vld [vmem:[%s7563_s6 + $0x714] ss:$8 sps:$4 sm:$0xff]   ;;  %v5449_v19 = vcombine.high %v1656_v11, %v1664_v12  ;;  %v6490_v63 = vld [vmem:[%s7563_s6 + $0x360] ss:$8 sps:$4 sm:$0xff]  }
 0x1b7   : > { %4589 = vmatprep.mubr.bf16.mxu0 %v5519_v20  ;;  %v5457_v20 = vcombine.high %v1660_v15, %v1668_v16  ;;  %v6493_v0 = vld [vmem:[%s7563_s6 + $0x760] ss:$8 sps:$4 sm:$0xff]  }
 0x1b8   : > { %4187 = vmatpush1.bf16.msra.mxu1 %v6412_v21  ;;  %v6460_v21 = vld [vmem:[%s7563_s6 + $0x310] ss:$8 sps:$4 sm:$0xff]   ;;  %v6502_v15 = vld [vmem:[%s7563_s6 + $0x380] ss:$8 sps:$4 sm:$0xff]  }
 0x1b9   : > { %4639 = vmatpush1.bf16.msra.mxu0 %v6415_v22  ;;  %4188 = vmatprep.subr.bf16.mxu1 %v6420_v23  ;;  %v6463_v22 = vld [vmem:[%s7563_s6 + $0x710] ss:$8 sps:$4 sm:$0xff]   ;;  %v6468_v23 = vld [vmem:[%s7563_s6 + $0x324] ss:$8 sps:$4 sm:$0xff]   ;;  %v6505_v16 = vld [vmem:[%s7563_s6 + $0x780] ss:$8 sps:$4 sm:$0xff]  }
 0x1ba   : > { %4640 = vmatprep.subr.bf16.mxu0 %v6423_v24  ;;  %v6471_v24 = vld [vmem:[%s7563_s6 + $0x724] ss:$8 sps:$4 sm:$0xff]  }
 0x1bb   : > { %4138 = vmatmul.mubr.bf16.gmra.mrb[20].mxu1 %v5510_v28  ;;  %v1680_v28 = vld [vmem:[%s7561_s4 + $0x150] sm:$0xff] }
 0x1bc   : > { %4590 = vmatmul.mubr.bf16.gmra.mrb[20].mxu0 %v5518_v29  ;;  %4189 = vmatpush1.bf16.msra.mxu1 %v6418_v25  ;;  %v6466_v25 = vld [vmem:[%s7563_s6 + $0x320] ss:$8 sps:$4 sm:$0xff]   ;;  %v5448_v29 = vcombine.low %v1656_v11, %v1664_v12  ;;  %v5464_v42 = vcombine.low %v1672_v27, %v1680_v28  ;;  %v1728_v12 = vld [vmem:[%s7561_s4 + $0x2d0] sm:$0xff] }
 0x1bd   : > { %4641 = vmatpush1.bf16.msra.mxu0 %v6421_v32  ;;  %4190 = vmatprep.subr.bf16.mxu1 %v6426_v33  ;;  %v1684_v32 = vld [vmem:[%s7561_s4 + $0x170] sm:$0xff] }
 0x1be   : > { %4642 = vmatprep.subr.bf16.mxu0 %v6429_v34  ;;  %4147 = vmatprep.mubr.bf16.mxu1 %v5527_v35  ;;  %v6474_v33 = vld [vmem:[%s7563_s6 + $0x334] ss:$8 sps:$4 sm:$0xff]   ;;  %v5465_v35 = vcombine.high %v1672_v27, %v1680_v28 }
 0x1bf   : > { %4599 = vmatprep.mubr.bf16.mxu0 %v5535_v36  ;;  %v6477_v34 = vld [vmem:[%s7563_s6 + $0x734] ss:$8 sps:$4 sm:$0xff]   ;;  %v5473_v36 = vcombine.high %v1676_v31, %v1684_v32 }
 0x1c0   : > { %4191 = vmatpush1.bf16.msra.mxu1 %v6424_v37  ;;  %v6472_v37 = vld [vmem:[%s7563_s6 + $0x330] ss:$8 sps:$4 sm:$0xff]  }
 0x1c1   : > { %4643 = vmatpush1.bf16.msra.mxu0 %v6427_v38  ;;  %4192 = vmatprep.subr.bf16.mxu1 %v6432_v39  ;;  %v6475_v38 = vld [vmem:[%s7563_s6 + $0x730] ss:$8 sps:$4 sm:$0xff]   ;;  %v6480_v39 = vld [vmem:[%s7563_s6 + $0x344] ss:$8 sps:$4 sm:$0xff]  }
 0x1c2   : > { %4644 = vmatprep.subr.bf16.mxu0 %v6435_v40  ;;  %v6483_v40 = vld [vmem:[%s7563_s6 + $0x744] ss:$8 sps:$4 sm:$0xff]   ;;  %v1744_v28 = vld [vmem:[%s7561_s4 + $0x350] sm:$0xff] }
 0x1c3   : > { %4148 = vmatmul.mubr.bf16.gmra.mrb[24].mxu1 %v5526_v43  ;;  %v5472_v43 = vcombine.low %v1676_v31, %v1684_v32  ;;  %v6514_v31 = vld [vmem:[%s7563_s6 + $0x3a0] ss:$8 sps:$4 sm:$0xff]  }
 0x1c4   : > { %4600 = vmatmul.mubr.bf16.gmra.mrb[24].mxu0 %v5534_v44  ;;  %4193 = vmatpush1.bf16.msra.mxu1 %v6430_v47  ;;  %v1696_v44 = vld [vmem:[%s7561_s4 + $0x1d0] sm:$0xff]  ;;  %v6478_v47 = vld [vmem:[%s7563_s6 + $0x340] ss:$8 sps:$4 sm:$0xff]  }
 0x1c5   : > { %4645 = vmatpush1.bf16.msra.mxu0 %v6433_v48  ;;  %4194 = vmatprep.subr.bf16.mxu1 %v6438_v49  ;;  %v6481_v48 = vld [vmem:[%s7563_s6 + $0x740] ss:$8 sps:$4 sm:$0xff]   ;;  %v6486_v49 = vld [vmem:[%s7563_s6 + $0x354] ss:$8 sps:$4 sm:$0xff]  }
 0x1c6   : > { %4646 = vmatprep.subr.bf16.mxu0 %v6441_v50  ;;  %4157 = vmatprep.mubr.bf16.mxu1 %v5543_v51  ;;  %v6489_v50 = vld [vmem:[%s7563_s6 + $0x754] ss:$8 sps:$4 sm:$0xff]   ;;  %v5481_v51 = vcombine.high %v1688_v41, %v1696_v44  ;;  %v6517_v32 = vld [vmem:[%s7563_s6 + $0x7a0] ss:$8 sps:$4 sm:$0xff]  }
 0x1c7   : > { %4609 = vmatprep.mubr.bf16.mxu0 %v5551_v52  ;;  %v5489_v52 = vcombine.high %v1692_v45, %v1700_v46  ;;  %v1756_v45 = vld [vmem:[%s7561_s4 + $0x3b0] sm:$0xff] }
 0x1c8   : > { %4195 = vmatpush1.bf16.msra.mxu1 %v6436_v53  ;;  %v6484_v53 = vld [vmem:[%s7563_s6 + $0x350] ss:$8 sps:$4 sm:$0xff]  }
 0x1c9   : > { %4647 = vmatpush1.bf16.msra.mxu0 %v6439_v54  ;;  %4196 = vmatprep.subr.bf16.mxu1 %v6444_v55  ;;  %v6487_v54 = vld [vmem:[%s7563_s6 + $0x750] ss:$8 sps:$4 sm:$0xff]   ;;  %v6492_v55 = vld [vmem:[%s7563_s6 + $0x364] ss:$8 sps:$4 sm:$0xff]  }
 0x1ca   : > { %4648 = vmatprep.subr.bf16.mxu0 %v6447_v56  ;;  %v6495_v56 = vld [vmem:[%s7563_s6 + $0x764] ss:$8 sps:$4 sm:$0xff]   ;;  %v1764_v46 = vld [vmem:[%s7561_s4 + $0x3f0] sm:$0xff] }
 0x1cb   : > { %4158 = vmatmul.mubr.bf16.gmra.mrb[28].mxu1 %v5542_v60  ;;  %v1712_v60 = vld [vmem:[%s7561_s4 + $0x250] sm:$0xff] }
 0x1cc   : > { %4610 = vmatmul.mubr.bf16.gmra.mrb[28].mxu0 %v5550_v61  ;;  %4197 = vmatpush1.bf16.msra.mxu1 %v6442_v57  ;;  %v1704_v57 = vld [vmem:[%s7561_s4 + $0x210] sm:$0xff] }
 0x1cd   : > { %4649 = vmatpush1.bf16.msra.mxu0 %v6445_v58  ;;  %4198 = vmatprep.subr.bf16.mxu1 %v6450_v1  ;;  %v5480_v58 = vcombine.low %v1688_v41, %v1696_v44  ;;  %v1708_v61 = vld [vmem:[%s7561_s4 + $0x230] sm:$0xff] }
 0x1ce   : > { %4650 = vmatprep.subr.bf16.mxu0 %v6453_v2  ;;  %4200 = vmatprep.mubr.bf16.mxu1 %v5433_v3  ;;  %v6498_v1 = vld [vmem:[%s7563_s6 + $0x374] ss:$8 sps:$4 sm:$0xff]   ;;  %v5497_v3 = vcombine.high %v1704_v57, %v1712_v60  ;;  %v5504_v11 = vcombine.low %v1708_v61, %v1716_v62 }
 0x1cf   : > { %4652 = vmatprep.mubr.bf16.mxu0 %v5441_v4  ;;  %v6501_v2 = vld [vmem:[%s7563_s6 + $0x774] ss:$8 sps:$4 sm:$0xff]   ;;  %v5505_v4 = vcombine.high %v1708_v61, %v1716_v62 }
 0x1d0   : > { %4199 = vmatpush1.bf16.msra.mxu1 %v6448_v5  ;;  %v6496_v5 = vld [vmem:[%s7563_s6 + $0x370] ss:$8 sps:$4 sm:$0xff]  }
 0x1d1   : > { %4651 = vmatpush1.bf16.msra.mxu0 %v6451_v6  ;;  %4281 = vmatprep.subr.bf16.mxu1 %v6456_v7  ;;  %v6499_v6 = vld [vmem:[%s7563_s6 + $0x770] ss:$8 sps:$4 sm:$0xff]   ;;  %v6504_v7 = vld [vmem:[%s7563_s6 + $0x384] ss:$8 sps:$4 sm:$0xff]  }
 0x1d2   : > { %4733 = vmatprep.subr.bf16.mxu0 %v6459_v8  ;;  %v6507_v8 = vld [vmem:[%s7563_s6 + $0x784] ss:$8 sps:$4 sm:$0xff]   ;;  %v1752_v41 = vld [vmem:[%s7561_s4 + $0x390] sm:$0xff]  ;;  %v1645_v61 = vld [vmem:[%s7561_s4 + $0x38] sm:$0xff] }
 0x1d3   : > { %4201 = vmatmul.mubr.bf16.vlgmr.msra.gmra.mrb[0].mxu1 %v5432_v13  ;;  %v1724_v13 = vld [vmem:[%s7561_s4 + $0x2b0] sm:$0xff]  ;;  %v1653_v62 = vld [vmem:[%s7561_s4 + $0x78] sm:$0xff] }
 0x1d4   : > { %4653 = vmatmul.mubr.bf16.vlgmr.msra.gmra.mrb[0].mxu0 %v5440_v14  ;;  %4282 = vmatpush1.bf16.msra.mxu1 %v6454_v9  ;;  %v1720_v9 = vld [vmem:[%s7561_s4 + $0x290] sm:$0xff] }
 0x1d5   : > { %4734 = vmatpush1.bf16.msra.mxu0 %v6457_v10  ;;  %4283 = vmatprep.subr.bf16.mxu1 %v6462_v17  ;;  %v5496_v10 = vcombine.low %v1704_v57, %v1712_v60  ;;  %v1732_v14 = vld [vmem:[%s7561_s4 + $0x2f0] sm:$0xff]  ;;  %v1641_v57 = vld [vmem:[%s7561_s4 + $0x18] sm:$0xff] }
 0x1d6   : > { %4735 = vmatprep.subr.bf16.mxu0 %v6465_v18  ;;  %4210 = vmatprep.mubr.bf16.mxu1 %v5449_v19  ;;  %v6510_v17 = vld [vmem:[%s7563_s6 + $0x394] ss:$8 sps:$4 sm:$0xff]   ;;  %v5513_v19 = vcombine.high %v1720_v9, %v1728_v12  ;;  %v5520_v27 = vcombine.low %v1724_v13, %v1732_v14 }
 0x1d7   : > { %4662 = vmatprep.mubr.bf16.mxu0 %v5457_v20  ;;  %v6513_v18 = vld [vmem:[%s7563_s6 + $0x794] ss:$8 sps:$4 sm:$0xff]   ;;  %v5521_v20 = vcombine.high %v1724_v13, %v1732_v14 }
 0x1d8   : > { %4284 = vmatpush1.bf16.msra.mxu1 %v6460_v21  ;;  %v6508_v21 = vld [vmem:[%s7563_s6 + $0x390] ss:$8 sps:$4 sm:$0xff]  }
 0x1d9   : > { %4736 = vmatpush1.bf16.msra.mxu0 %v6463_v22  ;;  %4285 = vmatprep.subr.bf16.mxu1 %v6468_v23  ;;  %v6511_v22 = vld [vmem:[%s7563_s6 + $0x790] ss:$8 sps:$4 sm:$0xff]   ;;  %v6516_v23 = vld [vmem:[%s7563_s6 + $0x3a4] ss:$8 sps:$4 sm:$0xff]  }
 0x1da   : > { %4737 = vmatprep.subr.bf16.mxu0 %v6471_v24  ;;  %v6519_v24 = vld [vmem:[%s7563_s6 + $0x7a4] ss:$8 sps:$4 sm:$0xff]   ;;  %v1760_v44 = vld [vmem:[%s7561_s4 + $0x3d0] sm:$0xff]  ;;  %v1649_v60 = vld [vmem:[%s7561_s4 + $0x58] sm:$0xff] }
 0x1db   : > { %4211 = vmatmul.mubr.bf16.gmra.mrb[4].mxu1 %v5448_v29  ;;  %v1740_v29 = vld [vmem:[%s7561_s4 + $0x330] sm:$0xff] }
 0x1dc   : > { %4663 = vmatmul.mubr.bf16.gmra.mrb[4].mxu0 %v5456_v30  ;;  %4286 = vmatpush1.bf16.msra.mxu1 %v6466_v25  ;;  %v1736_v25 = vld [vmem:[%s7561_s4 + $0x310] sm:$0xff] }
 0x1dd   : > { %4738 = vmatpush1.bf16.msra.mxu0 %v6469_v26  ;;  %4287 = vmatprep.subr.bf16.mxu1 %v6474_v33  ;;  %v5512_v26 = vcombine.low %v1720_v9, %v1728_v12  ;;  %v1748_v30 = vld [vmem:[%s7561_s4 + $0x370] sm:$0xff]  ;;  %v1661_v9 = vld [vmem:[%s7561_s4 + $0xb8] sm:$0xff]  ;;  %v5442_v12 = vcombine.low %v1645_v61, %v1653_v62 }
 0x1de   : > { %4739 = vmatprep.subr.bf16.mxu0 %v6477_v34  ;;  %4220 = vmatprep.mubr.bf16.mxu1 %v5465_v35  ;;  %v6522_v33 = vld [vmem:[%s7563_s6 + $0x3b4] ss:$8 sps:$4 sm:$0xff]   ;;  %v5529_v35 = vcombine.high %v1736_v25, %v1744_v28 }
 0x1df   : > { %4672 = vmatprep.mubr.bf16.mxu0 %v5473_v36  ;;  %v6525_v34 = vld [vmem:[%s7563_s6 + $0x7b4] ss:$8 sps:$4 sm:$0xff]   ;;  %v5537_v36 = vcombine.high %v1740_v29, %v1748_v30 }
 0x1e0   : > { %4288 = vmatpush1.bf16.msra.mxu1 %v6472_v37  ;;  %v6520_v37 = vld [vmem:[%s7563_s6 + $0x3b0] ss:$8 sps:$4 sm:$0xff]  }
 0x1e1   : > { %4740 = vmatpush1.bf16.msra.mxu0 %v6475_v38  ;;  %4289 = vmatprep.subr.bf16.mxu1 %v6480_v39  ;;  %v6523_v38 = vld [vmem:[%s7563_s6 + $0x7b0] ss:$8 sps:$4 sm:$0xff]   ;;  %v6528_v39 = vld [vmem:[%s7563_s6 + $0x3c4] ss:$8 sps:$4 sm:$0xff]  }
 0x1e2   : > { %4741 = vmatprep.subr.bf16.mxu0 %v6483_v40  ;;  %v6531_v40 = vld [vmem:[%s7563_s6 + $0x7c4] ss:$8 sps:$4 sm:$0xff]  }
 0x1e3   : > { %4221 = vmatmul.mubr.bf16.gmra.mrb[8].mxu1 %v5464_v42  ;;  %v5528_v42 = vcombine.low %v1736_v25, %v1744_v28  ;;  %v1693_v25 = vld [vmem:[%s7561_s4 + $0x1b8] sm:$0xff] }
 0x1e4   : > { %4673 = vmatmul.mubr.bf16.gmra.mrb[8].mxu0 %v5472_v43  ;;  %4290 = vmatpush1.bf16.msra.mxu1 %v6478_v47  ;;  %v5536_v43 = vcombine.low %v1740_v29, %v1748_v30  ;;  %v6526_v47 = vld [vmem:[%s7563_s6 + $0x3c0] ss:$8 sps:$4 sm:$0xff]  }
 0x1e5   : > { %4742 = vmatpush1.bf16.msra.mxu0 %v6481_v48  ;;  %4291 = vmatprep.subr.bf16.mxu1 %v6486_v49  ;;  %v6529_v48 = vld [vmem:[%s7563_s6 + $0x7c0] ss:$8 sps:$4 sm:$0xff]   ;;  %v6534_v49 = vld [vmem:[%s7563_s6 + $0x3d4] ss:$8 sps:$4 sm:$0xff]  }
 0x1e6   : > { %4743 = vmatprep.subr.bf16.mxu0 %v6489_v50  ;;  %4230 = vmatprep.mubr.bf16.mxu1 %v5481_v51  ;;  %v6537_v50 = vld [vmem:[%s7563_s6 + $0x7d4] ss:$8 sps:$4 sm:$0xff]   ;;  %v5545_v51 = vcombine.high %v1752_v41, %v1760_v44 }
 0x1e7   : > { %4682 = vmatprep.mubr.bf16.mxu0 %v5489_v52  ;;  %v5553_v52 = vcombine.high %v1756_v45, %v1764_v46 }
 0x1e8   : > { %4292 = vmatpush1.bf16.msra.mxu1 %v6484_v53  ;;  %v6532_v53 = vld [vmem:[%s7563_s6 + $0x3d0] ss:$8 sps:$4 sm:$0xff]  }
 0x1e9   : > { %4744 = vmatpush1.bf16.msra.mxu0 %v6487_v54  ;;  %4293 = vmatprep.subr.bf16.mxu1 %v6492_v55  ;;  %v6535_v54 = vld [vmem:[%s7563_s6 + $0x7d0] ss:$8 sps:$4 sm:$0xff]   ;;  %v6540_v55 = vld [vmem:[%s7563_s6 + $0x3e4] ss:$8 sps:$4 sm:$0xff]  }
 0x1ea   : > { %4745 = vmatprep.subr.bf16.mxu0 %v6495_v56  ;;  %v6543_v56 = vld [vmem:[%s7563_s6 + $0x7e4] ss:$8 sps:$4 sm:$0xff]  }
 0x1eb   : > { %4231 = vmatmul.mubr.bf16.gmra.mrb[12].mxu1 %v5480_v58  ;;  %v5544_v58 = vcombine.low %v1752_v41, %v1760_v44  ;;  %v1725_v41 = vld [vmem:[%s7561_s4 + $0x2b8] sm:$0xff] }
 0x1ec   : > { %4683 = vmatmul.mubr.bf16.gmra.mrb[12].mxu0 %v5488_v59  ;;  %4294 = vmatpush1.bf16.msra.mxu1 %v6490_v63  ;;  %v5552_v59 = vcombine.low %v1756_v45, %v1764_v46  ;;  %v6538_v63 = vld [vmem:[%s7563_s6 + $0x3e0] ss:$8 sps:$4 sm:$0xff]  }
 0x1ed   : > { %4746 = vmatpush1.bf16.msra.mxu0 %v6493_v0  ;;  %4295 = vmatprep.subr.bf16.mxu1 %v6498_v1  ;;  %v6541_v0 = vld [vmem:[%s7563_s6 + $0x7e0] ss:$8 sps:$4 sm:$0xff]   ;;  %v6546_v1 = vld [vmem:[%s7563_s6 + $0x3f4] ss:$8 sps:$4 sm:$0xff]  }
 0x1ee   : > { %4747 = vmatprep.subr.bf16.mxu0 %v6501_v2  ;;  %4240 = vmatprep.mubr.bf16.mxu1 %v5497_v3  ;;  %v6549_v2 = vld [vmem:[%s7563_s6 + $0x7f4] ss:$8 sps:$4 sm:$0xff]   ;;  %v5435_v3 = vcombine.high %v1641_v57, %v1649_v60 }
 0x1ef   : > { %4692 = vmatprep.mubr.bf16.mxu0 %v5505_v4  ;;  %v5443_v4 = vcombine.high %v1645_v61, %v1653_v62 }
 0x1f0   : > { %4296 = vmatpush1.bf16.msra.mxu1 %v6496_v5  ;;  %v6544_v5 = vld [vmem:[%s7563_s6 + $0x3f0] ss:$8 sps:$4 sm:$0xff]  }
 0x1f1   : > { %4748 = vmatpush1.bf16.msra.mxu0 %v6499_v6  ;;  %4297 = vmatprep.subr.bf16.mxu1 %v6504_v7  ;;  %v6547_v6 = vld [vmem:[%s7563_s6 + $0x7f0] ss:$8 sps:$4 sm:$0xff]  }
 0x1f2   : > { %4749 = vmatprep.subr.bf16.mxu0 %v6507_v8  ;;  %v1657_v7 = vld [vmem:[%s7561_s4 + $0x98] sm:$0xff] }
 0x1f3   : > { %4241 = vmatmul.mubr.bf16.gmra.mrb[16].mxu1 %v5496_v10  ;;  %v1665_v8 = vld [vmem:[%s7561_s4 + $0xd8] sm:$0xff] }
 0x1f4   : > { %4693 = vmatmul.mubr.bf16.gmra.mrb[16].mxu0 %v5504_v11  ;;  %4298 = vmatpush1.bf16.msra.mxu1 %v6502_v15  ;;  %v1669_v10 = vld [vmem:[%s7561_s4 + $0xf8] sm:$0xff]  ;;  %v5434_v11 = vcombine.low %v1641_v57, %v1649_v60  ;;  %v5451_v13 = vcombine.high %v1657_v7, %v1665_v8 }
 0x1f5   : > { %4750 = vmatpush1.bf16.msra.mxu0 %v6505_v16  ;;  %4299 = vmatprep.subr.bf16.mxu1 %v6510_v17  ;;  %v5459_v14 = vcombine.high %v1661_v9, %v1669_v10  ;;  %v1673_v15 = vld [vmem:[%s7561_s4 + $0x118] sm:$0xff] }
 0x1f6   : > { %4751 = vmatprep.subr.bf16.mxu0 %v6513_v18  ;;  %4250 = vmatprep.mubr.bf16.mxu1 %v5513_v19  ;;  %v1681_v16 = vld [vmem:[%s7561_s4 + $0x158] sm:$0xff]  ;;  %v5450_v19 = vcombine.low %v1657_v7, %v1665_v8 }
 0x1f7   : > { %4702 = vmatprep.mubr.bf16.mxu0 %v5521_v20  ;;  %v1677_v17 = vld [vmem:[%s7561_s4 + $0x138] sm:$0xff]  ;;  %v5458_v20 = vcombine.low %v1661_v9, %v1669_v10  ;;  %v1608_v10 = vld [vmem:[#allocation2 + $0x10] sm:$0xff] }
 0x1f8   : > { %4300 = vmatpush1.bf16.msra.mxu1 %v6508_v21  ;;  %v1685_v18 = vld [vmem:[%s7561_s4 + $0x178] sm:$0xff]  ;;  %v5467_v21 = vcombine.high %v1673_v15, %v1681_v16 }
 0x1f9   : > { %4752 = vmatpush1.bf16.msra.mxu0 %v6511_v22  ;;  %4301 = vmatprep.subr.bf16.mxu1 %v6516_v23  ;;  %v5475_v22 = vcombine.high %v1677_v17, %v1685_v18  ;;  %v1689_v23 = vld [vmem:[%s7561_s4 + $0x198] sm:$0xff]  ;;  %v5474_v28 = vcombine.low %v1677_v17, %v1685_v18 }
 0x1fa   : > { %4753 = vmatprep.subr.bf16.mxu0 %v6519_v24  ;;  %v1697_v24 = vld [vmem:[%s7561_s4 + $0x1d8] sm:$0xff] }
 0x1fb   : > { %4251 = vmatmul.mubr.bf16.gmra.mrb[20].mxu1 %v5512_v26  ;;  %v1701_v26 = vld [vmem:[%s7561_s4 + $0x1f8] sm:$0xff]  ;;  %v5483_v29 = vcombine.high %v1689_v23, %v1697_v24 }
 0x1fc   : > { %4703 = vmatmul.mubr.bf16.gmra.mrb[20].mxu0 %v5520_v27  ;;  %4302 = vmatpush1.bf16.msra.mxu1 %v6514_v31  ;;  %v5466_v27 = vcombine.low %v1673_v15, %v1681_v16  ;;  %v5491_v30 = vcombine.high %v1693_v25, %v1701_v26  ;;  %v1705_v31 = vld [vmem:[%s7561_s4 + $0x218] sm:$0xff] }
 0x1fd   : > { %4754 = vmatpush1.bf16.msra.mxu0 %v6517_v32  ;;  %4303 = vmatprep.subr.bf16.mxu1 %v6522_v33  ;;  %v1713_v32 = vld [vmem:[%s7561_s4 + $0x258] sm:$0xff] }
 0x1fe   : > { %4755 = vmatprep.subr.bf16.mxu0 %v6525_v34  ;;  %4260 = vmatprep.mubr.bf16.mxu1 %v5529_v35  ;;  %v1709_v33 = vld [vmem:[%s7561_s4 + $0x238] sm:$0xff]  ;;  %v5482_v35 = vcombine.low %v1689_v23, %v1697_v24 }
 0x1ff   : > { %4712 = vmatprep.mubr.bf16.mxu0 %v5537_v36  ;;  %v1717_v34 = vld [vmem:[%s7561_s4 + $0x278] sm:$0xff]  ;;  %v5490_v36 = vcombine.low %v1693_v25, %v1701_v26  ;;  %v1611_v26 = vld [vmem:[#allocation2 + $0x28] sm:$0xff] }
 0x200   : > { %4304 = vmatpush1.bf16.msra.mxu1 %v6520_v37  ;;  %v5499_v37 = vcombine.high %v1705_v31, %v1713_v32  ;;  %v5506_v44 = vcombine.low %v1709_v33, %v1717_v34  ;;  %v1757_v57 = vld [vmem:[%s7561_s4 + $0x3b8] sm:$0xff] }
 0x201   : > { %4756 = vmatpush1.bf16.msra.mxu0 %v6523_v38  ;;  %4305 = vmatprep.subr.bf16.mxu1 %v6528_v39  ;;  %v5507_v38 = vcombine.high %v1709_v33, %v1717_v34  ;;  %v1721_v39 = vld [vmem:[%s7561_s4 + $0x298] sm:$0xff] }
 0x202   : > { %4757 = vmatprep.subr.bf16.mxu0 %v6531_v40  ;;  %v1729_v40 = vld [vmem:[%s7561_s4 + $0x2d8] sm:$0xff] }
 0x203   : > { %4261 = vmatmul.mubr.bf16.gmra.mrb[24].mxu1 %v5528_v42  ;;  %v1733_v42 = vld [vmem:[%s7561_s4 + $0x2f8] sm:$0xff]  ;;  %v5515_v45 = vcombine.high %v1721_v39, %v1729_v40 }
 0x204   : > { %4713 = vmatmul.mubr.bf16.gmra.mrb[24].mxu0 %v5536_v43  ;;  %4306 = vmatpush1.bf16.msra.mxu1 %v6526_v47  ;;  %v5498_v43 = vcombine.low %v1705_v31, %v1713_v32  ;;  %v5523_v46 = vcombine.high %v1725_v41, %v1733_v42  ;;  %v1737_v47 = vld [vmem:[%s7561_s4 + $0x318] sm:$0xff] }
 0x205   : > { %4758 = vmatpush1.bf16.msra.mxu0 %v6529_v48  ;;  %4307 = vmatprep.subr.bf16.mxu1 %v6534_v49  ;;  %v1745_v48 = vld [vmem:[%s7561_s4 + $0x358] sm:$0xff] }
 0x206   : > { %4759 = vmatprep.subr.bf16.mxu0 %v6537_v50  ;;  %4270 = vmatprep.mubr.bf16.mxu1 %v5545_v51  ;;  %v1741_v49 = vld [vmem:[%s7561_s4 + $0x338] sm:$0xff]  ;;  %v5514_v51 = vcombine.low %v1721_v39, %v1729_v40 }
 0x207   : > { %4722 = vmatprep.mubr.bf16.mxu0 %v5553_v52  ;;  %v1749_v50 = vld [vmem:[%s7561_s4 + $0x378] sm:$0xff]  ;;  %v5522_v52 = vcombine.low %v1725_v41, %v1733_v42  ;;  %v1614_v42 = vld [vmem:[#allocation2 + $0x40] sm:$0xff] }
 0x208   : > { %4308 = vmatpush1.bf16.msra.mxu1 %v6532_v53  ;;  %v5531_v53 = vcombine.high %v1737_v47, %v1745_v48  ;;  %v5538_v60 = vcombine.low %v1741_v49, %v1749_v50  ;;  %v1609_v15 = vld [vmem:[#allocation2 + $0x18] sm:$0xff] }
 0x209   : > { %4760 = vmatpush1.bf16.msra.mxu0 %v6535_v54  ;;  %4309 = vmatprep.subr.bf16.mxu1 %v6540_v55  ;;  %v5539_v54 = vcombine.high %v1741_v49, %v1749_v50  ;;  %v1753_v55 = vld [vmem:[%s7561_s4 + $0x398] sm:$0xff]  ;;  %v1616_v50 = vld [vmem:[#allocation2 + $0x50] sm:$0xff] }
 0x20a   : > { %4761 = vmatprep.subr.bf16.mxu0 %v6543_v56  ;;  %v1761_v56 = vld [vmem:[%s7561_s4 + $0x3d8] sm:$0xff] }
 0x20b   : > { %4271 = vmatmul.mubr.bf16.gmra.mrb[28].mxu1 %v5544_v58  ;;  %v1765_v58 = vld [vmem:[%s7561_s4 + $0x3f8] sm:$0xff]  ;;  %v5547_v61 = vcombine.high %v1753_v55, %v1761_v56 }
 0x20c   : > { %4723 = vmatmul.mubr.bf16.gmra.mrb[28].mxu0 %v5552_v59  ;;  %4310 = vmatpush1.bf16.msra.mxu1 %v6538_v63  ;;  %v5530_v59 = vcombine.low %v1737_v47, %v1745_v48  ;;  %v5555_v62 = vcombine.high %v1757_v57, %v1765_v58  ;;  %v5546_v63 = vcombine.low %v1753_v55, %v1761_v56  ;;  %v1617_v55 = vld [vmem:[#allocation2 + $0x58] sm:$0xff] }
 0x20d   : > { %4762 = vmatpush1.bf16.msra.mxu0 %v6541_v0  ;;  %4311 = vmatprep.subr.bf16.mxu1 %v6546_v1  ;;  %v5554_v0 = vcombine.low %v1757_v57, %v1765_v58 }
 0x20e   : > { %4763 = vmatprep.subr.bf16.mxu0 %v6549_v2  ;;  %4313 = vmatprep.mubr.bf16.mxu1 %v5435_v3  ;;  %v1606_v2 = vld [vmem:[#allocation2] sm:$0xff] }
 0x20f   : > { %4765 = vmatprep.mubr.bf16.mxu0 %v5443_v4 }
 0x210   : > { %4312 = vmatpush1.bf16.msra.mxu1 %v6544_v5 }
 0x211   : > { %4764 = vmatpush1.bf16.msra.mxu0 %v6547_v6  ;;  %v1607_v6 = vld [vmem:[#allocation2 + $0x8] sm:$0xff] }
 0x213   : > { %4314 = vmatmul.mubr.bf16.vlgmr.msra.gmra.mrb[0].mxu1 %v5434_v11 }
 0x214   : > { %4766 = vmatmul.mubr.bf16.vlgmr.msra.gmra.mrb[0].mxu0 %v5442_v12  ;;  %4323 = vmatprep.mubr.bf16.mxu1 %v5451_v13 }
 0x215   : > { %4775 = vmatprep.mubr.bf16.mxu0 %v5459_v14 }
 0x21b   : > { %4324 = vmatmul.mubr.bf16.gmra.mrb[4].mxu1 %v5450_v19 }
 0x21c   : > { %4776 = vmatmul.mubr.bf16.gmra.mrb[4].mxu0 %v5458_v20  ;;  %4333 = vmatprep.mubr.bf16.mxu1 %v5467_v21 }
 0x21d   : > { %4785 = vmatprep.mubr.bf16.mxu0 %v5475_v22  ;;  %v1610_v22 = vld [vmem:[#allocation2 + $0x20] sm:$0xff] }
 0x223   : > { %4334 = vmatmul.mubr.bf16.gmra.mrb[8].mxu1 %v5466_v27 }
 0x224   : > { %4786 = vmatmul.mubr.bf16.gmra.mrb[8].mxu0 %v5474_v28  ;;  %4343 = vmatprep.mubr.bf16.mxu1 %v5483_v29 }
 0x225   : > { %4795 = vmatprep.mubr.bf16.mxu0 %v5491_v30  ;;  %v1612_v30 = vld [vmem:[#allocation2 + $0x30] sm:$0xff] }
 0x22b   : > { %4344 = vmatmul.mubr.bf16.gmra.mrb[12].mxu1 %v5482_v35  ;;  %v1613_v35 = vld [vmem:[#allocation2 + $0x38] sm:$0xff] }
 0x22c   : > { %4796 = vmatmul.mubr.bf16.gmra.mrb[12].mxu0 %v5490_v36  ;;  %4353 = vmatprep.mubr.bf16.mxu1 %v5499_v37 }
 0x22d   : > { %4805 = vmatprep.mubr.bf16.mxu0 %v5507_v38 }
 0x233   : > { %4354 = vmatmul.mubr.bf16.gmra.mrb[16].mxu1 %v5498_v43 }
 0x234   : > { %4806 = vmatmul.mubr.bf16.gmra.mrb[16].mxu0 %v5506_v44  ;;  %4363 = vmatprep.mubr.bf16.mxu1 %v5515_v45 }
 0x235   : > { %4815 = vmatprep.mubr.bf16.mxu0 %v5523_v46  ;;  %v1615_v46 = vld [vmem:[#allocation2 + $0x48] sm:$0xff] }
 0x23b   : > { %4364 = vmatmul.mubr.bf16.gmra.mrb[20].mxu1 %v5514_v51 }
 0x23c   : > { %4816 = vmatmul.mubr.bf16.gmra.mrb[20].mxu0 %v5522_v52  ;;  %4373 = vmatprep.mubr.bf16.mxu1 %v5531_v53 }
 0x23d   : > { %4825 = vmatprep.mubr.bf16.mxu0 %v5539_v54 }
 0x243   : > { %4374 = vmatmul.mubr.bf16.gmra.mrb[24].mxu1 %v5530_v59 }
 0x244   : > { %4826 = vmatmul.mubr.bf16.gmra.mrb[24].mxu0 %v5538_v60  ;;  %4383 = vmatprep.mubr.bf16.mxu1 %v5547_v61 }
 0x245   : > { %4835 = vmatprep.mubr.bf16.mxu0 %v5555_v62  ;;  %v1618_v62 = vld [vmem:[#allocation2 + $0x60] sm:$0xff] }
 0x24b   : > { %4384 = vmatmul.mubr.bf16.gmra.mrb[28].mxu1 %v5546_v63 }
 0x24c   : > { %4836 = vmatmul.mubr.bf16.gmra.mrb[28].mxu0 %v5554_v0 }
 0x2e6   : > { %v4315_v1 = vpop.f32.mrb[0].mxu1 }
 0x2e7   : > { %v4767_v3 = vpop.f32.mrb[0].mxu0  ;;  %v4317_v5 = vpop.f32.mrb[1].mxu1 }
 0x2e8   : > { %v5853_v4 = vadd.f32 %v4767_v3, %v4315_v1  ;;  %v4769_v7 = vpop.f32.mrb[1].mxu0  ;;  %v4319_v9 = vpop.f32.mrb[2].mxu1 }
 0x2e9   : > { %v5854_v8 = vadd.f32 %v4769_v7, %v4317_v5  ;;  %v4771_v11 = vpop.f32.mrb[2].mxu0  ;;  %v4321_v14 = vpop.f32.mrb[3].mxu1 }
 0x2ea   : > { %v4846_v12 = vadd.f32 %v5853_v4, %v1606_v2  ;;  %v5855_v13 = vadd.f32 %v4771_v11, %v4319_v9  ;;  %v4773_v16 = vpop.f32.mrb[3].mxu0  ;;  %v1619_v2 = vld [vmem:[#allocation2 + $0x68] sm:$0xff]  ;;  %v1621_v11 = vld [vmem:[#allocation2 + $0x78] sm:$0xff] }
 0x2eb   : > { %v4847_v17 = vadd.f32 %v5854_v8, %v1607_v6  ;;  %v5856_v18 = vadd.f32 %v4773_v16, %v4321_v14  ;;  %v1620_v6 = vld [vmem:[#allocation2 + $0x70] sm:$0xff] }
 0x2ec   : > { %4878 = vst [vmem:[#allocation2] sm:$0xff] %v4846_v12  ;;  %v4848_v19 = vadd.f32 %v5855_v13, %v1608_v10 }
 0x2ed   : > { %4879 = vst [vmem:[#allocation2 + $0x8] sm:$0xff] %v4847_v17  ;;  %v4849_v20 = vadd.f32 %v5856_v18, %v1609_v15  ;;  %v1622_v18 = vld [vmem:[#allocation2 + $0x80] sm:$0xff] }
 0x2ee   : > { %4880 = vst [vmem:[#allocation2 + $0x10] sm:$0xff] %v4848_v19  ;;  %v4325_v21 = vpop.f32.mrb[4].mxu1 }
 0x2ef   : > { %4881 = vst [vmem:[#allocation2 + $0x18] sm:$0xff] %v4849_v20  ;;  %v4777_v23 = vpop.f32.mrb[4].mxu0  ;;  %v4327_v25 = vpop.f32.mrb[5].mxu1 }
 0x2f0   : > { %v5857_v24 = vadd.f32 %v4777_v23, %v4325_v21  ;;  %v4779_v27 = vpop.f32.mrb[5].mxu0  ;;  %v4329_v29 = vpop.f32.mrb[6].mxu1 }
 0x2f1   : > { %v5858_v28 = vadd.f32 %v4779_v27, %v4327_v25  ;;  %v4781_v31 = vpop.f32.mrb[6].mxu0  ;;  %v4331_v34 = vpop.f32.mrb[7].mxu1 }
 0x2f2   : > { %v4850_v32 = vadd.f32 %v5857_v24, %v1610_v22  ;;  %v5859_v33 = vadd.f32 %v4781_v31, %v4329_v29  ;;  %v4783_v36 = vpop.f32.mrb[7].mxu0  ;;  %v1623_v22 = vld [vmem:[#allocation2 + $0x88] sm:$0xff]  ;;  %v1625_v31 = vld [vmem:[#allocation2 + $0x98] sm:$0xff] }
 0x2f3   : > { %v4851_v37 = vadd.f32 %v5858_v28, %v1611_v26  ;;  %v5860_v38 = vadd.f32 %v4783_v36, %v4331_v34  ;;  %v1624_v26 = vld [vmem:[#allocation2 + $0x90] sm:$0xff] }
 0x2f4   : > { %4882 = vst [vmem:[#allocation2 + $0x20] sm:$0xff] %v4850_v32  ;;  %v4852_v39 = vadd.f32 %v5859_v33, %v1612_v30 }
 0x2f5   : > { %4883 = vst [vmem:[#allocation2 + $0x28] sm:$0xff] %v4851_v37  ;;  %v4853_v40 = vadd.f32 %v5860_v38, %v1613_v35  ;;  %v1626_v38 = vld [vmem:[#allocation2 + $0xa0] sm:$0xff] }
 0x2f6   : > { %4884 = vst [vmem:[#allocation2 + $0x30] sm:$0xff] %v4852_v39  ;;  %v4335_v41 = vpop.f32.mrb[8].mxu1 }
 0x2f7   : > { %4885 = vst [vmem:[#allocation2 + $0x38] sm:$0xff] %v4853_v40  ;;  %v4787_v43 = vpop.f32.mrb[8].mxu0  ;;  %v4337_v45 = vpop.f32.mrb[9].mxu1 }
 0x2f8   : > { %v5861_v44 = vadd.f32 %v4787_v43, %v4335_v41  ;;  %v4789_v47 = vpop.f32.mrb[9].mxu0  ;;  %v4339_v49 = vpop.f32.mrb[10].mxu1 }
 0x2f9   : > { %v5862_v48 = vadd.f32 %v4789_v47, %v4337_v45  ;;  %v4791_v51 = vpop.f32.mrb[10].mxu0  ;;  %v4341_v54 = vpop.f32.mrb[11].mxu1 }
 0x2fa   : > { %v4854_v52 = vadd.f32 %v5861_v44, %v1614_v42  ;;  %v5863_v53 = vadd.f32 %v4791_v51, %v4339_v49  ;;  %v4793_v56 = vpop.f32.mrb[11].mxu0  ;;  %v1627_v42 = vld [vmem:[#allocation2 + $0xa8] sm:$0xff]  ;;  %v1629_v51 = vld [vmem:[#allocation2 + $0xb8] sm:$0xff] }
 0x2fb   : > { %v4855_v57 = vadd.f32 %v5862_v48, %v1615_v46  ;;  %v5864_v58 = vadd.f32 %v4793_v56, %v4341_v54  ;;  %v1628_v46 = vld [vmem:[#allocation2 + $0xb0] sm:$0xff] }
 0x2fc   : > { %4886 = vst [vmem:[#allocation2 + $0x40] sm:$0xff] %v4854_v52  ;;  %v4856_v59 = vadd.f32 %v5863_v53, %v1616_v50 }
 0x2fd   : > { %4887 = vst [vmem:[#allocation2 + $0x48] sm:$0xff] %v4855_v57  ;;  %v4857_v60 = vadd.f32 %v5864_v58, %v1617_v55  ;;  %v1630_v58 = vld [vmem:[#allocation2 + $0xc0] sm:$0xff] }
 0x2fe   : > { %4888 = vst [vmem:[#allocation2 + $0x50] sm:$0xff] %v4856_v59  ;;  %v4345_v61 = vpop.f32.mrb[12].mxu1 }
 0x2ff   : > { %4889 = vst [vmem:[#allocation2 + $0x58] sm:$0xff] %v4857_v60  ;;  %v4797_v63 = vpop.f32.mrb[12].mxu0  ;;  %v4347_v1 = vpop.f32.mrb[13].mxu1 }
 0x300   : > { %v5865_v0 = vadd.f32 %v4797_v63, %v4345_v61  ;;  %v4799_v3 = vpop.f32.mrb[13].mxu0  ;;  %v4349_v5 = vpop.f32.mrb[14].mxu1 }
 0x301   : > { %v5866_v4 = vadd.f32 %v4799_v3, %v4347_v1  ;;  %v4801_v7 = vpop.f32.mrb[14].mxu0  ;;  %v4351_v10 = vpop.f32.mrb[15].mxu1 }
 0x302   : > { %v4858_v8 = vadd.f32 %v5865_v0, %v1618_v62  ;;  %v5867_v9 = vadd.f32 %v4801_v7, %v4349_v5  ;;  %v4803_v12 = vpop.f32.mrb[15].mxu0  ;;  %v1631_v62 = vld [vmem:[#allocation2 + $0xc8] sm:$0xff]  ;;  %v1633_v7 = vld [vmem:[#allocation2 + $0xd8] sm:$0xff] }
 0x303   : > { %v4859_v13 = vadd.f32 %v5866_v4, %v1619_v2  ;;  %v5868_v14 = vadd.f32 %v4803_v12, %v4351_v10  ;;  %v1632_v2 = vld [vmem:[#allocation2 + $0xd0] sm:$0xff] }
 0x304   : > { %4890 = vst [vmem:[#allocation2 + $0x60] sm:$0xff] %v4858_v8  ;;  %v4860_v15 = vadd.f32 %v5867_v9, %v1620_v6 }
 0x305   : > { %4891 = vst [vmem:[#allocation2 + $0x68] sm:$0xff] %v4859_v13  ;;  %v4861_v16 = vadd.f32 %v5868_v14, %v1621_v11  ;;  %v1634_v14 = vld [vmem:[#allocation2 + $0xe0] sm:$0xff] }
 0x306   : > { %4892 = vst [vmem:[#allocation2 + $0x70] sm:$0xff] %v4860_v15  ;;  %v4355_v17 = vpop.f32.mrb[16].mxu1 }
 0x307   : > { %4893 = vst [vmem:[#allocation2 + $0x78] sm:$0xff] %v4861_v16  ;;  %v4807_v19 = vpop.f32.mrb[16].mxu0  ;;  %v4357_v21 = vpop.f32.mrb[17].mxu1 }
 0x308   : > { %v5869_v20 = vadd.f32 %v4807_v19, %v4355_v17  ;;  %v4809_v23 = vpop.f32.mrb[17].mxu0  ;;  %v4359_v25 = vpop.f32.mrb[18].mxu1 }
 0x309   : > { %v5870_v24 = vadd.f32 %v4809_v23, %v4357_v21  ;;  %v4811_v27 = vpop.f32.mrb[18].mxu0  ;;  %v4361_v30 = vpop.f32.mrb[19].mxu1 }
 0x30a   : > { %v4862_v28 = vadd.f32 %v5869_v20, %v1622_v18  ;;  %v5871_v29 = vadd.f32 %v4811_v27, %v4359_v25  ;;  %v4813_v32 = vpop.f32.mrb[19].mxu0  ;;  %v1635_v18 = vld [vmem:[#allocation2 + $0xe8] sm:$0xff]  ;;  %v1637_v27 = vld [vmem:[#allocation2 + $0xf8] sm:$0xff] }
 0x30b   : > { %v4863_v33 = vadd.f32 %v5870_v24, %v1623_v22  ;;  %v5872_v34 = vadd.f32 %v4813_v32, %v4361_v30  ;;  %v1636_v22 = vld [vmem:[#allocation2 + $0xf0] sm:$0xff] }
 0x30c   : > { %4894 = vst [vmem:[#allocation2 + $0x80] sm:$0xff] %v4862_v28  ;;  %v4864_v35 = vadd.f32 %v5871_v29, %v1624_v26 }
 0x30d   : > { %4895 = vst [vmem:[#allocation2 + $0x88] sm:$0xff] %v4863_v33  ;;  %v4865_v36 = vadd.f32 %v5872_v34, %v1625_v31  ;;  %v4948_v33 = vlaneseq (!%p5812_p5) }
 0x30e   : > { %4896 = vst [vmem:[#allocation2 + $0x90] sm:$0xff] %v4864_v35  ;;  %v4365_v37 = vpop.f32.mrb[20].mxu1  ;;  %v4946_v35 = vld [vmem:[%s1566_s29] sm:$0x3] (!%p5812_p5) }
 0x30f   : > { %4897 = vst [vmem:[#allocation2 + $0x98] sm:$0xff] %v4865_v36  ;;  %v4817_v39 = vpop.f32.mrb[20].mxu0  ;;  %v4367_v41 = vpop.f32.mrb[21].mxu1  ;;  %v4949_v34 = vshrl.u32 (!%p5812_p5), %v4948_v33, 7  ;;  %v4914_v36 = vld [vmem:[#allocation2] sm:$0xff] (!%p5812_p5) }
 0x310   : > { %v5873_v40 = vadd.f32 %v4817_v39, %v4365_v37  ;;  %v4819_v43 = vpop.f32.mrb[21].mxu0  ;;  %v4369_v45 = vpop.f32.mrb[22].mxu1  ;;  %v4915_v37 = vld [vmem:[#allocation2 + $0x8] sm:$0xff] (!%p5812_p5) }
 0x311   : > { %v5874_v44 = vadd.f32 %v4819_v43, %v4367_v41  ;;  %v4821_v47 = vpop.f32.mrb[22].mxu0  ;;  %v4371_v50 = vpop.f32.mrb[23].mxu1  ;;  %v4954_v39 = vsub.s32 (!%p5812_p5), 1, %v4949_v34  ;;  %v4917_v41 = vld [vmem:[#allocation2 + $0x18] sm:$0xff] (!%p5812_p5) }
 0x312   : > { %v4866_v48 = vadd.f32 %v5873_v40, %v1626_v38  ;;  %v5875_v49 = vadd.f32 %v4821_v47, %v4369_v45  ;;  %v4823_v52 = vpop.f32.mrb[23].mxu0  ;;  %v4950_v38 = vsub.s32 (!%p5812_p5), 0, %v4949_v34  ;;  %v4916_v40 = vld [vmem:[#allocation2 + $0x10] sm:$0xff] (!%p5812_p5)  ;;  %v4919_v45 = vld [vmem:[#allocation2 + $0x28] sm:$0xff] (!%p5812_p5)  ;;  %v4921_v47 = vld [vmem:[#allocation2 + $0x38] sm:$0xff] (!%p5812_p5) }
 0x313   : > { %v4867_v53 = vadd.f32 %v5874_v44, %v1627_v42  ;;  %v5876_v54 = vadd.f32 %v4823_v52, %v4371_v50  ;;  %v4918_v42 = vld [vmem:[#allocation2 + $0x20] sm:$0xff] (!%p5812_p5)  ;;  %v7960_v44 = vrot.slane (!%p5812_p5), %v4946_v35, %v4954_v39 }
 0x314   : > { %4898 = vst [vmem:[#allocation2 + $0xa0] sm:$0xff] %v4866_v48  ;;  %v4868_v55 = vadd.f32 %v5875_v49, %v1628_v46  ;;  %v7958_v43 = vrot.slane (!%p5812_p5), %v4946_v35, %v4950_v38  ;;  %v4920_v46 = vld [vmem:[#allocation2 + $0x30] sm:$0xff] (!%p5812_p5) }
 0x315   : > { %4899 = vst [vmem:[#allocation2 + $0xa8] sm:$0xff] %v4867_v53  ;;  %v4869_v56 = vadd.f32 %v5876_v54, %v1629_v51  ;;  %v4959_v49 = vadd.f32 (!%p5812_p5), %v7960_v44, %v4915_v37  ;;  %v4961_v51 = vadd.f32 (!%p5812_p5), %v7960_v44, %v4917_v41  ;;  %v4963_v53 = vadd.f32 (!%p5812_p5), %v7960_v44, %v4919_v45  ;;  %v4931_v37 = vld [vmem:[#allocation2 + $0x88] sm:$0xff] (!%p5812_p5)  ;;  %v4932_v38 = vld [vmem:[#allocation2 + $0x90] sm:$0xff] (!%p5812_p5) }
 0x316   : > { %4900 = vst [vmem:[#allocation2 + $0xb0] sm:$0xff] %v4868_v55  ;;  %v4375_v57 = vpop.f32.mrb[24].mxu1  ;;  %v4958_v48 = vadd.f32 (!%p5812_p5), %v7958_v43, %v4914_v36  ;;  %v4960_v50 = vadd.f32 (!%p5812_p5), %v7958_v43, %v4916_v40  ;;  %v4962_v52 = vadd.f32 (!%p5812_p5), %v7958_v43, %v4918_v42  ;;  %v4964_v54 = vadd.f32 (!%p5812_p5), %v7958_v43, %v4920_v46  ;;  %v4930_v36 = vld [vmem:[#allocation2 + $0x80] sm:$0xff] (!%p5812_p5) }
 0x317   : > { %4901 = vst [vmem:[#allocation2 + $0xb8] sm:$0xff] %v4869_v56  ;;  %v4827_v59 = vpop.f32.mrb[24].mxu0  ;;  %v4377_v61 = vpop.f32.mrb[25].mxu1  ;;  %v4965_v55 = vadd.f32 (!%p5812_p5), %v7960_v44, %v4921_v47  ;;  %vm4991_vm1 = vcmp.gt.f32.partialorder (!%p5812_p5), %v4959_v49, 0.0  ;;  %vm4993_vm3 = vcmp.gt.f32.partialorder (!%p5812_p5), %v4961_v51, 0.0  ;;  %vm4995_vm5 = vcmp.gt.f32.partialorder (!%p5812_p5), %v4963_v53, 0.0 }
 0x318   : > { %v5877_v60 = vadd.f32 %v4827_v59, %v4375_v57  ;;  %v4829_v63 = vpop.f32.mrb[25].mxu0  ;;  %v4379_v1 = vpop.f32.mrb[26].mxu1  ;;  %vm4990_vm0 = vcmp.gt.f32.partialorder (!%p5812_p5), %v4958_v48, 0.0  ;;  %v5022_v56 = vmul.f32 (!%p5812_p5), 0.2, %v4958_v48  ;;  %vm4992_vm2 = vcmp.gt.f32.partialorder (!%p5812_p5), %v4960_v50, 0.0 }
 0x319   : > { %v5878_v0 = vadd.f32 %v4829_v63, %v4377_v61  ;;  %v4831_v3 = vpop.f32.mrb[26].mxu0  ;;  %v4381_v6 = vpop.f32.mrb[27].mxu1  ;;  %v5023_v57 = vmul.f32 (!%p5812_p5), 0.2, %v4959_v49  ;;  %v5025_v59 = vmul.f32 (!%p5812_p5), 0.2, %v4961_v51  ;;  %v4974_v47 = vadd.f32 (!%p5812_p5), %v7958_v43, %v4930_v36 }
 0x31a   : > { %v4870_v4 = vadd.f32 %v5877_v60, %v1630_v58  ;;  %v5879_v5 = vadd.f32 %v4831_v3, %v4379_v1  ;;  %v4833_v8 = vpop.f32.mrb[27].mxu0  ;;  %v5024_v58 = vmul.f32 (!%p5812_p5), 0.2, %v4960_v50  ;;  %v5054_v60 = vsel (!%p5812_p5), %vm4990_vm0, %v4958_v48, %v5022_v56  ;;  %v4923_v3 = vld [vmem:[#allocation2 + $0x48] sm:$0xff] (!%p5812_p5) }
 0x31b   : > { %v4871_v9 = vadd.f32 %v5878_v0, %v1631_v62  ;;  %v5880_v10 = vadd.f32 %v4833_v8, %v4381_v6  ;;  %v5055_v61 = vsel (!%p5812_p5), %vm4991_vm1, %v4959_v49, %v5023_v57  ;;  %vm4994_vm4 = vcmp.gt.f32.partialorder (!%p5812_p5), %v4962_v52, 0.0  ;;  %v4922_v62 = vld [vmem:[#allocation2 + $0x40] sm:$0xff] (!%p5812_p5)  ;;  %v4933_v49 = vld [vmem:[#allocation2 + $0x98] sm:$0xff] (!%p5812_p5) }
 0x31c   : > { %4902 = vst [vmem:[#allocation2 + $0xc0] sm:$0xff] %v4870_v4  ;;  %v4872_v11 = vadd.f32 %v5879_v5, %v1632_v2  ;;  %v5836_v63 = vpack.c.bf16 (!%p5812_p5), %v5055_v61, %v5054_v60  ;;  %v5056_v0 = vsel (!%p5812_p5), %vm4992_vm2, %v4960_v50, %v5024_v58  ;;  %v5057_v1 = vsel (!%p5812_p5), %vm4993_vm3, %v4961_v51, %v5025_v59  ;;  %v4924_v4 = vld [vmem:[#allocation2 + $0x50] sm:$0xff] (!%p5812_p5)  ;;  %v4925_v5 = vld [vmem:[#allocation2 + $0x58] sm:$0xff] (!%p5812_p5)  ;;  %v4935_v57 = vld [vmem:[#allocation2 + $0xa8] sm:$0xff] (!%p5812_p5) }
 0x31d   : > { %4903 = vst [vmem:[#allocation2 + $0xc8] sm:$0xff] %v4871_v9  ;;  %v4873_v12 = vadd.f32 %v5880_v10, %v1633_v7  ;;  %v5026_v2 = vmul.f32 (!%p5812_p5), 0.2, %v4962_v52  ;;  %v5837_v6 = vpack.c.bf16 (!%p5812_p5), %v5057_v1, %v5056_v0  ;;  %v5027_v7 = vmul.f32 (!%p5812_p5), 0.2, %v4963_v53  ;;  %v4936_v1 = vld [vmem:[#allocation2 + $0xb0] sm:$0xff] (!%p5812_p5) }
 0x31e   : > { %4904 = vst [vmem:[#allocation2 + $0xd0] sm:$0xff] %v4872_v11  ;;  %v4385_v13 = vpop.f32.mrb[28].mxu1  ;;  %vm4996_vm6 = vcmp.gt.f32.partialorder (!%p5812_p5), %v4964_v54, 0.0  ;;  %vm4997_vm7 = vcmp.gt.f32.partialorder (!%p5812_p5), %v4965_v55, 0.0  ;;  %5182 = vst [vmem:[%s7565_s1] sm:$0xff] (!%p5812_p5), %v5836_v63  ;;  %v5028_v9 = vmul.f32 (!%p5812_p5), 0.2, %v4964_v54  ;;  %v4966_v11 = vadd.f32 (!%p5812_p5), %v7958_v43, %v4922_v62 }
 0x31f   : > { %4905 = vst [vmem:[#allocation2 + $0xd8] sm:$0xff] %v4873_v12  ;;  %v4837_v15 = vpop.f32.mrb[28].mxu0  ;;  %v4387_v17 = vpop.f32.mrb[29].mxu1  ;;  %v5058_v8 = vsel (!%p5812_p5), %vm4994_vm4, %v4962_v52, %v5026_v2  ;;  %v5029_v10 = vmul.f32 (!%p5812_p5), 0.2, %v4965_v55  ;;  %5183 = vst [vmem:[%s7565_s1 + $0x8] sm:$0xff] (!%p5812_p5), %v5837_v6  ;;  %v5059_v12 = vsel (!%p5812_p5), %vm4995_vm5, %v4963_v53, %v5027_v7  ;;  %v4975_v48 = vadd.f32 (!%p5812_p5), %v7960_v44, %v4931_v37 }
 0x320   : > { %v5881_v16 = vadd.f32 %v4837_v15, %v4385_v13  ;;  %v4839_v19 = vpop.f32.mrb[29].mxu0  ;;  %v4389_v21 = vpop.f32.mrb[30].mxu1  ;;  %v4967_v13 = vadd.f32 (!%p5812_p5), %v7960_v44, %v4923_v3  ;;  %v4969_v15 = vadd.f32 (!%p5812_p5), %v7960_v44, %v4925_v5  ;;  %vm4998_vm8 = vcmp.gt.f32.partialorder (!%p5812_p5), %v4966_v11, 0.0  ;;  %v4937_v5 = vld [vmem:[#allocation2 + $0xb8] sm:$0xff] (!%p5812_p5) }
 0x321   : > { %v5882_v20 = vadd.f32 %v4839_v19, %v4387_v17  ;;  %v4841_v23 = vpop.f32.mrb[30].mxu0  ;;  %v4391_v26 = vpop.f32.mrb[31].mxu1  ;;  %4913 = sbr.rel (%p5812_p5) target bundleno = 834 (0x342), region = 101  ;;  %v5060_v17 = vsel (!%p5812_p5), %vm4996_vm6, %v4964_v54, %v5028_v9  ;;  %v4926_v19 = vld [vmem:[#allocation2 + $0x60] sm:$0xff] (!%p5812_p5)  ;;  %v4976_v50 = vadd.f32 (!%p5812_p5), %v7958_v43, %v4932_v38  ;;  %vm5006_vm0 = vcmp.gt.f32.partialorder (!%p5812_p5), %v4974_v47, 0.0 }
 0x322   : > { %v4874_v24 = vadd.f32 %v5881_v16, %v1634_v14  ;;  %v5883_v25 = vadd.f32 %v4841_v23, %v4389_v21  ;;  %v4843_v28 = vpop.f32.mrb[31].mxu0  ;;  %v4968_v14 = vadd.f32 (!%p5812_p5), %v7958_v43, %v4924_v4  ;;  %v5838_v16 = vpack.c.bf16 (!%p5812_p5), %v5059_v12, %v5058_v8  ;;  %v4934_v54 = vld [vmem:[#allocation2 + $0xa0] sm:$0xff] (!%p5812_p5) }
 0x323   : > { %v4875_v29 = vadd.f32 %v5882_v20, %v1635_v18  ;;  %v5884_v30 = vadd.f32 %v4843_v28, %v4391_v26  ;;  %v5061_v18 = vsel (!%p5812_p5), %vm4997_vm7, %v4965_v55, %v5029_v10  ;;  %v4927_v20 = vld [vmem:[#allocation2 + $0x68] sm:$0xff] (!%p5812_p5)  ;;  %vm4999_vm9 = vcmp.gt.f32.partialorder (!%p5812_p5), %v4967_v13, 0.0  ;;  %v4938_v6 = vld [vmem:[#allocation2 + $0xc0] sm:$0xff] (!%p5812_p5) }
 0x324   : > { %4906 = vst [vmem:[#allocation2 + $0xe0] sm:$0xff] %v4874_v24  ;;  %v4876_v31 = vadd.f32 %v5883_v25, %v1636_v22  ;;  %v5839_v21 = vpack.c.bf16 (!%p5812_p5), %v5061_v18, %v5060_v17  ;;  %v5030_v22 = vmul.f32 (!%p5812_p5), 0.2, %v4966_v11  ;;  %v5031_v23 = vmul.f32 (!%p5812_p5), 0.2, %v4967_v13  ;;  %v4928_v24 = vld [vmem:[#allocation2 + $0x70] sm:$0xff] (!%p5812_p5) }
 0x325   : > { %4907 = vst [vmem:[#allocation2 + $0xe8] sm:$0xff] %v4875_v29  ;;  %v4877_v32 = vadd.f32 %v5884_v30, %v1637_v27  ;;  %5184 = vst [vmem:[%s7565_s1 + $0x10] sm:$0xff] (!%p5812_p5), %v5838_v16  ;;  %vm5000_vm10 = vcmp.gt.f32.partialorder (!%p5812_p5), %v4968_v14, 0.0  ;;  %vm5001_vm11 = vcmp.gt.f32.partialorder (!%p5812_p5), %v4969_v15, 0.0  ;;  %v5032_v25 = vmul.f32 (!%p5812_p5), 0.2, %v4968_v14 }
 0x326   : > { %4908 = vst [vmem:[#allocation2 + $0xf0] sm:$0xff] %v4876_v31  ;;  %v5033_v26 = vmul.f32 (!%p5812_p5), 0.2, %v4969_v15  ;;  %5185 = vst [vmem:[%s7565_s1 + $0x18] sm:$0xff] (!%p5812_p5), %v5839_v21  ;;  %v5062_v27 = vsel (!%p5812_p5), %vm4998_vm8, %v4966_v11, %v5030_v22  ;;  %v5063_v28 = vsel (!%p5812_p5), %vm4999_vm9, %v4967_v13, %v5031_v23  ;;  %v4970_v29 = vadd.f32 (!%p5812_p5), %v7958_v43, %v4926_v19  ;;  %v4929_v31 = vld [vmem:[#allocation2 + $0x78] sm:$0xff] (!%p5812_p5)  ;;  %v4939_v10 = vld [vmem:[#allocation2 + $0xc8] sm:$0xff] (!%p5812_p5) }
 0x327   : > { %4909 = vst [vmem:[#allocation2 + $0xf8] sm:$0xff] %v4877_v32  ;;  %v4971_v30 = vadd.f32 (!%p5812_p5), %v7960_v44, %v4927_v20  ;;  %v5840_v32 = vpack.c.bf16 (!%p5812_p5), %v5063_v28, %v5062_v27  ;;  %v5064_v33 = vsel (!%p5812_p5), %vm5000_vm10, %v4968_v14, %v5032_v25  ;;  %v4972_v35 = vadd.f32 (!%p5812_p5), %v7958_v43, %v4928_v24  ;;  %v4940_v21 = vld [vmem:[#allocation2 + $0xd0] sm:$0xff] (!%p5812_p5)  ;;  %v4941_v22 = vld [vmem:[#allocation2 + $0xd8] sm:$0xff] (!%p5812_p5) }
 0x328   : > { %v5065_v34 = vsel %vm5001_vm11, %v4969_v15, %v5033_v26  ;;  %vm5002_vm12 = vcmp.gt.f32.partialorder %v4970_v29, 0.0  ;;  %v5034_v40 = vmul.f32 0.2, %v4970_v29  ;;  %v4973_v42 = vadd.f32 %v7960_v44, %v4929_v31 }
 0x329   : > { %v5841_v39 = vpack.c.bf16 %v5065_v34, %v5064_v33  ;;  %vm5003_vm13 = vcmp.gt.f32.partialorder %v4971_v30, 0.0  ;;  %5186 = vst [vmem:[%s7565_s1 + $0x20] sm:$0xff] %v5840_v32  ;;  %v5035_v41 = vmul.f32 0.2, %v4971_v30  ;;  %vm5004_vm14 = vcmp.gt.f32.partialorder %v4972_v35, 0.0 }
 0x32a   : > { %v5036_v45 = vmul.f32 0.2, %v4972_v35  ;;  %v5066_v46 = vsel %vm5002_vm12, %v4970_v29, %v5034_v40  ;;  %vm5005_vm15 = vcmp.gt.f32.partialorder %v4973_v42, 0.0  ;;  %v5037_v52 = vmul.f32 0.2, %v4973_v42 }
 0x32b   : > { %5187 = vst [vmem:[%s7565_s1 + $0x28] sm:$0xff] %v5841_v39  ;;  %v5067_v51 = vsel %vm5003_vm13, %v4971_v30, %v5035_v41  ;;  %vm5007_vm1 = vcmp.gt.f32.partialorder %v4975_v48, 0.0  ;;  %v5038_v56 = vmul.f32 0.2, %v4974_v47  ;;  %v5039_v59 = vmul.f32 0.2, %v4975_v48 }
 0x32c   : > { %v5068_v53 = vsel %vm5004_vm14, %v4972_v35, %v5036_v45  ;;  %v5842_v55 = vpack.c.bf16 %v5067_v51, %v5066_v46  ;;  %v5069_v58 = vsel %vm5005_vm15, %v4973_v42, %v5037_v52  ;;  %v4977_v60 = vadd.f32 %v7960_v44, %v4933_v49  ;;  %v4942_v23 = vld [vmem:[#allocation2 + $0xe0] sm:$0xff]  ;;  %v4943_v26 = vld [vmem:[#allocation2 + $0xe8] sm:$0xff] }
 0x32d   : > { %vm5008_vm2 = vcmp.gt.f32.partialorder %v4976_v50, 0.0  ;;  %v5843_v61 = vpack.c.bf16 %v5069_v58, %v5068_v53  ;;  %v5070_v62 = vsel %vm5006_vm0, %v4974_v47, %v5038_v56  ;;  %v5040_v63 = vmul.f32 0.2, %v4976_v50  ;;  %v4944_v38 = vld [vmem:[#allocation2 + $0xf0] sm:$0xff] }
 0x32e   : > { %5188 = vst [vmem:[%s7565_s1 + $0x30] sm:$0xff] %v5842_v55  ;;  %v4978_v0 = vadd.f32 %v7958_v43, %v4934_v54  ;;  %v5071_v2 = vsel %vm5007_vm1, %v4975_v48, %v5039_v59  ;;  %vm5009_vm3 = vcmp.gt.f32.partialorder %v4977_v60, 0.0  ;;  %v5041_v3 = vmul.f32 0.2, %v4977_v60  ;;  %v4945_v39 = vld [vmem:[#allocation2 + $0xf8] sm:$0xff] }
 0x32f   : > { %v4979_v4 = vadd.f32 %v7960_v44, %v4935_v57  ;;  %5189 = vst [vmem:[%s7565_s1 + $0x38] sm:$0xff] %v5843_v61  ;;  %v5844_v7 = vpack.c.bf16 %v5071_v2, %v5070_v62  ;;  %v5072_v8 = vsel %vm5008_vm2, %v4976_v50, %v5040_v63  ;;  %v4980_v13 = vadd.f32 %v7958_v43, %v4936_v1 }
 0x330   : > { %vm5010_vm4 = vcmp.gt.f32.partialorder %v4978_v0, 0.0  ;;  %v5042_v9 = vmul.f32 0.2, %v4978_v0  ;;  %v5073_v11 = vsel %vm5009_vm3, %v4977_v60, %v5041_v3  ;;  %v4981_v16 = vadd.f32 %v7960_v44, %v4937_v5 }
 0x331   : > { %vm5011_vm5 = vcmp.gt.f32.partialorder %v4979_v4, 0.0  ;;  %v5043_v12 = vmul.f32 0.2, %v4979_v4  ;;  %5190 = vst [vmem:[%s7565_s1 + $0x40] sm:$0xff] %v5844_v7  ;;  %v5845_v14 = vpack.c.bf16 %v5073_v11, %v5072_v8  ;;  %v4982_v17 = vadd.f32 %v7958_v43, %v4938_v6 }
 0x332   : > { %v5074_v15 = vsel %vm5010_vm4, %v4978_v0, %v5042_v9  ;;  %vm5012_vm6 = vcmp.gt.f32.partialorder %v4980_v13, 0.0  ;;  %v5044_v19 = vmul.f32 0.2, %v4980_v13  ;;  %v4983_v20 = vadd.f32 %v7960_v44, %v4939_v10 }
 0x333   : > { %v5075_v18 = vsel %vm5011_vm5, %v4979_v4, %v5043_v12  ;;  %5191 = vst [vmem:[%s7565_s1 + $0x48] sm:$0xff] %v5845_v14  ;;  %vm5013_vm7 = vcmp.gt.f32.partialorder %v4981_v16, 0.0  ;;  %v5045_v25 = vmul.f32 0.2, %v4981_v16  ;;  %vm5014_vm8 = vcmp.gt.f32.partialorder %v4982_v17, 0.0 }
 0x334   : > { %v5846_v24 = vpack.c.bf16 %v5075_v18, %v5074_v15  ;;  %v5076_v27 = vsel %vm5012_vm6, %v4980_v13, %v5044_v19  ;;  %vm5015_vm9 = vcmp.gt.f32.partialorder %v4983_v20, 0.0  ;;  %v5046_v28 = vmul.f32 0.2, %v4982_v17 }
 0x335   : > { %v5047_v29 = vmul.f32 0.2, %v4983_v20  ;;  %v5077_v30 = vsel %vm5013_vm7, %v4981_v16, %v5045_v25  ;;  %v4984_v31 = vadd.f32 %v7958_v43, %v4940_v21  ;;  %v4985_v32 = vadd.f32 %v7960_v44, %v4941_v22 }
 0x336   : > { %5192 = vst [vmem:[%s7565_s1 + $0x50] sm:$0xff] %v5846_v24  ;;  %v4986_v33 = vadd.f32 %v7958_v43, %v4942_v23  ;;  %v5847_v34 = vpack.c.bf16 %v5077_v30, %v5076_v27  ;;  %v5078_v35 = vsel %vm5014_vm8, %v4982_v17, %v5046_v28  ;;  %v4987_v37 = vadd.f32 %v7960_v44, %v4943_v26 }
 0x337   : > { %v5079_v36 = vsel %vm5015_vm9, %v4983_v20, %v5047_v29  ;;  %vm5016_vm10 = vcmp.gt.f32.partialorder %v4984_v31, 0.0  ;;  %vm5017_vm11 = vcmp.gt.f32.partialorder %v4985_v32, 0.0  ;;  %v5048_v41 = vmul.f32 0.2, %v4984_v31 }
 0x338   : > { %v5848_v40 = vpack.c.bf16 %v5079_v36, %v5078_v35  ;;  %5193 = vst [vmem:[%s7565_s1 + $0x58] sm:$0xff] %v5847_v34  ;;  %v5049_v42 = vmul.f32 0.2, %v4985_v32  ;;  %vm5018_vm12 = vcmp.gt.f32.partialorder %v4986_v33, 0.0  ;;  %vm5019_vm13 = vcmp.gt.f32.partialorder %v4987_v37, 0.0 }
 0x339   : > { %v5050_v45 = vmul.f32 0.2, %v4986_v33  ;;  %v5080_v46 = vsel %vm5016_vm10, %v4984_v31, %v5048_v41  ;;  %v5051_v47 = vmul.f32 0.2, %v4987_v37  ;;  %v4988_v48 = vadd.f32 %v7958_v43, %v4944_v38 }
 0x33a   : > { %5194 = vst [vmem:[%s7565_s1 + $0x60] sm:$0xff] %v5848_v40  ;;  %v4989_v49 = vadd.f32 %v7960_v44, %v4945_v39  ;;  %v5081_v50 = vsel %vm5017_vm11, %v4985_v32, %v5049_v42 }
 0x33b   : > { %v5082_v51 = vsel %vm5018_vm12, %v4986_v33, %v5050_v45  ;;  %v5849_v52 = vpack.c.bf16 %v5081_v50, %v5080_v46  ;;  %v5083_v53 = vsel %vm5019_vm13, %v4987_v37, %v5051_v47  ;;  %vm5020_vm14 = vcmp.gt.f32.partialorder %v4988_v48, 0.0 }
 0x33c   : > { %vm5021_vm15 = vcmp.gt.f32.partialorder %v4989_v49, 0.0  ;;  %v5850_v54 = vpack.c.bf16 %v5083_v53, %v5082_v51  ;;  %v5052_v55 = vmul.f32 0.2, %v4988_v48  ;;  %v5053_v56 = vmul.f32 0.2, %v4989_v49 }
 0x33d   : > { %5195 = vst [vmem:[%s7565_s1 + $0x68] sm:$0xff] %v5849_v52 }
 0x33e   : > { %5196 = vst [vmem:[%s7565_s1 + $0x70] sm:$0xff] %v5850_v54  ;;  %v5084_v57 = vsel %vm5020_vm14, %v4988_v48, %v5052_v55  ;;  %v5085_v58 = vsel %vm5021_vm15, %v4989_v49, %v5053_v56 }
 0x33f   : > { %v5851_v59 = vpack.c.bf16 %v5085_v58, %v5084_v57 }
 0x341   : > { %5197 = vst [vmem:[%s7565_s1 + $0x78] sm:$0xff] %v5851_v59 }
 0x342 PF: > { %5204 = sbr.rel (!%p6753_p12) target bundleno = 844 (0x34c), region = 105  ;;  %s5852_s16 = sshll.u32 (%p6753_p12), %s6624_s19, 3  ;;  %v5268_v43 = vld [vmem:[%s7565_s1] sm:$0xff] (%p6753_p12)  ;;  %v5270_v44 = vld [vmem:[%s7565_s1 + $0x8] sm:$0xff] (%p6753_p12)  ;;  %v5280_v0 = vld [vmem:[%s7565_s1 + $0x30] sm:$0xff] (%p6753_p12) }
 0x343   : > { %s5210_s5 = scalar_lea.vmem (%p6753_p12), %s8069_s3, %s5852_s16  ;;  %v5276_v62 = vld [vmem:[%s7565_s1 + $0x20] sm:$0xff] (%p6753_p12)  ;;  %v5278_v63 = vld [vmem:[%s7565_s1 + $0x28] sm:$0xff] (%p6753_p12)  ;;  %v5282_v1 = vld [vmem:[%s7565_s1 + $0x38] sm:$0xff] (%p6753_p12) }
 0x344   : > { %5269 = vst [vmem:[%s5210_s5] sm:$0xff] (%p6753_p12), %v5268_v43  ;;  %5271 = vst [vmem:[%s5210_s5 + $0x10] sm:$0xff] (%p6753_p12), %v5270_v44  ;;  %v5284_v2 = vld [vmem:[%s7565_s1 + $0x40] sm:$0xff] (%p6753_p12)  ;;  %v5286_v3 = vld [vmem:[%s7565_s1 + $0x48] sm:$0xff] (%p6753_p12) }
 0x345   : > { %5277 = vst [vmem:[%s5210_s5 + $0x40] sm:$0xff] (%p6753_p12), %v5276_v62  ;;  %5279 = vst [vmem:[%s5210_s5 + $0x50] sm:$0xff] (%p6753_p12), %v5278_v63  ;;  %v5288_v4 = vld [vmem:[%s7565_s1 + $0x50] sm:$0xff] (%p6753_p12)  ;;  %v5290_v5 = vld [vmem:[%s7565_s1 + $0x58] sm:$0xff] (%p6753_p12) }
 0x346   : > { %v5272_v60 = vld [vmem:[%s7565_s1 + $0x10] sm:$0xff] (%p6753_p12)  ;;  %5281 = vst [vmem:[%s5210_s5 + $0x60] sm:$0xff] (%p6753_p12), %v5280_v0  ;;  %5283 = vst [vmem:[%s5210_s5 + $0x70] sm:$0xff] (%p6753_p12), %v5282_v1  ;;  %v5292_v6 = vld [vmem:[%s7565_s1 + $0x60] sm:$0xff] (%p6753_p12) }
 0x347   : > { %v5274_v61 = vld [vmem:[%s7565_s1 + $0x18] sm:$0xff] (%p6753_p12)  ;;  %5273 = vst [vmem:[%s5210_s5 + $0x20] sm:$0xff] (%p6753_p12), %v5272_v60  ;;  %5285 = vst [vmem:[%s5210_s5 + $0x80] sm:$0xff] (%p6753_p12), %v5284_v2  ;;  %v5294_v7 = vld [vmem:[%s7565_s1 + $0x68] sm:$0xff] (%p6753_p12) }
 0x348   : > { %5275 = vst [vmem:[%s5210_s5 + $0x30] sm:$0xff] (%p6753_p12), %v5274_v61  ;;  %5287 = vst [vmem:[%s5210_s5 + $0x90] sm:$0xff] (%p6753_p12), %v5286_v3  ;;  %v5296_v8 = vld [vmem:[%s7565_s1 + $0x70] sm:$0xff] (%p6753_p12)  ;;  %v5298_v9 = vld [vmem:[%s7565_s1 + $0x78] sm:$0xff] (%p6753_p12) }
 0x349   : > { %5289 = vst [vmem:[%s5210_s5 + $0xa0] sm:$0xff] %v5288_v4  ;;  %5291 = vst [vmem:[%s5210_s5 + $0xb0] sm:$0xff] %v5290_v5 }
 0x34a   : > { %5293 = vst [vmem:[%s5210_s5 + $0xc0] sm:$0xff] %v5292_v6  ;;  %5295 = vst [vmem:[%s5210_s5 + $0xd0] sm:$0xff] %v5294_v7 }
 0x34b   : > { %5297 = vst [vmem:[%s5210_s5 + $0xe0] sm:$0xff] %v5296_v8  ;;  %5299 = vst [vmem:[%s5210_s5 + $0xf0] sm:$0xff] %v5298_v9 }
 0x34c PF: > { %s13_s22 = sadd.s32 1, %s6636_s22   ;;  %s8079_s10 = sld [smem:[#allocation6_spill]] }
 0x34d   : > { %p10_p6 = scmp.ge.s32.totalorder %s13_s22, 6   ;;  %s8080_s12 = smov %s6600_s13 }
 0x34e   : > { %s8081_s13 = smov %s6751_s9  ;;  %s8082_s14 = smov %s6608_s15 }
 0x34f   : > { %s8083_s15 = smov %s6748_s8  ;;  %s8084_s16 = smov %s6616_s17 }
 0x350   : > { %s8085_s17 = smov %s6734_s30  ;;  %s8086_s18 = smov %s6628_s20 }
 0x351   : > { %s8087_s19 = smov %s6632_s21  ;;  %s8088_s20 = smov %s8091_s24 }
 0x352   : > { %s8089_s21 = smov %s8079_s10  ;;  %12 = sbr.rel (!%p10_p6) target bundleno = 9 (0x9), region = 185 }

// kernel: discriminator_forward.6
= control target key start
LH: loop header
LB: loop body
LE: loop exit
PB: predicated region body
PF: predicated region fallthrough
CT: control target
= control target key end

     0   :  { %s9438_s0 = inlined_call_operand.vmem [shape: bf16[32,8192], index: 0, kind: input, shape index: {}]   ;;  %s9439_s1 = inlined_call_operand.vmem [shape: bf16[8192,1024], index: 1, kind: input, shape index: {}]   ;;  %s9440_s2 = inlined_call_operand.vmem [shape: f32[1,1024], index: 2, kind: input, shape index: {}]   ;;  %s9441_s3 = inlined_call_operand.vmem [shape: bf16[32,1024], index: 3, kind: output, shape index: {}]  }
   0x1   :  { %9443 = sst [smem:[#allocation7_spill]] %s9438_s0 }
   0x2   :  { %9444 = sst [smem:[#allocation8_spill]] %s9439_s1 }
   0x3   :  { %s7523_s12 = smov 0   ;;  %s7525_s13 = smov 0  }
   0x4   :  { %s7527_s14 = smov 0   ;;  %s7529_s15 = smov 0  }
   0x5   :  { %s7531_s16 = smov 0   ;;  %s7533_s17 = smov 0  }
   0x6   :  { %s7535_s18 = smov 0   ;;  %s7537_s19 = smov 0  }
   0x7   :  { %s7539_s20 = smov 0   ;;  %s7541_s21 = smov 0  }
   0x8   :  { %s7543_s22 = smov 0  }
   0x9 LB: > { %s5858_s23 = sadd.s32 4294967295, %s7500_s22   ;;  %s25_s24 = sadd.s32 1, %s7492_s20  ;;  %s7500_s22 = sphi %s7543_s22, %s13_s22   ;;  %s7496_s21 = sphi %s7541_s21, %s9461_s21   ;;  %s7492_s20 = sphi %s7539_s20, %s9460_s20   ;;  %s7488_s19 = sphi %s7537_s19, %s9459_s19   ;;  %s7484_s18 = sphi %s7535_s18, %s9458_s18   ;;  %s7480_s17 = sphi %s7533_s17, %s9457_s17   ;;  %s7476_s16 = sphi %s7531_s16, %s9456_s16   ;;  %s7472_s15 = sphi %s7529_s15, %s9455_s15   ;;  %s7468_s14 = sphi %s7527_s14, %s9454_s14   ;;  %s7464_s13 = sphi %s7525_s13, %s9453_s13   ;;  %s7460_s12 = sphi %s7523_s12, %s9452_s12  }
   0xa   : > { %p26_p0 = scmp.ge.s32.totalorder %s25_s24, 4  ;;  %s28_s25 = sadd.s32 1, %s7496_s21 }
   0xb   : > { %s41_s26 = sadd.s32 1, %s7480_s17  ;;  %p48_p1 = scmp.ne.s32.totalorder %s7480_s17, %s7476_s16 }
   0xc   : > { %s9463_s24 = smov (%p26_p0, %s25_s24), 0  ;;  %s9465_s25 = smov (!%p26_p0, %s28_s25), %s7496_s21 }
   0xd   : > { %s37_s27 = ssub.s32 %s7492_s20, %s9463_s24  ;;  %p49_p2 = scmp.eq.s32.totalorder %s7500_s22, 0 }
   0xe   : > { %p30_p3 = scmp.ge.s32.totalorder %s9465_s25, 2  ;;  %p39_p4 = scmp.eq.s32.totalorder %s37_s27, 0 }
   0xf   : > { %p7590_p5 = por %p49_p2, %p48_p1  ;;  %s69_s29 = sadd.s32 1, %s7472_s15 }
  0x10   : > { %s9467_s25 = smov (%p30_p3, %s9465_s25), 0  ;;  %p76_p6 = scmp.ne.s32.totalorder %s7472_s15, %s7468_s14 }
  0x11   : > { %9446 = sst [smem:[#allocation6_spill]] %s9467_s25  ;;  %s65_s4 = ssub.s32 %s7496_s21, %s9467_s25 }
  0x12   : > { %s7598_s30 = scalar_select %p39_p4, %s7480_s17, %s41_s26  }
  0x13   : > { %s66_s5 = sor.u32 %s65_s4, %s37_s27  ;;  %p121_p7 = scmp.eq.s32.totalorder %s65_s4, 0 }
  0x14   : > { %p67_p8 = scmp.eq.s32.totalorder %s66_s5, 0  ;;  %p7604_p9 = por %p76_p6, %p49_p2 }
  0x15   : > { %s123_s7 = sadd.s32 1, %s7464_s13  ;;  %p133_p10 = scmp.ne.s32.totalorder %s7464_s13, %s7460_s12 }
  0x16   : > { %s7612_s8 = scalar_select %p67_p8, %s7472_s15, %s69_s29  }
  0x17   : > { %s7615_s9 = scalar_select %p121_p7, %s7464_s13, %s123_s7  }
  0x18   : > { %p134_p11 = scmp.eq.s32.totalorder %s5858_s23, 7  ;;  %p5861_p13 = scmp.ge.s32.totalorder %s7500_s22, 8 }
  0x1a   : > { %p7617_p12 = por %p134_p11, %p133_p10  ;;  %156 = sbr.rel (%p5861_p13) target bundleno = 325 (0x145), region = 16 }
  0x21   : > { %159 = sbr.rel (!%p7590_p5) target bundleno = 59 (0x3b), region = 20  ;;  %s161_s11 = sand.u32 (%p7590_p5), 1, %s7480_s17  }
  0x22   : > { %s6434_s26 = sshll.u32 (%p7590_p5), %s7492_s20, 6  ;;  %s5862_s27 = sshll.u32 (%p7590_p5), %s161_s11, 8 }
  0x23   : > { %s9449_s0 = sld [smem:[#allocation7_spill]] (%p7590_p5)  ;;  %s7634_s23 = scalar_lea.vmem (%p7590_p5), [#allocation3], %s5862_s27 }
  0x29   : > { %s7629_s5 = scalar_lea.vmem %s9449_s0, %s6434_s26 }
  0x2a   : > { %v182_v0 = vld [vmem:[%s7629_s5] sm:$0xff]  ;;  %v184_v1 = vld [vmem:[%s7629_s5 + $0x8] sm:$0xff]  ;;  %v186_v2 = vld [vmem:[%s7629_s5 + $0x10] sm:$0xff] }
  0x2b   : > { %183 = vst [vmem:[%s7634_s23] sm:$0xff] %v182_v0  ;;  %185 = vst [vmem:[%s7634_s23 + $0x8] sm:$0xff] %v184_v1  ;;  %v188_v3 = vld [vmem:[%s7629_s5 + $0x18] sm:$0xff]  ;;  %v190_v4 = vld [vmem:[%s7629_s5 + $0x20] sm:$0xff] }
  0x2c   : > { %187 = vst [vmem:[%s7634_s23 + $0x10] sm:$0xff] %v186_v2  ;;  %v192_v5 = vld [vmem:[%s7629_s5 + $0x28] sm:$0xff]  ;;  %189 = vst [vmem:[%s7634_s23 + $0x18] sm:$0xff] %v188_v3  ;;  %v194_v6 = vld [vmem:[%s7629_s5 + $0x30] sm:$0xff] }
  0x2d   : > { %191 = vst [vmem:[%s7634_s23 + $0x20] sm:$0xff] %v190_v4  ;;  %193 = vst [vmem:[%s7634_s23 + $0x28] sm:$0xff] %v192_v5  ;;  %v196_v7 = vld [vmem:[%s7629_s5 + $0x38] sm:$0xff]  ;;  %v198_v8 = vld [vmem:[%s7629_s5 + $0x100] sm:$0xff] }
  0x2e   : > { %195 = vst [vmem:[%s7634_s23 + $0x30] sm:$0xff] %v194_v6  ;;  %197 = vst [vmem:[%s7634_s23 + $0x38] sm:$0xff] %v196_v7  ;;  %v200_v9 = vld [vmem:[%s7629_s5 + $0x108] sm:$0xff]  ;;  %v202_v10 = vld [vmem:[%s7629_s5 + $0x110] sm:$0xff] }
  0x2f   : > { %199 = vst [vmem:[%s7634_s23 + $0x40] sm:$0xff] %v198_v8  ;;  %v204_v11 = vld [vmem:[%s7629_s5 + $0x118] sm:$0xff]  ;;  %201 = vst [vmem:[%s7634_s23 + $0x48] sm:$0xff] %v200_v9  ;;  %v206_v12 = vld [vmem:[%s7629_s5 + $0x120] sm:$0xff] }
  0x30   : > { %203 = vst [vmem:[%s7634_s23 + $0x50] sm:$0xff] %v202_v10  ;;  %205 = vst [vmem:[%s7634_s23 + $0x58] sm:$0xff] %v204_v11  ;;  %v208_v13 = vld [vmem:[%s7629_s5 + $0x128] sm:$0xff]  ;;  %v210_v14 = vld [vmem:[%s7629_s5 + $0x130] sm:$0xff] }
  0x31   : > { %207 = vst [vmem:[%s7634_s23 + $0x60] sm:$0xff] %v206_v12  ;;  %209 = vst [vmem:[%s7634_s23 + $0x68] sm:$0xff] %v208_v13  ;;  %v212_v15 = vld [vmem:[%s7629_s5 + $0x138] sm:$0xff]  ;;  %v214_v16 = vld [vmem:[%s7629_s5 + $0x200] sm:$0xff] }
  0x32   : > { %211 = vst [vmem:[%s7634_s23 + $0x70] sm:$0xff] %v210_v14  ;;  %v216_v17 = vld [vmem:[%s7629_s5 + $0x208] sm:$0xff]  ;;  %213 = vst [vmem:[%s7634_s23 + $0x78] sm:$0xff] %v212_v15  ;;  %v218_v18 = vld [vmem:[%s7629_s5 + $0x210] sm:$0xff] }
  0x33   : > { %215 = vst [vmem:[%s7634_s23 + $0x80] sm:$0xff] %v214_v16  ;;  %217 = vst [vmem:[%s7634_s23 + $0x88] sm:$0xff] %v216_v17  ;;  %v220_v19 = vld [vmem:[%s7629_s5 + $0x218] sm:$0xff]  ;;  %v222_v20 = vld [vmem:[%s7629_s5 + $0x220] sm:$0xff] }
  0x34   : > { %219 = vst [vmem:[%s7634_s23 + $0x90] sm:$0xff] %v218_v18  ;;  %221 = vst [vmem:[%s7634_s23 + $0x98] sm:$0xff] %v220_v19  ;;  %v224_v21 = vld [vmem:[%s7629_s5 + $0x228] sm:$0xff]  ;;  %v226_v22 = vld [vmem:[%s7629_s5 + $0x230] sm:$0xff] }
  0x35   : > { %223 = vst [vmem:[%s7634_s23 + $0xa0] sm:$0xff] %v222_v20  ;;  %v228_v23 = vld [vmem:[%s7629_s5 + $0x238] sm:$0xff]  ;;  %225 = vst [vmem:[%s7634_s23 + $0xa8] sm:$0xff] %v224_v21  ;;  %v230_v24 = vld [vmem:[%s7629_s5 + $0x300] sm:$0xff] }
  0x36   : > { %227 = vst [vmem:[%s7634_s23 + $0xb0] sm:$0xff] %v226_v22  ;;  %229 = vst [vmem:[%s7634_s23 + $0xb8] sm:$0xff] %v228_v23  ;;  %v232_v25 = vld [vmem:[%s7629_s5 + $0x308] sm:$0xff]  ;;  %v234_v26 = vld [vmem:[%s7629_s5 + $0x310] sm:$0xff] }
  0x37   : > { %231 = vst [vmem:[%s7634_s23 + $0xc0] sm:$0xff] %v230_v24  ;;  %233 = vst [vmem:[%s7634_s23 + $0xc8] sm:$0xff] %v232_v25  ;;  %v236_v27 = vld [vmem:[%s7629_s5 + $0x318] sm:$0xff]  ;;  %v238_v28 = vld [vmem:[%s7629_s5 + $0x320] sm:$0xff] }
  0x38   : > { %235 = vst [vmem:[%s7634_s23 + $0xd0] sm:$0xff] %v234_v26  ;;  %v240_v29 = vld [vmem:[%s7629_s5 + $0x328] sm:$0xff]  ;;  %237 = vst [vmem:[%s7634_s23 + $0xd8] sm:$0xff] %v236_v27  ;;  %v242_v30 = vld [vmem:[%s7629_s5 + $0x330] sm:$0xff] }
  0x39   : > { %239 = vst [vmem:[%s7634_s23 + $0xe0] sm:$0xff] %v238_v28  ;;  %241 = vst [vmem:[%s7634_s23 + $0xe8] sm:$0xff] %v240_v29  ;;  %v244_v31 = vld [vmem:[%s7629_s5 + $0x338] sm:$0xff] }
  0x3a   : > { %243 = vst [vmem:[%s7634_s23 + $0xf0] sm:$0xff] %v242_v30  ;;  %245 = vst [vmem:[%s7634_s23 + $0xf8] sm:$0xff] %v244_v31 }
  0x3b PF: > { %251 = sbr.rel (!%p7604_p9) target bundleno = 325 (0x145), region = 43  ;;  %s253_s28 = sand.u32 (%p7604_p9), 1, %s7472_s15  }
  0x3c   : > { %s5867_s7 = sshll.u32 (%p7604_p9), %s7496_s21, 2  ;;  %s5865_s11 = sshll.u32 (%p7604_p9), %s253_s28, 12 }
  0x3d   : > { %s6435_s26 = sshll.u32 (%p7604_p9), %s7492_s20, 11  ;;  %s9450_s1 = sld [smem:[#allocation8_spill]] (%p7604_p9) }
  0x3e   : > { %s259_s27 = sadd.s32 (%p7604_p9), %s6435_s26, %s5867_s7  ;;  %s7710_s6 = scalar_lea.vmem (%p7604_p9), [#allocation4], %s5865_s11 }
  0x3f   : > { %s5869_s29 = sshll.u32 (%p7604_p9), %s259_s27, 2 }
  0x43   : > { %s7705_s25 = scalar_lea.vmem %s9450_s1, %s5869_s29 }
  0x44   : > { %v274_v32 = vld [vmem:[%s7705_s25] sm:$0xff]  ;;  %v276_v33 = vld [vmem:[%s7705_s25 + $0x8] sm:$0xff] }
  0x45   : > { %v278_v34 = vld [vmem:[%s7705_s25 + $0x20] sm:$0xff]  ;;  %275 = vst [vmem:[%s7710_s6] sm:$0xff] %v274_v32  ;;  %277 = vst [vmem:[%s7710_s6 + $0x8] sm:$0xff] %v276_v33  ;;  %v280_v35 = vld [vmem:[%s7705_s25 + $0x28] sm:$0xff] }
  0x46   : > { %279 = vst [vmem:[%s7710_s6 + $0x10] sm:$0xff] %v278_v34  ;;  %v282_v36 = vld [vmem:[%s7705_s25 + $0x40] sm:$0xff]  ;;  %v284_v37 = vld [vmem:[%s7705_s25 + $0x48] sm:$0xff]  ;;  %281 = vst [vmem:[%s7710_s6 + $0x18] sm:$0xff] %v280_v35 }
  0x47   : > { %283 = vst [vmem:[%s7710_s6 + $0x20] sm:$0xff] %v282_v36  ;;  %285 = vst [vmem:[%s7710_s6 + $0x28] sm:$0xff] %v284_v37  ;;  %v286_v38 = vld [vmem:[%s7705_s25 + $0x60] sm:$0xff]  ;;  %v288_v39 = vld [vmem:[%s7705_s25 + $0x68] sm:$0xff] }
  0x48   : > { %v290_v40 = vld [vmem:[%s7705_s25 + $0x80] sm:$0xff]  ;;  %287 = vst [vmem:[%s7710_s6 + $0x30] sm:$0xff] %v286_v38  ;;  %289 = vst [vmem:[%s7710_s6 + $0x38] sm:$0xff] %v288_v39  ;;  %v292_v41 = vld [vmem:[%s7705_s25 + $0x88] sm:$0xff] }
  0x49   : > { %291 = vst [vmem:[%s7710_s6 + $0x40] sm:$0xff] %v290_v40  ;;  %v294_v42 = vld [vmem:[%s7705_s25 + $0xa0] sm:$0xff]  ;;  %v296_v43 = vld [vmem:[%s7705_s25 + $0xa8] sm:$0xff]  ;;  %293 = vst [vmem:[%s7710_s6 + $0x48] sm:$0xff] %v292_v41 }
  0x4a   : > { %295 = vst [vmem:[%s7710_s6 + $0x50] sm:$0xff] %v294_v42  ;;  %297 = vst [vmem:[%s7710_s6 + $0x58] sm:$0xff] %v296_v43  ;;  %v298_v44 = vld [vmem:[%s7705_s25 + $0xc0] sm:$0xff]  ;;  %v300_v45 = vld [vmem:[%s7705_s25 + $0xc8] sm:$0xff] }
  0x4b   : > { %v302_v46 = vld [vmem:[%s7705_s25 + $0xe0] sm:$0xff]  ;;  %299 = vst [vmem:[%s7710_s6 + $0x60] sm:$0xff] %v298_v44  ;;  %301 = vst [vmem:[%s7710_s6 + $0x68] sm:$0xff] %v300_v45  ;;  %v304_v47 = vld [vmem:[%s7705_s25 + $0xe8] sm:$0xff] }
  0x4c   : > { %303 = vst [vmem:[%s7710_s6 + $0x70] sm:$0xff] %v302_v46  ;;  %v306_v48 = vld [vmem:[%s7705_s25 + $0x100] sm:$0xff]  ;;  %v308_v49 = vld [vmem:[%s7705_s25 + $0x108] sm:$0xff]  ;;  %305 = vst [vmem:[%s7710_s6 + $0x78] sm:$0xff] %v304_v47 }
  0x4d   : > { %307 = vst [vmem:[%s7710_s6 + $0x80] sm:$0xff] %v306_v48  ;;  %309 = vst [vmem:[%s7710_s6 + $0x88] sm:$0xff] %v308_v49  ;;  %v310_v50 = vld [vmem:[%s7705_s25 + $0x120] sm:$0xff]  ;;  %v312_v51 = vld [vmem:[%s7705_s25 + $0x128] sm:$0xff] }
  0x4e   : > { %v314_v52 = vld [vmem:[%s7705_s25 + $0x140] sm:$0xff]  ;;  %311 = vst [vmem:[%s7710_s6 + $0x90] sm:$0xff] %v310_v50  ;;  %313 = vst [vmem:[%s7710_s6 + $0x98] sm:$0xff] %v312_v51  ;;  %v316_v53 = vld [vmem:[%s7705_s25 + $0x148] sm:$0xff] }
  0x4f   : > { %315 = vst [vmem:[%s7710_s6 + $0xa0] sm:$0xff] %v314_v52  ;;  %v318_v54 = vld [vmem:[%s7705_s25 + $0x160] sm:$0xff]  ;;  %v320_v55 = vld [vmem:[%s7705_s25 + $0x168] sm:$0xff]  ;;  %317 = vst [vmem:[%s7710_s6 + $0xa8] sm:$0xff] %v316_v53 }
  0x50   : > { %319 = vst [vmem:[%s7710_s6 + $0xb0] sm:$0xff] %v318_v54  ;;  %321 = vst [vmem:[%s7710_s6 + $0xb8] sm:$0xff] %v320_v55  ;;  %v322_v56 = vld [vmem:[%s7705_s25 + $0x180] sm:$0xff]  ;;  %v324_v57 = vld [vmem:[%s7705_s25 + $0x188] sm:$0xff] }
  0x51   : > { %v326_v58 = vld [vmem:[%s7705_s25 + $0x1a0] sm:$0xff]  ;;  %323 = vst [vmem:[%s7710_s6 + $0xc0] sm:$0xff] %v322_v56  ;;  %325 = vst [vmem:[%s7710_s6 + $0xc8] sm:$0xff] %v324_v57  ;;  %v328_v59 = vld [vmem:[%s7705_s25 + $0x1a8] sm:$0xff] }
  0x52   : > { %327 = vst [vmem:[%s7710_s6 + $0xd0] sm:$0xff] %v326_v58  ;;  %v330_v60 = vld [vmem:[%s7705_s25 + $0x1c0] sm:$0xff]  ;;  %v332_v61 = vld [vmem:[%s7705_s25 + $0x1c8] sm:$0xff]  ;;  %329 = vst [vmem:[%s7710_s6 + $0xd8] sm:$0xff] %v328_v59 }
  0x53   : > { %331 = vst [vmem:[%s7710_s6 + $0xe0] sm:$0xff] %v330_v60  ;;  %333 = vst [vmem:[%s7710_s6 + $0xe8] sm:$0xff] %v332_v61  ;;  %v334_v62 = vld [vmem:[%s7705_s25 + $0x1e0] sm:$0xff]  ;;  %v336_v63 = vld [vmem:[%s7705_s25 + $0x1e8] sm:$0xff] }
  0x54   : > { %v338_v0 = vld [vmem:[%s7705_s25 + $0x200] sm:$0xff]  ;;  %335 = vst [vmem:[%s7710_s6 + $0xf0] sm:$0xff] %v334_v62  ;;  %337 = vst [vmem:[%s7710_s6 + $0xf8] sm:$0xff] %v336_v63  ;;  %v340_v1 = vld [vmem:[%s7705_s25 + $0x208] sm:$0xff] }
  0x55   : > { %339 = vst [vmem:[%s7710_s6 + $0x100] sm:$0xff] %v338_v0  ;;  %v342_v2 = vld [vmem:[%s7705_s25 + $0x220] sm:$0xff]  ;;  %v344_v3 = vld [vmem:[%s7705_s25 + $0x228] sm:$0xff]  ;;  %341 = vst [vmem:[%s7710_s6 + $0x108] sm:$0xff] %v340_v1 }
  0x56   : > { %343 = vst [vmem:[%s7710_s6 + $0x110] sm:$0xff] %v342_v2  ;;  %345 = vst [vmem:[%s7710_s6 + $0x118] sm:$0xff] %v344_v3  ;;  %v346_v4 = vld [vmem:[%s7705_s25 + $0x240] sm:$0xff]  ;;  %v348_v5 = vld [vmem:[%s7705_s25 + $0x248] sm:$0xff] }
  0x57   : > { %v350_v6 = vld [vmem:[%s7705_s25 + $0x260] sm:$0xff]  ;;  %347 = vst [vmem:[%s7710_s6 + $0x120] sm:$0xff] %v346_v4  ;;  %349 = vst [vmem:[%s7710_s6 + $0x128] sm:$0xff] %v348_v5  ;;  %v352_v7 = vld [vmem:[%s7705_s25 + $0x268] sm:$0xff] }
  0x58   : > { %351 = vst [vmem:[%s7710_s6 + $0x130] sm:$0xff] %v350_v6  ;;  %v354_v8 = vld [vmem:[%s7705_s25 + $0x280] sm:$0xff]  ;;  %v356_v9 = vld [vmem:[%s7705_s25 + $0x288] sm:$0xff]  ;;  %353 = vst [vmem:[%s7710_s6 + $0x138] sm:$0xff] %v352_v7 }
  0x59   : > { %355 = vst [vmem:[%s7710_s6 + $0x140] sm:$0xff] %v354_v8  ;;  %357 = vst [vmem:[%s7710_s6 + $0x148] sm:$0xff] %v356_v9  ;;  %v358_v10 = vld [vmem:[%s7705_s25 + $0x2a0] sm:$0xff]  ;;  %v360_v11 = vld [vmem:[%s7705_s25 + $0x2a8] sm:$0xff] }
  0x5a   : > { %v362_v12 = vld [vmem:[%s7705_s25 + $0x2c0] sm:$0xff]  ;;  %359 = vst [vmem:[%s7710_s6 + $0x150] sm:$0xff] %v358_v10  ;;  %361 = vst [vmem:[%s7710_s6 + $0x158] sm:$0xff] %v360_v11  ;;  %v364_v13 = vld [vmem:[%s7705_s25 + $0x2c8] sm:$0xff] }
  0x5b   : > { %363 = vst [vmem:[%s7710_s6 + $0x160] sm:$0xff] %v362_v12  ;;  %v366_v14 = vld [vmem:[%s7705_s25 + $0x2e0] sm:$0xff]  ;;  %v368_v15 = vld [vmem:[%s7705_s25 + $0x2e8] sm:$0xff]  ;;  %365 = vst [vmem:[%s7710_s6 + $0x168] sm:$0xff] %v364_v13 }
  0x5c   : > { %367 = vst [vmem:[%s7710_s6 + $0x170] sm:$0xff] %v366_v14  ;;  %369 = vst [vmem:[%s7710_s6 + $0x178] sm:$0xff] %v368_v15  ;;  %v370_v16 = vld [vmem:[%s7705_s25 + $0x300] sm:$0xff]  ;;  %v372_v17 = vld [vmem:[%s7705_s25 + $0x308] sm:$0xff] }
  0x5d   : > { %v374_v18 = vld [vmem:[%s7705_s25 + $0x320] sm:$0xff]  ;;  %371 = vst [vmem:[%s7710_s6 + $0x180] sm:$0xff] %v370_v16  ;;  %373 = vst [vmem:[%s7710_s6 + $0x188] sm:$0xff] %v372_v17  ;;  %v376_v19 = vld [vmem:[%s7705_s25 + $0x328] sm:$0xff] }
  0x5e   : > { %375 = vst [vmem:[%s7710_s6 + $0x190] sm:$0xff] %v374_v18  ;;  %v378_v20 = vld [vmem:[%s7705_s25 + $0x340] sm:$0xff]  ;;  %v380_v21 = vld [vmem:[%s7705_s25 + $0x348] sm:$0xff]  ;;  %377 = vst [vmem:[%s7710_s6 + $0x198] sm:$0xff] %v376_v19 }
  0x5f   : > { %379 = vst [vmem:[%s7710_s6 + $0x1a0] sm:$0xff] %v378_v20  ;;  %381 = vst [vmem:[%s7710_s6 + $0x1a8] sm:$0xff] %v380_v21  ;;  %v382_v22 = vld [vmem:[%s7705_s25 + $0x360] sm:$0xff]  ;;  %v384_v23 = vld [vmem:[%s7705_s25 + $0x368] sm:$0xff] }
  0x60   : > { %v386_v24 = vld [vmem:[%s7705_s25 + $0x380] sm:$0xff]  ;;  %383 = vst [vmem:[%s7710_s6 + $0x1b0] sm:$0xff] %v382_v22  ;;  %385 = vst [vmem:[%s7710_s6 + $0x1b8] sm:$0xff] %v384_v23  ;;  %v388_v25 = vld [vmem:[%s7705_s25 + $0x388] sm:$0xff] }
  0x61   : > { %387 = vst [vmem:[%s7710_s6 + $0x1c0] sm:$0xff] %v386_v24  ;;  %v390_v26 = vld [vmem:[%s7705_s25 + $0x3a0] sm:$0xff]  ;;  %v392_v27 = vld [vmem:[%s7705_s25 + $0x3a8] sm:$0xff]  ;;  %389 = vst [vmem:[%s7710_s6 + $0x1c8] sm:$0xff] %v388_v25 }
  0x62   : > { %391 = vst [vmem:[%s7710_s6 + $0x1d0] sm:$0xff] %v390_v26  ;;  %393 = vst [vmem:[%s7710_s6 + $0x1d8] sm:$0xff] %v392_v27  ;;  %v394_v28 = vld [vmem:[%s7705_s25 + $0x3c0] sm:$0xff]  ;;  %v396_v29 = vld [vmem:[%s7705_s25 + $0x3c8] sm:$0xff] }
  0x63   : > { %v398_v30 = vld [vmem:[%s7705_s25 + $0x3e0] sm:$0xff]  ;;  %395 = vst [vmem:[%s7710_s6 + $0x1e0] sm:$0xff] %v394_v28  ;;  %397 = vst [vmem:[%s7710_s6 + $0x1e8] sm:$0xff] %v396_v29  ;;  %v400_v31 = vld [vmem:[%s7705_s25 + $0x3e8] sm:$0xff] }
  0x64   : > { %399 = vst [vmem:[%s7710_s6 + $0x1f0] sm:$0xff] %v398_v30  ;;  %v402_v32 = vld [vmem:[%s7705_s25 + $0x400] sm:$0xff]  ;;  %v404_v33 = vld [vmem:[%s7705_s25 + $0x408] sm:$0xff]  ;;  %401 = vst [vmem:[%s7710_s6 + $0x1f8] sm:$0xff] %v400_v31 }
  0x65   : > { %403 = vst [vmem:[%s7710_s6 + $0x200] sm:$0xff] %v402_v32  ;;  %405 = vst [vmem:[%s7710_s6 + $0x208] sm:$0xff] %v404_v33  ;;  %v406_v34 = vld [vmem:[%s7705_s25 + $0x420] sm:$0xff]  ;;  %v408_v35 = vld [vmem:[%s7705_s25 + $0x428] sm:$0xff] }
  0x66   : > { %v410_v36 = vld [vmem:[%s7705_s25 + $0x440] sm:$0xff]  ;;  %407 = vst [vmem:[%s7710_s6 + $0x210] sm:$0xff] %v406_v34  ;;  %409 = vst [vmem:[%s7710_s6 + $0x218] sm:$0xff] %v408_v35  ;;  %v412_v37 = vld [vmem:[%s7705_s25 + $0x448] sm:$0xff] }
  0x67   : > { %411 = vst [vmem:[%s7710_s6 + $0x220] sm:$0xff] %v410_v36  ;;  %v414_v38 = vld [vmem:[%s7705_s25 + $0x460] sm:$0xff]  ;;  %v416_v39 = vld [vmem:[%s7705_s25 + $0x468] sm:$0xff]  ;;  %413 = vst [vmem:[%s7710_s6 + $0x228] sm:$0xff] %v412_v37 }
  0x68   : > { %415 = vst [vmem:[%s7710_s6 + $0x230] sm:$0xff] %v414_v38  ;;  %417 = vst [vmem:[%s7710_s6 + $0x238] sm:$0xff] %v416_v39  ;;  %v418_v40 = vld [vmem:[%s7705_s25 + $0x480] sm:$0xff]  ;;  %v420_v41 = vld [vmem:[%s7705_s25 + $0x488] sm:$0xff] }
  0x69   : > { %v422_v42 = vld [vmem:[%s7705_s25 + $0x4a0] sm:$0xff]  ;;  %419 = vst [vmem:[%s7710_s6 + $0x240] sm:$0xff] %v418_v40  ;;  %421 = vst [vmem:[%s7710_s6 + $0x248] sm:$0xff] %v420_v41  ;;  %v424_v43 = vld [vmem:[%s7705_s25 + $0x4a8] sm:$0xff] }
  0x6a   : > { %423 = vst [vmem:[%s7710_s6 + $0x250] sm:$0xff] %v422_v42  ;;  %v426_v44 = vld [vmem:[%s7705_s25 + $0x4c0] sm:$0xff]  ;;  %v428_v45 = vld [vmem:[%s7705_s25 + $0x4c8] sm:$0xff]  ;;  %425 = vst [vmem:[%s7710_s6 + $0x258] sm:$0xff] %v424_v43 }
  0x6b   : > { %427 = vst [vmem:[%s7710_s6 + $0x260] sm:$0xff] %v426_v44  ;;  %429 = vst [vmem:[%s7710_s6 + $0x268] sm:$0xff] %v428_v45  ;;  %v430_v46 = vld [vmem:[%s7705_s25 + $0x4e0] sm:$0xff]  ;;  %v432_v47 = vld [vmem:[%s7705_s25 + $0x4e8] sm:$0xff] }
  0x6c   : > { %v434_v48 = vld [vmem:[%s7705_s25 + $0x500] sm:$0xff]  ;;  %431 = vst [vmem:[%s7710_s6 + $0x270] sm:$0xff] %v430_v46  ;;  %433 = vst [vmem:[%s7710_s6 + $0x278] sm:$0xff] %v432_v47  ;;  %v436_v49 = vld [vmem:[%s7705_s25 + $0x508] sm:$0xff] }
  0x6d   : > { %435 = vst [vmem:[%s7710_s6 + $0x280] sm:$0xff] %v434_v48  ;;  %v438_v50 = vld [vmem:[%s7705_s25 + $0x520] sm:$0xff]  ;;  %v440_v51 = vld [vmem:[%s7705_s25 + $0x528] sm:$0xff]  ;;  %437 = vst [vmem:[%s7710_s6 + $0x288] sm:$0xff] %v436_v49 }
  0x6e   : > { %439 = vst [vmem:[%s7710_s6 + $0x290] sm:$0xff] %v438_v50  ;;  %441 = vst [vmem:[%s7710_s6 + $0x298] sm:$0xff] %v440_v51  ;;  %v442_v52 = vld [vmem:[%s7705_s25 + $0x540] sm:$0xff]  ;;  %v444_v53 = vld [vmem:[%s7705_s25 + $0x548] sm:$0xff] }
  0x6f   : > { %v446_v54 = vld [vmem:[%s7705_s25 + $0x560] sm:$0xff]  ;;  %443 = vst [vmem:[%s7710_s6 + $0x2a0] sm:$0xff] %v442_v52  ;;  %445 = vst [vmem:[%s7710_s6 + $0x2a8] sm:$0xff] %v444_v53  ;;  %v448_v55 = vld [vmem:[%s7705_s25 + $0x568] sm:$0xff] }
  0x70   : > { %447 = vst [vmem:[%s7710_s6 + $0x2b0] sm:$0xff] %v446_v54  ;;  %v450_v56 = vld [vmem:[%s7705_s25 + $0x580] sm:$0xff]  ;;  %v452_v57 = vld [vmem:[%s7705_s25 + $0x588] sm:$0xff]  ;;  %449 = vst [vmem:[%s7710_s6 + $0x2b8] sm:$0xff] %v448_v55 }
  0x71   : > { %451 = vst [vmem:[%s7710_s6 + $0x2c0] sm:$0xff] %v450_v56  ;;  %453 = vst [vmem:[%s7710_s6 + $0x2c8] sm:$0xff] %v452_v57  ;;  %v454_v58 = vld [vmem:[%s7705_s25 + $0x5a0] sm:$0xff]  ;;  %v456_v59 = vld [vmem:[%s7705_s25 + $0x5a8] sm:$0xff] }
  0x72   : > { %v458_v60 = vld [vmem:[%s7705_s25 + $0x5c0] sm:$0xff]  ;;  %455 = vst [vmem:[%s7710_s6 + $0x2d0] sm:$0xff] %v454_v58  ;;  %457 = vst [vmem:[%s7710_s6 + $0x2d8] sm:$0xff] %v456_v59  ;;  %v460_v61 = vld [vmem:[%s7705_s25 + $0x5c8] sm:$0xff] }
  0x73   : > { %459 = vst [vmem:[%s7710_s6 + $0x2e0] sm:$0xff] %v458_v60  ;;  %v462_v62 = vld [vmem:[%s7705_s25 + $0x5e0] sm:$0xff]  ;;  %v464_v63 = vld [vmem:[%s7705_s25 + $0x5e8] sm:$0xff]  ;;  %461 = vst [vmem:[%s7710_s6 + $0x2e8] sm:$0xff] %v460_v61 }
  0x74   : > { %463 = vst [vmem:[%s7710_s6 + $0x2f0] sm:$0xff] %v462_v62  ;;  %465 = vst [vmem:[%s7710_s6 + $0x2f8] sm:$0xff] %v464_v63  ;;  %v466_v0 = vld [vmem:[%s7705_s25 + $0x600] sm:$0xff]  ;;  %v468_v1 = vld [vmem:[%s7705_s25 + $0x608] sm:$0xff] }
  0x75   : > { %v470_v2 = vld [vmem:[%s7705_s25 + $0x620] sm:$0xff]  ;;  %467 = vst [vmem:[%s7710_s6 + $0x300] sm:$0xff] %v466_v0  ;;  %469 = vst [vmem:[%s7710_s6 + $0x308] sm:$0xff] %v468_v1  ;;  %v472_v3 = vld [vmem:[%s7705_s25 + $0x628] sm:$0xff] }
  0x76   : > { %471 = vst [vmem:[%s7710_s6 + $0x310] sm:$0xff] %v470_v2  ;;  %v474_v4 = vld [vmem:[%s7705_s25 + $0x640] sm:$0xff]  ;;  %v476_v5 = vld [vmem:[%s7705_s25 + $0x648] sm:$0xff]  ;;  %473 = vst [vmem:[%s7710_s6 + $0x318] sm:$0xff] %v472_v3 }
  0x77   : > { %475 = vst [vmem:[%s7710_s6 + $0x320] sm:$0xff] %v474_v4  ;;  %477 = vst [vmem:[%s7710_s6 + $0x328] sm:$0xff] %v476_v5  ;;  %v478_v6 = vld [vmem:[%s7705_s25 + $0x660] sm:$0xff]  ;;  %v480_v7 = vld [vmem:[%s7705_s25 + $0x668] sm:$0xff] }
  0x78   : > { %v482_v8 = vld [vmem:[%s7705_s25 + $0x680] sm:$0xff]  ;;  %479 = vst [vmem:[%s7710_s6 + $0x330] sm:$0xff] %v478_v6  ;;  %481 = vst [vmem:[%s7710_s6 + $0x338] sm:$0xff] %v480_v7  ;;  %v484_v9 = vld [vmem:[%s7705_s25 + $0x688] sm:$0xff] }
  0x79   : > { %483 = vst [vmem:[%s7710_s6 + $0x340] sm:$0xff] %v482_v8  ;;  %v486_v10 = vld [vmem:[%s7705_s25 + $0x6a0] sm:$0xff]  ;;  %v488_v11 = vld [vmem:[%s7705_s25 + $0x6a8] sm:$0xff]  ;;  %485 = vst [vmem:[%s7710_s6 + $0x348] sm:$0xff] %v484_v9 }
  0x7a   : > { %487 = vst [vmem:[%s7710_s6 + $0x350] sm:$0xff] %v486_v10  ;;  %489 = vst [vmem:[%s7710_s6 + $0x358] sm:$0xff] %v488_v11  ;;  %v490_v12 = vld [vmem:[%s7705_s25 + $0x6c0] sm:$0xff]  ;;  %v492_v13 = vld [vmem:[%s7705_s25 + $0x6c8] sm:$0xff] }
  0x7b   : > { %v494_v14 = vld [vmem:[%s7705_s25 + $0x6e0] sm:$0xff]  ;;  %491 = vst [vmem:[%s7710_s6 + $0x360] sm:$0xff] %v490_v12  ;;  %493 = vst [vmem:[%s7710_s6 + $0x368] sm:$0xff] %v492_v13  ;;  %v496_v15 = vld [vmem:[%s7705_s25 + $0x6e8] sm:$0xff] }
  0x7c   : > { %495 = vst [vmem:[%s7710_s6 + $0x370] sm:$0xff] %v494_v14  ;;  %v498_v16 = vld [vmem:[%s7705_s25 + $0x700] sm:$0xff]  ;;  %v500_v17 = vld [vmem:[%s7705_s25 + $0x708] sm:$0xff]  ;;  %497 = vst [vmem:[%s7710_s6 + $0x378] sm:$0xff] %v496_v15 }
  0x7d   : > { %499 = vst [vmem:[%s7710_s6 + $0x380] sm:$0xff] %v498_v16  ;;  %501 = vst [vmem:[%s7710_s6 + $0x388] sm:$0xff] %v500_v17  ;;  %v502_v18 = vld [vmem:[%s7705_s25 + $0x720] sm:$0xff]  ;;  %v504_v19 = vld [vmem:[%s7705_s25 + $0x728] sm:$0xff] }
  0x7e   : > { %v506_v20 = vld [vmem:[%s7705_s25 + $0x740] sm:$0xff]  ;;  %503 = vst [vmem:[%s7710_s6 + $0x390] sm:$0xff] %v502_v18  ;;  %505 = vst [vmem:[%s7710_s6 + $0x398] sm:$0xff] %v504_v19  ;;  %v508_v21 = vld [vmem:[%s7705_s25 + $0x748] sm:$0xff] }
  0x7f   : > { %507 = vst [vmem:[%s7710_s6 + $0x3a0] sm:$0xff] %v506_v20  ;;  %v510_v22 = vld [vmem:[%s7705_s25 + $0x760] sm:$0xff]  ;;  %v512_v23 = vld [vmem:[%s7705_s25 + $0x768] sm:$0xff]  ;;  %509 = vst [vmem:[%s7710_s6 + $0x3a8] sm:$0xff] %v508_v21 }
  0x80   : > { %511 = vst [vmem:[%s7710_s6 + $0x3b0] sm:$0xff] %v510_v22  ;;  %513 = vst [vmem:[%s7710_s6 + $0x3b8] sm:$0xff] %v512_v23  ;;  %v514_v24 = vld [vmem:[%s7705_s25 + $0x780] sm:$0xff]  ;;  %v516_v25 = vld [vmem:[%s7705_s25 + $0x788] sm:$0xff] }
  0x81   : > { %v518_v26 = vld [vmem:[%s7705_s25 + $0x7a0] sm:$0xff]  ;;  %515 = vst [vmem:[%s7710_s6 + $0x3c0] sm:$0xff] %v514_v24  ;;  %517 = vst [vmem:[%s7710_s6 + $0x3c8] sm:$0xff] %v516_v25  ;;  %v520_v27 = vld [vmem:[%s7705_s25 + $0x7a8] sm:$0xff] }
  0x82   : > { %519 = vst [vmem:[%s7710_s6 + $0x3d0] sm:$0xff] %v518_v26  ;;  %v522_v28 = vld [vmem:[%s7705_s25 + $0x7c0] sm:$0xff]  ;;  %v524_v29 = vld [vmem:[%s7705_s25 + $0x7c8] sm:$0xff]  ;;  %521 = vst [vmem:[%s7710_s6 + $0x3d8] sm:$0xff] %v520_v27 }
  0x83   : > { %523 = vst [vmem:[%s7710_s6 + $0x3e0] sm:$0xff] %v522_v28  ;;  %525 = vst [vmem:[%s7710_s6 + $0x3e8] sm:$0xff] %v524_v29  ;;  %v526_v30 = vld [vmem:[%s7705_s25 + $0x7e0] sm:$0xff]  ;;  %v528_v31 = vld [vmem:[%s7705_s25 + $0x7e8] sm:$0xff] }
  0x84   : > { %v530_v32 = vld [vmem:[%s7705_s25 + $0x800] sm:$0xff]  ;;  %527 = vst [vmem:[%s7710_s6 + $0x3f0] sm:$0xff] %v526_v30  ;;  %529 = vst [vmem:[%s7710_s6 + $0x3f8] sm:$0xff] %v528_v31  ;;  %v532_v33 = vld [vmem:[%s7705_s25 + $0x808] sm:$0xff] }
  0x85   : > { %531 = vst [vmem:[%s7710_s6 + $0x400] sm:$0xff] %v530_v32  ;;  %v534_v34 = vld [vmem:[%s7705_s25 + $0x820] sm:$0xff]  ;;  %v536_v35 = vld [vmem:[%s7705_s25 + $0x828] sm:$0xff]  ;;  %533 = vst [vmem:[%s7710_s6 + $0x408] sm:$0xff] %v532_v33 }
  0x86   : > { %535 = vst [vmem:[%s7710_s6 + $0x410] sm:$0xff] %v534_v34  ;;  %537 = vst [vmem:[%s7710_s6 + $0x418] sm:$0xff] %v536_v35  ;;  %v538_v36 = vld [vmem:[%s7705_s25 + $0x840] sm:$0xff]  ;;  %v540_v37 = vld [vmem:[%s7705_s25 + $0x848] sm:$0xff] }
  0x87   : > { %v542_v38 = vld [vmem:[%s7705_s25 + $0x860] sm:$0xff]  ;;  %539 = vst [vmem:[%s7710_s6 + $0x420] sm:$0xff] %v538_v36  ;;  %541 = vst [vmem:[%s7710_s6 + $0x428] sm:$0xff] %v540_v37  ;;  %v544_v39 = vld [vmem:[%s7705_s25 + $0x868] sm:$0xff] }
  0x88   : > { %543 = vst [vmem:[%s7710_s6 + $0x430] sm:$0xff] %v542_v38  ;;  %v546_v40 = vld [vmem:[%s7705_s25 + $0x880] sm:$0xff]  ;;  %v548_v41 = vld [vmem:[%s7705_s25 + $0x888] sm:$0xff]  ;;  %545 = vst [vmem:[%s7710_s6 + $0x438] sm:$0xff] %v544_v39 }
  0x89   : > { %547 = vst [vmem:[%s7710_s6 + $0x440] sm:$0xff] %v546_v40  ;;  %549 = vst [vmem:[%s7710_s6 + $0x448] sm:$0xff] %v548_v41  ;;  %v550_v42 = vld [vmem:[%s7705_s25 + $0x8a0] sm:$0xff]  ;;  %v552_v43 = vld [vmem:[%s7705_s25 + $0x8a8] sm:$0xff] }
  0x8a   : > { %v554_v44 = vld [vmem:[%s7705_s25 + $0x8c0] sm:$0xff]  ;;  %551 = vst [vmem:[%s7710_s6 + $0x450] sm:$0xff] %v550_v42  ;;  %553 = vst [vmem:[%s7710_s6 + $0x458] sm:$0xff] %v552_v43  ;;  %v556_v45 = vld [vmem:[%s7705_s25 + $0x8c8] sm:$0xff] }
  0x8b   : > { %555 = vst [vmem:[%s7710_s6 + $0x460] sm:$0xff] %v554_v44  ;;  %v558_v46 = vld [vmem:[%s7705_s25 + $0x8e0] sm:$0xff]  ;;  %v560_v47 = vld [vmem:[%s7705_s25 + $0x8e8] sm:$0xff]  ;;  %557 = vst [vmem:[%s7710_s6 + $0x468] sm:$0xff] %v556_v45 }
  0x8c   : > { %559 = vst [vmem:[%s7710_s6 + $0x470] sm:$0xff] %v558_v46  ;;  %561 = vst [vmem:[%s7710_s6 + $0x478] sm:$0xff] %v560_v47  ;;  %v562_v48 = vld [vmem:[%s7705_s25 + $0x900] sm:$0xff]  ;;  %v564_v49 = vld [vmem:[%s7705_s25 + $0x908] sm:$0xff] }
  0x8d   : > { %v566_v50 = vld [vmem:[%s7705_s25 + $0x920] sm:$0xff]  ;;  %563 = vst [vmem:[%s7710_s6 + $0x480] sm:$0xff] %v562_v48  ;;  %565 = vst [vmem:[%s7710_s6 + $0x488] sm:$0xff] %v564_v49  ;;  %v568_v51 = vld [vmem:[%s7705_s25 + $0x928] sm:$0xff] }
  0x8e   : > { %567 = vst [vmem:[%s7710_s6 + $0x490] sm:$0xff] %v566_v50  ;;  %v570_v52 = vld [vmem:[%s7705_s25 + $0x940] sm:$0xff]  ;;  %v572_v53 = vld [vmem:[%s7705_s25 + $0x948] sm:$0xff]  ;;  %569 = vst [vmem:[%s7710_s6 + $0x498] sm:$0xff] %v568_v51 }
  0x8f   : > { %571 = vst [vmem:[%s7710_s6 + $0x4a0] sm:$0xff] %v570_v52  ;;  %573 = vst [vmem:[%s7710_s6 + $0x4a8] sm:$0xff] %v572_v53  ;;  %v574_v54 = vld [vmem:[%s7705_s25 + $0x960] sm:$0xff]  ;;  %v576_v55 = vld [vmem:[%s7705_s25 + $0x968] sm:$0xff] }
  0x90   : > { %v578_v56 = vld [vmem:[%s7705_s25 + $0x980] sm:$0xff]  ;;  %575 = vst [vmem:[%s7710_s6 + $0x4b0] sm:$0xff] %v574_v54  ;;  %577 = vst [vmem:[%s7710_s6 + $0x4b8] sm:$0xff] %v576_v55  ;;  %v580_v57 = vld [vmem:[%s7705_s25 + $0x988] sm:$0xff] }
  0x91   : > { %579 = vst [vmem:[%s7710_s6 + $0x4c0] sm:$0xff] %v578_v56  ;;  %v582_v58 = vld [vmem:[%s7705_s25 + $0x9a0] sm:$0xff]  ;;  %v584_v59 = vld [vmem:[%s7705_s25 + $0x9a8] sm:$0xff]  ;;  %581 = vst [vmem:[%s7710_s6 + $0x4c8] sm:$0xff] %v580_v57 }
  0x92   : > { %583 = vst [vmem:[%s7710_s6 + $0x4d0] sm:$0xff] %v582_v58  ;;  %585 = vst [vmem:[%s7710_s6 + $0x4d8] sm:$0xff] %v584_v59  ;;  %v586_v60 = vld [vmem:[%s7705_s25 + $0x9c0] sm:$0xff]  ;;  %v588_v61 = vld [vmem:[%s7705_s25 + $0x9c8] sm:$0xff] }
  0x93   : > { %v590_v62 = vld [vmem:[%s7705_s25 + $0x9e0] sm:$0xff]  ;;  %587 = vst [vmem:[%s7710_s6 + $0x4e0] sm:$0xff] %v586_v60  ;;  %589 = vst [vmem:[%s7710_s6 + $0x4e8] sm:$0xff] %v588_v61  ;;  %v592_v63 = vld [vmem:[%s7705_s25 + $0x9e8] sm:$0xff] }
  0x94   : > { %591 = vst [vmem:[%s7710_s6 + $0x4f0] sm:$0xff] %v590_v62  ;;  %v594_v0 = vld [vmem:[%s7705_s25 + $0xa00] sm:$0xff]  ;;  %v596_v1 = vld [vmem:[%s7705_s25 + $0xa08] sm:$0xff]  ;;  %593 = vst [vmem:[%s7710_s6 + $0x4f8] sm:$0xff] %v592_v63 }
  0x95   : > { %595 = vst [vmem:[%s7710_s6 + $0x500] sm:$0xff] %v594_v0  ;;  %597 = vst [vmem:[%s7710_s6 + $0x508] sm:$0xff] %v596_v1  ;;  %v598_v2 = vld [vmem:[%s7705_s25 + $0xa20] sm:$0xff]  ;;  %v600_v3 = vld [vmem:[%s7705_s25 + $0xa28] sm:$0xff] }
  0x96   : > { %v602_v4 = vld [vmem:[%s7705_s25 + $0xa40] sm:$0xff]  ;;  %599 = vst [vmem:[%s7710_s6 + $0x510] sm:$0xff] %v598_v2  ;;  %601 = vst [vmem:[%s7710_s6 + $0x518] sm:$0xff] %v600_v3  ;;  %v604_v5 = vld [vmem:[%s7705_s25 + $0xa48] sm:$0xff] }
  0x97   : > { %603 = vst [vmem:[%s7710_s6 + $0x520] sm:$0xff] %v602_v4  ;;  %v606_v6 = vld [vmem:[%s7705_s25 + $0xa60] sm:$0xff]  ;;  %v608_v7 = vld [vmem:[%s7705_s25 + $0xa68] sm:$0xff]  ;;  %605 = vst [vmem:[%s7710_s6 + $0x528] sm:$0xff] %v604_v5 }
  0x98   : > { %607 = vst [vmem:[%s7710_s6 + $0x530] sm:$0xff] %v606_v6  ;;  %609 = vst [vmem:[%s7710_s6 + $0x538] sm:$0xff] %v608_v7  ;;  %v610_v8 = vld [vmem:[%s7705_s25 + $0xa80] sm:$0xff]  ;;  %v612_v9 = vld [vmem:[%s7705_s25 + $0xa88] sm:$0xff] }
  0x99   : > { %v614_v10 = vld [vmem:[%s7705_s25 + $0xaa0] sm:$0xff]  ;;  %611 = vst [vmem:[%s7710_s6 + $0x540] sm:$0xff] %v610_v8  ;;  %613 = vst [vmem:[%s7710_s6 + $0x548] sm:$0xff] %v612_v9  ;;  %v616_v11 = vld [vmem:[%s7705_s25 + $0xaa8] sm:$0xff] }
  0x9a   : > { %615 = vst [vmem:[%s7710_s6 + $0x550] sm:$0xff] %v614_v10  ;;  %v618_v12 = vld [vmem:[%s7705_s25 + $0xac0] sm:$0xff]  ;;  %v620_v13 = vld [vmem:[%s7705_s25 + $0xac8] sm:$0xff]  ;;  %617 = vst [vmem:[%s7710_s6 + $0x558] sm:$0xff] %v616_v11 }
  0x9b   : > { %619 = vst [vmem:[%s7710_s6 + $0x560] sm:$0xff] %v618_v12  ;;  %621 = vst [vmem:[%s7710_s6 + $0x568] sm:$0xff] %v620_v13  ;;  %v622_v14 = vld [vmem:[%s7705_s25 + $0xae0] sm:$0xff]  ;;  %v624_v15 = vld [vmem:[%s7705_s25 + $0xae8] sm:$0xff] }
  0x9c   : > { %v626_v16 = vld [vmem:[%s7705_s25 + $0xb00] sm:$0xff]  ;;  %623 = vst [vmem:[%s7710_s6 + $0x570] sm:$0xff] %v622_v14  ;;  %625 = vst [vmem:[%s7710_s6 + $0x578] sm:$0xff] %v624_v15  ;;  %v628_v17 = vld [vmem:[%s7705_s25 + $0xb08] sm:$0xff] }
  0x9d   : > { %627 = vst [vmem:[%s7710_s6 + $0x580] sm:$0xff] %v626_v16  ;;  %v630_v18 = vld [vmem:[%s7705_s25 + $0xb20] sm:$0xff]  ;;  %v632_v19 = vld [vmem:[%s7705_s25 + $0xb28] sm:$0xff]  ;;  %629 = vst [vmem:[%s7710_s6 + $0x588] sm:$0xff] %v628_v17 }
  0x9e   : > { %631 = vst [vmem:[%s7710_s6 + $0x590] sm:$0xff] %v630_v18  ;;  %633 = vst [vmem:[%s7710_s6 + $0x598] sm:$0xff] %v632_v19  ;;  %v634_v20 = vld [vmem:[%s7705_s25 + $0xb40] sm:$0xff]  ;;  %v636_v21 = vld [vmem:[%s7705_s25 + $0xb48] sm:$0xff] }
  0x9f   : > { %v638_v22 = vld [vmem:[%s7705_s25 + $0xb60] sm:$0xff]  ;;  %635 = vst [vmem:[%s7710_s6 + $0x5a0] sm:$0xff] %v634_v20  ;;  %637 = vst [vmem:[%s7710_s6 + $0x5a8] sm:$0xff] %v636_v21  ;;  %v640_v23 = vld [vmem:[%s7705_s25 + $0xb68] sm:$0xff] }
  0xa0   : > { %639 = vst [vmem:[%s7710_s6 + $0x5b0] sm:$0xff] %v638_v22  ;;  %v642_v24 = vld [vmem:[%s7705_s25 + $0xb80] sm:$0xff]  ;;  %v644_v25 = vld [vmem:[%s7705_s25 + $0xb88] sm:$0xff]  ;;  %641 = vst [vmem:[%s7710_s6 + $0x5b8] sm:$0xff] %v640_v23 }
  0xa1   : > { %643 = vst [vmem:[%s7710_s6 + $0x5c0] sm:$0xff] %v642_v24  ;;  %645 = vst [vmem:[%s7710_s6 + $0x5c8] sm:$0xff] %v644_v25  ;;  %v646_v26 = vld [vmem:[%s7705_s25 + $0xba0] sm:$0xff]  ;;  %v648_v27 = vld [vmem:[%s7705_s25 + $0xba8] sm:$0xff] }
  0xa2   : > { %v650_v28 = vld [vmem:[%s7705_s25 + $0xbc0] sm:$0xff]  ;;  %647 = vst [vmem:[%s7710_s6 + $0x5d0] sm:$0xff] %v646_v26  ;;  %649 = vst [vmem:[%s7710_s6 + $0x5d8] sm:$0xff] %v648_v27  ;;  %v652_v29 = vld [vmem:[%s7705_s25 + $0xbc8] sm:$0xff] }
  0xa3   : > { %651 = vst [vmem:[%s7710_s6 + $0x5e0] sm:$0xff] %v650_v28  ;;  %v654_v30 = vld [vmem:[%s7705_s25 + $0xbe0] sm:$0xff]  ;;  %v656_v31 = vld [vmem:[%s7705_s25 + $0xbe8] sm:$0xff]  ;;  %653 = vst [vmem:[%s7710_s6 + $0x5e8] sm:$0xff] %v652_v29 }
  0xa4   : > { %655 = vst [vmem:[%s7710_s6 + $0x5f0] sm:$0xff] %v654_v30  ;;  %657 = vst [vmem:[%s7710_s6 + $0x5f8] sm:$0xff] %v656_v31  ;;  %v658_v32 = vld [vmem:[%s7705_s25 + $0xc00] sm:$0xff]  ;;  %v660_v33 = vld [vmem:[%s7705_s25 + $0xc08] sm:$0xff] }
  0xa5   : > { %v662_v34 = vld [vmem:[%s7705_s25 + $0xc20] sm:$0xff]  ;;  %659 = vst [vmem:[%s7710_s6 + $0x600] sm:$0xff] %v658_v32  ;;  %661 = vst [vmem:[%s7710_s6 + $0x608] sm:$0xff] %v660_v33  ;;  %v664_v35 = vld [vmem:[%s7705_s25 + $0xc28] sm:$0xff] }
  0xa6   : > { %663 = vst [vmem:[%s7710_s6 + $0x610] sm:$0xff] %v662_v34  ;;  %v666_v36 = vld [vmem:[%s7705_s25 + $0xc40] sm:$0xff]  ;;  %v668_v37 = vld [vmem:[%s7705_s25 + $0xc48] sm:$0xff]  ;;  %665 = vst [vmem:[%s7710_s6 + $0x618] sm:$0xff] %v664_v35 }
  0xa7   : > { %667 = vst [vmem:[%s7710_s6 + $0x620] sm:$0xff] %v666_v36  ;;  %669 = vst [vmem:[%s7710_s6 + $0x628] sm:$0xff] %v668_v37  ;;  %v670_v38 = vld [vmem:[%s7705_s25 + $0xc60] sm:$0xff]  ;;  %v672_v39 = vld [vmem:[%s7705_s25 + $0xc68] sm:$0xff] }
  0xa8   : > { %v674_v40 = vld [vmem:[%s7705_s25 + $0xc80] sm:$0xff]  ;;  %671 = vst [vmem:[%s7710_s6 + $0x630] sm:$0xff] %v670_v38  ;;  %673 = vst [vmem:[%s7710_s6 + $0x638] sm:$0xff] %v672_v39  ;;  %v676_v41 = vld [vmem:[%s7705_s25 + $0xc88] sm:$0xff] }
  0xa9   : > { %675 = vst [vmem:[%s7710_s6 + $0x640] sm:$0xff] %v674_v40  ;;  %v678_v42 = vld [vmem:[%s7705_s25 + $0xca0] sm:$0xff]  ;;  %v680_v43 = vld [vmem:[%s7705_s25 + $0xca8] sm:$0xff]  ;;  %677 = vst [vmem:[%s7710_s6 + $0x648] sm:$0xff] %v676_v41 }
  0xaa   : > { %679 = vst [vmem:[%s7710_s6 + $0x650] sm:$0xff] %v678_v42  ;;  %681 = vst [vmem:[%s7710_s6 + $0x658] sm:$0xff] %v680_v43  ;;  %v682_v44 = vld [vmem:[%s7705_s25 + $0xcc0] sm:$0xff]  ;;  %v684_v45 = vld [vmem:[%s7705_s25 + $0xcc8] sm:$0xff] }
  0xab   : > { %v686_v46 = vld [vmem:[%s7705_s25 + $0xce0] sm:$0xff]  ;;  %683 = vst [vmem:[%s7710_s6 + $0x660] sm:$0xff] %v682_v44  ;;  %685 = vst [vmem:[%s7710_s6 + $0x668] sm:$0xff] %v684_v45  ;;  %v688_v47 = vld [vmem:[%s7705_s25 + $0xce8] sm:$0xff] }
  0xac   : > { %687 = vst [vmem:[%s7710_s6 + $0x670] sm:$0xff] %v686_v46  ;;  %v690_v48 = vld [vmem:[%s7705_s25 + $0xd00] sm:$0xff]  ;;  %v692_v49 = vld [vmem:[%s7705_s25 + $0xd08] sm:$0xff]  ;;  %689 = vst [vmem:[%s7710_s6 + $0x678] sm:$0xff] %v688_v47 }
  0xad   : > { %691 = vst [vmem:[%s7710_s6 + $0x680] sm:$0xff] %v690_v48  ;;  %693 = vst [vmem:[%s7710_s6 + $0x688] sm:$0xff] %v692_v49  ;;  %v694_v50 = vld [vmem:[%s7705_s25 + $0xd20] sm:$0xff]  ;;  %v696_v51 = vld [vmem:[%s7705_s25 + $0xd28] sm:$0xff] }
  0xae   : > { %v698_v52 = vld [vmem:[%s7705_s25 + $0xd40] sm:$0xff]  ;;  %695 = vst [vmem:[%s7710_s6 + $0x690] sm:$0xff] %v694_v50  ;;  %697 = vst [vmem:[%s7710_s6 + $0x698] sm:$0xff] %v696_v51  ;;  %v700_v53 = vld [vmem:[%s7705_s25 + $0xd48] sm:$0xff] }
  0xaf   : > { %699 = vst [vmem:[%s7710_s6 + $0x6a0] sm:$0xff] %v698_v52  ;;  %v702_v54 = vld [vmem:[%s7705_s25 + $0xd60] sm:$0xff]  ;;  %v704_v55 = vld [vmem:[%s7705_s25 + $0xd68] sm:$0xff]  ;;  %701 = vst [vmem:[%s7710_s6 + $0x6a8] sm:$0xff] %v700_v53 }
  0xb0   : > { %703 = vst [vmem:[%s7710_s6 + $0x6b0] sm:$0xff] %v702_v54  ;;  %705 = vst [vmem:[%s7710_s6 + $0x6b8] sm:$0xff] %v704_v55  ;;  %v706_v56 = vld [vmem:[%s7705_s25 + $0xd80] sm:$0xff]  ;;  %v708_v57 = vld [vmem:[%s7705_s25 + $0xd88] sm:$0xff] }
  0xb1   : > { %v710_v58 = vld [vmem:[%s7705_s25 + $0xda0] sm:$0xff]  ;;  %707 = vst [vmem:[%s7710_s6 + $0x6c0] sm:$0xff] %v706_v56  ;;  %709 = vst [vmem:[%s7710_s6 + $0x6c8] sm:$0xff] %v708_v57  ;;  %v712_v59 = vld [vmem:[%s7705_s25 + $0xda8] sm:$0xff] }
  0xb2   : > { %711 = vst [vmem:[%s7710_s6 + $0x6d0] sm:$0xff] %v710_v58  ;;  %v714_v60 = vld [vmem:[%s7705_s25 + $0xdc0] sm:$0xff]  ;;  %v716_v61 = vld [vmem:[%s7705_s25 + $0xdc8] sm:$0xff]  ;;  %713 = vst [vmem:[%s7710_s6 + $0x6d8] sm:$0xff] %v712_v59 }
  0xb3   : > { %715 = vst [vmem:[%s7710_s6 + $0x6e0] sm:$0xff] %v714_v60  ;;  %717 = vst [vmem:[%s7710_s6 + $0x6e8] sm:$0xff] %v716_v61  ;;  %v718_v62 = vld [vmem:[%s7705_s25 + $0xde0] sm:$0xff]  ;;  %v720_v63 = vld [vmem:[%s7705_s25 + $0xde8] sm:$0xff] }
  0xb4   : > { %v722_v0 = vld [vmem:[%s7705_s25 + $0xe00] sm:$0xff]  ;;  %719 = vst [vmem:[%s7710_s6 + $0x6f0] sm:$0xff] %v718_v62  ;;  %721 = vst [vmem:[%s7710_s6 + $0x6f8] sm:$0xff] %v720_v63  ;;  %v724_v1 = vld [vmem:[%s7705_s25 + $0xe08] sm:$0xff] }
  0xb5   : > { %723 = vst [vmem:[%s7710_s6 + $0x700] sm:$0xff] %v722_v0  ;;  %v726_v2 = vld [vmem:[%s7705_s25 + $0xe20] sm:$0xff]  ;;  %v728_v3 = vld [vmem:[%s7705_s25 + $0xe28] sm:$0xff]  ;;  %725 = vst [vmem:[%s7710_s6 + $0x708] sm:$0xff] %v724_v1 }
  0xb6   : > { %727 = vst [vmem:[%s7710_s6 + $0x710] sm:$0xff] %v726_v2  ;;  %729 = vst [vmem:[%s7710_s6 + $0x718] sm:$0xff] %v728_v3  ;;  %v730_v4 = vld [vmem:[%s7705_s25 + $0xe40] sm:$0xff]  ;;  %v732_v5 = vld [vmem:[%s7705_s25 + $0xe48] sm:$0xff] }
  0xb7   : > { %v734_v6 = vld [vmem:[%s7705_s25 + $0xe60] sm:$0xff]  ;;  %731 = vst [vmem:[%s7710_s6 + $0x720] sm:$0xff] %v730_v4  ;;  %733 = vst [vmem:[%s7710_s6 + $0x728] sm:$0xff] %v732_v5  ;;  %v736_v7 = vld [vmem:[%s7705_s25 + $0xe68] sm:$0xff] }
  0xb8   : > { %735 = vst [vmem:[%s7710_s6 + $0x730] sm:$0xff] %v734_v6  ;;  %v738_v8 = vld [vmem:[%s7705_s25 + $0xe80] sm:$0xff]  ;;  %v740_v9 = vld [vmem:[%s7705_s25 + $0xe88] sm:$0xff]  ;;  %737 = vst [vmem:[%s7710_s6 + $0x738] sm:$0xff] %v736_v7 }
  0xb9   : > { %739 = vst [vmem:[%s7710_s6 + $0x740] sm:$0xff] %v738_v8  ;;  %741 = vst [vmem:[%s7710_s6 + $0x748] sm:$0xff] %v740_v9  ;;  %v742_v10 = vld [vmem:[%s7705_s25 + $0xea0] sm:$0xff]  ;;  %v744_v11 = vld [vmem:[%s7705_s25 + $0xea8] sm:$0xff] }
  0xba   : > { %v746_v12 = vld [vmem:[%s7705_s25 + $0xec0] sm:$0xff]  ;;  %743 = vst [vmem:[%s7710_s6 + $0x750] sm:$0xff] %v742_v10  ;;  %745 = vst [vmem:[%s7710_s6 + $0x758] sm:$0xff] %v744_v11  ;;  %v748_v13 = vld [vmem:[%s7705_s25 + $0xec8] sm:$0xff] }
  0xbb   : > { %747 = vst [vmem:[%s7710_s6 + $0x760] sm:$0xff] %v746_v12  ;;  %v750_v14 = vld [vmem:[%s7705_s25 + $0xee0] sm:$0xff]  ;;  %v752_v15 = vld [vmem:[%s7705_s25 + $0xee8] sm:$0xff]  ;;  %749 = vst [vmem:[%s7710_s6 + $0x768] sm:$0xff] %v748_v13 }
  0xbc   : > { %751 = vst [vmem:[%s7710_s6 + $0x770] sm:$0xff] %v750_v14  ;;  %753 = vst [vmem:[%s7710_s6 + $0x778] sm:$0xff] %v752_v15  ;;  %v754_v16 = vld [vmem:[%s7705_s25 + $0xf00] sm:$0xff]  ;;  %v756_v17 = vld [vmem:[%s7705_s25 + $0xf08] sm:$0xff] }
  0xbd   : > { %v758_v18 = vld [vmem:[%s7705_s25 + $0xf20] sm:$0xff]  ;;  %755 = vst [vmem:[%s7710_s6 + $0x780] sm:$0xff] %v754_v16  ;;  %757 = vst [vmem:[%s7710_s6 + $0x788] sm:$0xff] %v756_v17  ;;  %v760_v19 = vld [vmem:[%s7705_s25 + $0xf28] sm:$0xff] }
  0xbe   : > { %759 = vst [vmem:[%s7710_s6 + $0x790] sm:$0xff] %v758_v18  ;;  %v762_v20 = vld [vmem:[%s7705_s25 + $0xf40] sm:$0xff]  ;;  %v764_v21 = vld [vmem:[%s7705_s25 + $0xf48] sm:$0xff]  ;;  %761 = vst [vmem:[%s7710_s6 + $0x798] sm:$0xff] %v760_v19 }
  0xbf   : > { %763 = vst [vmem:[%s7710_s6 + $0x7a0] sm:$0xff] %v762_v20  ;;  %765 = vst [vmem:[%s7710_s6 + $0x7a8] sm:$0xff] %v764_v21  ;;  %v766_v22 = vld [vmem:[%s7705_s25 + $0xf60] sm:$0xff]  ;;  %v768_v23 = vld [vmem:[%s7705_s25 + $0xf68] sm:$0xff] }
  0xc0   : > { %v770_v24 = vld [vmem:[%s7705_s25 + $0xf80] sm:$0xff]  ;;  %767 = vst [vmem:[%s7710_s6 + $0x7b0] sm:$0xff] %v766_v22  ;;  %769 = vst [vmem:[%s7710_s6 + $0x7b8] sm:$0xff] %v768_v23  ;;  %v772_v25 = vld [vmem:[%s7705_s25 + $0xf88] sm:$0xff] }
  0xc1   : > { %771 = vst [vmem:[%s7710_s6 + $0x7c0] sm:$0xff] %v770_v24  ;;  %v774_v26 = vld [vmem:[%s7705_s25 + $0xfa0] sm:$0xff]  ;;  %v776_v27 = vld [vmem:[%s7705_s25 + $0xfa8] sm:$0xff]  ;;  %773 = vst [vmem:[%s7710_s6 + $0x7c8] sm:$0xff] %v772_v25 }
  0xc2   : > { %775 = vst [vmem:[%s7710_s6 + $0x7d0] sm:$0xff] %v774_v26  ;;  %777 = vst [vmem:[%s7710_s6 + $0x7d8] sm:$0xff] %v776_v27  ;;  %v778_v28 = vld [vmem:[%s7705_s25 + $0xfc0] sm:$0xff]  ;;  %v780_v29 = vld [vmem:[%s7705_s25 + $0xfc8] sm:$0xff] }
  0xc3   : > { %v782_v30 = vld [vmem:[%s7705_s25 + $0xfe0] sm:$0xff]  ;;  %779 = vst [vmem:[%s7710_s6 + $0x7e0] sm:$0xff] %v778_v28  ;;  %781 = vst [vmem:[%s7710_s6 + $0x7e8] sm:$0xff] %v780_v29  ;;  %v784_v31 = vld [vmem:[%s7705_s25 + $0xfe8] sm:$0xff] }
  0xc4   : > { %783 = vst [vmem:[%s7710_s6 + $0x7f0] sm:$0xff] %v782_v30  ;;  %v786_v32 = vld [vmem:[%s7705_s25 + $0x1000] sm:$0xff]  ;;  %v788_v33 = vld [vmem:[%s7705_s25 + $0x1008] sm:$0xff]  ;;  %785 = vst [vmem:[%s7710_s6 + $0x7f8] sm:$0xff] %v784_v31 }
  0xc5   : > { %787 = vst [vmem:[%s7710_s6 + $0x800] sm:$0xff] %v786_v32  ;;  %789 = vst [vmem:[%s7710_s6 + $0x808] sm:$0xff] %v788_v33  ;;  %v790_v34 = vld [vmem:[%s7705_s25 + $0x1020] sm:$0xff]  ;;  %v792_v35 = vld [vmem:[%s7705_s25 + $0x1028] sm:$0xff] }
  0xc6   : > { %v794_v36 = vld [vmem:[%s7705_s25 + $0x1040] sm:$0xff]  ;;  %791 = vst [vmem:[%s7710_s6 + $0x810] sm:$0xff] %v790_v34  ;;  %793 = vst [vmem:[%s7710_s6 + $0x818] sm:$0xff] %v792_v35  ;;  %v796_v37 = vld [vmem:[%s7705_s25 + $0x1048] sm:$0xff] }
  0xc7   : > { %795 = vst [vmem:[%s7710_s6 + $0x820] sm:$0xff] %v794_v36  ;;  %v798_v38 = vld [vmem:[%s7705_s25 + $0x1060] sm:$0xff]  ;;  %v800_v39 = vld [vmem:[%s7705_s25 + $0x1068] sm:$0xff]  ;;  %797 = vst [vmem:[%s7710_s6 + $0x828] sm:$0xff] %v796_v37 }
  0xc8   : > { %799 = vst [vmem:[%s7710_s6 + $0x830] sm:$0xff] %v798_v38  ;;  %801 = vst [vmem:[%s7710_s6 + $0x838] sm:$0xff] %v800_v39  ;;  %v802_v40 = vld [vmem:[%s7705_s25 + $0x1080] sm:$0xff]  ;;  %v804_v41 = vld [vmem:[%s7705_s25 + $0x1088] sm:$0xff] }
  0xc9   : > { %v806_v42 = vld [vmem:[%s7705_s25 + $0x10a0] sm:$0xff]  ;;  %803 = vst [vmem:[%s7710_s6 + $0x840] sm:$0xff] %v802_v40  ;;  %805 = vst [vmem:[%s7710_s6 + $0x848] sm:$0xff] %v804_v41  ;;  %v808_v43 = vld [vmem:[%s7705_s25 + $0x10a8] sm:$0xff] }
  0xca   : > { %807 = vst [vmem:[%s7710_s6 + $0x850] sm:$0xff] %v806_v42  ;;  %v810_v44 = vld [vmem:[%s7705_s25 + $0x10c0] sm:$0xff]  ;;  %v812_v45 = vld [vmem:[%s7705_s25 + $0x10c8] sm:$0xff]  ;;  %809 = vst [vmem:[%s7710_s6 + $0x858] sm:$0xff] %v808_v43 }
  0xcb   : > { %811 = vst [vmem:[%s7710_s6 + $0x860] sm:$0xff] %v810_v44  ;;  %813 = vst [vmem:[%s7710_s6 + $0x868] sm:$0xff] %v812_v45  ;;  %v814_v46 = vld [vmem:[%s7705_s25 + $0x10e0] sm:$0xff]  ;;  %v816_v47 = vld [vmem:[%s7705_s25 + $0x10e8] sm:$0xff] }
  0xcc   : > { %v818_v48 = vld [vmem:[%s7705_s25 + $0x1100] sm:$0xff]  ;;  %815 = vst [vmem:[%s7710_s6 + $0x870] sm:$0xff] %v814_v46  ;;  %817 = vst [vmem:[%s7710_s6 + $0x878] sm:$0xff] %v816_v47  ;;  %v820_v49 = vld [vmem:[%s7705_s25 + $0x1108] sm:$0xff] }
  0xcd   : > { %819 = vst [vmem:[%s7710_s6 + $0x880] sm:$0xff] %v818_v48  ;;  %v822_v50 = vld [vmem:[%s7705_s25 + $0x1120] sm:$0xff]  ;;  %v824_v51 = vld [vmem:[%s7705_s25 + $0x1128] sm:$0xff]  ;;  %821 = vst [vmem:[%s7710_s6 + $0x888] sm:$0xff] %v820_v49 }
  0xce   : > { %823 = vst [vmem:[%s7710_s6 + $0x890] sm:$0xff] %v822_v50  ;;  %825 = vst [vmem:[%s7710_s6 + $0x898] sm:$0xff] %v824_v51  ;;  %v826_v52 = vld [vmem:[%s7705_s25 + $0x1140] sm:$0xff]  ;;  %v828_v53 = vld [vmem:[%s7705_s25 + $0x1148] sm:$0xff] }
  0xcf   : > { %v830_v54 = vld [vmem:[%s7705_s25 + $0x1160] sm:$0xff]  ;;  %827 = vst [vmem:[%s7710_s6 + $0x8a0] sm:$0xff] %v826_v52  ;;  %829 = vst [vmem:[%s7710_s6 + $0x8a8] sm:$0xff] %v828_v53  ;;  %v832_v55 = vld [vmem:[%s7705_s25 + $0x1168] sm:$0xff] }
  0xd0   : > { %831 = vst [vmem:[%s7710_s6 + $0x8b0] sm:$0xff] %v830_v54  ;;  %v834_v56 = vld [vmem:[%s7705_s25 + $0x1180] sm:$0xff]  ;;  %v836_v57 = vld [vmem:[%s7705_s25 + $0x1188] sm:$0xff]  ;;  %833 = vst [vmem:[%s7710_s6 + $0x8b8] sm:$0xff] %v832_v55 }
  0xd1   : > { %835 = vst [vmem:[%s7710_s6 + $0x8c0] sm:$0xff] %v834_v56  ;;  %837 = vst [vmem:[%s7710_s6 + $0x8c8] sm:$0xff] %v836_v57  ;;  %v838_v58 = vld [vmem:[%s7705_s25 + $0x11a0] sm:$0xff]  ;;  %v840_v59 = vld [vmem:[%s7705_s25 + $0x11a8] sm:$0xff] }
  0xd2   : > { %v842_v60 = vld [vmem:[%s7705_s25 + $0x11c0] sm:$0xff]  ;;  %839 = vst [vmem:[%s7710_s6 + $0x8d0] sm:$0xff] %v838_v58  ;;  %841 = vst [vmem:[%s7710_s6 + $0x8d8] sm:$0xff] %v840_v59  ;;  %v844_v61 = vld [vmem:[%s7705_s25 + $0x11c8] sm:$0xff] }
  0xd3   : > { %843 = vst [vmem:[%s7710_s6 + $0x8e0] sm:$0xff] %v842_v60  ;;  %v846_v62 = vld [vmem:[%s7705_s25 + $0x11e0] sm:$0xff]  ;;  %v848_v63 = vld [vmem:[%s7705_s25 + $0x11e8] sm:$0xff]  ;;  %845 = vst [vmem:[%s7710_s6 + $0x8e8] sm:$0xff] %v844_v61 }
  0xd4   : > { %847 = vst [vmem:[%s7710_s6 + $0x8f0] sm:$0xff] %v846_v62  ;;  %849 = vst [vmem:[%s7710_s6 + $0x8f8] sm:$0xff] %v848_v63  ;;  %v850_v0 = vld [vmem:[%s7705_s25 + $0x1200] sm:$0xff]  ;;  %v852_v1 = vld [vmem:[%s7705_s25 + $0x1208] sm:$0xff] }
  0xd5   : > { %v854_v2 = vld [vmem:[%s7705_s25 + $0x1220] sm:$0xff]  ;;  %851 = vst [vmem:[%s7710_s6 + $0x900] sm:$0xff] %v850_v0  ;;  %853 = vst [vmem:[%s7710_s6 + $0x908] sm:$0xff] %v852_v1  ;;  %v856_v3 = vld [vmem:[%s7705_s25 + $0x1228] sm:$0xff] }
  0xd6   : > { %855 = vst [vmem:[%s7710_s6 + $0x910] sm:$0xff] %v854_v2  ;;  %v858_v4 = vld [vmem:[%s7705_s25 + $0x1240] sm:$0xff]  ;;  %v860_v5 = vld [vmem:[%s7705_s25 + $0x1248] sm:$0xff]  ;;  %857 = vst [vmem:[%s7710_s6 + $0x918] sm:$0xff] %v856_v3 }
  0xd7   : > { %859 = vst [vmem:[%s7710_s6 + $0x920] sm:$0xff] %v858_v4  ;;  %861 = vst [vmem:[%s7710_s6 + $0x928] sm:$0xff] %v860_v5  ;;  %v862_v6 = vld [vmem:[%s7705_s25 + $0x1260] sm:$0xff]  ;;  %v864_v7 = vld [vmem:[%s7705_s25 + $0x1268] sm:$0xff] }
  0xd8   : > { %v866_v8 = vld [vmem:[%s7705_s25 + $0x1280] sm:$0xff]  ;;  %863 = vst [vmem:[%s7710_s6 + $0x930] sm:$0xff] %v862_v6  ;;  %865 = vst [vmem:[%s7710_s6 + $0x938] sm:$0xff] %v864_v7  ;;  %v868_v9 = vld [vmem:[%s7705_s25 + $0x1288] sm:$0xff] }
  0xd9   : > { %867 = vst [vmem:[%s7710_s6 + $0x940] sm:$0xff] %v866_v8  ;;  %v870_v10 = vld [vmem:[%s7705_s25 + $0x12a0] sm:$0xff]  ;;  %v872_v11 = vld [vmem:[%s7705_s25 + $0x12a8] sm:$0xff]  ;;  %869 = vst [vmem:[%s7710_s6 + $0x948] sm:$0xff] %v868_v9 }
  0xda   : > { %871 = vst [vmem:[%s7710_s6 + $0x950] sm:$0xff] %v870_v10  ;;  %873 = vst [vmem:[%s7710_s6 + $0x958] sm:$0xff] %v872_v11  ;;  %v874_v12 = vld [vmem:[%s7705_s25 + $0x12c0] sm:$0xff]  ;;  %v876_v13 = vld [vmem:[%s7705_s25 + $0x12c8] sm:$0xff] }
  0xdb   : > { %v878_v14 = vld [vmem:[%s7705_s25 + $0x12e0] sm:$0xff]  ;;  %875 = vst [vmem:[%s7710_s6 + $0x960] sm:$0xff] %v874_v12  ;;  %877 = vst [vmem:[%s7710_s6 + $0x968] sm:$0xff] %v876_v13  ;;  %v880_v15 = vld [vmem:[%s7705_s25 + $0x12e8] sm:$0xff] }
  0xdc   : > { %879 = vst [vmem:[%s7710_s6 + $0x970] sm:$0xff] %v878_v14  ;;  %v882_v16 = vld [vmem:[%s7705_s25 + $0x1300] sm:$0xff]  ;;  %v884_v17 = vld [vmem:[%s7705_s25 + $0x1308] sm:$0xff]  ;;  %881 = vst [vmem:[%s7710_s6 + $0x978] sm:$0xff] %v880_v15 }
  0xdd   : > { %883 = vst [vmem:[%s7710_s6 + $0x980] sm:$0xff] %v882_v16  ;;  %885 = vst [vmem:[%s7710_s6 + $0x988] sm:$0xff] %v884_v17  ;;  %v886_v18 = vld [vmem:[%s7705_s25 + $0x1320] sm:$0xff]  ;;  %v888_v19 = vld [vmem:[%s7705_s25 + $0x1328] sm:$0xff] }
  0xde   : > { %v890_v20 = vld [vmem:[%s7705_s25 + $0x1340] sm:$0xff]  ;;  %887 = vst [vmem:[%s7710_s6 + $0x990] sm:$0xff] %v886_v18  ;;  %889 = vst [vmem:[%s7710_s6 + $0x998] sm:$0xff] %v888_v19  ;;  %v892_v21 = vld [vmem:[%s7705_s25 + $0x1348] sm:$0xff] }
  0xdf   : > { %891 = vst [vmem:[%s7710_s6 + $0x9a0] sm:$0xff] %v890_v20  ;;  %v894_v22 = vld [vmem:[%s7705_s25 + $0x1360] sm:$0xff]  ;;  %v896_v23 = vld [vmem:[%s7705_s25 + $0x1368] sm:$0xff]  ;;  %893 = vst [vmem:[%s7710_s6 + $0x9a8] sm:$0xff] %v892_v21 }
  0xe0   : > { %895 = vst [vmem:[%s7710_s6 + $0x9b0] sm:$0xff] %v894_v22  ;;  %897 = vst [vmem:[%s7710_s6 + $0x9b8] sm:$0xff] %v896_v23  ;;  %v898_v24 = vld [vmem:[%s7705_s25 + $0x1380] sm:$0xff]  ;;  %v900_v25 = vld [vmem:[%s7705_s25 + $0x1388] sm:$0xff] }
  0xe1   : > { %v902_v26 = vld [vmem:[%s7705_s25 + $0x13a0] sm:$0xff]  ;;  %899 = vst [vmem:[%s7710_s6 + $0x9c0] sm:$0xff] %v898_v24  ;;  %901 = vst [vmem:[%s7710_s6 + $0x9c8] sm:$0xff] %v900_v25  ;;  %v904_v27 = vld [vmem:[%s7705_s25 + $0x13a8] sm:$0xff] }
  0xe2   : > { %903 = vst [vmem:[%s7710_s6 + $0x9d0] sm:$0xff] %v902_v26  ;;  %v906_v28 = vld [vmem:[%s7705_s25 + $0x13c0] sm:$0xff]  ;;  %v908_v29 = vld [vmem:[%s7705_s25 + $0x13c8] sm:$0xff]  ;;  %905 = vst [vmem:[%s7710_s6 + $0x9d8] sm:$0xff] %v904_v27 }
  0xe3   : > { %907 = vst [vmem:[%s7710_s6 + $0x9e0] sm:$0xff] %v906_v28  ;;  %909 = vst [vmem:[%s7710_s6 + $0x9e8] sm:$0xff] %v908_v29  ;;  %v910_v30 = vld [vmem:[%s7705_s25 + $0x13e0] sm:$0xff]  ;;  %v912_v31 = vld [vmem:[%s7705_s25 + $0x13e8] sm:$0xff] }
  0xe4   : > { %v914_v32 = vld [vmem:[%s7705_s25 + $0x1400] sm:$0xff]  ;;  %911 = vst [vmem:[%s7710_s6 + $0x9f0] sm:$0xff] %v910_v30  ;;  %913 = vst [vmem:[%s7710_s6 + $0x9f8] sm:$0xff] %v912_v31  ;;  %v916_v33 = vld [vmem:[%s7705_s25 + $0x1408] sm:$0xff] }
  0xe5   : > { %915 = vst [vmem:[%s7710_s6 + $0xa00] sm:$0xff] %v914_v32  ;;  %v918_v34 = vld [vmem:[%s7705_s25 + $0x1420] sm:$0xff]  ;;  %v920_v35 = vld [vmem:[%s7705_s25 + $0x1428] sm:$0xff]  ;;  %917 = vst [vmem:[%s7710_s6 + $0xa08] sm:$0xff] %v916_v33 }
  0xe6   : > { %919 = vst [vmem:[%s7710_s6 + $0xa10] sm:$0xff] %v918_v34  ;;  %921 = vst [vmem:[%s7710_s6 + $0xa18] sm:$0xff] %v920_v35  ;;  %v922_v36 = vld [vmem:[%s7705_s25 + $0x1440] sm:$0xff]  ;;  %v924_v37 = vld [vmem:[%s7705_s25 + $0x1448] sm:$0xff] }
  0xe7   : > { %v926_v38 = vld [vmem:[%s7705_s25 + $0x1460] sm:$0xff]  ;;  %923 = vst [vmem:[%s7710_s6 + $0xa20] sm:$0xff] %v922_v36  ;;  %925 = vst [vmem:[%s7710_s6 + $0xa28] sm:$0xff] %v924_v37  ;;  %v928_v39 = vld [vmem:[%s7705_s25 + $0x1468] sm:$0xff] }
  0xe8   : > { %927 = vst [vmem:[%s7710_s6 + $0xa30] sm:$0xff] %v926_v38  ;;  %v930_v40 = vld [vmem:[%s7705_s25 + $0x1480] sm:$0xff]  ;;  %v932_v41 = vld [vmem:[%s7705_s25 + $0x1488] sm:$0xff]  ;;  %929 = vst [vmem:[%s7710_s6 + $0xa38] sm:$0xff] %v928_v39 }
  0xe9   : > { %931 = vst [vmem:[%s7710_s6 + $0xa40] sm:$0xff] %v930_v40  ;;  %933 = vst [vmem:[%s7710_s6 + $0xa48] sm:$0xff] %v932_v41  ;;  %v934_v42 = vld [vmem:[%s7705_s25 + $0x14a0] sm:$0xff]  ;;  %v936_v43 = vld [vmem:[%s7705_s25 + $0x14a8] sm:$0xff] }
  0xea   : > { %v938_v44 = vld [vmem:[%s7705_s25 + $0x14c0] sm:$0xff]  ;;  %935 = vst [vmem:[%s7710_s6 + $0xa50] sm:$0xff] %v934_v42  ;;  %937 = vst [vmem:[%s7710_s6 + $0xa58] sm:$0xff] %v936_v43  ;;  %v940_v45 = vld [vmem:[%s7705_s25 + $0x14c8] sm:$0xff] }
  0xeb   : > { %939 = vst [vmem:[%s7710_s6 + $0xa60] sm:$0xff] %v938_v44  ;;  %v942_v46 = vld [vmem:[%s7705_s25 + $0x14e0] sm:$0xff]  ;;  %v944_v47 = vld [vmem:[%s7705_s25 + $0x14e8] sm:$0xff]  ;;  %941 = vst [vmem:[%s7710_s6 + $0xa68] sm:$0xff] %v940_v45 }
  0xec   : > { %943 = vst [vmem:[%s7710_s6 + $0xa70] sm:$0xff] %v942_v46  ;;  %945 = vst [vmem:[%s7710_s6 + $0xa78] sm:$0xff] %v944_v47  ;;  %v946_v48 = vld [vmem:[%s7705_s25 + $0x1500] sm:$0xff]  ;;  %v948_v49 = vld [vmem:[%s7705_s25 + $0x1508] sm:$0xff] }
  0xed   : > { %v950_v50 = vld [vmem:[%s7705_s25 + $0x1520] sm:$0xff]  ;;  %947 = vst [vmem:[%s7710_s6 + $0xa80] sm:$0xff] %v946_v48  ;;  %949 = vst [vmem:[%s7710_s6 + $0xa88] sm:$0xff] %v948_v49  ;;  %v952_v51 = vld [vmem:[%s7705_s25 + $0x1528] sm:$0xff] }
  0xee   : > { %951 = vst [vmem:[%s7710_s6 + $0xa90] sm:$0xff] %v950_v50  ;;  %v954_v52 = vld [vmem:[%s7705_s25 + $0x1540] sm:$0xff]  ;;  %v956_v53 = vld [vmem:[%s7705_s25 + $0x1548] sm:$0xff]  ;;  %953 = vst [vmem:[%s7710_s6 + $0xa98] sm:$0xff] %v952_v51 }
  0xef   : > { %955 = vst [vmem:[%s7710_s6 + $0xaa0] sm:$0xff] %v954_v52  ;;  %957 = vst [vmem:[%s7710_s6 + $0xaa8] sm:$0xff] %v956_v53  ;;  %v958_v54 = vld [vmem:[%s7705_s25 + $0x1560] sm:$0xff]  ;;  %v960_v55 = vld [vmem:[%s7705_s25 + $0x1568] sm:$0xff] }
  0xf0   : > { %v962_v56 = vld [vmem:[%s7705_s25 + $0x1580] sm:$0xff]  ;;  %959 = vst [vmem:[%s7710_s6 + $0xab0] sm:$0xff] %v958_v54  ;;  %961 = vst [vmem:[%s7710_s6 + $0xab8] sm:$0xff] %v960_v55  ;;  %v964_v57 = vld [vmem:[%s7705_s25 + $0x1588] sm:$0xff] }
  0xf1   : > { %963 = vst [vmem:[%s7710_s6 + $0xac0] sm:$0xff] %v962_v56  ;;  %v966_v58 = vld [vmem:[%s7705_s25 + $0x15a0] sm:$0xff]  ;;  %v968_v59 = vld [vmem:[%s7705_s25 + $0x15a8] sm:$0xff]  ;;  %965 = vst [vmem:[%s7710_s6 + $0xac8] sm:$0xff] %v964_v57 }
  0xf2   : > { %967 = vst [vmem:[%s7710_s6 + $0xad0] sm:$0xff] %v966_v58  ;;  %969 = vst [vmem:[%s7710_s6 + $0xad8] sm:$0xff] %v968_v59  ;;  %v970_v60 = vld [vmem:[%s7705_s25 + $0x15c0] sm:$0xff]  ;;  %v972_v61 = vld [vmem:[%s7705_s25 + $0x15c8] sm:$0xff] }
  0xf3   : > { %v974_v62 = vld [vmem:[%s7705_s25 + $0x15e0] sm:$0xff]  ;;  %971 = vst [vmem:[%s7710_s6 + $0xae0] sm:$0xff] %v970_v60  ;;  %973 = vst [vmem:[%s7710_s6 + $0xae8] sm:$0xff] %v972_v61  ;;  %v976_v63 = vld [vmem:[%s7705_s25 + $0x15e8] sm:$0xff] }
  0xf4   : > { %975 = vst [vmem:[%s7710_s6 + $0xaf0] sm:$0xff] %v974_v62  ;;  %v978_v0 = vld [vmem:[%s7705_s25 + $0x1600] sm:$0xff]  ;;  %v980_v1 = vld [vmem:[%s7705_s25 + $0x1608] sm:$0xff]  ;;  %977 = vst [vmem:[%s7710_s6 + $0xaf8] sm:$0xff] %v976_v63 }
  0xf5   : > { %979 = vst [vmem:[%s7710_s6 + $0xb00] sm:$0xff] %v978_v0  ;;  %981 = vst [vmem:[%s7710_s6 + $0xb08] sm:$0xff] %v980_v1  ;;  %v982_v2 = vld [vmem:[%s7705_s25 + $0x1620] sm:$0xff]  ;;  %v984_v3 = vld [vmem:[%s7705_s25 + $0x1628] sm:$0xff] }
  0xf6   : > { %v986_v4 = vld [vmem:[%s7705_s25 + $0x1640] sm:$0xff]  ;;  %983 = vst [vmem:[%s7710_s6 + $0xb10] sm:$0xff] %v982_v2  ;;  %985 = vst [vmem:[%s7710_s6 + $0xb18] sm:$0xff] %v984_v3  ;;  %v988_v5 = vld [vmem:[%s7705_s25 + $0x1648] sm:$0xff] }
  0xf7   : > { %987 = vst [vmem:[%s7710_s6 + $0xb20] sm:$0xff] %v986_v4  ;;  %v990_v6 = vld [vmem:[%s7705_s25 + $0x1660] sm:$0xff]  ;;  %v992_v7 = vld [vmem:[%s7705_s25 + $0x1668] sm:$0xff]  ;;  %989 = vst [vmem:[%s7710_s6 + $0xb28] sm:$0xff] %v988_v5 }
  0xf8   : > { %991 = vst [vmem:[%s7710_s6 + $0xb30] sm:$0xff] %v990_v6  ;;  %993 = vst [vmem:[%s7710_s6 + $0xb38] sm:$0xff] %v992_v7  ;;  %v994_v8 = vld [vmem:[%s7705_s25 + $0x1680] sm:$0xff]  ;;  %v996_v9 = vld [vmem:[%s7705_s25 + $0x1688] sm:$0xff] }
  0xf9   : > { %v998_v10 = vld [vmem:[%s7705_s25 + $0x16a0] sm:$0xff]  ;;  %995 = vst [vmem:[%s7710_s6 + $0xb40] sm:$0xff] %v994_v8  ;;  %997 = vst [vmem:[%s7710_s6 + $0xb48] sm:$0xff] %v996_v9  ;;  %v1000_v11 = vld [vmem:[%s7705_s25 + $0x16a8] sm:$0xff] }
  0xfa   : > { %999 = vst [vmem:[%s7710_s6 + $0xb50] sm:$0xff] %v998_v10  ;;  %v1002_v12 = vld [vmem:[%s7705_s25 + $0x16c0] sm:$0xff]  ;;  %v1004_v13 = vld [vmem:[%s7705_s25 + $0x16c8] sm:$0xff]  ;;  %1001 = vst [vmem:[%s7710_s6 + $0xb58] sm:$0xff] %v1000_v11 }
  0xfb   : > { %1003 = vst [vmem:[%s7710_s6 + $0xb60] sm:$0xff] %v1002_v12  ;;  %1005 = vst [vmem:[%s7710_s6 + $0xb68] sm:$0xff] %v1004_v13  ;;  %v1006_v14 = vld [vmem:[%s7705_s25 + $0x16e0] sm:$0xff]  ;;  %v1008_v15 = vld [vmem:[%s7705_s25 + $0x16e8] sm:$0xff] }
  0xfc   : > { %v1010_v16 = vld [vmem:[%s7705_s25 + $0x1700] sm:$0xff]  ;;  %1007 = vst [vmem:[%s7710_s6 + $0xb70] sm:$0xff] %v1006_v14  ;;  %1009 = vst [vmem:[%s7710_s6 + $0xb78] sm:$0xff] %v1008_v15  ;;  %v1012_v17 = vld [vmem:[%s7705_s25 + $0x1708] sm:$0xff] }
  0xfd   : > { %1011 = vst [vmem:[%s7710_s6 + $0xb80] sm:$0xff] %v1010_v16  ;;  %v1014_v18 = vld [vmem:[%s7705_s25 + $0x1720] sm:$0xff]  ;;  %v1016_v19 = vld [vmem:[%s7705_s25 + $0x1728] sm:$0xff]  ;;  %1013 = vst [vmem:[%s7710_s6 + $0xb88] sm:$0xff] %v1012_v17 }
  0xfe   : > { %1015 = vst [vmem:[%s7710_s6 + $0xb90] sm:$0xff] %v1014_v18  ;;  %1017 = vst [vmem:[%s7710_s6 + $0xb98] sm:$0xff] %v1016_v19  ;;  %v1018_v20 = vld [vmem:[%s7705_s25 + $0x1740] sm:$0xff]  ;;  %v1020_v21 = vld [vmem:[%s7705_s25 + $0x1748] sm:$0xff] }
  0xff   : > { %v1022_v22 = vld [vmem:[%s7705_s25 + $0x1760] sm:$0xff]  ;;  %1019 = vst [vmem:[%s7710_s6 + $0xba0] sm:$0xff] %v1018_v20  ;;  %1021 = vst [vmem:[%s7710_s6 + $0xba8] sm:$0xff] %v1020_v21  ;;  %v1024_v23 = vld [vmem:[%s7705_s25 + $0x1768] sm:$0xff] }
 0x100   : > { %1023 = vst [vmem:[%s7710_s6 + $0xbb0] sm:$0xff] %v1022_v22  ;;  %v1026_v24 = vld [vmem:[%s7705_s25 + $0x1780] sm:$0xff]  ;;  %v1028_v25 = vld [vmem:[%s7705_s25 + $0x1788] sm:$0xff]  ;;  %1025 = vst [vmem:[%s7710_s6 + $0xbb8] sm:$0xff] %v1024_v23 }
 0x101   : > { %1027 = vst [vmem:[%s7710_s6 + $0xbc0] sm:$0xff] %v1026_v24  ;;  %1029 = vst [vmem:[%s7710_s6 + $0xbc8] sm:$0xff] %v1028_v25  ;;  %v1030_v26 = vld [vmem:[%s7705_s25 + $0x17a0] sm:$0xff]  ;;  %v1032_v27 = vld [vmem:[%s7705_s25 + $0x17a8] sm:$0xff] }
 0x102   : > { %v1034_v28 = vld [vmem:[%s7705_s25 + $0x17c0] sm:$0xff]  ;;  %1031 = vst [vmem:[%s7710_s6 + $0xbd0] sm:$0xff] %v1030_v26  ;;  %1033 = vst [vmem:[%s7710_s6 + $0xbd8] sm:$0xff] %v1032_v27  ;;  %v1036_v29 = vld [vmem:[%s7705_s25 + $0x17c8] sm:$0xff] }
 0x103   : > { %1035 = vst [vmem:[%s7710_s6 + $0xbe0] sm:$0xff] %v1034_v28  ;;  %v1038_v30 = vld [vmem:[%s7705_s25 + $0x17e0] sm:$0xff]  ;;  %v1040_v31 = vld [vmem:[%s7705_s25 + $0x17e8] sm:$0xff]  ;;  %1037 = vst [vmem:[%s7710_s6 + $0xbe8] sm:$0xff] %v1036_v29 }
 0x104   : > { %1039 = vst [vmem:[%s7710_s6 + $0xbf0] sm:$0xff] %v1038_v30  ;;  %1041 = vst [vmem:[%s7710_s6 + $0xbf8] sm:$0xff] %v1040_v31  ;;  %v1042_v32 = vld [vmem:[%s7705_s25 + $0x1800] sm:$0xff]  ;;  %v1044_v33 = vld [vmem:[%s7705_s25 + $0x1808] sm:$0xff] }
 0x105   : > { %v1046_v34 = vld [vmem:[%s7705_s25 + $0x1820] sm:$0xff]  ;;  %1043 = vst [vmem:[%s7710_s6 + $0xc00] sm:$0xff] %v1042_v32  ;;  %1045 = vst [vmem:[%s7710_s6 + $0xc08] sm:$0xff] %v1044_v33  ;;  %v1048_v35 = vld [vmem:[%s7705_s25 + $0x1828] sm:$0xff] }
 0x106   : > { %1047 = vst [vmem:[%s7710_s6 + $0xc10] sm:$0xff] %v1046_v34  ;;  %v1050_v36 = vld [vmem:[%s7705_s25 + $0x1840] sm:$0xff]  ;;  %v1052_v37 = vld [vmem:[%s7705_s25 + $0x1848] sm:$0xff]  ;;  %1049 = vst [vmem:[%s7710_s6 + $0xc18] sm:$0xff] %v1048_v35 }
 0x107   : > { %1051 = vst [vmem:[%s7710_s6 + $0xc20] sm:$0xff] %v1050_v36  ;;  %1053 = vst [vmem:[%s7710_s6 + $0xc28] sm:$0xff] %v1052_v37  ;;  %v1054_v38 = vld [vmem:[%s7705_s25 + $0x1860] sm:$0xff]  ;;  %v1056_v39 = vld [vmem:[%s7705_s25 + $0x1868] sm:$0xff] }
 0x108   : > { %v1058_v40 = vld [vmem:[%s7705_s25 + $0x1880] sm:$0xff]  ;;  %1055 = vst [vmem:[%s7710_s6 + $0xc30] sm:$0xff] %v1054_v38  ;;  %1057 = vst [vmem:[%s7710_s6 + $0xc38] sm:$0xff] %v1056_v39  ;;  %v1060_v41 = vld [vmem:[%s7705_s25 + $0x1888] sm:$0xff] }
 0x109   : > { %1059 = vst [vmem:[%s7710_s6 + $0xc40] sm:$0xff] %v1058_v40  ;;  %v1062_v42 = vld [vmem:[%s7705_s25 + $0x18a0] sm:$0xff]  ;;  %v1064_v43 = vld [vmem:[%s7705_s25 + $0x18a8] sm:$0xff]  ;;  %1061 = vst [vmem:[%s7710_s6 + $0xc48] sm:$0xff] %v1060_v41 }
 0x10a   : > { %1063 = vst [vmem:[%s7710_s6 + $0xc50] sm:$0xff] %v1062_v42  ;;  %1065 = vst [vmem:[%s7710_s6 + $0xc58] sm:$0xff] %v1064_v43  ;;  %v1066_v44 = vld [vmem:[%s7705_s25 + $0x18c0] sm:$0xff]  ;;  %v1068_v45 = vld [vmem:[%s7705_s25 + $0x18c8] sm:$0xff] }
 0x10b   : > { %v1070_v46 = vld [vmem:[%s7705_s25 + $0x18e0] sm:$0xff]  ;;  %1067 = vst [vmem:[%s7710_s6 + $0xc60] sm:$0xff] %v1066_v44  ;;  %1069 = vst [vmem:[%s7710_s6 + $0xc68] sm:$0xff] %v1068_v45  ;;  %v1072_v47 = vld [vmem:[%s7705_s25 + $0x18e8] sm:$0xff] }
 0x10c   : > { %1071 = vst [vmem:[%s7710_s6 + $0xc70] sm:$0xff] %v1070_v46  ;;  %v1074_v48 = vld [vmem:[%s7705_s25 + $0x1900] sm:$0xff]  ;;  %v1076_v49 = vld [vmem:[%s7705_s25 + $0x1908] sm:$0xff]  ;;  %1073 = vst [vmem:[%s7710_s6 + $0xc78] sm:$0xff] %v1072_v47 }
 0x10d   : > { %1075 = vst [vmem:[%s7710_s6 + $0xc80] sm:$0xff] %v1074_v48  ;;  %1077 = vst [vmem:[%s7710_s6 + $0xc88] sm:$0xff] %v1076_v49  ;;  %v1078_v50 = vld [vmem:[%s7705_s25 + $0x1920] sm:$0xff]  ;;  %v1080_v51 = vld [vmem:[%s7705_s25 + $0x1928] sm:$0xff] }
 0x10e   : > { %v1082_v52 = vld [vmem:[%s7705_s25 + $0x1940] sm:$0xff]  ;;  %1079 = vst [vmem:[%s7710_s6 + $0xc90] sm:$0xff] %v1078_v50  ;;  %1081 = vst [vmem:[%s7710_s6 + $0xc98] sm:$0xff] %v1080_v51  ;;  %v1084_v53 = vld [vmem:[%s7705_s25 + $0x1948] sm:$0xff] }
 0x10f   : > { %1083 = vst [vmem:[%s7710_s6 + $0xca0] sm:$0xff] %v1082_v52  ;;  %v1086_v54 = vld [vmem:[%s7705_s25 + $0x1960] sm:$0xff]  ;;  %v1088_v55 = vld [vmem:[%s7705_s25 + $0x1968] sm:$0xff]  ;;  %1085 = vst [vmem:[%s7710_s6 + $0xca8] sm:$0xff] %v1084_v53 }
 0x110   : > { %1087 = vst [vmem:[%s7710_s6 + $0xcb0] sm:$0xff] %v1086_v54  ;;  %1089 = vst [vmem:[%s7710_s6 + $0xcb8] sm:$0xff] %v1088_v55  ;;  %v1090_v56 = vld [vmem:[%s7705_s25 + $0x1980] sm:$0xff]  ;;  %v1092_v57 = vld [vmem:[%s7705_s25 + $0x1988] sm:$0xff] }
 0x111   : > { %v1094_v58 = vld [vmem:[%s7705_s25 + $0x19a0] sm:$0xff]  ;;  %1091 = vst [vmem:[%s7710_s6 + $0xcc0] sm:$0xff] %v1090_v56  ;;  %1093 = vst [vmem:[%s7710_s6 + $0xcc8] sm:$0xff] %v1092_v57  ;;  %v1096_v59 = vld [vmem:[%s7705_s25 + $0x19a8] sm:$0xff] }
 0x112   : > { %1095 = vst [vmem:[%s7710_s6 + $0xcd0] sm:$0xff] %v1094_v58  ;;  %v1098_v60 = vld [vmem:[%s7705_s25 + $0x19c0] sm:$0xff]  ;;  %v1100_v61 = vld [vmem:[%s7705_s25 + $0x19c8] sm:$0xff]  ;;  %1097 = vst [vmem:[%s7710_s6 + $0xcd8] sm:$0xff] %v1096_v59 }
 0x113   : > { %1099 = vst [vmem:[%s7710_s6 + $0xce0] sm:$0xff] %v1098_v60  ;;  %1101 = vst [vmem:[%s7710_s6 + $0xce8] sm:$0xff] %v1100_v61  ;;  %v1102_v62 = vld [vmem:[%s7705_s25 + $0x19e0] sm:$0xff]  ;;  %v1104_v63 = vld [vmem:[%s7705_s25 + $0x19e8] sm:$0xff] }
 0x114   : > { %v1106_v0 = vld [vmem:[%s7705_s25 + $0x1a00] sm:$0xff]  ;;  %1103 = vst [vmem:[%s7710_s6 + $0xcf0] sm:$0xff] %v1102_v62  ;;  %1105 = vst [vmem:[%s7710_s6 + $0xcf8] sm:$0xff] %v1104_v63  ;;  %v1108_v1 = vld [vmem:[%s7705_s25 + $0x1a08] sm:$0xff] }
 0x115   : > { %1107 = vst [vmem:[%s7710_s6 + $0xd00] sm:$0xff] %v1106_v0  ;;  %v1110_v2 = vld [vmem:[%s7705_s25 + $0x1a20] sm:$0xff]  ;;  %v1112_v3 = vld [vmem:[%s7705_s25 + $0x1a28] sm:$0xff]  ;;  %1109 = vst [vmem:[%s7710_s6 + $0xd08] sm:$0xff] %v1108_v1 }
 0x116   : > { %1111 = vst [vmem:[%s7710_s6 + $0xd10] sm:$0xff] %v1110_v2  ;;  %1113 = vst [vmem:[%s7710_s6 + $0xd18] sm:$0xff] %v1112_v3  ;;  %v1114_v4 = vld [vmem:[%s7705_s25 + $0x1a40] sm:$0xff]  ;;  %v1116_v5 = vld [vmem:[%s7705_s25 + $0x1a48] sm:$0xff] }
 0x117   : > { %v1118_v6 = vld [vmem:[%s7705_s25 + $0x1a60] sm:$0xff]  ;;  %1115 = vst [vmem:[%s7710_s6 + $0xd20] sm:$0xff] %v1114_v4  ;;  %1117 = vst [vmem:[%s7710_s6 + $0xd28] sm:$0xff] %v1116_v5  ;;  %v1120_v7 = vld [vmem:[%s7705_s25 + $0x1a68] sm:$0xff] }
 0x118   : > { %1119 = vst [vmem:[%s7710_s6 + $0xd30] sm:$0xff] %v1118_v6  ;;  %v1122_v8 = vld [vmem:[%s7705_s25 + $0x1a80] sm:$0xff]  ;;  %v1124_v9 = vld [vmem:[%s7705_s25 + $0x1a88] sm:$0xff]  ;;  %1121 = vst [vmem:[%s7710_s6 + $0xd38] sm:$0xff] %v1120_v7 }
 0x119   : > { %1123 = vst [vmem:[%s7710_s6 + $0xd40] sm:$0xff] %v1122_v8  ;;  %1125 = vst [vmem:[%s7710_s6 + $0xd48] sm:$0xff] %v1124_v9  ;;  %v1126_v10 = vld [vmem:[%s7705_s25 + $0x1aa0] sm:$0xff]  ;;  %v1128_v11 = vld [vmem:[%s7705_s25 + $0x1aa8] sm:$0xff] }
 0x11a   : > { %v1130_v12 = vld [vmem:[%s7705_s25 + $0x1ac0] sm:$0xff]  ;;  %1127 = vst [vmem:[%s7710_s6 + $0xd50] sm:$0xff] %v1126_v10  ;;  %1129 = vst [vmem:[%s7710_s6 + $0xd58] sm:$0xff] %v1128_v11  ;;  %v1132_v13 = vld [vmem:[%s7705_s25 + $0x1ac8] sm:$0xff] }
 0x11b   : > { %1131 = vst [vmem:[%s7710_s6 + $0xd60] sm:$0xff] %v1130_v12  ;;  %v1134_v14 = vld [vmem:[%s7705_s25 + $0x1ae0] sm:$0xff]  ;;  %v1136_v15 = vld [vmem:[%s7705_s25 + $0x1ae8] sm:$0xff]  ;;  %1133 = vst [vmem:[%s7710_s6 + $0xd68] sm:$0xff] %v1132_v13 }
 0x11c   : > { %1135 = vst [vmem:[%s7710_s6 + $0xd70] sm:$0xff] %v1134_v14  ;;  %1137 = vst [vmem:[%s7710_s6 + $0xd78] sm:$0xff] %v1136_v15  ;;  %v1138_v16 = vld [vmem:[%s7705_s25 + $0x1b00] sm:$0xff]  ;;  %v1140_v17 = vld [vmem:[%s7705_s25 + $0x1b08] sm:$0xff] }
 0x11d   : > { %v1142_v18 = vld [vmem:[%s7705_s25 + $0x1b20] sm:$0xff]  ;;  %1139 = vst [vmem:[%s7710_s6 + $0xd80] sm:$0xff] %v1138_v16  ;;  %1141 = vst [vmem:[%s7710_s6 + $0xd88] sm:$0xff] %v1140_v17  ;;  %v1144_v19 = vld [vmem:[%s7705_s25 + $0x1b28] sm:$0xff] }
 0x11e   : > { %1143 = vst [vmem:[%s7710_s6 + $0xd90] sm:$0xff] %v1142_v18  ;;  %v1146_v20 = vld [vmem:[%s7705_s25 + $0x1b40] sm:$0xff]  ;;  %v1148_v21 = vld [vmem:[%s7705_s25 + $0x1b48] sm:$0xff]  ;;  %1145 = vst [vmem:[%s7710_s6 + $0xd98] sm:$0xff] %v1144_v19 }
 0x11f   : > { %1147 = vst [vmem:[%s7710_s6 + $0xda0] sm:$0xff] %v1146_v20  ;;  %1149 = vst [vmem:[%s7710_s6 + $0xda8] sm:$0xff] %v1148_v21  ;;  %v1150_v22 = vld [vmem:[%s7705_s25 + $0x1b60] sm:$0xff]  ;;  %v1152_v23 = vld [vmem:[%s7705_s25 + $0x1b68] sm:$0xff] }
 0x120   : > { %v1154_v24 = vld [vmem:[%s7705_s25 + $0x1b80] sm:$0xff]  ;;  %1151 = vst [vmem:[%s7710_s6 + $0xdb0] sm:$0xff] %v1150_v22  ;;  %1153 = vst [vmem:[%s7710_s6 + $0xdb8] sm:$0xff] %v1152_v23  ;;  %v1156_v25 = vld [vmem:[%s7705_s25 + $0x1b88] sm:$0xff] }
 0x121   : > { %1155 = vst [vmem:[%s7710_s6 + $0xdc0] sm:$0xff] %v1154_v24  ;;  %v1158_v26 = vld [vmem:[%s7705_s25 + $0x1ba0] sm:$0xff]  ;;  %v1160_v27 = vld [vmem:[%s7705_s25 + $0x1ba8] sm:$0xff]  ;;  %1157 = vst [vmem:[%s7710_s6 + $0xdc8] sm:$0xff] %v1156_v25 }
 0x122   : > { %1159 = vst [vmem:[%s7710_s6 + $0xdd0] sm:$0xff] %v1158_v26  ;;  %1161 = vst [vmem:[%s7710_s6 + $0xdd8] sm:$0xff] %v1160_v27  ;;  %v1162_v28 = vld [vmem:[%s7705_s25 + $0x1bc0] sm:$0xff]  ;;  %v1164_v29 = vld [vmem:[%s7705_s25 + $0x1bc8] sm:$0xff] }
 0x123   : > { %v1166_v30 = vld [vmem:[%s7705_s25 + $0x1be0] sm:$0xff]  ;;  %1163 = vst [vmem:[%s7710_s6 + $0xde0] sm:$0xff] %v1162_v28  ;;  %1165 = vst [vmem:[%s7710_s6 + $0xde8] sm:$0xff] %v1164_v29  ;;  %v1168_v31 = vld [vmem:[%s7705_s25 + $0x1be8] sm:$0xff] }
 0x124   : > { %1167 = vst [vmem:[%s7710_s6 + $0xdf0] sm:$0xff] %v1166_v30  ;;  %v1170_v32 = vld [vmem:[%s7705_s25 + $0x1c00] sm:$0xff]  ;;  %v1172_v33 = vld [vmem:[%s7705_s25 + $0x1c08] sm:$0xff]  ;;  %1169 = vst [vmem:[%s7710_s6 + $0xdf8] sm:$0xff] %v1168_v31 }
 0x125   : > { %1171 = vst [vmem:[%s7710_s6 + $0xe00] sm:$0xff] %v1170_v32  ;;  %1173 = vst [vmem:[%s7710_s6 + $0xe08] sm:$0xff] %v1172_v33  ;;  %v1174_v34 = vld [vmem:[%s7705_s25 + $0x1c20] sm:$0xff]  ;;  %v1176_v35 = vld [vmem:[%s7705_s25 + $0x1c28] sm:$0xff] }
 0x126   : > { %v1178_v36 = vld [vmem:[%s7705_s25 + $0x1c40] sm:$0xff]  ;;  %1175 = vst [vmem:[%s7710_s6 + $0xe10] sm:$0xff] %v1174_v34  ;;  %1177 = vst [vmem:[%s7710_s6 + $0xe18] sm:$0xff] %v1176_v35  ;;  %v1180_v37 = vld [vmem:[%s7705_s25 + $0x1c48] sm:$0xff] }
 0x127   : > { %1179 = vst [vmem:[%s7710_s6 + $0xe20] sm:$0xff] %v1178_v36  ;;  %v1182_v38 = vld [vmem:[%s7705_s25 + $0x1c60] sm:$0xff]  ;;  %v1184_v39 = vld [vmem:[%s7705_s25 + $0x1c68] sm:$0xff]  ;;  %1181 = vst [vmem:[%s7710_s6 + $0xe28] sm:$0xff] %v1180_v37 }
 0x128   : > { %1183 = vst [vmem:[%s7710_s6 + $0xe30] sm:$0xff] %v1182_v38  ;;  %1185 = vst [vmem:[%s7710_s6 + $0xe38] sm:$0xff] %v1184_v39  ;;  %v1186_v40 = vld [vmem:[%s7705_s25 + $0x1c80] sm:$0xff]  ;;  %v1188_v41 = vld [vmem:[%s7705_s25 + $0x1c88] sm:$0xff] }
 0x129   : > { %v1190_v42 = vld [vmem:[%s7705_s25 + $0x1ca0] sm:$0xff]  ;;  %1187 = vst [vmem:[%s7710_s6 + $0xe40] sm:$0xff] %v1186_v40  ;;  %1189 = vst [vmem:[%s7710_s6 + $0xe48] sm:$0xff] %v1188_v41  ;;  %v1192_v43 = vld [vmem:[%s7705_s25 + $0x1ca8] sm:$0xff] }
 0x12a   : > { %1191 = vst [vmem:[%s7710_s6 + $0xe50] sm:$0xff] %v1190_v42  ;;  %v1194_v44 = vld [vmem:[%s7705_s25 + $0x1cc0] sm:$0xff]  ;;  %v1196_v45 = vld [vmem:[%s7705_s25 + $0x1cc8] sm:$0xff]  ;;  %1193 = vst [vmem:[%s7710_s6 + $0xe58] sm:$0xff] %v1192_v43 }
 0x12b   : > { %1195 = vst [vmem:[%s7710_s6 + $0xe60] sm:$0xff] %v1194_v44  ;;  %1197 = vst [vmem:[%s7710_s6 + $0xe68] sm:$0xff] %v1196_v45  ;;  %v1198_v46 = vld [vmem:[%s7705_s25 + $0x1ce0] sm:$0xff]  ;;  %v1200_v47 = vld [vmem:[%s7705_s25 + $0x1ce8] sm:$0xff] }
 0x12c   : > { %v1202_v48 = vld [vmem:[%s7705_s25 + $0x1d00] sm:$0xff]  ;;  %1199 = vst [vmem:[%s7710_s6 + $0xe70] sm:$0xff] %v1198_v46  ;;  %1201 = vst [vmem:[%s7710_s6 + $0xe78] sm:$0xff] %v1200_v47  ;;  %v1204_v49 = vld [vmem:[%s7705_s25 + $0x1d08] sm:$0xff] }
 0x12d   : > { %1203 = vst [vmem:[%s7710_s6 + $0xe80] sm:$0xff] %v1202_v48  ;;  %v1206_v50 = vld [vmem:[%s7705_s25 + $0x1d20] sm:$0xff]  ;;  %v1208_v51 = vld [vmem:[%s7705_s25 + $0x1d28] sm:$0xff]  ;;  %1205 = vst [vmem:[%s7710_s6 + $0xe88] sm:$0xff] %v1204_v49 }
 0x12e   : > { %1207 = vst [vmem:[%s7710_s6 + $0xe90] sm:$0xff] %v1206_v50  ;;  %1209 = vst [vmem:[%s7710_s6 + $0xe98] sm:$0xff] %v1208_v51  ;;  %v1210_v52 = vld [vmem:[%s7705_s25 + $0x1d40] sm:$0xff]  ;;  %v1212_v53 = vld [vmem:[%s7705_s25 + $0x1d48] sm:$0xff] }
 0x12f   : > { %v1214_v54 = vld [vmem:[%s7705_s25 + $0x1d60] sm:$0xff]  ;;  %1211 = vst [vmem:[%s7710_s6 + $0xea0] sm:$0xff] %v1210_v52  ;;  %1213 = vst [vmem:[%s7710_s6 + $0xea8] sm:$0xff] %v1212_v53  ;;  %v1216_v55 = vld [vmem:[%s7705_s25 + $0x1d68] sm:$0xff] }
 0x130   : > { %1215 = vst [vmem:[%s7710_s6 + $0xeb0] sm:$0xff] %v1214_v54  ;;  %v1218_v56 = vld [vmem:[%s7705_s25 + $0x1d80] sm:$0xff]  ;;  %v1220_v57 = vld [vmem:[%s7705_s25 + $0x1d88] sm:$0xff]  ;;  %1217 = vst [vmem:[%s7710_s6 + $0xeb8] sm:$0xff] %v1216_v55 }
 0x131   : > { %1219 = vst [vmem:[%s7710_s6 + $0xec0] sm:$0xff] %v1218_v56  ;;  %1221 = vst [vmem:[%s7710_s6 + $0xec8] sm:$0xff] %v1220_v57  ;;  %v1222_v58 = vld [vmem:[%s7705_s25 + $0x1da0] sm:$0xff]  ;;  %v1224_v59 = vld [vmem:[%s7705_s25 + $0x1da8] sm:$0xff] }
 0x132   : > { %v1226_v60 = vld [vmem:[%s7705_s25 + $0x1dc0] sm:$0xff]  ;;  %1223 = vst [vmem:[%s7710_s6 + $0xed0] sm:$0xff] %v1222_v58  ;;  %1225 = vst [vmem:[%s7710_s6 + $0xed8] sm:$0xff] %v1224_v59  ;;  %v1228_v61 = vld [vmem:[%s7705_s25 + $0x1dc8] sm:$0xff] }
 0x133   : > { %1227 = vst [vmem:[%s7710_s6 + $0xee0] sm:$0xff] %v1226_v60  ;;  %v1230_v62 = vld [vmem:[%s7705_s25 + $0x1de0] sm:$0xff]  ;;  %v1232_v63 = vld [vmem:[%s7705_s25 + $0x1de8] sm:$0xff]  ;;  %1229 = vst [vmem:[%s7710_s6 + $0xee8] sm:$0xff] %v1228_v61 }
 0x134   : > { %1231 = vst [vmem:[%s7710_s6 + $0xef0] sm:$0xff] %v1230_v62  ;;  %1233 = vst [vmem:[%s7710_s6 + $0xef8] sm:$0xff] %v1232_v63  ;;  %v1234_v0 = vld [vmem:[%s7705_s25 + $0x1e00] sm:$0xff]  ;;  %v1236_v1 = vld [vmem:[%s7705_s25 + $0x1e08] sm:$0xff] }
 0x135   : > { %v1238_v2 = vld [vmem:[%s7705_s25 + $0x1e20] sm:$0xff]  ;;  %1235 = vst [vmem:[%s7710_s6 + $0xf00] sm:$0xff] %v1234_v0  ;;  %1237 = vst [vmem:[%s7710_s6 + $0xf08] sm:$0xff] %v1236_v1  ;;  %v1240_v3 = vld [vmem:[%s7705_s25 + $0x1e28] sm:$0xff] }
 0x136   : > { %1239 = vst [vmem:[%s7710_s6 + $0xf10] sm:$0xff] %v1238_v2  ;;  %v1242_v4 = vld [vmem:[%s7705_s25 + $0x1e40] sm:$0xff]  ;;  %v1244_v5 = vld [vmem:[%s7705_s25 + $0x1e48] sm:$0xff]  ;;  %1241 = vst [vmem:[%s7710_s6 + $0xf18] sm:$0xff] %v1240_v3 }
 0x137   : > { %1243 = vst [vmem:[%s7710_s6 + $0xf20] sm:$0xff] %v1242_v4  ;;  %1245 = vst [vmem:[%s7710_s6 + $0xf28] sm:$0xff] %v1244_v5  ;;  %v1246_v6 = vld [vmem:[%s7705_s25 + $0x1e60] sm:$0xff]  ;;  %v1248_v7 = vld [vmem:[%s7705_s25 + $0x1e68] sm:$0xff] }
 0x138   : > { %v1250_v8 = vld [vmem:[%s7705_s25 + $0x1e80] sm:$0xff]  ;;  %1247 = vst [vmem:[%s7710_s6 + $0xf30] sm:$0xff] %v1246_v6  ;;  %1249 = vst [vmem:[%s7710_s6 + $0xf38] sm:$0xff] %v1248_v7  ;;  %v1252_v9 = vld [vmem:[%s7705_s25 + $0x1e88] sm:$0xff] }
 0x139   : > { %1251 = vst [vmem:[%s7710_s6 + $0xf40] sm:$0xff] %v1250_v8  ;;  %v1254_v10 = vld [vmem:[%s7705_s25 + $0x1ea0] sm:$0xff]  ;;  %v1256_v11 = vld [vmem:[%s7705_s25 + $0x1ea8] sm:$0xff]  ;;  %1253 = vst [vmem:[%s7710_s6 + $0xf48] sm:$0xff] %v1252_v9 }
 0x13a   : > { %1255 = vst [vmem:[%s7710_s6 + $0xf50] sm:$0xff] %v1254_v10  ;;  %1257 = vst [vmem:[%s7710_s6 + $0xf58] sm:$0xff] %v1256_v11  ;;  %v1258_v12 = vld [vmem:[%s7705_s25 + $0x1ec0] sm:$0xff]  ;;  %v1260_v13 = vld [vmem:[%s7705_s25 + $0x1ec8] sm:$0xff] }
 0x13b   : > { %v1262_v14 = vld [vmem:[%s7705_s25 + $0x1ee0] sm:$0xff]  ;;  %1259 = vst [vmem:[%s7710_s6 + $0xf60] sm:$0xff] %v1258_v12  ;;  %1261 = vst [vmem:[%s7710_s6 + $0xf68] sm:$0xff] %v1260_v13  ;;  %v1264_v15 = vld [vmem:[%s7705_s25 + $0x1ee8] sm:$0xff] }
 0x13c   : > { %1263 = vst [vmem:[%s7710_s6 + $0xf70] sm:$0xff] %v1262_v14  ;;  %v1266_v16 = vld [vmem:[%s7705_s25 + $0x1f00] sm:$0xff]  ;;  %v1268_v17 = vld [vmem:[%s7705_s25 + $0x1f08] sm:$0xff]  ;;  %1265 = vst [vmem:[%s7710_s6 + $0xf78] sm:$0xff] %v1264_v15 }
 0x13d   : > { %1267 = vst [vmem:[%s7710_s6 + $0xf80] sm:$0xff] %v1266_v16  ;;  %1269 = vst [vmem:[%s7710_s6 + $0xf88] sm:$0xff] %v1268_v17  ;;  %v1270_v18 = vld [vmem:[%s7705_s25 + $0x1f20] sm:$0xff]  ;;  %v1272_v19 = vld [vmem:[%s7705_s25 + $0x1f28] sm:$0xff] }
 0x13e   : > { %v1274_v20 = vld [vmem:[%s7705_s25 + $0x1f40] sm:$0xff]  ;;  %1271 = vst [vmem:[%s7710_s6 + $0xf90] sm:$0xff] %v1270_v18  ;;  %1273 = vst [vmem:[%s7710_s6 + $0xf98] sm:$0xff] %v1272_v19  ;;  %v1276_v21 = vld [vmem:[%s7705_s25 + $0x1f48] sm:$0xff] }
 0x13f   : > { %1275 = vst [vmem:[%s7710_s6 + $0xfa0] sm:$0xff] %v1274_v20  ;;  %v1278_v22 = vld [vmem:[%s7705_s25 + $0x1f60] sm:$0xff]  ;;  %v1280_v23 = vld [vmem:[%s7705_s25 + $0x1f68] sm:$0xff]  ;;  %1277 = vst [vmem:[%s7710_s6 + $0xfa8] sm:$0xff] %v1276_v21 }
 0x140   : > { %1279 = vst [vmem:[%s7710_s6 + $0xfb0] sm:$0xff] %v1278_v22  ;;  %1281 = vst [vmem:[%s7710_s6 + $0xfb8] sm:$0xff] %v1280_v23  ;;  %v1282_v24 = vld [vmem:[%s7705_s25 + $0x1f80] sm:$0xff]  ;;  %v1284_v25 = vld [vmem:[%s7705_s25 + $0x1f88] sm:$0xff] }
 0x141   : > { %v1286_v26 = vld [vmem:[%s7705_s25 + $0x1fa0] sm:$0xff]  ;;  %1283 = vst [vmem:[%s7710_s6 + $0xfc0] sm:$0xff] %v1282_v24  ;;  %1285 = vst [vmem:[%s7710_s6 + $0xfc8] sm:$0xff] %v1284_v25  ;;  %v1288_v27 = vld [vmem:[%s7705_s25 + $0x1fa8] sm:$0xff] }
 0x142   : > { %1287 = vst [vmem:[%s7710_s6 + $0xfd0] sm:$0xff] %v1286_v26  ;;  %v1290_v28 = vld [vmem:[%s7705_s25 + $0x1fc0] sm:$0xff]  ;;  %v1292_v29 = vld [vmem:[%s7705_s25 + $0x1fc8] sm:$0xff]  ;;  %1289 = vst [vmem:[%s7710_s6 + $0xfd8] sm:$0xff] %v1288_v27 }
 0x143   : > { %1291 = vst [vmem:[%s7710_s6 + $0xfe0] sm:$0xff] %v1290_v28  ;;  %1293 = vst [vmem:[%s7710_s6 + $0xfe8] sm:$0xff] %v1292_v29  ;;  %v1294_v30 = vld [vmem:[%s7705_s25 + $0x1fe0] sm:$0xff]  ;;  %v1296_v31 = vld [vmem:[%s7705_s25 + $0x1fe8] sm:$0xff] }
 0x144   : > { %1295 = vst [vmem:[%s7710_s6 + $0xff0] sm:$0xff] %v1294_v30  ;;  %1297 = vst [vmem:[%s7710_s6 + $0xff8] sm:$0xff] %v1296_v31 }
 0x145 PF: > { %p5870_p0 = scmp.ge.s32.totalorder %s7500_s22, 1  ;;  %p1310_p1 = scmp.lt.s32.totalorder %s7500_s22, 9 }
 0x147   : > { %p1311_p2 = pnand %p5870_p0, %p1310_p1 }
 0x148   : > { %s1317_s0 = sand.u32 (!%p1311_p2), 1, %s7476_s16   ;;  %s1324_s5 = sand.u32 (!%p1311_p2), 1, %s7468_s14  }
 0x149   : > { %1314 = sbr.rel (%p1311_p2) target bundleno = 1113 (0x459), region = 70  ;;  %s5871_s23 = sshll.u32 (!%p1311_p2), %s1317_s0, 8 }
 0x14a   : > { %s5872_s28 = sshll.u32 (!%p1311_p2), %s1324_s5, 12  ;;  %s1351_s7 = sand.u32 (!%p1311_p2), 1, %s7460_s12  }
 0x14b   : > { %s5874_s25 = sshll.u32 (!%p1311_p2), %s7488_s19, 2  ;;  %s5873_s11 = sshll.u32 (!%p1311_p2), %s1351_s7, 6 }
 0x14c   : > { %p1359_p3 = scmp.lt.s32.totalorder (!%p1311_p2), %s5874_s25, 7  ;;  %s8745_s4 = scalar_lea.vmem (!%p1311_p2), [#allocation3], %s5871_s23 }
 0x14d   : > { %s8747_s6 = scalar_lea.vmem (!%p1311_p2), [#allocation4], %s5872_s28  ;;  %s8749_s1 = scalar_lea.vmem (!%p1311_p2), [#allocation5], %s5873_s11 }
 0x14e   : > { %p5875_p4 = scmp.ne.s32.totalorder (!%p1311_p2), %s7484_s18, 0 }
 0x150   : > { %s9469_s25 = smov (!%p1359_p3, %s5874_s25), 7  ;;  %1368 = sbr.rel (%p5875_p4) target bundleno = 346 (0x15a), region = 82 }
 0x151   : > { %s1361_s29 = scalar_lea.vmem %s9440_s2, %s9469_s25  ;;  %v7502_v32 = vmov (!%p5875_p4), 0.0  }
 0x152   : > { %1369 = vst [vmem:[#allocation2] sm:$0xff] (!%p5875_p4), %v7502_v32  ;;  %1370 = vst [vmem:[#allocation2 + $0x8] sm:$0xff] (!%p5875_p4), %v7502_v32 }
 0x153   : > { %1371 = vst [vmem:[#allocation2 + $0x10] sm:$0xff] (!%p5875_p4), %v7502_v32  ;;  %1372 = vst [vmem:[#allocation2 + $0x18] sm:$0xff] (!%p5875_p4), %v7502_v32 }
 0x154   : > { %1373 = vst [vmem:[#allocation2 + $0x20] sm:$0xff] (!%p5875_p4), %v7502_v32  ;;  %1374 = vst [vmem:[#allocation2 + $0x28] sm:$0xff] (!%p5875_p4), %v7502_v32 }
 0x155   : > { %1375 = vst [vmem:[#allocation2 + $0x30] sm:$0xff] (!%p5875_p4), %v7502_v32  ;;  %1376 = vst [vmem:[#allocation2 + $0x38] sm:$0xff] (!%p5875_p4), %v7502_v32 }
 0x156   : > { %1377 = vst [vmem:[#allocation2 + $0x40] sm:$0xff] (!%p5875_p4), %v7502_v32  ;;  %1378 = vst [vmem:[#allocation2 + $0x48] sm:$0xff] (!%p5875_p4), %v7502_v32 }
 0x157   : > { %1379 = vst [vmem:[#allocation2 + $0x50] sm:$0xff] %v7502_v32  ;;  %1380 = vst [vmem:[#allocation2 + $0x58] sm:$0xff] %v7502_v32 }
 0x158   : > { %1381 = vst [vmem:[#allocation2 + $0x60] sm:$0xff] %v7502_v32  ;;  %1382 = vst [vmem:[#allocation2 + $0x68] sm:$0xff] %v7502_v32 }
 0x159   : > { %1383 = vst [vmem:[#allocation2 + $0x70] sm:$0xff] %v7502_v32  ;;  %1384 = vst [vmem:[#allocation2 + $0x78] sm:$0xff] %v7502_v32 }
 0x15a PF: > { %v6646_v33 = vld [vmem:[%s8747_s6 + $0x4] ss:$16 sps:$4 sm:$0xff]   ;;  %v6648_v34 = vld [vmem:[%s8747_s6 + $0xc] ss:$16 sps:$4 sm:$0xff]   ;;  %v6650_v35 = vld [vmem:[%s8747_s6] ss:$16 sps:$4 sm:$0xff]  }
 0x15b   : > { %4665 = vmatprep.subr.bf16.mxu0 %v6646_v33  ;;  %v6651_v36 = vld [vmem:[%s8747_s6 + $0x8] ss:$16 sps:$4 sm:$0xff]   ;;  %5089 = vmatprep.subr.bf16.mxu1 %v6648_v34  ;;  %v6652_v37 = vld [vmem:[%s8747_s6 + $0x24] ss:$16 sps:$4 sm:$0xff]   ;;  %v6654_v38 = vld [vmem:[%s8747_s6 + $0x2c] ss:$16 sps:$4 sm:$0xff]  }
 0x15c   : > { %4666 = vmatpush1.bf16.msra.mxu0 %v6650_v35  ;;  %5090 = vmatpush1.bf16.msra.mxu1 %v6651_v36  ;;  %v6656_v39 = vld [vmem:[%s8747_s6 + $0x20] ss:$16 sps:$4 sm:$0xff]   ;;  %v6657_v40 = vld [vmem:[%s8747_s6 + $0x28] ss:$16 sps:$4 sm:$0xff]   ;;  %v6658_v41 = vld [vmem:[%s8747_s6 + $0x44] ss:$16 sps:$4 sm:$0xff]  }
 0x15d   : > { %4667 = vmatprep.subr.bf16.mxu0 %v6652_v37  ;;  %5091 = vmatprep.subr.bf16.mxu1 %v6654_v38  ;;  %v6660_v42 = vld [vmem:[%s8747_s6 + $0x4c] ss:$16 sps:$4 sm:$0xff]   ;;  %v6662_v43 = vld [vmem:[%s8747_s6 + $0x40] ss:$16 sps:$4 sm:$0xff]   ;;  %v6663_v44 = vld [vmem:[%s8747_s6 + $0x48] ss:$16 sps:$4 sm:$0xff]  }
 0x15e   : > { %v6664_v45 = vld [vmem:[%s8747_s6 + $0x64] ss:$16 sps:$4 sm:$0xff]   ;;  %v6666_v46 = vld [vmem:[%s8747_s6 + $0x6c] ss:$16 sps:$4 sm:$0xff]   ;;  %v6668_v47 = vld [vmem:[%s8747_s6 + $0x60] ss:$16 sps:$4 sm:$0xff]  }
 0x15f   : > { %v6669_v48 = vld [vmem:[%s8747_s6 + $0x68] ss:$16 sps:$4 sm:$0xff]   ;;  %v6670_v49 = vld [vmem:[%s8747_s6 + $0x84] ss:$16 sps:$4 sm:$0xff]   ;;  %v6672_v50 = vld [vmem:[%s8747_s6 + $0x8c] ss:$16 sps:$4 sm:$0xff]  }
 0x160   : > { %4668 = vmatpush1.bf16.msra.mxu0 %v6656_v39  ;;  %5092 = vmatpush1.bf16.msra.mxu1 %v6657_v40  ;;  %v6674_v51 = vld [vmem:[%s8747_s6 + $0x80] ss:$16 sps:$4 sm:$0xff]   ;;  %v6675_v52 = vld [vmem:[%s8747_s6 + $0x88] ss:$16 sps:$4 sm:$0xff]   ;;  %v6676_v53 = vld [vmem:[%s8747_s6 + $0xa4] ss:$16 sps:$4 sm:$0xff]  }
 0x161   : > { %4669 = vmatprep.subr.bf16.mxu0 %v6658_v41  ;;  %5093 = vmatprep.subr.bf16.mxu1 %v6660_v42  ;;  %v6678_v54 = vld [vmem:[%s8747_s6 + $0xac] ss:$16 sps:$4 sm:$0xff]   ;;  %v6680_v55 = vld [vmem:[%s8747_s6 + $0xa0] ss:$16 sps:$4 sm:$0xff]   ;;  %v6681_v56 = vld [vmem:[%s8747_s6 + $0xa8] ss:$16 sps:$4 sm:$0xff]  }
 0x162   : > { %v6682_v57 = vld [vmem:[%s8747_s6 + $0xc4] ss:$16 sps:$4 sm:$0xff]   ;;  %v6684_v58 = vld [vmem:[%s8747_s6 + $0xcc] ss:$16 sps:$4 sm:$0xff]   ;;  %v6686_v59 = vld [vmem:[%s8747_s6 + $0xc0] ss:$16 sps:$4 sm:$0xff]  }
 0x163   : > { %v6687_v60 = vld [vmem:[%s8747_s6 + $0xc8] ss:$16 sps:$4 sm:$0xff]   ;;  %v6688_v61 = vld [vmem:[%s8747_s6 + $0xe4] ss:$16 sps:$4 sm:$0xff]   ;;  %v6690_v62 = vld [vmem:[%s8747_s6 + $0xec] ss:$16 sps:$4 sm:$0xff]  }
 0x164   : > { %4670 = vmatpush1.bf16.msra.mxu0 %v6662_v43  ;;  %5094 = vmatpush1.bf16.msra.mxu1 %v6663_v44  ;;  %v6692_v63 = vld [vmem:[%s8747_s6 + $0xe0] ss:$16 sps:$4 sm:$0xff]   ;;  %v6693_v0 = vld [vmem:[%s8747_s6 + $0xe8] ss:$16 sps:$4 sm:$0xff]   ;;  %v6694_v1 = vld [vmem:[%s8747_s6 + $0x104] ss:$16 sps:$4 sm:$0xff]  }
 0x165   : > { %4671 = vmatprep.subr.bf16.mxu0 %v6664_v45  ;;  %5095 = vmatprep.subr.bf16.mxu1 %v6666_v46  ;;  %v6696_v2 = vld [vmem:[%s8747_s6 + $0x10c] ss:$16 sps:$4 sm:$0xff]   ;;  %v6698_v3 = vld [vmem:[%s8747_s6 + $0x100] ss:$16 sps:$4 sm:$0xff]   ;;  %v6699_v4 = vld [vmem:[%s8747_s6 + $0x108] ss:$16 sps:$4 sm:$0xff]  }
 0x166   : > { %v6700_v5 = vld [vmem:[%s8747_s6 + $0x124] ss:$16 sps:$4 sm:$0xff]   ;;  %v6702_v6 = vld [vmem:[%s8747_s6 + $0x12c] ss:$16 sps:$4 sm:$0xff]   ;;  %v6704_v7 = vld [vmem:[%s8747_s6 + $0x120] ss:$16 sps:$4 sm:$0xff]  }
 0x167   : > { %v6705_v8 = vld [vmem:[%s8747_s6 + $0x128] ss:$16 sps:$4 sm:$0xff]   ;;  %v6706_v9 = vld [vmem:[%s8747_s6 + $0x144] ss:$16 sps:$4 sm:$0xff]   ;;  %v6708_v10 = vld [vmem:[%s8747_s6 + $0x14c] ss:$16 sps:$4 sm:$0xff]  }
 0x168   : > { %4672 = vmatpush1.bf16.msra.mxu0 %v6668_v47  ;;  %5096 = vmatpush1.bf16.msra.mxu1 %v6669_v48  ;;  %v6710_v11 = vld [vmem:[%s8747_s6 + $0x140] ss:$16 sps:$4 sm:$0xff]   ;;  %v6711_v12 = vld [vmem:[%s8747_s6 + $0x148] ss:$16 sps:$4 sm:$0xff]   ;;  %v6712_v13 = vld [vmem:[%s8747_s6 + $0x164] ss:$16 sps:$4 sm:$0xff]  }
 0x169   : > { %4673 = vmatprep.subr.bf16.mxu0 %v6670_v49  ;;  %5097 = vmatprep.subr.bf16.mxu1 %v6672_v50  ;;  %v6714_v14 = vld [vmem:[%s8747_s6 + $0x16c] ss:$16 sps:$4 sm:$0xff]   ;;  %v1401_v15 = vld [vmem:[%s8745_s4] sm:$0xff]  ;;  %v6717_v18 = vld [vmem:[%s8747_s6 + $0x168] ss:$16 sps:$4 sm:$0xff]   ;;  %p6420_p5 = scmp.ne.s32.totalorder %s7484_s18, 3 }
 0x16a   : > { %v1409_v16 = vld [vmem:[%s8745_s4 + $0x40] sm:$0xff]  ;;  %v6720_v21 = vld [vmem:[%s8747_s6 + $0x18c] ss:$16 sps:$4 sm:$0xff]   ;;  %v6723_v23 = vld [vmem:[%s8747_s6 + $0x188] ss:$16 sps:$4 sm:$0xff]  }
 0x16b   : > { %v6716_v17 = vld [vmem:[%s8747_s6 + $0x160] ss:$16 sps:$4 sm:$0xff]   ;;  %v5877_v19 = vcombine.high %v1401_v15, %v1409_v16  ;;  %v6718_v20 = vld [vmem:[%s8747_s6 + $0x184] ss:$16 sps:$4 sm:$0xff]   ;;  %v6726_v25 = vld [vmem:[%s8747_s6 + $0x1ac] ss:$16 sps:$4 sm:$0xff]   ;;  %v5876_v38 = vcombine.low %v1401_v15, %v1409_v16 }
 0x16c   : > { %4674 = vmatpush1.bf16.msra.mxu0 %v6674_v51  ;;  %5098 = vmatpush1.bf16.msra.mxu1 %v6675_v52  ;;  %v6722_v22 = vld [vmem:[%s8747_s6 + $0x180] ss:$16 sps:$4 sm:$0xff]   ;;  %v6724_v24 = vld [vmem:[%s8747_s6 + $0x1a4] ss:$16 sps:$4 sm:$0xff]   ;;  %v6729_v27 = vld [vmem:[%s8747_s6 + $0x1a8] ss:$16 sps:$4 sm:$0xff]  }
 0x16d   : > { %4675 = vmatprep.subr.bf16.mxu0 %v6676_v53  ;;  %5099 = vmatprep.subr.bf16.mxu1 %v6678_v54  ;;  %v6728_v26 = vld [vmem:[%s8747_s6 + $0x1a0] ss:$16 sps:$4 sm:$0xff]   ;;  %v6730_v28 = vld [vmem:[%s8747_s6 + $0x1c4] ss:$16 sps:$4 sm:$0xff]   ;;  %v6732_v29 = vld [vmem:[%s8747_s6 + $0x1cc] ss:$16 sps:$4 sm:$0xff]  }
 0x16e   : > { %4697 = vmatprep.mubr.bf16.mxu0 %v5877_v19  ;;  %5121 = vmatprep.mubr.bf16.mxu1 %v5877_v19  ;;  %v6734_v30 = vld [vmem:[%s8747_s6 + $0x1c0] ss:$16 sps:$4 sm:$0xff]   ;;  %v6735_v31 = vld [vmem:[%s8747_s6 + $0x1c8] ss:$16 sps:$4 sm:$0xff]   ;;  %v6736_v32 = vld [vmem:[%s8747_s6 + $0x1e4] ss:$16 sps:$4 sm:$0xff]  }
 0x16f   : > { %v6738_v33 = vld [vmem:[%s8747_s6 + $0x1ec] ss:$16 sps:$4 sm:$0xff]   ;;  %v6740_v34 = vld [vmem:[%s8747_s6 + $0x1e0] ss:$16 sps:$4 sm:$0xff]   ;;  %v6741_v35 = vld [vmem:[%s8747_s6 + $0x1e8] ss:$16 sps:$4 sm:$0xff]  }
 0x170   : > { %4676 = vmatpush1.bf16.msra.mxu0 %v6680_v55  ;;  %5100 = vmatpush1.bf16.msra.mxu1 %v6681_v56  ;;  %v6744_v36 = vld [vmem:[%s8747_s6 + $0x204] ss:$16 sps:$4 sm:$0xff]   ;;  %v6747_v37 = vld [vmem:[%s8747_s6 + $0x20c] ss:$16 sps:$4 sm:$0xff]   ;;  %v6742_v39 = vld [vmem:[%s8747_s6 + $0x200] ss:$16 sps:$4 sm:$0xff]  }
 0x171   : > { %4677 = vmatprep.subr.bf16.mxu0 %v6682_v57  ;;  %5101 = vmatprep.subr.bf16.mxu1 %v6684_v58  ;;  %v6745_v40 = vld [vmem:[%s8747_s6 + $0x208] ss:$16 sps:$4 sm:$0xff]   ;;  %v6750_v41 = vld [vmem:[%s8747_s6 + $0x224] ss:$16 sps:$4 sm:$0xff]   ;;  %v6753_v42 = vld [vmem:[%s8747_s6 + $0x22c] ss:$16 sps:$4 sm:$0xff]  }
 0x172   : > { %v6748_v43 = vld [vmem:[%s8747_s6 + $0x220] ss:$16 sps:$4 sm:$0xff]   ;;  %v6751_v44 = vld [vmem:[%s8747_s6 + $0x228] ss:$16 sps:$4 sm:$0xff]   ;;  %v6756_v45 = vld [vmem:[%s8747_s6 + $0x244] ss:$16 sps:$4 sm:$0xff]  }
 0x173   : > { %v6759_v46 = vld [vmem:[%s8747_s6 + $0x24c] ss:$16 sps:$4 sm:$0xff]   ;;  %v6754_v47 = vld [vmem:[%s8747_s6 + $0x240] ss:$16 sps:$4 sm:$0xff]   ;;  %v6757_v48 = vld [vmem:[%s8747_s6 + $0x248] ss:$16 sps:$4 sm:$0xff]  }
 0x174   : > { %4678 = vmatpush1.bf16.msra.mxu0 %v6686_v59  ;;  %5102 = vmatpush1.bf16.msra.mxu1 %v6687_v60  ;;  %v6762_v49 = vld [vmem:[%s8747_s6 + $0x264] ss:$16 sps:$4 sm:$0xff]   ;;  %v6765_v50 = vld [vmem:[%s8747_s6 + $0x26c] ss:$16 sps:$4 sm:$0xff]   ;;  %v6760_v51 = vld [vmem:[%s8747_s6 + $0x260] ss:$16 sps:$4 sm:$0xff]  }
 0x175   : > { %4679 = vmatprep.subr.bf16.mxu0 %v6688_v61  ;;  %5103 = vmatprep.subr.bf16.mxu1 %v6690_v62  ;;  %v6763_v52 = vld [vmem:[%s8747_s6 + $0x268] ss:$16 sps:$4 sm:$0xff]   ;;  %v6768_v53 = vld [vmem:[%s8747_s6 + $0x284] ss:$16 sps:$4 sm:$0xff]   ;;  %v6771_v54 = vld [vmem:[%s8747_s6 + $0x28c] ss:$16 sps:$4 sm:$0xff]  }
 0x176   : > { %v6766_v55 = vld [vmem:[%s8747_s6 + $0x280] ss:$16 sps:$4 sm:$0xff]   ;;  %v6769_v56 = vld [vmem:[%s8747_s6 + $0x288] ss:$16 sps:$4 sm:$0xff]   ;;  %v6774_v57 = vld [vmem:[%s8747_s6 + $0x2a4] ss:$16 sps:$4 sm:$0xff]  }
 0x177   : > { %v6777_v58 = vld [vmem:[%s8747_s6 + $0x2ac] ss:$16 sps:$4 sm:$0xff]   ;;  %v1417_v59 = vld [vmem:[%s8745_s4 + $0x80] sm:$0xff]  ;;  %v6793_v15 = vld [vmem:[%s8747_s6 + $0x308] ss:$16 sps:$4 sm:$0xff]  }
 0x178   : > { %4680 = vmatpush1.bf16.msra.mxu0 %v6692_v63  ;;  %5104 = vmatpush1.bf16.msra.mxu1 %v6693_v0  ;;  %v1425_v60 = vld [vmem:[%s8745_s4 + $0xc0] sm:$0xff]  ;;  %v6775_v63 = vld [vmem:[%s8747_s6 + $0x2a8] ss:$16 sps:$4 sm:$0xff]  }
 0x179   : > { %4681 = vmatprep.subr.bf16.mxu0 %v6694_v1  ;;  %5105 = vmatprep.subr.bf16.mxu1 %v6696_v2  ;;  %v5893_v61 = vcombine.high %v1417_v59, %v1425_v60  ;;  %v6772_v62 = vld [vmem:[%s8747_s6 + $0x2a0] ss:$16 sps:$4 sm:$0xff]   ;;  %v5892_v0 = vcombine.low %v1417_v59, %v1425_v60  ;;  %v6780_v1 = vld [vmem:[%s8747_s6 + $0x2c4] ss:$16 sps:$4 sm:$0xff]   ;;  %v6783_v2 = vld [vmem:[%s8747_s6 + $0x2cc] ss:$16 sps:$4 sm:$0xff]  }
 0x17a   : > { %v6798_v16 = vld [vmem:[%s8747_s6 + $0x324] ss:$16 sps:$4 sm:$0xff]   ;;  %v6799_v19 = vld [vmem:[%s8747_s6 + $0x328] ss:$16 sps:$4 sm:$0xff]  }
 0x17b   : > { %v8910_v60 = vld [vmem:[%s8745_s4 + $0x50] sm:$0xff] }
 0x17c   : > { %4682 = vmatpush1.bf16.msra.mxu0 %v6698_v3  ;;  %5106 = vmatpush1.bf16.msra.mxu1 %v6699_v4  ;;  %v8847_v3 = vld [vmem:[%s8745_s4 + $0x8] sm:$0xff] }
 0x17d   : > { %4683 = vmatprep.subr.bf16.mxu0 %v6700_v5  ;;  %5107 = vmatprep.subr.bf16.mxu1 %v6702_v6  ;;  %v8850_v4 = vld [vmem:[%s8745_s4 + $0x48] sm:$0xff]  ;;  %v6778_v5 = vld [vmem:[%s8747_s6 + $0x2c0] ss:$16 sps:$4 sm:$0xff]  }
 0x17e   : > { %v6781_v6 = vld [vmem:[%s8747_s6 + $0x2c8] ss:$16 sps:$4 sm:$0xff]  }
 0x180   : > { %4684 = vmatpush1.bf16.msra.mxu0 %v6704_v7  ;;  %5108 = vmatpush1.bf16.msra.mxu1 %v6705_v8  ;;  %v5879_v7 = vcombine.high %v8847_v3, %v8850_v4  ;;  %v6786_v8 = vld [vmem:[%s8747_s6 + $0x2e4] ss:$16 sps:$4 sm:$0xff]  }
 0x181   : > { %4685 = vmatprep.subr.bf16.mxu0 %v6706_v9  ;;  %5109 = vmatprep.subr.bf16.mxu1 %v6708_v10  ;;  %v6789_v9 = vld [vmem:[%s8747_s6 + $0x2ec] ss:$16 sps:$4 sm:$0xff]   ;;  %v6784_v10 = vld [vmem:[%s8747_s6 + $0x2e0] ss:$16 sps:$4 sm:$0xff]  }
 0x184   : > { %4686 = vmatpush1.bf16.msra.mxu0 %v6710_v11  ;;  %5110 = vmatpush1.bf16.msra.mxu1 %v6711_v12  ;;  %v6787_v11 = vld [vmem:[%s8747_s6 + $0x2e8] ss:$16 sps:$4 sm:$0xff]   ;;  %v6792_v12 = vld [vmem:[%s8747_s6 + $0x304] ss:$16 sps:$4 sm:$0xff]  }
 0x185   : > { %4687 = vmatprep.subr.bf16.mxu0 %v6712_v13  ;;  %5111 = vmatprep.subr.bf16.mxu1 %v6714_v14  ;;  %v6795_v13 = vld [vmem:[%s8747_s6 + $0x30c] ss:$16 sps:$4 sm:$0xff]   ;;  %v6790_v14 = vld [vmem:[%s8747_s6 + $0x300] ss:$16 sps:$4 sm:$0xff]  }
 0x188   : > { %4688 = vmatpush1.bf16.msra.mxu0 %v6716_v17  ;;  %5112 = vmatpush1.bf16.msra.mxu1 %v6717_v18  ;;  %v6801_v17 = vld [vmem:[%s8747_s6 + $0x32c] ss:$16 sps:$4 sm:$0xff]   ;;  %v6796_v18 = vld [vmem:[%s8747_s6 + $0x320] ss:$16 sps:$4 sm:$0xff]  }
 0x189   : > { %4689 = vmatprep.subr.bf16.mxu0 %v6718_v20  ;;  %5113 = vmatprep.subr.bf16.mxu1 %v6720_v21  ;;  %v6804_v20 = vld [vmem:[%s8747_s6 + $0x344] ss:$16 sps:$4 sm:$0xff]   ;;  %v6807_v21 = vld [vmem:[%s8747_s6 + $0x34c] ss:$16 sps:$4 sm:$0xff]  }
 0x18c   : > { %4690 = vmatpush1.bf16.msra.mxu0 %v6722_v22  ;;  %5114 = vmatpush1.bf16.msra.mxu1 %v6723_v23  ;;  %v6802_v22 = vld [vmem:[%s8747_s6 + $0x340] ss:$16 sps:$4 sm:$0xff]   ;;  %v6805_v23 = vld [vmem:[%s8747_s6 + $0x348] ss:$16 sps:$4 sm:$0xff]  }
 0x18d   : > { %4691 = vmatprep.subr.bf16.mxu0 %v6724_v24  ;;  %5115 = vmatprep.subr.bf16.mxu1 %v6726_v25  ;;  %v6810_v24 = vld [vmem:[%s8747_s6 + $0x364] ss:$16 sps:$4 sm:$0xff]   ;;  %v6813_v25 = vld [vmem:[%s8747_s6 + $0x36c] ss:$16 sps:$4 sm:$0xff]  }
 0x190   : > { %4692 = vmatpush1.bf16.msra.mxu0 %v6728_v26  ;;  %5116 = vmatpush1.bf16.msra.mxu1 %v6729_v27  ;;  %v6808_v26 = vld [vmem:[%s8747_s6 + $0x360] ss:$16 sps:$4 sm:$0xff]   ;;  %v6811_v27 = vld [vmem:[%s8747_s6 + $0x368] ss:$16 sps:$4 sm:$0xff]  }
 0x191   : > { %4693 = vmatprep.subr.bf16.mxu0 %v6730_v28  ;;  %5117 = vmatprep.subr.bf16.mxu1 %v6732_v29  ;;  %v6816_v28 = vld [vmem:[%s8747_s6 + $0x384] ss:$16 sps:$4 sm:$0xff]   ;;  %v6819_v29 = vld [vmem:[%s8747_s6 + $0x38c] ss:$16 sps:$4 sm:$0xff]  }
 0x194   : > { %4694 = vmatpush1.bf16.msra.mxu0 %v6734_v30  ;;  %5118 = vmatpush1.bf16.msra.mxu1 %v6735_v31  ;;  %v6814_v30 = vld [vmem:[%s8747_s6 + $0x380] ss:$16 sps:$4 sm:$0xff]   ;;  %v6817_v31 = vld [vmem:[%s8747_s6 + $0x388] ss:$16 sps:$4 sm:$0xff]  }
 0x195   : > { %4695 = vmatprep.subr.bf16.mxu0 %v6736_v32  ;;  %5119 = vmatprep.subr.bf16.mxu1 %v6738_v33  ;;  %v6822_v32 = vld [vmem:[%s8747_s6 + $0x3a4] ss:$16 sps:$4 sm:$0xff]   ;;  %v6825_v33 = vld [vmem:[%s8747_s6 + $0x3ac] ss:$16 sps:$4 sm:$0xff]  }
 0x198   : > { %4696 = vmatpush1.bf16.msra.mxu0 %v6740_v34  ;;  %5120 = vmatpush1.bf16.msra.mxu1 %v6741_v35  ;;  %v6820_v34 = vld [vmem:[%s8747_s6 + $0x3a0] ss:$16 sps:$4 sm:$0xff]   ;;  %v6823_v35 = vld [vmem:[%s8747_s6 + $0x3a8] ss:$16 sps:$4 sm:$0xff]  }
 0x199   : > { %4718 = vmatprep.subr.bf16.mxu0 %v6744_v36  ;;  %5142 = vmatprep.subr.bf16.mxu1 %v6747_v37  ;;  %v6828_v36 = vld [vmem:[%s8747_s6 + $0x3c4] ss:$16 sps:$4 sm:$0xff]   ;;  %v6831_v37 = vld [vmem:[%s8747_s6 + $0x3cc] ss:$16 sps:$4 sm:$0xff]  }
 0x19b   : > { %4698 = vmatmul.mubr.bf16.vlgmr.msra.gmra.mrb[0].mxu0 %v5876_v38  ;;  %5122 = vmatmul.mubr.bf16.vlgmr.msra.gmra.mrb[0].mxu1 %v5876_v38  ;;  %v6826_v38 = vld [vmem:[%s8747_s6 + $0x3c0] ss:$16 sps:$4 sm:$0xff]  }
 0x19c   : > { %4719 = vmatpush1.bf16.msra.mxu0 %v6742_v39  ;;  %5143 = vmatpush1.bf16.msra.mxu1 %v6745_v40  ;;  %v6829_v39 = vld [vmem:[%s8747_s6 + $0x3c8] ss:$16 sps:$4 sm:$0xff]   ;;  %v6834_v40 = vld [vmem:[%s8747_s6 + $0x3e4] ss:$16 sps:$4 sm:$0xff]  }
 0x19d   : > { %4720 = vmatprep.subr.bf16.mxu0 %v6750_v41  ;;  %5144 = vmatprep.subr.bf16.mxu1 %v6753_v42  ;;  %v6837_v41 = vld [vmem:[%s8747_s6 + $0x3ec] ss:$16 sps:$4 sm:$0xff]   ;;  %v6832_v42 = vld [vmem:[%s8747_s6 + $0x3e0] ss:$16 sps:$4 sm:$0xff]  }
 0x19e   : > { %4707 = vmatprep.mubr.bf16.mxu0 %v5893_v61  ;;  %5131 = vmatprep.mubr.bf16.mxu1 %v5893_v61  ;;  %v6850_v61 = vld [vmem:[%s8747_s6 + $0x440] ss:$16 sps:$4 sm:$0xff]  }
 0x1a0   : > { %4721 = vmatpush1.bf16.msra.mxu0 %v6748_v43  ;;  %5145 = vmatpush1.bf16.msra.mxu1 %v6751_v44  ;;  %v6835_v43 = vld [vmem:[%s8747_s6 + $0x3e8] ss:$16 sps:$4 sm:$0xff]   ;;  %v6840_v44 = vld [vmem:[%s8747_s6 + $0x404] ss:$16 sps:$4 sm:$0xff]  }
 0x1a1   : > { %4722 = vmatprep.subr.bf16.mxu0 %v6756_v45  ;;  %5146 = vmatprep.subr.bf16.mxu1 %v6759_v46  ;;  %v6843_v45 = vld [vmem:[%s8747_s6 + $0x40c] ss:$16 sps:$4 sm:$0xff]   ;;  %v6838_v46 = vld [vmem:[%s8747_s6 + $0x400] ss:$16 sps:$4 sm:$0xff]  }
 0x1a3   : > { %4708 = vmatmul.mubr.bf16.gmra.mrb[4].mxu0 %v5892_v0  ;;  %5132 = vmatmul.mubr.bf16.gmra.mrb[4].mxu1 %v5892_v0  ;;  %v6861_v0 = vld [vmem:[%s8747_s6 + $0x46c] ss:$16 sps:$4 sm:$0xff]  }
 0x1a4   : > { %4723 = vmatpush1.bf16.msra.mxu0 %v6754_v47  ;;  %5147 = vmatpush1.bf16.msra.mxu1 %v6757_v48  ;;  %v6841_v47 = vld [vmem:[%s8747_s6 + $0x408] ss:$16 sps:$4 sm:$0xff]   ;;  %v5878_v48 = vcombine.low %v8847_v3, %v8850_v4  ;;  %v6864_v4 = vld [vmem:[%s8747_s6 + $0x484] ss:$16 sps:$4 sm:$0xff]  }
 0x1a5   : > { %4724 = vmatprep.subr.bf16.mxu0 %v6762_v49  ;;  %5148 = vmatprep.subr.bf16.mxu1 %v6765_v50  ;;  %v1418_v49 = vld [vmem:[%s8745_s4 + $0x88] sm:$0xff] }
 0x1a6   : > { %4750 = vmatprep.mubr.bf16.mxu0 %v5879_v7  ;;  %5174 = vmatprep.mubr.bf16.mxu1 %v5879_v7  ;;  %v1426_v50 = vld [vmem:[%s8745_s4 + $0xc8] sm:$0xff] }
 0x1a7   : > { %v5894_v59 = vcombine.low %v1418_v49, %v1426_v50  ;;  %v6859_v3 = vld [vmem:[%s8747_s6 + $0x468] ss:$16 sps:$4 sm:$0xff]  }
 0x1a8   : > { %4725 = vmatpush1.bf16.msra.mxu0 %v6760_v51  ;;  %5149 = vmatpush1.bf16.msra.mxu1 %v6763_v52  ;;  %v6846_v51 = vld [vmem:[%s8747_s6 + $0x424] ss:$16 sps:$4 sm:$0xff]   ;;  %v6849_v52 = vld [vmem:[%s8747_s6 + $0x42c] ss:$16 sps:$4 sm:$0xff]   ;;  %v6865_v7 = vld [vmem:[%s8747_s6 + $0x488] ss:$16 sps:$4 sm:$0xff]  }
 0x1a9   : > { %4726 = vmatprep.subr.bf16.mxu0 %v6768_v53  ;;  %5150 = vmatprep.subr.bf16.mxu1 %v6771_v54  ;;  %v5895_v53 = vcombine.high %v1418_v49, %v1426_v50  ;;  %v6844_v54 = vld [vmem:[%s8747_s6 + $0x420] ss:$16 sps:$4 sm:$0xff]   ;;  %v6933_v49 = vld [vmem:[%s8747_s6 + $0x5ec] ss:$16 sps:$4 sm:$0xff]  }
 0x1aa   : > { %v6928_v50 = vld [vmem:[%s8747_s6 + $0x5e0] ss:$16 sps:$4 sm:$0xff]  }
 0x1ac   : > { %4727 = vmatpush1.bf16.msra.mxu0 %v6766_v55  ;;  %5151 = vmatpush1.bf16.msra.mxu1 %v6769_v56  ;;  %v6847_v55 = vld [vmem:[%s8747_s6 + $0x428] ss:$16 sps:$4 sm:$0xff]   ;;  %v6852_v56 = vld [vmem:[%s8747_s6 + $0x444] ss:$16 sps:$4 sm:$0xff]  }
 0x1ad   : > { %4728 = vmatprep.subr.bf16.mxu0 %v6774_v57  ;;  %5152 = vmatprep.subr.bf16.mxu1 %v6777_v58  ;;  %v6855_v57 = vld [vmem:[%s8747_s6 + $0x44c] ss:$16 sps:$4 sm:$0xff]   ;;  %v8907_v58 = vld [vmem:[%s8745_s4 + $0x10] sm:$0xff] }
 0x1b0   : > { %4729 = vmatpush1.bf16.msra.mxu0 %v6772_v62  ;;  %5153 = vmatpush1.bf16.msra.mxu1 %v6775_v63  ;;  %v6853_v62 = vld [vmem:[%s8747_s6 + $0x448] ss:$16 sps:$4 sm:$0xff]   ;;  %v6858_v63 = vld [vmem:[%s8747_s6 + $0x464] ss:$16 sps:$4 sm:$0xff]  }
 0x1b1   : > { %4730 = vmatprep.subr.bf16.mxu0 %v6780_v1  ;;  %5154 = vmatprep.subr.bf16.mxu1 %v6783_v2  ;;  %v5881_v1 = vcombine.high %v8907_v58, %v8910_v60  ;;  %v6856_v2 = vld [vmem:[%s8747_s6 + $0x460] ss:$16 sps:$4 sm:$0xff]  }
 0x1b4   : > { %4731 = vmatpush1.bf16.msra.mxu0 %v6778_v5  ;;  %5155 = vmatpush1.bf16.msra.mxu1 %v6781_v6  ;;  %v6867_v5 = vld [vmem:[%s8747_s6 + $0x48c] ss:$16 sps:$4 sm:$0xff]   ;;  %v6862_v6 = vld [vmem:[%s8747_s6 + $0x480] ss:$16 sps:$4 sm:$0xff]  }
 0x1b5   : > { %4732 = vmatprep.subr.bf16.mxu0 %v6786_v8  ;;  %5156 = vmatprep.subr.bf16.mxu1 %v6789_v9  ;;  %v6870_v8 = vld [vmem:[%s8747_s6 + $0x4a4] ss:$16 sps:$4 sm:$0xff]   ;;  %v6873_v9 = vld [vmem:[%s8747_s6 + $0x4ac] ss:$16 sps:$4 sm:$0xff]  }
 0x1b8   : > { %4733 = vmatpush1.bf16.msra.mxu0 %v6784_v10  ;;  %5157 = vmatpush1.bf16.msra.mxu1 %v6787_v11  ;;  %v6868_v10 = vld [vmem:[%s8747_s6 + $0x4a0] ss:$16 sps:$4 sm:$0xff]   ;;  %v6871_v11 = vld [vmem:[%s8747_s6 + $0x4a8] ss:$16 sps:$4 sm:$0xff]  }
 0x1b9   : > { %4734 = vmatprep.subr.bf16.mxu0 %v6792_v12  ;;  %5158 = vmatprep.subr.bf16.mxu1 %v6795_v13  ;;  %v6876_v12 = vld [vmem:[%s8747_s6 + $0x4c4] ss:$16 sps:$4 sm:$0xff]   ;;  %v6879_v13 = vld [vmem:[%s8747_s6 + $0x4cc] ss:$16 sps:$4 sm:$0xff]  }
 0x1bc   : > { %4735 = vmatpush1.bf16.msra.mxu0 %v6790_v14  ;;  %5159 = vmatpush1.bf16.msra.mxu1 %v6793_v15  ;;  %v6874_v14 = vld [vmem:[%s8747_s6 + $0x4c0] ss:$16 sps:$4 sm:$0xff]   ;;  %v6877_v15 = vld [vmem:[%s8747_s6 + $0x4c8] ss:$16 sps:$4 sm:$0xff]  }
 0x1bd   : > { %4736 = vmatprep.subr.bf16.mxu0 %v6798_v16  ;;  %5160 = vmatprep.subr.bf16.mxu1 %v6801_v17  ;;  %v6882_v16 = vld [vmem:[%s8747_s6 + $0x4e4] ss:$16 sps:$4 sm:$0xff]   ;;  %v6885_v17 = vld [vmem:[%s8747_s6 + $0x4ec] ss:$16 sps:$4 sm:$0xff]  }
 0x1c0   : > { %4737 = vmatpush1.bf16.msra.mxu0 %v6796_v18  ;;  %5161 = vmatpush1.bf16.msra.mxu1 %v6799_v19  ;;  %v6880_v18 = vld [vmem:[%s8747_s6 + $0x4e0] ss:$16 sps:$4 sm:$0xff]   ;;  %v6883_v19 = vld [vmem:[%s8747_s6 + $0x4e8] ss:$16 sps:$4 sm:$0xff]  }
 0x1c1   : > { %4738 = vmatprep.subr.bf16.mxu0 %v6804_v20  ;;  %5162 = vmatprep.subr.bf16.mxu1 %v6807_v21  ;;  %v6888_v20 = vld [vmem:[%s8747_s6 + $0x504] ss:$16 sps:$4 sm:$0xff]   ;;  %v6891_v21 = vld [vmem:[%s8747_s6 + $0x50c] ss:$16 sps:$4 sm:$0xff]  }
 0x1c4   : > { %4739 = vmatpush1.bf16.msra.mxu0 %v6802_v22  ;;  %5163 = vmatpush1.bf16.msra.mxu1 %v6805_v23  ;;  %v6886_v22 = vld [vmem:[%s8747_s6 + $0x500] ss:$16 sps:$4 sm:$0xff]   ;;  %v6889_v23 = vld [vmem:[%s8747_s6 + $0x508] ss:$16 sps:$4 sm:$0xff]  }
 0x1c5   : > { %4740 = vmatprep.subr.bf16.mxu0 %v6810_v24  ;;  %5164 = vmatprep.subr.bf16.mxu1 %v6813_v25  ;;  %v6894_v24 = vld [vmem:[%s8747_s6 + $0x524] ss:$16 sps:$4 sm:$0xff]   ;;  %v6897_v25 = vld [vmem:[%s8747_s6 + $0x52c] ss:$16 sps:$4 sm:$0xff]  }
 0x1c8   : > { %4741 = vmatpush1.bf16.msra.mxu0 %v6808_v26  ;;  %5165 = vmatpush1.bf16.msra.mxu1 %v6811_v27  ;;  %v6892_v26 = vld [vmem:[%s8747_s6 + $0x520] ss:$16 sps:$4 sm:$0xff]   ;;  %v6895_v27 = vld [vmem:[%s8747_s6 + $0x528] ss:$16 sps:$4 sm:$0xff]  }
 0x1c9   : > { %4742 = vmatprep.subr.bf16.mxu0 %v6816_v28  ;;  %5166 = vmatprep.subr.bf16.mxu1 %v6819_v29  ;;  %v6900_v28 = vld [vmem:[%s8747_s6 + $0x544] ss:$16 sps:$4 sm:$0xff]   ;;  %v6903_v29 = vld [vmem:[%s8747_s6 + $0x54c] ss:$16 sps:$4 sm:$0xff]  }
 0x1cc   : > { %4743 = vmatpush1.bf16.msra.mxu0 %v6814_v30  ;;  %5167 = vmatpush1.bf16.msra.mxu1 %v6817_v31  ;;  %v6898_v30 = vld [vmem:[%s8747_s6 + $0x540] ss:$16 sps:$4 sm:$0xff]   ;;  %v6901_v31 = vld [vmem:[%s8747_s6 + $0x548] ss:$16 sps:$4 sm:$0xff]  }
 0x1cd   : > { %4744 = vmatprep.subr.bf16.mxu0 %v6822_v32  ;;  %5168 = vmatprep.subr.bf16.mxu1 %v6825_v33  ;;  %v6906_v32 = vld [vmem:[%s8747_s6 + $0x564] ss:$16 sps:$4 sm:$0xff]   ;;  %v6909_v33 = vld [vmem:[%s8747_s6 + $0x56c] ss:$16 sps:$4 sm:$0xff]  }
 0x1d0   : > { %4745 = vmatpush1.bf16.msra.mxu0 %v6820_v34  ;;  %5169 = vmatpush1.bf16.msra.mxu1 %v6823_v35  ;;  %v6904_v34 = vld [vmem:[%s8747_s6 + $0x560] ss:$16 sps:$4 sm:$0xff]   ;;  %v6907_v35 = vld [vmem:[%s8747_s6 + $0x568] ss:$16 sps:$4 sm:$0xff]  }
 0x1d1   : > { %4746 = vmatprep.subr.bf16.mxu0 %v6828_v36  ;;  %5170 = vmatprep.subr.bf16.mxu1 %v6831_v37  ;;  %v6912_v36 = vld [vmem:[%s8747_s6 + $0x584] ss:$16 sps:$4 sm:$0xff]   ;;  %v6915_v37 = vld [vmem:[%s8747_s6 + $0x58c] ss:$16 sps:$4 sm:$0xff]  }
 0x1d4   : > { %4747 = vmatpush1.bf16.msra.mxu0 %v6826_v38  ;;  %5171 = vmatpush1.bf16.msra.mxu1 %v6829_v39  ;;  %v6910_v38 = vld [vmem:[%s8747_s6 + $0x580] ss:$16 sps:$4 sm:$0xff]   ;;  %v6913_v39 = vld [vmem:[%s8747_s6 + $0x588] ss:$16 sps:$4 sm:$0xff]  }
 0x1d5   : > { %4748 = vmatprep.subr.bf16.mxu0 %v6834_v40  ;;  %5172 = vmatprep.subr.bf16.mxu1 %v6837_v41  ;;  %v6918_v40 = vld [vmem:[%s8747_s6 + $0x5a4] ss:$16 sps:$4 sm:$0xff]   ;;  %v6921_v41 = vld [vmem:[%s8747_s6 + $0x5ac] ss:$16 sps:$4 sm:$0xff]  }
 0x1d8   : > { %4749 = vmatpush1.bf16.msra.mxu0 %v6832_v42  ;;  %5173 = vmatpush1.bf16.msra.mxu1 %v6835_v43  ;;  %v6916_v42 = vld [vmem:[%s8747_s6 + $0x5a0] ss:$16 sps:$4 sm:$0xff]   ;;  %v6919_v43 = vld [vmem:[%s8747_s6 + $0x5a8] ss:$16 sps:$4 sm:$0xff]  }
 0x1d9   : > { %4771 = vmatprep.subr.bf16.mxu0 %v6840_v44  ;;  %5195 = vmatprep.subr.bf16.mxu1 %v6843_v45  ;;  %v6924_v44 = vld [vmem:[%s8747_s6 + $0x5c4] ss:$16 sps:$4 sm:$0xff]   ;;  %v6927_v45 = vld [vmem:[%s8747_s6 + $0x5cc] ss:$16 sps:$4 sm:$0xff]  }
 0x1db   : > { %4751 = vmatmul.mubr.bf16.vlgmr.msra.gmra.mrb[0].mxu0 %v5878_v48  ;;  %5175 = vmatmul.mubr.bf16.vlgmr.msra.gmra.mrb[0].mxu1 %v5878_v48  ;;  %v6930_v48 = vld [vmem:[%s8747_s6 + $0x5e4] ss:$16 sps:$4 sm:$0xff]  }
 0x1dc   : > { %4772 = vmatpush1.bf16.msra.mxu0 %v6838_v46  ;;  %5196 = vmatpush1.bf16.msra.mxu1 %v6841_v47  ;;  %v6922_v46 = vld [vmem:[%s8747_s6 + $0x5c0] ss:$16 sps:$4 sm:$0xff]   ;;  %v6925_v47 = vld [vmem:[%s8747_s6 + $0x5c8] ss:$16 sps:$4 sm:$0xff]  }
 0x1dd   : > { %4773 = vmatprep.subr.bf16.mxu0 %v6846_v51  ;;  %5197 = vmatprep.subr.bf16.mxu1 %v6849_v52  ;;  %v6931_v51 = vld [vmem:[%s8747_s6 + $0x5e8] ss:$16 sps:$4 sm:$0xff]   ;;  %v6936_v52 = vld [vmem:[%s8747_s6 + $0x604] ss:$16 sps:$4 sm:$0xff]  }
 0x1de   : > { %4760 = vmatprep.mubr.bf16.mxu0 %v5895_v53  ;;  %5184 = vmatprep.mubr.bf16.mxu1 %v5895_v53  ;;  %v6939_v53 = vld [vmem:[%s8747_s6 + $0x60c] ss:$16 sps:$4 sm:$0xff]  }
 0x1e0   : > { %4774 = vmatpush1.bf16.msra.mxu0 %v6844_v54  ;;  %5198 = vmatpush1.bf16.msra.mxu1 %v6847_v55  ;;  %v1419_v54 = vld [vmem:[%s8745_s4 + $0x90] sm:$0xff]  ;;  %v5880_v55 = vcombine.low %v8907_v58, %v8910_v60  ;;  %v6943_v60 = vld [vmem:[%s8747_s6 + $0x628] ss:$16 sps:$4 sm:$0xff]  }
 0x1e1   : > { %4775 = vmatprep.subr.bf16.mxu0 %v6852_v56  ;;  %5199 = vmatprep.subr.bf16.mxu1 %v6855_v57  ;;  %v1427_v56 = vld [vmem:[%s8745_s4 + $0xd0] sm:$0xff] }
 0x1e2   : > { %v6934_v57 = vld [vmem:[%s8747_s6 + $0x600] ss:$16 sps:$4 sm:$0xff]  }
 0x1e3   : > { %4761 = vmatmul.mubr.bf16.gmra.mrb[4].mxu0 %v5894_v59  ;;  %5185 = vmatmul.mubr.bf16.gmra.mrb[4].mxu1 %v5894_v59  ;;  %v6937_v59 = vld [vmem:[%s8747_s6 + $0x608] ss:$16 sps:$4 sm:$0xff]   ;;  %v6940_v58 = vld [vmem:[%s8747_s6 + $0x620] ss:$16 sps:$4 sm:$0xff]  }
 0x1e4   : > { %4776 = vmatpush1.bf16.msra.mxu0 %v6850_v61  ;;  %5200 = vmatpush1.bf16.msra.mxu1 %v6853_v62  ;;  %v6942_v61 = vld [vmem:[%s8747_s6 + $0x624] ss:$16 sps:$4 sm:$0xff]   ;;  %v6945_v62 = vld [vmem:[%s8747_s6 + $0x62c] ss:$16 sps:$4 sm:$0xff]  }
 0x1e5   : > { %4777 = vmatprep.subr.bf16.mxu0 %v6858_v63  ;;  %5201 = vmatprep.subr.bf16.mxu1 %v6861_v0  ;;  %v5897_v63 = vcombine.high %v1419_v54, %v1427_v56  ;;  %v6948_v0 = vld [vmem:[%s8747_s6 + $0x644] ss:$16 sps:$4 sm:$0xff]  }
 0x1e6   : > { %4803 = vmatprep.mubr.bf16.mxu0 %v5881_v1  ;;  %5227 = vmatprep.mubr.bf16.mxu1 %v5881_v1  ;;  %v6951_v1 = vld [vmem:[%s8747_s6 + $0x64c] ss:$16 sps:$4 sm:$0xff]  }
 0x1e8   : > { %4778 = vmatpush1.bf16.msra.mxu0 %v6856_v2  ;;  %5202 = vmatpush1.bf16.msra.mxu1 %v6859_v3  ;;  %v8983_v2 = vld [vmem:[%s8745_s4 + $0x18] sm:$0xff]  ;;  %v5896_v3 = vcombine.low %v1419_v54, %v1427_v56  ;;  %v7018_v54 = vld [vmem:[%s8747_s6 + $0x7c0] ss:$16 sps:$4 sm:$0xff]   ;;  %v7026_v56 = vld [vmem:[%s8747_s6 + $0x7e4] ss:$16 sps:$4 sm:$0xff]  }
 0x1e9   : > { %4779 = vmatprep.subr.bf16.mxu0 %v6864_v4  ;;  %5203 = vmatprep.subr.bf16.mxu1 %v6867_v5  ;;  %v8986_v4 = vld [vmem:[%s8745_s4 + $0x58] sm:$0xff]  ;;  %v6946_v5 = vld [vmem:[%s8747_s6 + $0x640] ss:$16 sps:$4 sm:$0xff]  }
 0x1ec   : > { %4780 = vmatpush1.bf16.msra.mxu0 %v6862_v6  ;;  %5204 = vmatpush1.bf16.msra.mxu1 %v6865_v7  ;;  %v6949_v6 = vld [vmem:[%s8747_s6 + $0x648] ss:$16 sps:$4 sm:$0xff]   ;;  %v6954_v7 = vld [vmem:[%s8747_s6 + $0x664] ss:$16 sps:$4 sm:$0xff]  }
 0x1ed   : > { %4781 = vmatprep.subr.bf16.mxu0 %v6870_v8  ;;  %5205 = vmatprep.subr.bf16.mxu1 %v6873_v9  ;;  %v6957_v8 = vld [vmem:[%s8747_s6 + $0x66c] ss:$16 sps:$4 sm:$0xff]   ;;  %v5883_v9 = vcombine.high %v8983_v2, %v8986_v4 }
 0x1f0   : > { %4782 = vmatpush1.bf16.msra.mxu0 %v6868_v10  ;;  %5206 = vmatpush1.bf16.msra.mxu1 %v6871_v11  ;;  %v6952_v10 = vld [vmem:[%s8747_s6 + $0x660] ss:$16 sps:$4 sm:$0xff]   ;;  %v6955_v11 = vld [vmem:[%s8747_s6 + $0x668] ss:$16 sps:$4 sm:$0xff]  }
 0x1f1   : > { %4783 = vmatprep.subr.bf16.mxu0 %v6876_v12  ;;  %5207 = vmatprep.subr.bf16.mxu1 %v6879_v13  ;;  %v6960_v12 = vld [vmem:[%s8747_s6 + $0x684] ss:$16 sps:$4 sm:$0xff]   ;;  %v6963_v13 = vld [vmem:[%s8747_s6 + $0x68c] ss:$16 sps:$4 sm:$0xff]  }
 0x1f4   : > { %4784 = vmatpush1.bf16.msra.mxu0 %v6874_v14  ;;  %5208 = vmatpush1.bf16.msra.mxu1 %v6877_v15  ;;  %v6958_v14 = vld [vmem:[%s8747_s6 + $0x680] ss:$16 sps:$4 sm:$0xff]   ;;  %v6961_v15 = vld [vmem:[%s8747_s6 + $0x688] ss:$16 sps:$4 sm:$0xff]  }
 0x1f5   : > { %4785 = vmatprep.subr.bf16.mxu0 %v6882_v16  ;;  %5209 = vmatprep.subr.bf16.mxu1 %v6885_v17  ;;  %v6966_v16 = vld [vmem:[%s8747_s6 + $0x6a4] ss:$16 sps:$4 sm:$0xff]   ;;  %v6969_v17 = vld [vmem:[%s8747_s6 + $0x6ac] ss:$16 sps:$4 sm:$0xff]  }
 0x1f8   : > { %4786 = vmatpush1.bf16.msra.mxu0 %v6880_v18  ;;  %5210 = vmatpush1.bf16.msra.mxu1 %v6883_v19  ;;  %v6964_v18 = vld [vmem:[%s8747_s6 + $0x6a0] ss:$16 sps:$4 sm:$0xff]   ;;  %v6967_v19 = vld [vmem:[%s8747_s6 + $0x6a8] ss:$16 sps:$4 sm:$0xff]  }
 0x1f9   : > { %4787 = vmatprep.subr.bf16.mxu0 %v6888_v20  ;;  %5211 = vmatprep.subr.bf16.mxu1 %v6891_v21  ;;  %v6972_v20 = vld [vmem:[%s8747_s6 + $0x6c4] ss:$16 sps:$4 sm:$0xff]   ;;  %v6975_v21 = vld [vmem:[%s8747_s6 + $0x6cc] ss:$16 sps:$4 sm:$0xff]  }
 0x1fc   : > { %4788 = vmatpush1.bf16.msra.mxu0 %v6886_v22  ;;  %5212 = vmatpush1.bf16.msra.mxu1 %v6889_v23  ;;  %v6970_v22 = vld [vmem:[%s8747_s6 + $0x6c0] ss:$16 sps:$4 sm:$0xff]   ;;  %v6973_v23 = vld [vmem:[%s8747_s6 + $0x6c8] ss:$16 sps:$4 sm:$0xff]  }
 0x1fd   : > { %4789 = vmatprep.subr.bf16.mxu0 %v6894_v24  ;;  %5213 = vmatprep.subr.bf16.mxu1 %v6897_v25  ;;  %v6978_v24 = vld [vmem:[%s8747_s6 + $0x6e4] ss:$16 sps:$4 sm:$0xff]   ;;  %v6981_v25 = vld [vmem:[%s8747_s6 + $0x6ec] ss:$16 sps:$4 sm:$0xff]  }
 0x200   : > { %4790 = vmatpush1.bf16.msra.mxu0 %v6892_v26  ;;  %5214 = vmatpush1.bf16.msra.mxu1 %v6895_v27  ;;  %v6976_v26 = vld [vmem:[%s8747_s6 + $0x6e0] ss:$16 sps:$4 sm:$0xff]   ;;  %v6979_v27 = vld [vmem:[%s8747_s6 + $0x6e8] ss:$16 sps:$4 sm:$0xff]  }
 0x201   : > { %4791 = vmatprep.subr.bf16.mxu0 %v6900_v28  ;;  %5215 = vmatprep.subr.bf16.mxu1 %v6903_v29  ;;  %v6984_v28 = vld [vmem:[%s8747_s6 + $0x704] ss:$16 sps:$4 sm:$0xff]   ;;  %v6987_v29 = vld [vmem:[%s8747_s6 + $0x70c] ss:$16 sps:$4 sm:$0xff]  }
 0x204   : > { %4792 = vmatpush1.bf16.msra.mxu0 %v6898_v30  ;;  %5216 = vmatpush1.bf16.msra.mxu1 %v6901_v31  ;;  %v6982_v30 = vld [vmem:[%s8747_s6 + $0x700] ss:$16 sps:$4 sm:$0xff]   ;;  %v6985_v31 = vld [vmem:[%s8747_s6 + $0x708] ss:$16 sps:$4 sm:$0xff]  }
 0x205   : > { %4793 = vmatprep.subr.bf16.mxu0 %v6906_v32  ;;  %5217 = vmatprep.subr.bf16.mxu1 %v6909_v33  ;;  %v6990_v32 = vld [vmem:[%s8747_s6 + $0x724] ss:$16 sps:$4 sm:$0xff]   ;;  %v6993_v33 = vld [vmem:[%s8747_s6 + $0x72c] ss:$16 sps:$4 sm:$0xff]  }
 0x208   : > { %4794 = vmatpush1.bf16.msra.mxu0 %v6904_v34  ;;  %5218 = vmatpush1.bf16.msra.mxu1 %v6907_v35  ;;  %v6988_v34 = vld [vmem:[%s8747_s6 + $0x720] ss:$16 sps:$4 sm:$0xff]   ;;  %v6991_v35 = vld [vmem:[%s8747_s6 + $0x728] ss:$16 sps:$4 sm:$0xff]  }
 0x209   : > { %4795 = vmatprep.subr.bf16.mxu0 %v6912_v36  ;;  %5219 = vmatprep.subr.bf16.mxu1 %v6915_v37  ;;  %v6996_v36 = vld [vmem:[%s8747_s6 + $0x744] ss:$16 sps:$4 sm:$0xff]   ;;  %v6999_v37 = vld [vmem:[%s8747_s6 + $0x74c] ss:$16 sps:$4 sm:$0xff]  }
 0x20c   : > { %4796 = vmatpush1.bf16.msra.mxu0 %v6910_v38  ;;  %5220 = vmatpush1.bf16.msra.mxu1 %v6913_v39  ;;  %v6994_v38 = vld [vmem:[%s8747_s6 + $0x740] ss:$16 sps:$4 sm:$0xff]   ;;  %v6997_v39 = vld [vmem:[%s8747_s6 + $0x748] ss:$16 sps:$4 sm:$0xff]  }
 0x20d   : > { %4797 = vmatprep.subr.bf16.mxu0 %v6918_v40  ;;  %5221 = vmatprep.subr.bf16.mxu1 %v6921_v41  ;;  %v7002_v40 = vld [vmem:[%s8747_s6 + $0x764] ss:$16 sps:$4 sm:$0xff]   ;;  %v7005_v41 = vld [vmem:[%s8747_s6 + $0x76c] ss:$16 sps:$4 sm:$0xff]  }
 0x210   : > { %4798 = vmatpush1.bf16.msra.mxu0 %v6916_v42  ;;  %5222 = vmatpush1.bf16.msra.mxu1 %v6919_v43  ;;  %v7000_v42 = vld [vmem:[%s8747_s6 + $0x760] ss:$16 sps:$4 sm:$0xff]   ;;  %v7003_v43 = vld [vmem:[%s8747_s6 + $0x768] ss:$16 sps:$4 sm:$0xff]  }
 0x211   : > { %4799 = vmatprep.subr.bf16.mxu0 %v6924_v44  ;;  %5223 = vmatprep.subr.bf16.mxu1 %v6927_v45  ;;  %v7008_v44 = vld [vmem:[%s8747_s6 + $0x784] ss:$16 sps:$4 sm:$0xff]   ;;  %v7011_v45 = vld [vmem:[%s8747_s6 + $0x78c] ss:$16 sps:$4 sm:$0xff]  }
 0x214   : > { %4800 = vmatpush1.bf16.msra.mxu0 %v6922_v46  ;;  %5224 = vmatpush1.bf16.msra.mxu1 %v6925_v47  ;;  %v7006_v46 = vld [vmem:[%s8747_s6 + $0x780] ss:$16 sps:$4 sm:$0xff]   ;;  %v7009_v47 = vld [vmem:[%s8747_s6 + $0x788] ss:$16 sps:$4 sm:$0xff]  }
 0x215   : > { %4801 = vmatprep.subr.bf16.mxu0 %v6930_v48  ;;  %5225 = vmatprep.subr.bf16.mxu1 %v6933_v49  ;;  %v7014_v48 = vld [vmem:[%s8747_s6 + $0x7a4] ss:$16 sps:$4 sm:$0xff]   ;;  %v7017_v49 = vld [vmem:[%s8747_s6 + $0x7ac] ss:$16 sps:$4 sm:$0xff]  }
 0x218   : > { %4802 = vmatpush1.bf16.msra.mxu0 %v6928_v50  ;;  %5226 = vmatpush1.bf16.msra.mxu1 %v6931_v51  ;;  %v7012_v50 = vld [vmem:[%s8747_s6 + $0x7a0] ss:$16 sps:$4 sm:$0xff]   ;;  %v7015_v51 = vld [vmem:[%s8747_s6 + $0x7a8] ss:$16 sps:$4 sm:$0xff]  }
 0x219   : > { %4824 = vmatprep.subr.bf16.mxu0 %v6936_v52  ;;  %5248 = vmatprep.subr.bf16.mxu1 %v6939_v53  ;;  %v7020_v52 = vld [vmem:[%s8747_s6 + $0x7c4] ss:$16 sps:$4 sm:$0xff]   ;;  %v7023_v53 = vld [vmem:[%s8747_s6 + $0x7cc] ss:$16 sps:$4 sm:$0xff]  }
 0x21b   : > { %4804 = vmatmul.mubr.bf16.vlgmr.msra.gmra.mrb[0].mxu0 %v5880_v55  ;;  %5228 = vmatmul.mubr.bf16.vlgmr.msra.gmra.mrb[0].mxu1 %v5880_v55  ;;  %v7021_v55 = vld [vmem:[%s8747_s6 + $0x7c8] ss:$16 sps:$4 sm:$0xff]  }
 0x21c   : > { %4825 = vmatpush1.bf16.msra.mxu0 %v6934_v57  ;;  %5249 = vmatpush1.bf16.msra.mxu1 %v6937_v59  ;;  %v7029_v57 = vld [vmem:[%s8747_s6 + $0x7ec] ss:$16 sps:$4 sm:$0xff]   ;;  %v7024_v59 = vld [vmem:[%s8747_s6 + $0x7e0] ss:$16 sps:$4 sm:$0xff]  }
 0x21d   : > { %4826 = vmatprep.subr.bf16.mxu0 %v6942_v61  ;;  %5250 = vmatprep.subr.bf16.mxu1 %v6945_v62  ;;  %v7027_v61 = vld [vmem:[%s8747_s6 + $0x7e8] ss:$16 sps:$4 sm:$0xff]   ;;  %v7032_v62 = vld [vmem:[%s8747_s6 + $0x804] ss:$16 sps:$4 sm:$0xff]  }
 0x21e   : > { %4813 = vmatprep.mubr.bf16.mxu0 %v5897_v63  ;;  %5237 = vmatprep.mubr.bf16.mxu1 %v5897_v63  ;;  %v7035_v63 = vld [vmem:[%s8747_s6 + $0x80c] ss:$16 sps:$4 sm:$0xff]  }
 0x220   : > { %4827 = vmatpush1.bf16.msra.mxu0 %v6940_v58  ;;  %5251 = vmatpush1.bf16.msra.mxu1 %v6943_v60  ;;  %v1420_v58 = vld [vmem:[%s8745_s4 + $0x98] sm:$0xff]  ;;  %v5882_v60 = vcombine.low %v8983_v2, %v8986_v4  ;;  %v7044_v4 = vld [vmem:[%s8747_s6 + $0x844] ss:$16 sps:$4 sm:$0xff]  }
 0x221   : > { %4828 = vmatprep.subr.bf16.mxu0 %v6948_v0  ;;  %5252 = vmatprep.subr.bf16.mxu1 %v6951_v1  ;;  %v1428_v0 = vld [vmem:[%s8745_s4 + $0xd8] sm:$0xff]  ;;  %v7030_v1 = vld [vmem:[%s8747_s6 + $0x800] ss:$16 sps:$4 sm:$0xff]  }
 0x222   : > { %v7039_v2 = vld [vmem:[%s8747_s6 + $0x828] ss:$16 sps:$4 sm:$0xff]  }
 0x223   : > { %4814 = vmatmul.mubr.bf16.gmra.mrb[4].mxu0 %v5896_v3  ;;  %5238 = vmatmul.mubr.bf16.gmra.mrb[4].mxu1 %v5896_v3  ;;  %v7033_v3 = vld [vmem:[%s8747_s6 + $0x808] ss:$16 sps:$4 sm:$0xff]  }
 0x224   : > { %4829 = vmatpush1.bf16.msra.mxu0 %v6946_v5  ;;  %5253 = vmatpush1.bf16.msra.mxu1 %v6949_v6  ;;  %v7038_v5 = vld [vmem:[%s8747_s6 + $0x824] ss:$16 sps:$4 sm:$0xff]   ;;  %v7041_v6 = vld [vmem:[%s8747_s6 + $0x82c] ss:$16 sps:$4 sm:$0xff]  }
 0x225   : > { %4830 = vmatprep.subr.bf16.mxu0 %v6954_v7  ;;  %5254 = vmatprep.subr.bf16.mxu1 %v6957_v8  ;;  %v5899_v7 = vcombine.high %v1420_v58, %v1428_v0  ;;  %v7036_v8 = vld [vmem:[%s8747_s6 + $0x820] ss:$16 sps:$4 sm:$0xff]  }
 0x226   : > { %4856 = vmatprep.mubr.bf16.mxu0 %v5883_v9  ;;  %5280 = vmatprep.mubr.bf16.mxu1 %v5883_v9  ;;  %v7047_v9 = vld [vmem:[%s8747_s6 + $0x84c] ss:$16 sps:$4 sm:$0xff]  }
 0x228   : > { %4831 = vmatpush1.bf16.msra.mxu0 %v6952_v10  ;;  %5255 = vmatpush1.bf16.msra.mxu1 %v6955_v11  ;;  %v9059_v10 = vld [vmem:[%s8745_s4 + $0x20] sm:$0xff]  ;;  %v5898_v11 = vcombine.low %v1420_v58, %v1428_v0 }
 0x229   : > { %4832 = vmatprep.subr.bf16.mxu0 %v6960_v12  ;;  %5256 = vmatprep.subr.bf16.mxu1 %v6963_v13  ;;  %v9062_v12 = vld [vmem:[%s8745_s4 + $0x60] sm:$0xff] }
 0x22a   : > { %v7042_v13 = vld [vmem:[%s8747_s6 + $0x840] ss:$16 sps:$4 sm:$0xff]   ;;  %v7122_v0 = vld [vmem:[%s8747_s6 + $0x9e4] ss:$16 sps:$4 sm:$0xff]  }
 0x22b   : > { %v7114_v58 = vld [vmem:[%s8747_s6 + $0x9c0] ss:$16 sps:$4 sm:$0xff]  }
 0x22c   : > { %4833 = vmatpush1.bf16.msra.mxu0 %v6958_v14  ;;  %5257 = vmatpush1.bf16.msra.mxu1 %v6961_v15  ;;  %v7045_v14 = vld [vmem:[%s8747_s6 + $0x848] ss:$16 sps:$4 sm:$0xff]   ;;  %v7050_v15 = vld [vmem:[%s8747_s6 + $0x864] ss:$16 sps:$4 sm:$0xff]  }
 0x22d   : > { %4834 = vmatprep.subr.bf16.mxu0 %v6966_v16  ;;  %5258 = vmatprep.subr.bf16.mxu1 %v6969_v17  ;;  %v7053_v16 = vld [vmem:[%s8747_s6 + $0x86c] ss:$16 sps:$4 sm:$0xff]   ;;  %v5885_v17 = vcombine.high %v9059_v10, %v9062_v12 }
 0x230   : > { %4835 = vmatpush1.bf16.msra.mxu0 %v6964_v18  ;;  %5259 = vmatpush1.bf16.msra.mxu1 %v6967_v19  ;;  %v7048_v18 = vld [vmem:[%s8747_s6 + $0x860] ss:$16 sps:$4 sm:$0xff]   ;;  %v7051_v19 = vld [vmem:[%s8747_s6 + $0x868] ss:$16 sps:$4 sm:$0xff]  }
 0x231   : > { %4836 = vmatprep.subr.bf16.mxu0 %v6972_v20  ;;  %5260 = vmatprep.subr.bf16.mxu1 %v6975_v21  ;;  %v7056_v20 = vld [vmem:[%s8747_s6 + $0x884] ss:$16 sps:$4 sm:$0xff]   ;;  %v7059_v21 = vld [vmem:[%s8747_s6 + $0x88c] ss:$16 sps:$4 sm:$0xff]  }
 0x234   : > { %4837 = vmatpush1.bf16.msra.mxu0 %v6970_v22  ;;  %5261 = vmatpush1.bf16.msra.mxu1 %v6973_v23  ;;  %v7054_v22 = vld [vmem:[%s8747_s6 + $0x880] ss:$16 sps:$4 sm:$0xff]   ;;  %v7057_v23 = vld [vmem:[%s8747_s6 + $0x888] ss:$16 sps:$4 sm:$0xff]  }
 0x235   : > { %4838 = vmatprep.subr.bf16.mxu0 %v6978_v24  ;;  %5262 = vmatprep.subr.bf16.mxu1 %v6981_v25  ;;  %v7062_v24 = vld [vmem:[%s8747_s6 + $0x8a4] ss:$16 sps:$4 sm:$0xff]   ;;  %v7065_v25 = vld [vmem:[%s8747_s6 + $0x8ac] ss:$16 sps:$4 sm:$0xff]  }
 0x238   : > { %4839 = vmatpush1.bf16.msra.mxu0 %v6976_v26  ;;  %5263 = vmatpush1.bf16.msra.mxu1 %v6979_v27  ;;  %v7060_v26 = vld [vmem:[%s8747_s6 + $0x8a0] ss:$16 sps:$4 sm:$0xff]   ;;  %v7063_v27 = vld [vmem:[%s8747_s6 + $0x8a8] ss:$16 sps:$4 sm:$0xff]  }
 0x239   : > { %4840 = vmatprep.subr.bf16.mxu0 %v6984_v28  ;;  %5264 = vmatprep.subr.bf16.mxu1 %v6987_v29  ;;  %v7068_v28 = vld [vmem:[%s8747_s6 + $0x8c4] ss:$16 sps:$4 sm:$0xff]   ;;  %v7071_v29 = vld [vmem:[%s8747_s6 + $0x8cc] ss:$16 sps:$4 sm:$0xff]  }
 0x23c   : > { %4841 = vmatpush1.bf16.msra.mxu0 %v6982_v30  ;;  %5265 = vmatpush1.bf16.msra.mxu1 %v6985_v31  ;;  %v7066_v30 = vld [vmem:[%s8747_s6 + $0x8c0] ss:$16 sps:$4 sm:$0xff]   ;;  %v7069_v31 = vld [vmem:[%s8747_s6 + $0x8c8] ss:$16 sps:$4 sm:$0xff]  }
 0x23d   : > { %4842 = vmatprep.subr.bf16.mxu0 %v6990_v32  ;;  %5266 = vmatprep.subr.bf16.mxu1 %v6993_v33  ;;  %v7074_v32 = vld [vmem:[%s8747_s6 + $0x8e4] ss:$16 sps:$4 sm:$0xff]   ;;  %v7077_v33 = vld [vmem:[%s8747_s6 + $0x8ec] ss:$16 sps:$4 sm:$0xff]  }
 0x240   : > { %4843 = vmatpush1.bf16.msra.mxu0 %v6988_v34  ;;  %5267 = vmatpush1.bf16.msra.mxu1 %v6991_v35  ;;  %v7072_v34 = vld [vmem:[%s8747_s6 + $0x8e0] ss:$16 sps:$4 sm:$0xff]   ;;  %v7075_v35 = vld [vmem:[%s8747_s6 + $0x8e8] ss:$16 sps:$4 sm:$0xff]  }
 0x241   : > { %4844 = vmatprep.subr.bf16.mxu0 %v6996_v36  ;;  %5268 = vmatprep.subr.bf16.mxu1 %v6999_v37  ;;  %v7080_v36 = vld [vmem:[%s8747_s6 + $0x904] ss:$16 sps:$4 sm:$0xff]   ;;  %v7083_v37 = vld [vmem:[%s8747_s6 + $0x90c] ss:$16 sps:$4 sm:$0xff]  }
 0x244   : > { %4845 = vmatpush1.bf16.msra.mxu0 %v6994_v38  ;;  %5269 = vmatpush1.bf16.msra.mxu1 %v6997_v39  ;;  %v7078_v38 = vld [vmem:[%s8747_s6 + $0x900] ss:$16 sps:$4 sm:$0xff]   ;;  %v7081_v39 = vld [vmem:[%s8747_s6 + $0x908] ss:$16 sps:$4 sm:$0xff]  }
 0x245   : > { %4846 = vmatprep.subr.bf16.mxu0 %v7002_v40  ;;  %5270 = vmatprep.subr.bf16.mxu1 %v7005_v41  ;;  %v7086_v40 = vld [vmem:[%s8747_s6 + $0x924] ss:$16 sps:$4 sm:$0xff]   ;;  %v7089_v41 = vld [vmem:[%s8747_s6 + $0x92c] ss:$16 sps:$4 sm:$0xff]  }
 0x248   : > { %4847 = vmatpush1.bf16.msra.mxu0 %v7000_v42  ;;  %5271 = vmatpush1.bf16.msra.mxu1 %v7003_v43  ;;  %v7084_v42 = vld [vmem:[%s8747_s6 + $0x920] ss:$16 sps:$4 sm:$0xff]   ;;  %v7087_v43 = vld [vmem:[%s8747_s6 + $0x928] ss:$16 sps:$4 sm:$0xff]  }
 0x249   : > { %4848 = vmatprep.subr.bf16.mxu0 %v7008_v44  ;;  %5272 = vmatprep.subr.bf16.mxu1 %v7011_v45  ;;  %v7092_v44 = vld [vmem:[%s8747_s6 + $0x944] ss:$16 sps:$4 sm:$0xff]   ;;  %v7095_v45 = vld [vmem:[%s8747_s6 + $0x94c] ss:$16 sps:$4 sm:$0xff]  }
 0x24c   : > { %4849 = vmatpush1.bf16.msra.mxu0 %v7006_v46  ;;  %5273 = vmatpush1.bf16.msra.mxu1 %v7009_v47  ;;  %v7090_v46 = vld [vmem:[%s8747_s6 + $0x940] ss:$16 sps:$4 sm:$0xff]   ;;  %v7093_v47 = vld [vmem:[%s8747_s6 + $0x948] ss:$16 sps:$4 sm:$0xff]  }
 0x24d   : > { %4850 = vmatprep.subr.bf16.mxu0 %v7014_v48  ;;  %5274 = vmatprep.subr.bf16.mxu1 %v7017_v49  ;;  %v7098_v48 = vld [vmem:[%s8747_s6 + $0x964] ss:$16 sps:$4 sm:$0xff]   ;;  %v7101_v49 = vld [vmem:[%s8747_s6 + $0x96c] ss:$16 sps:$4 sm:$0xff]  }
 0x250   : > { %4851 = vmatpush1.bf16.msra.mxu0 %v7012_v50  ;;  %5275 = vmatpush1.bf16.msra.mxu1 %v7015_v51  ;;  %v7096_v50 = vld [vmem:[%s8747_s6 + $0x960] ss:$16 sps:$4 sm:$0xff]   ;;  %v7099_v51 = vld [vmem:[%s8747_s6 + $0x968] ss:$16 sps:$4 sm:$0xff]  }
 0x251   : > { %4852 = vmatprep.subr.bf16.mxu0 %v7020_v52  ;;  %5276 = vmatprep.subr.bf16.mxu1 %v7023_v53  ;;  %v7104_v52 = vld [vmem:[%s8747_s6 + $0x984] ss:$16 sps:$4 sm:$0xff]   ;;  %v7107_v53 = vld [vmem:[%s8747_s6 + $0x98c] ss:$16 sps:$4 sm:$0xff]  }
 0x254   : > { %4853 = vmatpush1.bf16.msra.mxu0 %v7018_v54  ;;  %5277 = vmatpush1.bf16.msra.mxu1 %v7021_v55  ;;  %v7102_v54 = vld [vmem:[%s8747_s6 + $0x980] ss:$16 sps:$4 sm:$0xff]   ;;  %v7105_v55 = vld [vmem:[%s8747_s6 + $0x988] ss:$16 sps:$4 sm:$0xff]  }
 0x255   : > { %4854 = vmatprep.subr.bf16.mxu0 %v7026_v56  ;;  %5278 = vmatprep.subr.bf16.mxu1 %v7029_v57  ;;  %v7110_v56 = vld [vmem:[%s8747_s6 + $0x9a4] ss:$16 sps:$4 sm:$0xff]   ;;  %v7113_v57 = vld [vmem:[%s8747_s6 + $0x9ac] ss:$16 sps:$4 sm:$0xff]  }
 0x258   : > { %4855 = vmatpush1.bf16.msra.mxu0 %v7024_v59  ;;  %5279 = vmatpush1.bf16.msra.mxu1 %v7027_v61  ;;  %v7108_v59 = vld [vmem:[%s8747_s6 + $0x9a0] ss:$16 sps:$4 sm:$0xff]   ;;  %v7111_v61 = vld [vmem:[%s8747_s6 + $0x9a8] ss:$16 sps:$4 sm:$0xff]  }
 0x259   : > { %4877 = vmatprep.subr.bf16.mxu0 %v7032_v62  ;;  %5301 = vmatprep.subr.bf16.mxu1 %v7035_v63  ;;  %v7116_v62 = vld [vmem:[%s8747_s6 + $0x9c4] ss:$16 sps:$4 sm:$0xff]   ;;  %v7119_v63 = vld [vmem:[%s8747_s6 + $0x9cc] ss:$16 sps:$4 sm:$0xff]  }
 0x25b   : > { %4857 = vmatmul.mubr.bf16.vlgmr.msra.gmra.mrb[0].mxu0 %v5882_v60  ;;  %5281 = vmatmul.mubr.bf16.vlgmr.msra.gmra.mrb[0].mxu1 %v5882_v60  ;;  %v7117_v60 = vld [vmem:[%s8747_s6 + $0x9c8] ss:$16 sps:$4 sm:$0xff]  }
 0x25c   : > { %4878 = vmatpush1.bf16.msra.mxu0 %v7030_v1  ;;  %5302 = vmatpush1.bf16.msra.mxu1 %v7033_v3  ;;  %v7125_v1 = vld [vmem:[%s8747_s6 + $0x9ec] ss:$16 sps:$4 sm:$0xff]   ;;  %v7120_v3 = vld [vmem:[%s8747_s6 + $0x9e0] ss:$16 sps:$4 sm:$0xff]  }
 0x25d   : > { %4879 = vmatprep.subr.bf16.mxu0 %v7038_v5  ;;  %5303 = vmatprep.subr.bf16.mxu1 %v7041_v6  ;;  %v7123_v5 = vld [vmem:[%s8747_s6 + $0x9e8] ss:$16 sps:$4 sm:$0xff]   ;;  %v7128_v6 = vld [vmem:[%s8747_s6 + $0xa04] ss:$16 sps:$4 sm:$0xff]  }
 0x25e   : > { %4866 = vmatprep.mubr.bf16.mxu0 %v5899_v7  ;;  %5290 = vmatprep.mubr.bf16.mxu1 %v5899_v7  ;;  %v7131_v7 = vld [vmem:[%s8747_s6 + $0xa0c] ss:$16 sps:$4 sm:$0xff]  }
 0x260   : > { %4880 = vmatpush1.bf16.msra.mxu0 %v7036_v8  ;;  %5304 = vmatpush1.bf16.msra.mxu1 %v7039_v2  ;;  %v1421_v8 = vld [vmem:[%s8745_s4 + $0xa0] sm:$0xff] }
 0x261   : > { %4881 = vmatprep.subr.bf16.mxu0 %v7044_v4  ;;  %5305 = vmatprep.subr.bf16.mxu1 %v7047_v9  ;;  %v1429_v2 = vld [vmem:[%s8745_s4 + $0xe0] sm:$0xff]  ;;  %v5884_v4 = vcombine.low %v9059_v10, %v9062_v12  ;;  %v7143_v12 = vld [vmem:[%s8747_s6 + $0xa4c] ss:$16 sps:$4 sm:$0xff]  }
 0x262   : > { %v7126_v9 = vld [vmem:[%s8747_s6 + $0xa00] ss:$16 sps:$4 sm:$0xff]   ;;  %v7140_v10 = vld [vmem:[%s8747_s6 + $0xa44] ss:$16 sps:$4 sm:$0xff]  }
 0x263   : > { %4867 = vmatmul.mubr.bf16.gmra.mrb[4].mxu0 %v5898_v11  ;;  %5291 = vmatmul.mubr.bf16.gmra.mrb[4].mxu1 %v5898_v11  ;;  %v7129_v11 = vld [vmem:[%s8747_s6 + $0xa08] ss:$16 sps:$4 sm:$0xff]  }
 0x264   : > { %4882 = vmatpush1.bf16.msra.mxu0 %v7042_v13  ;;  %5306 = vmatpush1.bf16.msra.mxu1 %v7045_v14  ;;  %v7134_v13 = vld [vmem:[%s8747_s6 + $0xa24] ss:$16 sps:$4 sm:$0xff]   ;;  %v7137_v14 = vld [vmem:[%s8747_s6 + $0xa2c] ss:$16 sps:$4 sm:$0xff]  }
 0x265   : > { %4883 = vmatprep.subr.bf16.mxu0 %v7050_v15  ;;  %5307 = vmatprep.subr.bf16.mxu1 %v7053_v16  ;;  %v7132_v15 = vld [vmem:[%s8747_s6 + $0xa20] ss:$16 sps:$4 sm:$0xff]   ;;  %v7135_v16 = vld [vmem:[%s8747_s6 + $0xa28] ss:$16 sps:$4 sm:$0xff]  }
 0x266   : > { %4909 = vmatprep.mubr.bf16.mxu0 %v5885_v17  ;;  %5333 = vmatprep.mubr.bf16.mxu1 %v5885_v17  ;;  %v5901_v17 = vcombine.high %v1421_v8, %v1429_v2 }
 0x268   : > { %4884 = vmatpush1.bf16.msra.mxu0 %v7048_v18  ;;  %5308 = vmatpush1.bf16.msra.mxu1 %v7051_v19  ;;  %v9135_v18 = vld [vmem:[%s8745_s4 + $0x28] sm:$0xff] }
 0x269   : > { %4885 = vmatprep.subr.bf16.mxu0 %v7056_v20  ;;  %5309 = vmatprep.subr.bf16.mxu1 %v7059_v21  ;;  %v9138_v19 = vld [vmem:[%s8745_s4 + $0x68] sm:$0xff]  ;;  %v5900_v20 = vcombine.low %v1421_v8, %v1429_v2  ;;  %v7138_v21 = vld [vmem:[%s8747_s6 + $0xa40] ss:$16 sps:$4 sm:$0xff]  }
 0x26a   : > { %v7210_v8 = vld [vmem:[%s8747_s6 + $0xbc0] ss:$16 sps:$4 sm:$0xff]   ;;  %v7213_v2 = vld [vmem:[%s8747_s6 + $0xbc8] ss:$16 sps:$4 sm:$0xff]  }
 0x26c   : > { %4886 = vmatpush1.bf16.msra.mxu0 %v7054_v22  ;;  %5310 = vmatpush1.bf16.msra.mxu1 %v7057_v23  ;;  %v7141_v22 = vld [vmem:[%s8747_s6 + $0xa48] ss:$16 sps:$4 sm:$0xff]   ;;  %v7146_v23 = vld [vmem:[%s8747_s6 + $0xa64] ss:$16 sps:$4 sm:$0xff]  }
 0x26d   : > { %4887 = vmatprep.subr.bf16.mxu0 %v7062_v24  ;;  %5311 = vmatprep.subr.bf16.mxu1 %v7065_v25  ;;  %v7149_v24 = vld [vmem:[%s8747_s6 + $0xa6c] ss:$16 sps:$4 sm:$0xff]   ;;  %v5887_v25 = vcombine.high %v9135_v18, %v9138_v19 }
 0x270   : > { %4888 = vmatpush1.bf16.msra.mxu0 %v7060_v26  ;;  %5312 = vmatpush1.bf16.msra.mxu1 %v7063_v27  ;;  %v7144_v26 = vld [vmem:[%s8747_s6 + $0xa60] ss:$16 sps:$4 sm:$0xff]   ;;  %v7147_v27 = vld [vmem:[%s8747_s6 + $0xa68] ss:$16 sps:$4 sm:$0xff]  }
 0x271   : > { %4889 = vmatprep.subr.bf16.mxu0 %v7068_v28  ;;  %5313 = vmatprep.subr.bf16.mxu1 %v7071_v29  ;;  %v7152_v28 = vld [vmem:[%s8747_s6 + $0xa84] ss:$16 sps:$4 sm:$0xff]   ;;  %v7155_v29 = vld [vmem:[%s8747_s6 + $0xa8c] ss:$16 sps:$4 sm:$0xff]  }
 0x274   : > { %4890 = vmatpush1.bf16.msra.mxu0 %v7066_v30  ;;  %5314 = vmatpush1.bf16.msra.mxu1 %v7069_v31  ;;  %v7150_v30 = vld [vmem:[%s8747_s6 + $0xa80] ss:$16 sps:$4 sm:$0xff]   ;;  %v7153_v31 = vld [vmem:[%s8747_s6 + $0xa88] ss:$16 sps:$4 sm:$0xff]  }
 0x275   : > { %4891 = vmatprep.subr.bf16.mxu0 %v7074_v32  ;;  %5315 = vmatprep.subr.bf16.mxu1 %v7077_v33  ;;  %v7158_v32 = vld [vmem:[%s8747_s6 + $0xaa4] ss:$16 sps:$4 sm:$0xff]   ;;  %v7161_v33 = vld [vmem:[%s8747_s6 + $0xaac] ss:$16 sps:$4 sm:$0xff]  }
 0x278   : > { %4892 = vmatpush1.bf16.msra.mxu0 %v7072_v34  ;;  %5316 = vmatpush1.bf16.msra.mxu1 %v7075_v35  ;;  %v7156_v34 = vld [vmem:[%s8747_s6 + $0xaa0] ss:$16 sps:$4 sm:$0xff]   ;;  %v7159_v35 = vld [vmem:[%s8747_s6 + $0xaa8] ss:$16 sps:$4 sm:$0xff]  }
 0x279   : > { %4893 = vmatprep.subr.bf16.mxu0 %v7080_v36  ;;  %5317 = vmatprep.subr.bf16.mxu1 %v7083_v37  ;;  %v7164_v36 = vld [vmem:[%s8747_s6 + $0xac4] ss:$16 sps:$4 sm:$0xff]   ;;  %v7167_v37 = vld [vmem:[%s8747_s6 + $0xacc] ss:$16 sps:$4 sm:$0xff]  }
 0x27c   : > { %4894 = vmatpush1.bf16.msra.mxu0 %v7078_v38  ;;  %5318 = vmatpush1.bf16.msra.mxu1 %v7081_v39  ;;  %v7162_v38 = vld [vmem:[%s8747_s6 + $0xac0] ss:$16 sps:$4 sm:$0xff]   ;;  %v7165_v39 = vld [vmem:[%s8747_s6 + $0xac8] ss:$16 sps:$4 sm:$0xff]  }
 0x27d   : > { %4895 = vmatprep.subr.bf16.mxu0 %v7086_v40  ;;  %5319 = vmatprep.subr.bf16.mxu1 %v7089_v41  ;;  %v7170_v40 = vld [vmem:[%s8747_s6 + $0xae4] ss:$16 sps:$4 sm:$0xff]   ;;  %v7173_v41 = vld [vmem:[%s8747_s6 + $0xaec] ss:$16 sps:$4 sm:$0xff]  }
 0x280   : > { %4896 = vmatpush1.bf16.msra.mxu0 %v7084_v42  ;;  %5320 = vmatpush1.bf16.msra.mxu1 %v7087_v43  ;;  %v7168_v42 = vld [vmem:[%s8747_s6 + $0xae0] ss:$16 sps:$4 sm:$0xff]   ;;  %v7171_v43 = vld [vmem:[%s8747_s6 + $0xae8] ss:$16 sps:$4 sm:$0xff]  }
 0x281   : > { %4897 = vmatprep.subr.bf16.mxu0 %v7092_v44  ;;  %5321 = vmatprep.subr.bf16.mxu1 %v7095_v45  ;;  %v7176_v44 = vld [vmem:[%s8747_s6 + $0xb04] ss:$16 sps:$4 sm:$0xff]   ;;  %v7179_v45 = vld [vmem:[%s8747_s6 + $0xb0c] ss:$16 sps:$4 sm:$0xff]  }
 0x284   : > { %4898 = vmatpush1.bf16.msra.mxu0 %v7090_v46  ;;  %5322 = vmatpush1.bf16.msra.mxu1 %v7093_v47  ;;  %v7174_v46 = vld [vmem:[%s8747_s6 + $0xb00] ss:$16 sps:$4 sm:$0xff]   ;;  %v7177_v47 = vld [vmem:[%s8747_s6 + $0xb08] ss:$16 sps:$4 sm:$0xff]  }
 0x285   : > { %4899 = vmatprep.subr.bf16.mxu0 %v7098_v48  ;;  %5323 = vmatprep.subr.bf16.mxu1 %v7101_v49  ;;  %v7182_v48 = vld [vmem:[%s8747_s6 + $0xb24] ss:$16 sps:$4 sm:$0xff]   ;;  %v7185_v49 = vld [vmem:[%s8747_s6 + $0xb2c] ss:$16 sps:$4 sm:$0xff]  }
 0x288   : > { %4900 = vmatpush1.bf16.msra.mxu0 %v7096_v50  ;;  %5324 = vmatpush1.bf16.msra.mxu1 %v7099_v51  ;;  %v7180_v50 = vld [vmem:[%s8747_s6 + $0xb20] ss:$16 sps:$4 sm:$0xff]   ;;  %v7183_v51 = vld [vmem:[%s8747_s6 + $0xb28] ss:$16 sps:$4 sm:$0xff]  }
 0x289   : > { %4901 = vmatprep.subr.bf16.mxu0 %v7104_v52  ;;  %5325 = vmatprep.subr.bf16.mxu1 %v7107_v53  ;;  %v7188_v52 = vld [vmem:[%s8747_s6 + $0xb44] ss:$16 sps:$4 sm:$0xff]   ;;  %v7191_v53 = vld [vmem:[%s8747_s6 + $0xb4c] ss:$16 sps:$4 sm:$0xff]  }
 0x28c   : > { %4902 = vmatpush1.bf16.msra.mxu0 %v7102_v54  ;;  %5326 = vmatpush1.bf16.msra.mxu1 %v7105_v55  ;;  %v7186_v54 = vld [vmem:[%s8747_s6 + $0xb40] ss:$16 sps:$4 sm:$0xff]   ;;  %v7189_v55 = vld [vmem:[%s8747_s6 + $0xb48] ss:$16 sps:$4 sm:$0xff]  }
 0x28d   : > { %4903 = vmatprep.subr.bf16.mxu0 %v7110_v56  ;;  %5327 = vmatprep.subr.bf16.mxu1 %v7113_v57  ;;  %v7194_v56 = vld [vmem:[%s8747_s6 + $0xb64] ss:$16 sps:$4 sm:$0xff]   ;;  %v7197_v57 = vld [vmem:[%s8747_s6 + $0xb6c] ss:$16 sps:$4 sm:$0xff]  }
 0x290   : > { %4904 = vmatpush1.bf16.msra.mxu0 %v7108_v59  ;;  %5328 = vmatpush1.bf16.msra.mxu1 %v7111_v61  ;;  %v7192_v59 = vld [vmem:[%s8747_s6 + $0xb60] ss:$16 sps:$4 sm:$0xff]   ;;  %v7195_v61 = vld [vmem:[%s8747_s6 + $0xb68] ss:$16 sps:$4 sm:$0xff]  }
 0x291   : > { %4905 = vmatprep.subr.bf16.mxu0 %v7116_v62  ;;  %5329 = vmatprep.subr.bf16.mxu1 %v7119_v63  ;;  %v7200_v62 = vld [vmem:[%s8747_s6 + $0xb84] ss:$16 sps:$4 sm:$0xff]   ;;  %v7203_v63 = vld [vmem:[%s8747_s6 + $0xb8c] ss:$16 sps:$4 sm:$0xff]  }
 0x294   : > { %4906 = vmatpush1.bf16.msra.mxu0 %v7114_v58  ;;  %5330 = vmatpush1.bf16.msra.mxu1 %v7117_v60  ;;  %v7198_v58 = vld [vmem:[%s8747_s6 + $0xb80] ss:$16 sps:$4 sm:$0xff]   ;;  %v7201_v60 = vld [vmem:[%s8747_s6 + $0xb88] ss:$16 sps:$4 sm:$0xff]  }
 0x295   : > { %4907 = vmatprep.subr.bf16.mxu0 %v7122_v0  ;;  %5331 = vmatprep.subr.bf16.mxu1 %v7125_v1  ;;  %v7206_v0 = vld [vmem:[%s8747_s6 + $0xba4] ss:$16 sps:$4 sm:$0xff]   ;;  %v7209_v1 = vld [vmem:[%s8747_s6 + $0xbac] ss:$16 sps:$4 sm:$0xff]  }
 0x298   : > { %4908 = vmatpush1.bf16.msra.mxu0 %v7120_v3  ;;  %5332 = vmatpush1.bf16.msra.mxu1 %v7123_v5  ;;  %v7204_v3 = vld [vmem:[%s8747_s6 + $0xba0] ss:$16 sps:$4 sm:$0xff]   ;;  %v7207_v5 = vld [vmem:[%s8747_s6 + $0xba8] ss:$16 sps:$4 sm:$0xff]  }
 0x299   : > { %4930 = vmatprep.subr.bf16.mxu0 %v7128_v6  ;;  %5354 = vmatprep.subr.bf16.mxu1 %v7131_v7  ;;  %v7212_v6 = vld [vmem:[%s8747_s6 + $0xbc4] ss:$16 sps:$4 sm:$0xff]   ;;  %v7215_v7 = vld [vmem:[%s8747_s6 + $0xbcc] ss:$16 sps:$4 sm:$0xff]  }
 0x29b   : > { %4910 = vmatmul.mubr.bf16.vlgmr.msra.gmra.mrb[0].mxu0 %v5884_v4  ;;  %5334 = vmatmul.mubr.bf16.vlgmr.msra.gmra.mrb[0].mxu1 %v5884_v4  ;;  %v7218_v4 = vld [vmem:[%s8747_s6 + $0xbe4] ss:$16 sps:$4 sm:$0xff]  }
 0x29c   : > { %4931 = vmatpush1.bf16.msra.mxu0 %v7126_v9  ;;  %5355 = vmatpush1.bf16.msra.mxu1 %v7129_v11  ;;  %v7221_v9 = vld [vmem:[%s8747_s6 + $0xbec] ss:$16 sps:$4 sm:$0xff]   ;;  %v7216_v11 = vld [vmem:[%s8747_s6 + $0xbe0] ss:$16 sps:$4 sm:$0xff]  }
 0x29d   : > { %4932 = vmatprep.subr.bf16.mxu0 %v7134_v13  ;;  %5356 = vmatprep.subr.bf16.mxu1 %v7137_v14  ;;  %v7219_v13 = vld [vmem:[%s8747_s6 + $0xbe8] ss:$16 sps:$4 sm:$0xff]   ;;  %v7224_v14 = vld [vmem:[%s8747_s6 + $0xc04] ss:$16 sps:$4 sm:$0xff]  }
 0x29e   : > { %4919 = vmatprep.mubr.bf16.mxu0 %v5901_v17  ;;  %5343 = vmatprep.mubr.bf16.mxu1 %v5901_v17  ;;  %v1422_v17 = vld [vmem:[%s8745_s4 + $0xa8] sm:$0xff] }
 0x2a0   : > { %4933 = vmatpush1.bf16.msra.mxu0 %v7132_v15  ;;  %5357 = vmatpush1.bf16.msra.mxu1 %v7135_v16  ;;  %v7227_v15 = vld [vmem:[%s8747_s6 + $0xc0c] ss:$16 sps:$4 sm:$0xff]   ;;  %v5886_v16 = vcombine.low %v9135_v18, %v9138_v19  ;;  %v7228_v18 = vld [vmem:[%s8747_s6 + $0xc20] ss:$16 sps:$4 sm:$0xff]   ;;  %v7231_v19 = vld [vmem:[%s8747_s6 + $0xc28] ss:$16 sps:$4 sm:$0xff]  }
 0x2a1   : > { %4934 = vmatprep.subr.bf16.mxu0 %v7140_v10  ;;  %5358 = vmatprep.subr.bf16.mxu1 %v7143_v12  ;;  %v1430_v10 = vld [vmem:[%s8745_s4 + $0xe8] sm:$0xff]  ;;  %v7222_v12 = vld [vmem:[%s8747_s6 + $0xc00] ss:$16 sps:$4 sm:$0xff]  }
 0x2a3   : > { %4920 = vmatmul.mubr.bf16.gmra.mrb[4].mxu0 %v5900_v20  ;;  %5344 = vmatmul.mubr.bf16.gmra.mrb[4].mxu1 %v5900_v20  ;;  %v7225_v20 = vld [vmem:[%s8747_s6 + $0xc08] ss:$16 sps:$4 sm:$0xff]  }
 0x2a4   : > { %4935 = vmatpush1.bf16.msra.mxu0 %v7138_v21  ;;  %5359 = vmatpush1.bf16.msra.mxu1 %v7141_v22  ;;  %v7230_v21 = vld [vmem:[%s8747_s6 + $0xc24] ss:$16 sps:$4 sm:$0xff]   ;;  %v7233_v22 = vld [vmem:[%s8747_s6 + $0xc2c] ss:$16 sps:$4 sm:$0xff]  }
 0x2a5   : > { %4936 = vmatprep.subr.bf16.mxu0 %v7146_v23  ;;  %5360 = vmatprep.subr.bf16.mxu1 %v7149_v24  ;;  %v5903_v23 = vcombine.high %v1422_v17, %v1430_v10  ;;  %v7236_v24 = vld [vmem:[%s8747_s6 + $0xc44] ss:$16 sps:$4 sm:$0xff]  }
 0x2a6   : > { %4962 = vmatprep.mubr.bf16.mxu0 %v5887_v25  ;;  %5386 = vmatprep.mubr.bf16.mxu1 %v5887_v25  ;;  %v7239_v25 = vld [vmem:[%s8747_s6 + $0xc4c] ss:$16 sps:$4 sm:$0xff]  }
 0x2a8   : > { %4937 = vmatpush1.bf16.msra.mxu0 %v7144_v26  ;;  %5361 = vmatpush1.bf16.msra.mxu1 %v7147_v27  ;;  %v5902_v26 = vcombine.low %v1422_v17, %v1430_v10  ;;  %v9211_v27 = vld [vmem:[%s8745_s4 + $0x30] sm:$0xff]  ;;  %v7309_v17 = vld [vmem:[%s8747_s6 + $0xdc8] ss:$16 sps:$4 sm:$0xff]  }
 0x2a9   : > { %4938 = vmatprep.subr.bf16.mxu0 %v7152_v28  ;;  %5362 = vmatprep.subr.bf16.mxu1 %v7155_v29  ;;  %v9214_v28 = vld [vmem:[%s8745_s4 + $0x70] sm:$0xff] }
 0x2aa   : > { %v7234_v29 = vld [vmem:[%s8747_s6 + $0xc40] ss:$16 sps:$4 sm:$0xff]   ;;  %v7314_v10 = vld [vmem:[%s8747_s6 + $0xde4] ss:$16 sps:$4 sm:$0xff]  }
 0x2ac   : > { %4939 = vmatpush1.bf16.msra.mxu0 %v7150_v30  ;;  %5363 = vmatpush1.bf16.msra.mxu1 %v7153_v31  ;;  %v7237_v30 = vld [vmem:[%s8747_s6 + $0xc48] ss:$16 sps:$4 sm:$0xff]   ;;  %v7242_v31 = vld [vmem:[%s8747_s6 + $0xc64] ss:$16 sps:$4 sm:$0xff]  }
 0x2ad   : > { %4940 = vmatprep.subr.bf16.mxu0 %v7158_v32  ;;  %5364 = vmatprep.subr.bf16.mxu1 %v7161_v33  ;;  %v7245_v32 = vld [vmem:[%s8747_s6 + $0xc6c] ss:$16 sps:$4 sm:$0xff]   ;;  %v5889_v33 = vcombine.high %v9211_v27, %v9214_v28 }
 0x2b0   : > { %4941 = vmatpush1.bf16.msra.mxu0 %v7156_v34  ;;  %5365 = vmatpush1.bf16.msra.mxu1 %v7159_v35  ;;  %v7240_v34 = vld [vmem:[%s8747_s6 + $0xc60] ss:$16 sps:$4 sm:$0xff]   ;;  %v7243_v35 = vld [vmem:[%s8747_s6 + $0xc68] ss:$16 sps:$4 sm:$0xff]  }
 0x2b1   : > { %4942 = vmatprep.subr.bf16.mxu0 %v7164_v36  ;;  %5366 = vmatprep.subr.bf16.mxu1 %v7167_v37  ;;  %v7248_v36 = vld [vmem:[%s8747_s6 + $0xc84] ss:$16 sps:$4 sm:$0xff]   ;;  %v7251_v37 = vld [vmem:[%s8747_s6 + $0xc8c] ss:$16 sps:$4 sm:$0xff]  }
 0x2b4   : > { %4943 = vmatpush1.bf16.msra.mxu0 %v7162_v38  ;;  %5367 = vmatpush1.bf16.msra.mxu1 %v7165_v39  ;;  %v7246_v38 = vld [vmem:[%s8747_s6 + $0xc80] ss:$16 sps:$4 sm:$0xff]   ;;  %v7249_v39 = vld [vmem:[%s8747_s6 + $0xc88] ss:$16 sps:$4 sm:$0xff]  }
 0x2b5   : > { %4944 = vmatprep.subr.bf16.mxu0 %v7170_v40  ;;  %5368 = vmatprep.subr.bf16.mxu1 %v7173_v41  ;;  %v7254_v40 = vld [vmem:[%s8747_s6 + $0xca4] ss:$16 sps:$4 sm:$0xff]   ;;  %v7257_v41 = vld [vmem:[%s8747_s6 + $0xcac] ss:$16 sps:$4 sm:$0xff]  }
 0x2b8   : > { %4945 = vmatpush1.bf16.msra.mxu0 %v7168_v42  ;;  %5369 = vmatpush1.bf16.msra.mxu1 %v7171_v43  ;;  %v7252_v42 = vld [vmem:[%s8747_s6 + $0xca0] ss:$16 sps:$4 sm:$0xff]   ;;  %v7255_v43 = vld [vmem:[%s8747_s6 + $0xca8] ss:$16 sps:$4 sm:$0xff]  }
 0x2b9   : > { %4946 = vmatprep.subr.bf16.mxu0 %v7176_v44  ;;  %5370 = vmatprep.subr.bf16.mxu1 %v7179_v45  ;;  %v7260_v44 = vld [vmem:[%s8747_s6 + $0xcc4] ss:$16 sps:$4 sm:$0xff]   ;;  %v7263_v45 = vld [vmem:[%s8747_s6 + $0xccc] ss:$16 sps:$4 sm:$0xff]  }
 0x2bc   : > { %4947 = vmatpush1.bf16.msra.mxu0 %v7174_v46  ;;  %5371 = vmatpush1.bf16.msra.mxu1 %v7177_v47  ;;  %v7258_v46 = vld [vmem:[%s8747_s6 + $0xcc0] ss:$16 sps:$4 sm:$0xff]   ;;  %v7261_v47 = vld [vmem:[%s8747_s6 + $0xcc8] ss:$16 sps:$4 sm:$0xff]  }
 0x2bd   : > { %4948 = vmatprep.subr.bf16.mxu0 %v7182_v48  ;;  %5372 = vmatprep.subr.bf16.mxu1 %v7185_v49  ;;  %v7266_v48 = vld [vmem:[%s8747_s6 + $0xce4] ss:$16 sps:$4 sm:$0xff]   ;;  %v7269_v49 = vld [vmem:[%s8747_s6 + $0xcec] ss:$16 sps:$4 sm:$0xff]  }
 0x2c0   : > { %4949 = vmatpush1.bf16.msra.mxu0 %v7180_v50  ;;  %5373 = vmatpush1.bf16.msra.mxu1 %v7183_v51  ;;  %v7264_v50 = vld [vmem:[%s8747_s6 + $0xce0] ss:$16 sps:$4 sm:$0xff]   ;;  %v7267_v51 = vld [vmem:[%s8747_s6 + $0xce8] ss:$16 sps:$4 sm:$0xff]  }
 0x2c1   : > { %4950 = vmatprep.subr.bf16.mxu0 %v7188_v52  ;;  %5374 = vmatprep.subr.bf16.mxu1 %v7191_v53  ;;  %v7272_v52 = vld [vmem:[%s8747_s6 + $0xd04] ss:$16 sps:$4 sm:$0xff]   ;;  %v7275_v53 = vld [vmem:[%s8747_s6 + $0xd0c] ss:$16 sps:$4 sm:$0xff]  }
 0x2c4   : > { %4951 = vmatpush1.bf16.msra.mxu0 %v7186_v54  ;;  %5375 = vmatpush1.bf16.msra.mxu1 %v7189_v55  ;;  %v7270_v54 = vld [vmem:[%s8747_s6 + $0xd00] ss:$16 sps:$4 sm:$0xff]   ;;  %v7273_v55 = vld [vmem:[%s8747_s6 + $0xd08] ss:$16 sps:$4 sm:$0xff]  }
 0x2c5   : > { %4952 = vmatprep.subr.bf16.mxu0 %v7194_v56  ;;  %5376 = vmatprep.subr.bf16.mxu1 %v7197_v57  ;;  %v7278_v56 = vld [vmem:[%s8747_s6 + $0xd24] ss:$16 sps:$4 sm:$0xff]   ;;  %v7281_v57 = vld [vmem:[%s8747_s6 + $0xd2c] ss:$16 sps:$4 sm:$0xff]  }
 0x2c8   : > { %4953 = vmatpush1.bf16.msra.mxu0 %v7192_v59  ;;  %5377 = vmatpush1.bf16.msra.mxu1 %v7195_v61  ;;  %v7276_v59 = vld [vmem:[%s8747_s6 + $0xd20] ss:$16 sps:$4 sm:$0xff]   ;;  %v7279_v61 = vld [vmem:[%s8747_s6 + $0xd28] ss:$16 sps:$4 sm:$0xff]  }
 0x2c9   : > { %4954 = vmatprep.subr.bf16.mxu0 %v7200_v62  ;;  %5378 = vmatprep.subr.bf16.mxu1 %v7203_v63  ;;  %v7284_v62 = vld [vmem:[%s8747_s6 + $0xd44] ss:$16 sps:$4 sm:$0xff]   ;;  %v7287_v63 = vld [vmem:[%s8747_s6 + $0xd4c] ss:$16 sps:$4 sm:$0xff]  }
 0x2cc   : > { %4955 = vmatpush1.bf16.msra.mxu0 %v7198_v58  ;;  %5379 = vmatpush1.bf16.msra.mxu1 %v7201_v60  ;;  %v7282_v58 = vld [vmem:[%s8747_s6 + $0xd40] ss:$16 sps:$4 sm:$0xff]   ;;  %v7285_v60 = vld [vmem:[%s8747_s6 + $0xd48] ss:$16 sps:$4 sm:$0xff]  }
 0x2cd   : > { %4956 = vmatprep.subr.bf16.mxu0 %v7206_v0  ;;  %5380 = vmatprep.subr.bf16.mxu1 %v7209_v1  ;;  %v7290_v0 = vld [vmem:[%s8747_s6 + $0xd64] ss:$16 sps:$4 sm:$0xff]   ;;  %v7293_v1 = vld [vmem:[%s8747_s6 + $0xd6c] ss:$16 sps:$4 sm:$0xff]  }
 0x2d0   : > { %4957 = vmatpush1.bf16.msra.mxu0 %v7204_v3  ;;  %5381 = vmatpush1.bf16.msra.mxu1 %v7207_v5  ;;  %v7288_v3 = vld [vmem:[%s8747_s6 + $0xd60] ss:$16 sps:$4 sm:$0xff]   ;;  %v7291_v5 = vld [vmem:[%s8747_s6 + $0xd68] ss:$16 sps:$4 sm:$0xff]  }
 0x2d1   : > { %4958 = vmatprep.subr.bf16.mxu0 %v7212_v6  ;;  %5382 = vmatprep.subr.bf16.mxu1 %v7215_v7  ;;  %v7296_v6 = vld [vmem:[%s8747_s6 + $0xd84] ss:$16 sps:$4 sm:$0xff]   ;;  %v7299_v7 = vld [vmem:[%s8747_s6 + $0xd8c] ss:$16 sps:$4 sm:$0xff]  }
 0x2d4   : > { %4959 = vmatpush1.bf16.msra.mxu0 %v7210_v8  ;;  %5383 = vmatpush1.bf16.msra.mxu1 %v7213_v2  ;;  %v7294_v8 = vld [vmem:[%s8747_s6 + $0xd80] ss:$16 sps:$4 sm:$0xff]   ;;  %v7297_v2 = vld [vmem:[%s8747_s6 + $0xd88] ss:$16 sps:$4 sm:$0xff]  }
 0x2d5   : > { %4960 = vmatprep.subr.bf16.mxu0 %v7218_v4  ;;  %5384 = vmatprep.subr.bf16.mxu1 %v7221_v9  ;;  %v7302_v4 = vld [vmem:[%s8747_s6 + $0xda4] ss:$16 sps:$4 sm:$0xff]   ;;  %v7305_v9 = vld [vmem:[%s8747_s6 + $0xdac] ss:$16 sps:$4 sm:$0xff]  }
 0x2d8   : > { %4961 = vmatpush1.bf16.msra.mxu0 %v7216_v11  ;;  %5385 = vmatpush1.bf16.msra.mxu1 %v7219_v13  ;;  %v7300_v11 = vld [vmem:[%s8747_s6 + $0xda0] ss:$16 sps:$4 sm:$0xff]   ;;  %v7303_v13 = vld [vmem:[%s8747_s6 + $0xda8] ss:$16 sps:$4 sm:$0xff]  }
 0x2d9   : > { %4983 = vmatprep.subr.bf16.mxu0 %v7224_v14  ;;  %5407 = vmatprep.subr.bf16.mxu1 %v7227_v15  ;;  %v7308_v14 = vld [vmem:[%s8747_s6 + $0xdc4] ss:$16 sps:$4 sm:$0xff]   ;;  %v7311_v15 = vld [vmem:[%s8747_s6 + $0xdcc] ss:$16 sps:$4 sm:$0xff]  }
 0x2db   : > { %4963 = vmatmul.mubr.bf16.vlgmr.msra.gmra.mrb[0].mxu0 %v5886_v16  ;;  %5387 = vmatmul.mubr.bf16.vlgmr.msra.gmra.mrb[0].mxu1 %v5886_v16  ;;  %v7306_v16 = vld [vmem:[%s8747_s6 + $0xdc0] ss:$16 sps:$4 sm:$0xff]  }
 0x2dc   : > { %4984 = vmatpush1.bf16.msra.mxu0 %v7222_v12  ;;  %5408 = vmatpush1.bf16.msra.mxu1 %v7225_v20  ;;  %v7317_v12 = vld [vmem:[%s8747_s6 + $0xdec] ss:$16 sps:$4 sm:$0xff]   ;;  %v7312_v20 = vld [vmem:[%s8747_s6 + $0xde0] ss:$16 sps:$4 sm:$0xff]  }
 0x2dd   : > { %4985 = vmatprep.subr.bf16.mxu0 %v7230_v21  ;;  %5409 = vmatprep.subr.bf16.mxu1 %v7233_v22  ;;  %v7315_v21 = vld [vmem:[%s8747_s6 + $0xde8] ss:$16 sps:$4 sm:$0xff]   ;;  %v7320_v22 = vld [vmem:[%s8747_s6 + $0xe04] ss:$16 sps:$4 sm:$0xff]  }
 0x2de   : > { %4972 = vmatprep.mubr.bf16.mxu0 %v5903_v23  ;;  %5396 = vmatprep.mubr.bf16.mxu1 %v5903_v23  ;;  %v7323_v23 = vld [vmem:[%s8747_s6 + $0xe0c] ss:$16 sps:$4 sm:$0xff]  }
 0x2e0   : > { %4986 = vmatpush1.bf16.msra.mxu0 %v7228_v18  ;;  %5410 = vmatpush1.bf16.msra.mxu1 %v7231_v19  ;;  %v5888_v18 = vcombine.low %v9211_v27, %v9214_v28  ;;  %v1423_v19 = vld [vmem:[%s8745_s4 + $0xb0] sm:$0xff]  ;;  %v7327_v28 = vld [vmem:[%s8747_s6 + $0xe28] ss:$16 sps:$4 sm:$0xff]  }
 0x2e1   : > { %4987 = vmatprep.subr.bf16.mxu0 %v7236_v24  ;;  %5411 = vmatprep.subr.bf16.mxu1 %v7239_v25  ;;  %v1431_v24 = vld [vmem:[%s8745_s4 + $0xf0] sm:$0xff] }
 0x2e2   : > { %v7318_v25 = vld [vmem:[%s8747_s6 + $0xe00] ss:$16 sps:$4 sm:$0xff]  }
 0x2e3   : > { %4973 = vmatmul.mubr.bf16.gmra.mrb[4].mxu0 %v5902_v26  ;;  %5397 = vmatmul.mubr.bf16.gmra.mrb[4].mxu1 %v5902_v26  ;;  %v7321_v26 = vld [vmem:[%s8747_s6 + $0xe08] ss:$16 sps:$4 sm:$0xff]   ;;  %v7324_v27 = vld [vmem:[%s8747_s6 + $0xe20] ss:$16 sps:$4 sm:$0xff]  }
 0x2e4   : > { %4988 = vmatpush1.bf16.msra.mxu0 %v7234_v29  ;;  %5412 = vmatpush1.bf16.msra.mxu1 %v7237_v30  ;;  %v7326_v29 = vld [vmem:[%s8747_s6 + $0xe24] ss:$16 sps:$4 sm:$0xff]   ;;  %v7329_v30 = vld [vmem:[%s8747_s6 + $0xe2c] ss:$16 sps:$4 sm:$0xff]  }
 0x2e5   : > { %4989 = vmatprep.subr.bf16.mxu0 %v7242_v31  ;;  %5413 = vmatprep.subr.bf16.mxu1 %v7245_v32  ;;  %v5905_v31 = vcombine.high %v1423_v19, %v1431_v24  ;;  %v7332_v32 = vld [vmem:[%s8747_s6 + $0xe44] ss:$16 sps:$4 sm:$0xff]  }
 0x2e6   : > { %5015 = vmatprep.mubr.bf16.mxu0 %v5889_v33  ;;  %5439 = vmatprep.mubr.bf16.mxu1 %v5889_v33  ;;  %v7335_v33 = vld [vmem:[%s8747_s6 + $0xe4c] ss:$16 sps:$4 sm:$0xff]  }
 0x2e8   : > { %4990 = vmatpush1.bf16.msra.mxu0 %v7240_v34  ;;  %5414 = vmatpush1.bf16.msra.mxu1 %v7243_v35  ;;  %v5904_v34 = vcombine.low %v1423_v19, %v1431_v24  ;;  %v9287_v35 = vld [vmem:[%s8745_s4 + $0x38] sm:$0xff]  ;;  %v7410_v24 = vld [vmem:[%s8747_s6 + $0xfe4] ss:$16 sps:$4 sm:$0xff]  }
 0x2e9   : > { %4991 = vmatprep.subr.bf16.mxu0 %v7248_v36  ;;  %5415 = vmatprep.subr.bf16.mxu1 %v7251_v37  ;;  %v9290_v36 = vld [vmem:[%s8745_s4 + $0x78] sm:$0xff]  ;;  %v7330_v37 = vld [vmem:[%s8747_s6 + $0xe40] ss:$16 sps:$4 sm:$0xff]  }
 0x2ea   : > { %v7405_v19 = vld [vmem:[%s8747_s6 + $0xfc8] ss:$16 sps:$4 sm:$0xff]  }
 0x2ec   : > { %4992 = vmatpush1.bf16.msra.mxu0 %v7246_v38  ;;  %5416 = vmatpush1.bf16.msra.mxu1 %v7249_v39  ;;  %v7333_v38 = vld [vmem:[%s8747_s6 + $0xe48] ss:$16 sps:$4 sm:$0xff]   ;;  %v7338_v39 = vld [vmem:[%s8747_s6 + $0xe64] ss:$16 sps:$4 sm:$0xff]  }
 0x2ed   : > { %4993 = vmatprep.subr.bf16.mxu0 %v7254_v40  ;;  %5417 = vmatprep.subr.bf16.mxu1 %v7257_v41  ;;  %v7341_v40 = vld [vmem:[%s8747_s6 + $0xe6c] ss:$16 sps:$4 sm:$0xff]   ;;  %v5891_v41 = vcombine.high %v9287_v35, %v9290_v36 }
 0x2f0   : > { %4994 = vmatpush1.bf16.msra.mxu0 %v7252_v42  ;;  %5418 = vmatpush1.bf16.msra.mxu1 %v7255_v43  ;;  %v7336_v42 = vld [vmem:[%s8747_s6 + $0xe60] ss:$16 sps:$4 sm:$0xff]   ;;  %v7339_v43 = vld [vmem:[%s8747_s6 + $0xe68] ss:$16 sps:$4 sm:$0xff]  }
 0x2f1   : > { %4995 = vmatprep.subr.bf16.mxu0 %v7260_v44  ;;  %5419 = vmatprep.subr.bf16.mxu1 %v7263_v45  ;;  %v7344_v44 = vld [vmem:[%s8747_s6 + $0xe84] ss:$16 sps:$4 sm:$0xff]   ;;  %v7347_v45 = vld [vmem:[%s8747_s6 + $0xe8c] ss:$16 sps:$4 sm:$0xff]  }
 0x2f4   : > { %4996 = vmatpush1.bf16.msra.mxu0 %v7258_v46  ;;  %5420 = vmatpush1.bf16.msra.mxu1 %v7261_v47  ;;  %v7342_v46 = vld [vmem:[%s8747_s6 + $0xe80] ss:$16 sps:$4 sm:$0xff]   ;;  %v7345_v47 = vld [vmem:[%s8747_s6 + $0xe88] ss:$16 sps:$4 sm:$0xff]  }
 0x2f5   : > { %4997 = vmatprep.subr.bf16.mxu0 %v7266_v48  ;;  %5421 = vmatprep.subr.bf16.mxu1 %v7269_v49  ;;  %v7350_v48 = vld [vmem:[%s8747_s6 + $0xea4] ss:$16 sps:$4 sm:$0xff]   ;;  %v7353_v49 = vld [vmem:[%s8747_s6 + $0xeac] ss:$16 sps:$4 sm:$0xff]  }
 0x2f8   : > { %4998 = vmatpush1.bf16.msra.mxu0 %v7264_v50  ;;  %5422 = vmatpush1.bf16.msra.mxu1 %v7267_v51  ;;  %v7348_v50 = vld [vmem:[%s8747_s6 + $0xea0] ss:$16 sps:$4 sm:$0xff]   ;;  %v7351_v51 = vld [vmem:[%s8747_s6 + $0xea8] ss:$16 sps:$4 sm:$0xff]  }
 0x2f9   : > { %4999 = vmatprep.subr.bf16.mxu0 %v7272_v52  ;;  %5423 = vmatprep.subr.bf16.mxu1 %v7275_v53  ;;  %v7356_v52 = vld [vmem:[%s8747_s6 + $0xec4] ss:$16 sps:$4 sm:$0xff]   ;;  %v7359_v53 = vld [vmem:[%s8747_s6 + $0xecc] ss:$16 sps:$4 sm:$0xff]  }
 0x2fc   : > { %5000 = vmatpush1.bf16.msra.mxu0 %v7270_v54  ;;  %5424 = vmatpush1.bf16.msra.mxu1 %v7273_v55  ;;  %v7354_v54 = vld [vmem:[%s8747_s6 + $0xec0] ss:$16 sps:$4 sm:$0xff]   ;;  %v7357_v55 = vld [vmem:[%s8747_s6 + $0xec8] ss:$16 sps:$4 sm:$0xff]  }
 0x2fd   : > { %5001 = vmatprep.subr.bf16.mxu0 %v7278_v56  ;;  %5425 = vmatprep.subr.bf16.mxu1 %v7281_v57  ;;  %v7362_v56 = vld [vmem:[%s8747_s6 + $0xee4] ss:$16 sps:$4 sm:$0xff]   ;;  %v7365_v57 = vld [vmem:[%s8747_s6 + $0xeec] ss:$16 sps:$4 sm:$0xff]  }
 0x300   : > { %5002 = vmatpush1.bf16.msra.mxu0 %v7276_v59  ;;  %5426 = vmatpush1.bf16.msra.mxu1 %v7279_v61  ;;  %v7360_v59 = vld [vmem:[%s8747_s6 + $0xee0] ss:$16 sps:$4 sm:$0xff]   ;;  %v7363_v61 = vld [vmem:[%s8747_s6 + $0xee8] ss:$16 sps:$4 sm:$0xff]  }
 0x301   : > { %5003 = vmatprep.subr.bf16.mxu0 %v7284_v62  ;;  %5427 = vmatprep.subr.bf16.mxu1 %v7287_v63  ;;  %v7368_v62 = vld [vmem:[%s8747_s6 + $0xf04] ss:$16 sps:$4 sm:$0xff]   ;;  %v7371_v63 = vld [vmem:[%s8747_s6 + $0xf0c] ss:$16 sps:$4 sm:$0xff]  }
 0x304   : > { %5004 = vmatpush1.bf16.msra.mxu0 %v7282_v58  ;;  %5428 = vmatpush1.bf16.msra.mxu1 %v7285_v60  ;;  %v7366_v58 = vld [vmem:[%s8747_s6 + $0xf00] ss:$16 sps:$4 sm:$0xff]   ;;  %v7369_v60 = vld [vmem:[%s8747_s6 + $0xf08] ss:$16 sps:$4 sm:$0xff]  }
 0x305   : > { %5005 = vmatprep.subr.bf16.mxu0 %v7290_v0  ;;  %5429 = vmatprep.subr.bf16.mxu1 %v7293_v1  ;;  %v7374_v0 = vld [vmem:[%s8747_s6 + $0xf24] ss:$16 sps:$4 sm:$0xff]   ;;  %v7377_v1 = vld [vmem:[%s8747_s6 + $0xf2c] ss:$16 sps:$4 sm:$0xff]  }
 0x308   : > { %5006 = vmatpush1.bf16.msra.mxu0 %v7288_v3  ;;  %5430 = vmatpush1.bf16.msra.mxu1 %v7291_v5  ;;  %v7372_v3 = vld [vmem:[%s8747_s6 + $0xf20] ss:$16 sps:$4 sm:$0xff]   ;;  %v7375_v5 = vld [vmem:[%s8747_s6 + $0xf28] ss:$16 sps:$4 sm:$0xff]  }
 0x309   : > { %5007 = vmatprep.subr.bf16.mxu0 %v7296_v6  ;;  %5431 = vmatprep.subr.bf16.mxu1 %v7299_v7  ;;  %v7380_v6 = vld [vmem:[%s8747_s6 + $0xf44] ss:$16 sps:$4 sm:$0xff]   ;;  %v7383_v7 = vld [vmem:[%s8747_s6 + $0xf4c] ss:$16 sps:$4 sm:$0xff]  }
 0x30c   : > { %5008 = vmatpush1.bf16.msra.mxu0 %v7294_v8  ;;  %5432 = vmatpush1.bf16.msra.mxu1 %v7297_v2  ;;  %v7378_v8 = vld [vmem:[%s8747_s6 + $0xf40] ss:$16 sps:$4 sm:$0xff]   ;;  %v7381_v2 = vld [vmem:[%s8747_s6 + $0xf48] ss:$16 sps:$4 sm:$0xff]  }
 0x30d   : > { %5009 = vmatprep.subr.bf16.mxu0 %v7302_v4  ;;  %5433 = vmatprep.subr.bf16.mxu1 %v7305_v9  ;;  %v7386_v4 = vld [vmem:[%s8747_s6 + $0xf64] ss:$16 sps:$4 sm:$0xff]   ;;  %v7389_v9 = vld [vmem:[%s8747_s6 + $0xf6c] ss:$16 sps:$4 sm:$0xff]  }
 0x310   : > { %5010 = vmatpush1.bf16.msra.mxu0 %v7300_v11  ;;  %5434 = vmatpush1.bf16.msra.mxu1 %v7303_v13  ;;  %v7384_v11 = vld [vmem:[%s8747_s6 + $0xf60] ss:$16 sps:$4 sm:$0xff]   ;;  %v7387_v13 = vld [vmem:[%s8747_s6 + $0xf68] ss:$16 sps:$4 sm:$0xff]  }
 0x311   : > { %5011 = vmatprep.subr.bf16.mxu0 %v7308_v14  ;;  %5435 = vmatprep.subr.bf16.mxu1 %v7311_v15  ;;  %v7392_v14 = vld [vmem:[%s8747_s6 + $0xf84] ss:$16 sps:$4 sm:$0xff]   ;;  %v7395_v15 = vld [vmem:[%s8747_s6 + $0xf8c] ss:$16 sps:$4 sm:$0xff]  }
 0x314   : > { %5012 = vmatpush1.bf16.msra.mxu0 %v7306_v16  ;;  %5436 = vmatpush1.bf16.msra.mxu1 %v7309_v17  ;;  %v7390_v16 = vld [vmem:[%s8747_s6 + $0xf80] ss:$16 sps:$4 sm:$0xff]   ;;  %v7393_v17 = vld [vmem:[%s8747_s6 + $0xf88] ss:$16 sps:$4 sm:$0xff]  }
 0x315   : > { %5013 = vmatprep.subr.bf16.mxu0 %v7314_v10  ;;  %5437 = vmatprep.subr.bf16.mxu1 %v7317_v12  ;;  %v7398_v10 = vld [vmem:[%s8747_s6 + $0xfa4] ss:$16 sps:$4 sm:$0xff]   ;;  %v7401_v12 = vld [vmem:[%s8747_s6 + $0xfac] ss:$16 sps:$4 sm:$0xff]  }
 0x318   : > { %5014 = vmatpush1.bf16.msra.mxu0 %v7312_v20  ;;  %5438 = vmatpush1.bf16.msra.mxu1 %v7315_v21  ;;  %v7396_v20 = vld [vmem:[%s8747_s6 + $0xfa0] ss:$16 sps:$4 sm:$0xff]   ;;  %v7399_v21 = vld [vmem:[%s8747_s6 + $0xfa8] ss:$16 sps:$4 sm:$0xff]  }
 0x319   : > { %5036 = vmatprep.subr.bf16.mxu0 %v7320_v22  ;;  %5460 = vmatprep.subr.bf16.mxu1 %v7323_v23  ;;  %v7404_v22 = vld [vmem:[%s8747_s6 + $0xfc4] ss:$16 sps:$4 sm:$0xff]   ;;  %v7407_v23 = vld [vmem:[%s8747_s6 + $0xfcc] ss:$16 sps:$4 sm:$0xff]  }
 0x31b   : > { %5016 = vmatmul.mubr.bf16.vlgmr.msra.gmra.mrb[0].mxu0 %v5888_v18  ;;  %5440 = vmatmul.mubr.bf16.vlgmr.msra.gmra.mrb[0].mxu1 %v5888_v18  ;;  %v7402_v18 = vld [vmem:[%s8747_s6 + $0xfc0] ss:$16 sps:$4 sm:$0xff]  }
 0x31c   : > { %5037 = vmatpush1.bf16.msra.mxu0 %v7318_v25  ;;  %5461 = vmatpush1.bf16.msra.mxu1 %v7321_v26  ;;  %v7413_v25 = vld [vmem:[%s8747_s6 + $0xfec] ss:$16 sps:$4 sm:$0xff]   ;;  %v7408_v26 = vld [vmem:[%s8747_s6 + $0xfe0] ss:$16 sps:$4 sm:$0xff]  }
 0x31d   : > { %5038 = vmatprep.subr.bf16.mxu0 %v7326_v29  ;;  %5462 = vmatprep.subr.bf16.mxu1 %v7329_v30  ;;  %v7411_v29 = vld [vmem:[%s8747_s6 + $0xfe8] ss:$16 sps:$4 sm:$0xff]  }
 0x31e   : > { %5025 = vmatprep.mubr.bf16.mxu0 %v5905_v31  ;;  %5449 = vmatprep.mubr.bf16.mxu1 %v5905_v31  ;;  %v1424_v30 = vld [vmem:[%s8745_s4 + $0xb8] sm:$0xff] }
 0x31f   : > { %v1432_v31 = vld [vmem:[%s8745_s4 + $0xf8] sm:$0xff] }
 0x320   : > { %5039 = vmatpush1.bf16.msra.mxu0 %v7324_v27  ;;  %5463 = vmatpush1.bf16.msra.mxu1 %v7327_v28  ;;  %v5890_v27 = vcombine.low %v9287_v35, %v9290_v36  ;;  %v5907_v28 = vcombine.high %v1424_v30, %v1432_v31 }
 0x321   : > { %5040 = vmatprep.subr.bf16.mxu0 %v7332_v32  ;;  %5464 = vmatprep.subr.bf16.mxu1 %v7335_v33  ;;  %v5906_v32 = vcombine.low %v1424_v30, %v1432_v31  ;;  %v1385_v33 = vld [vmem:[#allocation2] sm:$0xff] }
 0x323   : > { %5026 = vmatmul.mubr.bf16.gmra.mrb[4].mxu0 %v5904_v34  ;;  %5450 = vmatmul.mubr.bf16.gmra.mrb[4].mxu1 %v5904_v34  ;;  %v1387_v34 = vld [vmem:[#allocation2 + $0x10] sm:$0xff] }
 0x324   : > { %5041 = vmatpush1.bf16.msra.mxu0 %v7330_v37  ;;  %5465 = vmatpush1.bf16.msra.mxu1 %v7333_v38  ;;  %v1386_v37 = vld [vmem:[#allocation2 + $0x8] sm:$0xff]  ;;  %v1388_v38 = vld [vmem:[#allocation2 + $0x18] sm:$0xff] }
 0x325   : > { %5042 = vmatprep.subr.bf16.mxu0 %v7338_v39  ;;  %5466 = vmatprep.subr.bf16.mxu1 %v7341_v40 }
 0x326   : > { %5068 = vmatprep.mubr.bf16.mxu0 %v5891_v41  ;;  %5492 = vmatprep.mubr.bf16.mxu1 %v5891_v41  ;;  %v1389_v41 = vld [vmem:[#allocation2 + $0x20] sm:$0xff] }
 0x328   : > { %5043 = vmatpush1.bf16.msra.mxu0 %v7336_v42  ;;  %5467 = vmatpush1.bf16.msra.mxu1 %v7339_v43  ;;  %v1391_v42 = vld [vmem:[#allocation2 + $0x30] sm:$0xff] }
 0x329   : > { %5044 = vmatprep.subr.bf16.mxu0 %v7344_v44  ;;  %5468 = vmatprep.subr.bf16.mxu1 %v7347_v45  ;;  %v1390_v45 = vld [vmem:[#allocation2 + $0x28] sm:$0xff] }
 0x32c   : > { %5045 = vmatpush1.bf16.msra.mxu0 %v7342_v46  ;;  %5469 = vmatpush1.bf16.msra.mxu1 %v7345_v47  ;;  %v1392_v46 = vld [vmem:[#allocation2 + $0x38] sm:$0xff] }
 0x32d   : > { %5046 = vmatprep.subr.bf16.mxu0 %v7350_v48  ;;  %5470 = vmatprep.subr.bf16.mxu1 %v7353_v49 }
 0x330   : > { %5047 = vmatpush1.bf16.msra.mxu0 %v7348_v50  ;;  %5471 = vmatpush1.bf16.msra.mxu1 %v7351_v51 }
 0x331   : > { %5048 = vmatprep.subr.bf16.mxu0 %v7356_v52  ;;  %5472 = vmatprep.subr.bf16.mxu1 %v7359_v53 }
 0x334   : > { %5049 = vmatpush1.bf16.msra.mxu0 %v7354_v54  ;;  %5473 = vmatpush1.bf16.msra.mxu1 %v7357_v55 }
 0x335   : > { %5050 = vmatprep.subr.bf16.mxu0 %v7362_v56  ;;  %5474 = vmatprep.subr.bf16.mxu1 %v7365_v57  ;;  %v1393_v57 = vld [vmem:[#allocation2 + $0x40] sm:$0xff] }
 0x338   : > { %5051 = vmatpush1.bf16.msra.mxu0 %v7360_v59  ;;  %5475 = vmatpush1.bf16.msra.mxu1 %v7363_v61  ;;  %v1395_v59 = vld [vmem:[#allocation2 + $0x50] sm:$0xff]  ;;  %v1394_v61 = vld [vmem:[#allocation2 + $0x48] sm:$0xff] }
 0x339   : > { %5052 = vmatprep.subr.bf16.mxu0 %v7368_v62  ;;  %5476 = vmatprep.subr.bf16.mxu1 %v7371_v63  ;;  %v1396_v62 = vld [vmem:[#allocation2 + $0x58] sm:$0xff] }
 0x33c   : > { %5053 = vmatpush1.bf16.msra.mxu0 %v7366_v58  ;;  %5477 = vmatpush1.bf16.msra.mxu1 %v7369_v60  ;;  %v1397_v60 = vld [vmem:[#allocation2 + $0x60] sm:$0xff] }
 0x33d   : > { %5054 = vmatprep.subr.bf16.mxu0 %v7374_v0  ;;  %5478 = vmatprep.subr.bf16.mxu1 %v7377_v1  ;;  %v1399_v0 = vld [vmem:[#allocation2 + $0x70] sm:$0xff] }
 0x340   : > { %5055 = vmatpush1.bf16.msra.mxu0 %v7372_v3  ;;  %5479 = vmatpush1.bf16.msra.mxu1 %v7375_v5 }
 0x341   : > { %5056 = vmatprep.subr.bf16.mxu0 %v7380_v6  ;;  %5480 = vmatprep.subr.bf16.mxu1 %v7383_v7  ;;  %v1398_v7 = vld [vmem:[#allocation2 + $0x68] sm:$0xff] }
 0x344   : > { %5057 = vmatpush1.bf16.msra.mxu0 %v7378_v8  ;;  %5481 = vmatpush1.bf16.msra.mxu1 %v7381_v2  ;;  %v1400_v8 = vld [vmem:[#allocation2 + $0x78] sm:$0xff] }
 0x345   : > { %5058 = vmatprep.subr.bf16.mxu0 %v7386_v4  ;;  %5482 = vmatprep.subr.bf16.mxu1 %v7389_v9 }
 0x348   : > { %5059 = vmatpush1.bf16.msra.mxu0 %v7384_v11  ;;  %5483 = vmatpush1.bf16.msra.mxu1 %v7387_v13 }
 0x349   : > { %5060 = vmatprep.subr.bf16.mxu0 %v7392_v14  ;;  %5484 = vmatprep.subr.bf16.mxu1 %v7395_v15 }
 0x34c   : > { %5061 = vmatpush1.bf16.msra.mxu0 %v7390_v16  ;;  %5485 = vmatpush1.bf16.msra.mxu1 %v7393_v17 }
 0x34d   : > { %5062 = vmatprep.subr.bf16.mxu0 %v7398_v10  ;;  %5486 = vmatprep.subr.bf16.mxu1 %v7401_v12  ;;  %v5567_v12 = vlaneseq (!%p6420_p5) }
 0x350   : > { %5063 = vmatpush1.bf16.msra.mxu0 %v7396_v20  ;;  %5487 = vmatpush1.bf16.msra.mxu1 %v7399_v21  ;;  %v5568_v20 = vshrl.u32 (!%p6420_p5), %v5567_v12, 7  ;;  %v5565_v21 = vld [vmem:[%s1361_s29] sm:$0xf] (!%p6420_p5) }
 0x351   : > { %5064 = vmatprep.subr.bf16.mxu0 %v7404_v22  ;;  %5488 = vmatprep.subr.bf16.mxu1 %v7407_v23 }
 0x354   : > { %5065 = vmatpush1.bf16.msra.mxu0 %v7402_v18  ;;  %5489 = vmatpush1.bf16.msra.mxu1 %v7405_v19  ;;  %v5569_v18 = vsub.s32 (!%p6420_p5), 0, %v5568_v20  ;;  %v5573_v19 = vsub.s32 (!%p6420_p5), 1, %v5568_v20 }
 0x355   : > { %5066 = vmatprep.subr.bf16.mxu0 %v7410_v24  ;;  %5490 = vmatprep.subr.bf16.mxu1 %v7413_v25  ;;  %v5577_v24 = vsub.s32 (!%p6420_p5), 2, %v5568_v20  ;;  %v5581_v25 = vsub.s32 (!%p6420_p5), 3, %v5568_v20 }
 0x356   : > { %v9358_v31 = vrot.slane (!%p6420_p5), %v5565_v21, %v5569_v18 }
 0x358   : > { %5067 = vmatpush1.bf16.msra.mxu0 %v7408_v26  ;;  %5491 = vmatpush1.bf16.msra.mxu1 %v7411_v29 }
 0x35b   : > { %5069 = vmatmul.mubr.bf16.vlgmr.msra.gmra.mrb[0].mxu0 %v5890_v27  ;;  %5493 = vmatmul.mubr.bf16.vlgmr.msra.gmra.mrb[0].mxu1 %v5890_v27  ;;  %v9360_v27 = vrot.slane (!%p6420_p5), %v5565_v21, %v5573_v19 }
 0x35c   : > { %5078 = vmatprep.mubr.bf16.mxu0 %v5907_v28  ;;  %5502 = vmatprep.mubr.bf16.mxu1 %v5907_v28  ;;  %v9362_v28 = vrot.slane (!%p6420_p5), %v5565_v21, %v5577_v24 }
 0x363   : > { %5079 = vmatmul.mubr.bf16.gmra.mrb[4].mxu0 %v5906_v32  ;;  %5503 = vmatmul.mubr.bf16.gmra.mrb[4].mxu1 %v5906_v32  ;;  %v9364_v32 = vrot.slane (!%p6420_p5), %v5565_v21, %v5581_v25 }
 0x42e   : > { %v5070_v39 = vpop.f32.mrb[0].mxu0  ;;  %v5494_v40 = vpop.f32.mrb[0].mxu1 }
 0x42f   : > { %v5513_v43 = vadd.f32 %v5070_v39, %v1385_v33  ;;  %v5515_v35 = vadd.f32 %v5494_v40, %v1387_v34  ;;  %v5072_v36 = vpop.f32.mrb[1].mxu0  ;;  %v5496_v44 = vpop.f32.mrb[1].mxu1 }
 0x430   : > { %v5514_v47 = vadd.f32 %v5072_v36, %v1386_v37  ;;  %v5516_v48 = vadd.f32 %v5496_v44, %v1388_v38  ;;  %v5074_v49 = vpop.f32.mrb[2].mxu0  ;;  %v5498_v50 = vpop.f32.mrb[2].mxu1 }
 0x431   : > { %5529 = vst [vmem:[#allocation2] sm:$0xff] %v5513_v43  ;;  %5531 = vst [vmem:[#allocation2 + $0x10] sm:$0xff] %v5515_v35  ;;  %v5517_v51 = vadd.f32 %v5074_v49, %v1389_v41  ;;  %v5519_v52 = vadd.f32 %v5498_v50, %v1391_v42  ;;  %v5076_v53 = vpop.f32.mrb[3].mxu0  ;;  %v5500_v54 = vpop.f32.mrb[3].mxu1 }
 0x432   : > { %5530 = vst [vmem:[#allocation2 + $0x8] sm:$0xff] %v5514_v47  ;;  %5532 = vst [vmem:[#allocation2 + $0x18] sm:$0xff] %v5516_v48  ;;  %v5518_v55 = vadd.f32 %v5076_v53, %v1390_v45  ;;  %v5520_v56 = vadd.f32 %v5500_v54, %v1392_v46 }
 0x433   : > { %5533 = vst [vmem:[#allocation2 + $0x20] sm:$0xff] %v5517_v51  ;;  %5535 = vst [vmem:[#allocation2 + $0x30] sm:$0xff] %v5519_v52 }
 0x434   : > { %5534 = vst [vmem:[#allocation2 + $0x28] sm:$0xff] %v5518_v55  ;;  %5536 = vst [vmem:[#allocation2 + $0x38] sm:$0xff] %v5520_v56 }
 0x436   : > { %v5080_v63 = vpop.f32.mrb[4].mxu0  ;;  %v5504_v58 = vpop.f32.mrb[4].mxu1  ;;  %5548 = sbr.rel (%p6420_p5) target bundleno = 1105 (0x451), region = 86 }
 0x437   : > { %v5521_v1 = vadd.f32 %v5080_v63, %v1393_v57  ;;  %v5523_v3 = vadd.f32 %v5504_v58, %v1395_v59  ;;  %v5082_v5 = vpop.f32.mrb[5].mxu0  ;;  %v5506_v6 = vpop.f32.mrb[5].mxu1 }
 0x438   : > { %v5522_v2 = vadd.f32 %v5082_v5, %v1394_v61  ;;  %v5524_v4 = vadd.f32 %v5506_v6, %v1396_v62  ;;  %v5084_v9 = vpop.f32.mrb[6].mxu0  ;;  %v5508_v11 = vpop.f32.mrb[6].mxu1  ;;  %v5549_v22 = vld [vmem:[#allocation2] sm:$0xff] (!%p6420_p5)  ;;  %v5551_v26 = vld [vmem:[#allocation2 + $0x10] sm:$0xff] (!%p6420_p5) }
 0x439   : > { %5537 = vst [vmem:[#allocation2 + $0x40] sm:$0xff] %v5521_v1  ;;  %5539 = vst [vmem:[#allocation2 + $0x50] sm:$0xff] %v5523_v3  ;;  %v5525_v13 = vadd.f32 %v5084_v9, %v1397_v60  ;;  %v5527_v14 = vadd.f32 %v5508_v11, %v1399_v0  ;;  %v5086_v15 = vpop.f32.mrb[7].mxu0  ;;  %v5510_v16 = vpop.f32.mrb[7].mxu1  ;;  %v5550_v23 = vld [vmem:[#allocation2 + $0x8] sm:$0xff] (!%p6420_p5)  ;;  %v5552_v29 = vld [vmem:[#allocation2 + $0x18] sm:$0xff] (!%p6420_p5)  ;;  %v5587_v38 = vadd.f32 (!%p6420_p5), %v9358_v31, %v5549_v22 }
 0x43a   : > { %5538 = vst [vmem:[#allocation2 + $0x48] sm:$0xff] %v5522_v2  ;;  %5540 = vst [vmem:[#allocation2 + $0x58] sm:$0xff] %v5524_v4  ;;  %v5526_v17 = vadd.f32 %v5086_v15, %v1398_v7  ;;  %v5528_v10 = vadd.f32 %v5510_v16, %v1400_v8  ;;  %v5553_v30 = vld [vmem:[#allocation2 + $0x20] sm:$0xff] (!%p6420_p5)  ;;  %v5555_v34 = vld [vmem:[#allocation2 + $0x30] sm:$0xff] (!%p6420_p5)  ;;  %v5588_v39 = vadd.f32 (!%p6420_p5), %v9360_v27, %v5550_v23 }
 0x43b   : > { %5541 = vst [vmem:[#allocation2 + $0x60] sm:$0xff] %v5525_v13  ;;  %5543 = vst [vmem:[#allocation2 + $0x70] sm:$0xff] %v5527_v14  ;;  %v5554_v33 = vld [vmem:[#allocation2 + $0x28] sm:$0xff] (!%p6420_p5)  ;;  %v5556_v37 = vld [vmem:[#allocation2 + $0x38] sm:$0xff] (!%p6420_p5)  ;;  %v5589_v40 = vadd.f32 (!%p6420_p5), %v9362_v28, %v5551_v26  ;;  %v5590_v41 = vadd.f32 (!%p6420_p5), %v9364_v32, %v5552_v29  ;;  %v5591_v42 = vadd.f32 (!%p6420_p5), %v9358_v31, %v5553_v30  ;;  %vm5603_vm0 = vcmp.gt.f32.partialorder (!%p6420_p5), %v5587_v38, 0.0 }
 0x43c   : > { %5542 = vst [vmem:[#allocation2 + $0x68] sm:$0xff] %v5526_v17  ;;  %5544 = vst [vmem:[#allocation2 + $0x78] sm:$0xff] %v5528_v10  ;;  %v5592_v43 = vadd.f32 (!%p6420_p5), %v9360_v27, %v5554_v33  ;;  %v5593_v35 = vadd.f32 (!%p6420_p5), %v9362_v28, %v5555_v34  ;;  %v5594_v36 = vadd.f32 (!%p6420_p5), %v9364_v32, %v5556_v37  ;;  %vm5604_vm1 = vcmp.gt.f32.partialorder (!%p6420_p5), %v5588_v39, 0.0 }
 0x43d   : > { %v5619_v44 = vmul.f32 0.2, %v5587_v38  ;;  %v5620_v45 = vmul.f32 0.2, %v5588_v39  ;;  %vm5605_vm2 = vcmp.gt.f32.partialorder %v5589_v40, 0.0  ;;  %vm5606_vm3 = vcmp.gt.f32.partialorder %v5590_v41, 0.0 }
 0x43e   : > { %v5621_v46 = vmul.f32 0.2, %v5589_v40  ;;  %v5622_v47 = vmul.f32 0.2, %v5590_v41  ;;  %vm5607_vm4 = vcmp.gt.f32.partialorder %v5591_v42, 0.0  ;;  %vm5608_vm5 = vcmp.gt.f32.partialorder %v5592_v43, 0.0 }
 0x43f   : > { %v5635_v48 = vsel %vm5603_vm0, %v5587_v38, %v5619_v44  ;;  %v5636_v49 = vsel %vm5604_vm1, %v5588_v39, %v5620_v45  ;;  %v5623_v54 = vmul.f32 0.2, %v5591_v42  ;;  %v5624_v61 = vmul.f32 0.2, %v5592_v43 }
 0x440   : > { %v5557_v50 = vld [vmem:[#allocation2 + $0x40] sm:$0xff]  ;;  %v6436_v51 = vpack.c.bf16 %v5636_v49, %v5635_v48  ;;  %v5637_v52 = vsel %vm5605_vm2, %v5589_v40, %v5621_v46  ;;  %v5638_v53 = vsel %vm5606_vm3, %v5590_v41, %v5622_v47  ;;  %v5559_v56 = vld [vmem:[#allocation2 + $0x50] sm:$0xff]  ;;  %vm5609_vm6 = vcmp.gt.f32.partialorder %v5593_v35, 0.0 }
 0x441   : > { %v5558_v55 = vld [vmem:[#allocation2 + $0x48] sm:$0xff]  ;;  %v5560_v57 = vld [vmem:[#allocation2 + $0x58] sm:$0xff]  ;;  %v6437_v59 = vpack.c.bf16 %v5638_v53, %v5637_v52  ;;  %vm5610_vm7 = vcmp.gt.f32.partialorder %v5594_v36, 0.0  ;;  %v5639_v62 = vsel %vm5607_vm4, %v5591_v42, %v5623_v54  ;;  %v5625_v63 = vmul.f32 0.2, %v5593_v35 }
 0x442   : > { %5699 = vst [vmem:[%s8749_s1] sm:$0xff] %v6436_v51  ;;  %v5626_v58 = vmul.f32 0.2, %v5594_v36  ;;  %v5595_v60 = vadd.f32 %v9358_v31, %v5557_v50  ;;  %v5640_v0 = vsel %vm5608_vm5, %v5592_v43, %v5624_v61  ;;  %v5596_v1 = vadd.f32 %v9360_v27, %v5558_v55  ;;  %v5561_v2 = vld [vmem:[#allocation2 + $0x60] sm:$0xff]  ;;  %v5563_v14 = vld [vmem:[#allocation2 + $0x70] sm:$0xff] }
 0x443   : > { %5700 = vst [vmem:[%s8749_s1 + $0x8] sm:$0xff] %v6437_v59  ;;  %v5597_v3 = vadd.f32 %v9362_v28, %v5559_v56  ;;  %v5598_v5 = vadd.f32 %v9364_v32, %v5560_v57  ;;  %v6438_v6 = vpack.c.bf16 %v5640_v0, %v5639_v62  ;;  %v5641_v7 = vsel %vm5609_vm6, %v5593_v35, %v5625_v63  ;;  %v5562_v4 = vld [vmem:[#allocation2 + $0x68] sm:$0xff]  ;;  %v5564_v21 = vld [vmem:[#allocation2 + $0x78] sm:$0xff] }
 0x444   : > { %v5642_v8 = vsel %vm5610_vm7, %v5594_v36, %v5626_v58  ;;  %vm5611_vm8 = vcmp.gt.f32.partialorder %v5595_v60, 0.0  ;;  %vm5612_vm9 = vcmp.gt.f32.partialorder %v5596_v1, 0.0  ;;  %v5627_v11 = vmul.f32 0.2, %v5595_v60 }
 0x445   : > { %v6439_v9 = vpack.c.bf16 %v5642_v8, %v5641_v7  ;;  %v5628_v13 = vmul.f32 0.2, %v5596_v1  ;;  %5701 = vst [vmem:[%s8749_s1 + $0x10] sm:$0xff] %v6438_v6  ;;  %vm5613_vm10 = vcmp.gt.f32.partialorder %v5597_v3, 0.0  ;;  %vm5614_vm11 = vcmp.gt.f32.partialorder %v5598_v5, 0.0 }
 0x446   : > { %v5629_v15 = vmul.f32 0.2, %v5597_v3  ;;  %v5630_v16 = vmul.f32 0.2, %v5598_v5  ;;  %v5643_v17 = vsel %vm5611_vm8, %v5595_v60, %v5627_v11  ;;  %v5599_v12 = vadd.f32 %v9358_v31, %v5561_v2 }
 0x447   : > { %5702 = vst [vmem:[%s8749_s1 + $0x18] sm:$0xff] %v6439_v9  ;;  %v5644_v10 = vsel %vm5612_vm9, %v5596_v1, %v5628_v13  ;;  %v5600_v20 = vadd.f32 %v9360_v27, %v5562_v4  ;;  %v5601_v19 = vadd.f32 %v9362_v28, %v5563_v14  ;;  %v5602_v29 = vadd.f32 %v9364_v32, %v5564_v21 }
 0x448   : > { %v6440_v22 = vpack.c.bf16 %v5644_v10, %v5643_v17  ;;  %v5645_v23 = vsel %vm5613_vm10, %v5597_v3, %v5629_v15  ;;  %v5646_v18 = vsel %vm5614_vm11, %v5598_v5, %v5630_v16  ;;  %vm5615_vm12 = vcmp.gt.f32.partialorder %v5599_v12, 0.0 }
 0x449   : > { %v6441_v24 = vpack.c.bf16 %v5646_v18, %v5645_v23  ;;  %vm5616_vm13 = vcmp.gt.f32.partialorder %v5600_v20, 0.0  ;;  %v5631_v25 = vmul.f32 0.2, %v5599_v12  ;;  %v5632_v26 = vmul.f32 0.2, %v5600_v20 }
 0x44a   : > { %5703 = vst [vmem:[%s8749_s1 + $0x20] sm:$0xff] %v6440_v22  ;;  %vm5617_vm14 = vcmp.gt.f32.partialorder %v5601_v19, 0.0  ;;  %v5633_v30 = vmul.f32 0.2, %v5601_v19  ;;  %vm5618_vm15 = vcmp.gt.f32.partialorder %v5602_v29, 0.0 }
 0x44b   : > { %5704 = vst [vmem:[%s8749_s1 + $0x28] sm:$0xff] %v6441_v24  ;;  %v5647_v31 = vsel %vm5615_vm12, %v5599_v12, %v5631_v25  ;;  %v5648_v27 = vsel %vm5616_vm13, %v5600_v20, %v5632_v26  ;;  %v5634_v33 = vmul.f32 0.2, %v5602_v29 }
 0x44c   : > { %v5649_v34 = vsel %vm5617_vm14, %v5601_v19, %v5633_v30  ;;  %v6442_v37 = vpack.c.bf16 %v5648_v27, %v5647_v31 }
 0x44d   : > { %v5650_v28 = vsel %vm5618_vm15, %v5602_v29, %v5634_v33 }
 0x44e   : > { %5705 = vst [vmem:[%s8749_s1 + $0x30] sm:$0xff] %v6442_v37  ;;  %v6443_v38 = vpack.c.bf16 %v5650_v28, %v5649_v34 }
 0x450   : > { %5706 = vst [vmem:[%s8749_s1 + $0x38] sm:$0xff] %v6443_v38 }
 0x451 PF: > { %5713 = sbr.rel (!%p7617_p12) target bundleno = 1113 (0x459), region = 90  ;;  %s6444_s16 = sshll.u32 (%p7617_p12), %s7488_s19, 4  ;;  %v5732_v32 = vld [vmem:[%s8749_s1] sm:$0xff] (%p7617_p12)  ;;  %v5734_v39 = vld [vmem:[%s8749_s1 + $0x8] sm:$0xff] (%p7617_p12)  ;;  %v5736_v40 = vld [vmem:[%s8749_s1 + $0x10] sm:$0xff] (%p7617_p12) }
 0x452   : > { %s5719_s5 = scalar_lea.vmem (%p7617_p12), %s9441_s3, %s6444_s16  ;;  %v5738_v41 = vld [vmem:[%s8749_s1 + $0x18] sm:$0xff] (%p7617_p12)  ;;  %v5740_v42 = vld [vmem:[%s8749_s1 + $0x20] sm:$0xff] (%p7617_p12)  ;;  %v5742_v43 = vld [vmem:[%s8749_s1 + $0x28] sm:$0xff] (%p7617_p12) }
 0x453   : > { %5733 = vst [vmem:[%s5719_s5] sm:$0xff] (%p7617_p12), %v5732_v32  ;;  %5735 = vst [vmem:[%s5719_s5 + $0x8] sm:$0xff] (%p7617_p12), %v5734_v39 }
 0x454   : > { %5737 = vst [vmem:[%s5719_s5 + $0x20] sm:$0xff] (%p7617_p12), %v5736_v40  ;;  %5739 = vst [vmem:[%s5719_s5 + $0x28] sm:$0xff] (%p7617_p12), %v5738_v41 }
 0x455   : > { %5741 = vst [vmem:[%s5719_s5 + $0x40] sm:$0xff] (%p7617_p12), %v5740_v42  ;;  %5743 = vst [vmem:[%s5719_s5 + $0x48] sm:$0xff] (%p7617_p12), %v5742_v43  ;;  %v5744_v35 = vld [vmem:[%s8749_s1 + $0x30] sm:$0xff] (%p7617_p12) }
 0x456   : > { %5745 = vst [vmem:[%s5719_s5 + $0x60] sm:$0xff] (%p7617_p12), %v5744_v35 }
 0x457   : > { %v5746_v36 = vld [vmem:[%s8749_s1 + $0x38] sm:$0xff] (%p7617_p12) }
 0x458   : > { %5747 = vst [vmem:[%s5719_s5 + $0x68] sm:$0xff] %v5746_v36 }
 0x459 PF: > { %s13_s22 = sadd.s32 1, %s7500_s22   ;;  %s9451_s10 = sld [smem:[#allocation6_spill]] }
 0x45a   : > { %p10_p6 = scmp.ge.s32.totalorder %s13_s22, 10   ;;  %s9452_s12 = smov %s7464_s13 }
 0x45b   : > { %s9453_s13 = smov %s7615_s9  ;;  %s9454_s14 = smov %s7472_s15 }
 0x45c   : > { %s9455_s15 = smov %s7612_s8  ;;  %s9456_s16 = smov %s7480_s17 }
 0x45d   : > { %s9457_s17 = smov %s7598_s30  ;;  %s9458_s18 = smov %s7492_s20 }
 0x45e   : > { %s9459_s19 = smov %s7496_s21  ;;  %s9460_s20 = smov %s9463_s24 }
 0x45f   : > { %s9461_s21 = smov %s9451_s10  ;;  %12 = sbr.rel (!%p10_p6) target bundleno = 9 (0x9), region = 155 }

// kernel: discriminator_forward.7
= control target key start
LH: loop header
LB: loop body
LE: loop exit
PB: predicated region body
PF: predicated region fallthrough
CT: control target
= control target key end

     0   :  { %s4340_s12 = smov 0   ;;  %s4342_s13 = smov 0   ;;  %s4776_s0 = inlined_call_operand.vmem [shape: bf16[16,16384], index: 0, kind: input, shape index: {}]   ;;  %s4777_s1 = inlined_call_operand.vmem [shape: bf16[16384,128], index: 1, kind: input, shape index: {}]   ;;  %s4778_s2 = inlined_call_operand.vmem [shape: f32[1,128], index: 2, kind: input, shape index: {}]   ;;  %s4779_s3 = inlined_call_operand.vmem [shape: f32[16,128], index: 3, kind: output, shape index: {}]  }
   0x1   :  { %s4344_s14 = smov 0   ;;  %s4346_s15 = smov 0  }
   0x2   :  { %s4348_s16 = smov 0  }
   0x3 LB: > { %s22_s17 = sadd.s32 1, %s4313_s15  ;;  %p41_p1 = scmp.ne.s32.totalorder %s4305_s13, %s4301_s12  ;;  %s4317_s16 = sphi %s4348_s16, %s13_s16   ;;  %s4313_s15 = sphi %s4346_s15, %s4783_s15   ;;  %s4309_s14 = sphi %s4344_s14, %s4782_s14   ;;  %s4305_s13 = sphi %s4342_s13, %s4781_s13   ;;  %s4301_s12 = sphi %s4340_s12, %s4780_s12  }
   0x4   : > { %p23_p0 = scmp.ge.s32.totalorder %s22_s17, 4  ;;  %p42_p2 = scmp.eq.s32.totalorder %s4317_s16, 0 }
   0x5   : > { %s34_s19 = sadd.s32 1, %s4305_s13  ;;  %p3318_p5 = scmp.ge.s32.totalorder %s4317_s16, 4 }
   0x6   : > { %s4785_s17 = smov (%p23_p0, %s22_s17), 0  ;;  %p43_p3 = por %p42_p2, %p41_p1 }
   0x7   : > { %s30_s18 = ssub.s32 %s4313_s15, %s4785_s17  ;;  %143 = sbr.rel (%p3318_p5) target bundleno = 34 (0x22), region = 20 }
   0x8   : > { %p32_p4 = scmp.eq.s32.totalorder %s30_s18, 0 }
   0xa   : > { %s4375_s20 = scalar_select %p32_p4, %s4305_s13, %s34_s19  }
   0xe   : > { %146 = sbr.rel (!%p43_p3) target bundleno = 34 (0x22), region = 24  ;;  %s148_s21 = sand.u32 (%p43_p3), 1, %s4305_s13  }
   0xf   : > { %s3621_s22 = sshll.u32 (%p43_p3), %s4313_s15, 7  ;;  %s3319_s23 = sshll.u32 (%p43_p3), %s148_s21, 8 }
  0x10   : > { %s4383_s26 = scalar_lea.vmem (%p43_p3), %s4776_s0, %s3621_s22  ;;  %s4388_s27 = scalar_lea.vmem (%p43_p3), [#allocation3], %s3319_s23 }
  0x11   : > { %v169_v0 = vld [vmem:[%s4383_s26] sm:$0xff] (%p43_p3)  ;;  %v171_v1 = vld [vmem:[%s4383_s26 + $0x8] sm:$0xff] (%p43_p3)  ;;  %v173_v2 = vld [vmem:[%s4383_s26 + $0x10] sm:$0xff] (%p43_p3) }
  0x12   : > { %170 = vst [vmem:[%s4388_s27] sm:$0xff] (%p43_p3), %v169_v0  ;;  %172 = vst [vmem:[%s4388_s27 + $0x8] sm:$0xff] (%p43_p3), %v171_v1  ;;  %v175_v3 = vld [vmem:[%s4383_s26 + $0x18] sm:$0xff] (%p43_p3)  ;;  %v177_v4 = vld [vmem:[%s4383_s26 + $0x20] sm:$0xff] (%p43_p3) }
  0x13   : > { %174 = vst [vmem:[%s4388_s27 + $0x10] sm:$0xff] (%p43_p3), %v173_v2  ;;  %v179_v5 = vld [vmem:[%s4383_s26 + $0x28] sm:$0xff] (%p43_p3)  ;;  %176 = vst [vmem:[%s4388_s27 + $0x18] sm:$0xff] (%p43_p3), %v175_v3  ;;  %v181_v6 = vld [vmem:[%s4383_s26 + $0x30] sm:$0xff] (%p43_p3) }
  0x14   : > { %178 = vst [vmem:[%s4388_s27 + $0x20] sm:$0xff] (%p43_p3), %v177_v4  ;;  %180 = vst [vmem:[%s4388_s27 + $0x28] sm:$0xff] (%p43_p3), %v179_v5  ;;  %v183_v7 = vld [vmem:[%s4383_s26 + $0x38] sm:$0xff] (%p43_p3)  ;;  %v185_v8 = vld [vmem:[%s4383_s26 + $0x40] sm:$0xff] (%p43_p3) }
  0x15   : > { %182 = vst [vmem:[%s4388_s27 + $0x30] sm:$0xff] %v181_v6  ;;  %184 = vst [vmem:[%s4388_s27 + $0x38] sm:$0xff] %v183_v7  ;;  %v187_v9 = vld [vmem:[%s4383_s26 + $0x48] sm:$0xff]  ;;  %v189_v10 = vld [vmem:[%s4383_s26 + $0x50] sm:$0xff] }
  0x16   : > { %186 = vst [vmem:[%s4388_s27 + $0x40] sm:$0xff] %v185_v8  ;;  %v191_v11 = vld [vmem:[%s4383_s26 + $0x58] sm:$0xff]  ;;  %188 = vst [vmem:[%s4388_s27 + $0x48] sm:$0xff] %v187_v9  ;;  %v193_v12 = vld [vmem:[%s4383_s26 + $0x60] sm:$0xff] }
  0x17   : > { %190 = vst [vmem:[%s4388_s27 + $0x50] sm:$0xff] %v189_v10  ;;  %192 = vst [vmem:[%s4388_s27 + $0x58] sm:$0xff] %v191_v11  ;;  %v195_v13 = vld [vmem:[%s4383_s26 + $0x68] sm:$0xff]  ;;  %v197_v14 = vld [vmem:[%s4383_s26 + $0x70] sm:$0xff] }
  0x18   : > { %194 = vst [vmem:[%s4388_s27 + $0x60] sm:$0xff] %v193_v12  ;;  %196 = vst [vmem:[%s4388_s27 + $0x68] sm:$0xff] %v195_v13  ;;  %v199_v15 = vld [vmem:[%s4383_s26 + $0x78] sm:$0xff]  ;;  %v201_v16 = vld [vmem:[%s4383_s26 + $0x200] sm:$0xff] }
  0x19   : > { %198 = vst [vmem:[%s4388_s27 + $0x70] sm:$0xff] %v197_v14  ;;  %v203_v17 = vld [vmem:[%s4383_s26 + $0x208] sm:$0xff]  ;;  %200 = vst [vmem:[%s4388_s27 + $0x78] sm:$0xff] %v199_v15  ;;  %v205_v18 = vld [vmem:[%s4383_s26 + $0x210] sm:$0xff] }
  0x1a   : > { %202 = vst [vmem:[%s4388_s27 + $0x80] sm:$0xff] %v201_v16  ;;  %204 = vst [vmem:[%s4388_s27 + $0x88] sm:$0xff] %v203_v17  ;;  %v207_v19 = vld [vmem:[%s4383_s26 + $0x218] sm:$0xff]  ;;  %v209_v20 = vld [vmem:[%s4383_s26 + $0x220] sm:$0xff] }
  0x1b   : > { %206 = vst [vmem:[%s4388_s27 + $0x90] sm:$0xff] %v205_v18  ;;  %208 = vst [vmem:[%s4388_s27 + $0x98] sm:$0xff] %v207_v19  ;;  %v211_v21 = vld [vmem:[%s4383_s26 + $0x228] sm:$0xff]  ;;  %v213_v22 = vld [vmem:[%s4383_s26 + $0x230] sm:$0xff] }
  0x1c   : > { %210 = vst [vmem:[%s4388_s27 + $0xa0] sm:$0xff] %v209_v20  ;;  %v215_v23 = vld [vmem:[%s4383_s26 + $0x238] sm:$0xff]  ;;  %212 = vst [vmem:[%s4388_s27 + $0xa8] sm:$0xff] %v211_v21  ;;  %v217_v24 = vld [vmem:[%s4383_s26 + $0x240] sm:$0xff] }
  0x1d   : > { %214 = vst [vmem:[%s4388_s27 + $0xb0] sm:$0xff] %v213_v22  ;;  %216 = vst [vmem:[%s4388_s27 + $0xb8] sm:$0xff] %v215_v23  ;;  %v219_v25 = vld [vmem:[%s4383_s26 + $0x248] sm:$0xff]  ;;  %v221_v26 = vld [vmem:[%s4383_s26 + $0x250] sm:$0xff] }
  0x1e   : > { %218 = vst [vmem:[%s4388_s27 + $0xc0] sm:$0xff] %v217_v24  ;;  %220 = vst [vmem:[%s4388_s27 + $0xc8] sm:$0xff] %v219_v25  ;;  %v223_v27 = vld [vmem:[%s4383_s26 + $0x258] sm:$0xff]  ;;  %v225_v28 = vld [vmem:[%s4383_s26 + $0x260] sm:$0xff] }
  0x1f   : > { %222 = vst [vmem:[%s4388_s27 + $0xd0] sm:$0xff] %v221_v26  ;;  %v227_v29 = vld [vmem:[%s4383_s26 + $0x268] sm:$0xff]  ;;  %224 = vst [vmem:[%s4388_s27 + $0xd8] sm:$0xff] %v223_v27  ;;  %v229_v30 = vld [vmem:[%s4383_s26 + $0x270] sm:$0xff] }
  0x20   : > { %226 = vst [vmem:[%s4388_s27 + $0xe0] sm:$0xff] %v225_v28  ;;  %228 = vst [vmem:[%s4388_s27 + $0xe8] sm:$0xff] %v227_v29  ;;  %v231_v31 = vld [vmem:[%s4383_s26 + $0x278] sm:$0xff] }
  0x21   : > { %230 = vst [vmem:[%s4388_s27 + $0xf0] sm:$0xff] %v229_v30  ;;  %232 = vst [vmem:[%s4388_s27 + $0xf8] sm:$0xff] %v231_v31 }
  0x22 PF: > { %p3322_p6 = scmp.ge.s32.totalorder %s4317_s16, 1  ;;  %p246_p7 = scmp.lt.s32.totalorder %s4317_s16, 5 }
  0x24   : > { %p247_p8 = pnand %p3322_p6, %p246_p7 }
  0x25   : > { %s253_s28 = sand.u32 (!%p247_p8), 1, %s4301_s12   ;;  %s3324_s29 = sshll.u32 (!%p247_p8), %s4309_s14, 9 }
  0x26   : > { %250 = sbr.rel (%p247_p8) target bundleno = 572 (0x23c), region = 51  ;;  %s3323_s30 = sshll.u32 (!%p247_p8), %s253_s28, 8 }
  0x27   : > { %p284_p9 = scmp.lt.s32.totalorder (!%p247_p8), %s3324_s29, 2047  ;;  %s4460_s8 = scalar_lea.vmem (!%p247_p8), [#allocation3], %s3323_s30 }
  0x28   : > { %p3326_p10 = scmp.ne.s32.totalorder (!%p247_p8), %s4309_s14, 0 }
  0x2d   : > { %s4787_s29 = smov (!%p284_p9, %s3324_s29), 2047  ;;  %299 = sbr.rel (%p3326_p10) target bundleno = 52 (0x34), region = 59 }
  0x2e   : > { %s3325_s4 = sshll.u32 %s4787_s29, 2  ;;  %v4319_v32 = vmov (!%p3326_p10), 0.0  }
  0x2f   : > { %s4458_s7 = scalar_lea.vmem %s4777_s1, %s3325_s4  ;;  %300 = vst [vmem:[#allocation2] sm:$0xff] (!%p3326_p10), %v4319_v32  ;;  %301 = vst [vmem:[#allocation2 + $0x8] sm:$0xff] (!%p3326_p10), %v4319_v32 }
  0x34 PF: > { %v4015_v33 = vld [vmem:[%s4458_s7 + $0x40] sm:$0xff]   ;;  %v4019_v37 = vld [vmem:[%s4458_s7 + $0x48] sm:$0xff]   ;;  %v4023_v41 = vld [vmem:[%s4458_s7 + $0x50] sm:$0xff]   ;;  %p3615_p11 = scmp.ne.s32.totalorder %s4309_s14, 3 }
  0x35   : > { %v4016_v34 = vld [vmem:[%s4458_s7 + $0xc0] sm:$0xff]   ;;  %3622 = vmatprep.subr.bf16.mxu0 %v4015_v33  ;;  %v4020_v38 = vld [vmem:[%s4458_s7 + $0xc8] sm:$0xff]   ;;  %v4024_v42 = vld [vmem:[%s4458_s7 + $0xd0] sm:$0xff]  }
  0x36   : > { %v4017_v35 = vld [vmem:[%s4458_s7] sm:$0xff]   ;;  %3644 = vmatprep.subr.bf16.mxu1 %v4016_v34  ;;  %v4021_v39 = vld [vmem:[%s4458_s7 + $0x8] sm:$0xff]   ;;  %v4025_v43 = vld [vmem:[%s4458_s7 + $0x10] sm:$0xff]  }
  0x37   : > { %v4018_v36 = vld [vmem:[%s4458_s7 + $0x80] sm:$0xff]   ;;  %3623 = vmatpush3.bf16.msra.mxu0 %v4017_v35  ;;  %v4022_v40 = vld [vmem:[%s4458_s7 + $0x88] sm:$0xff]   ;;  %v4026_v44 = vld [vmem:[%s4458_s7 + $0x90] sm:$0xff]  }
  0x38   : > { %3645 = vmatpush3.bf16.msra.mxu1 %v4018_v36  ;;  %3624 = vmatprep.subr.bf16.mxu0 %v4019_v37  ;;  %v4027_v45 = vld [vmem:[%s4458_s7 + $0x58] sm:$0xff]   ;;  %v4031_v49 = vld [vmem:[%s4458_s7 + $0x60] sm:$0xff]   ;;  %v4035_v53 = vld [vmem:[%s4458_s7 + $0x68] sm:$0xff]  }
  0x39   : > { %3646 = vmatprep.subr.bf16.mxu1 %v4020_v38  ;;  %v4028_v46 = vld [vmem:[%s4458_s7 + $0xd8] sm:$0xff]   ;;  %v4032_v50 = vld [vmem:[%s4458_s7 + $0xe0] sm:$0xff]   ;;  %v4036_v54 = vld [vmem:[%s4458_s7 + $0xe8] sm:$0xff]  }
  0x3a   : > { %v4029_v47 = vld [vmem:[%s4458_s7 + $0x18] sm:$0xff]   ;;  %v4033_v51 = vld [vmem:[%s4458_s7 + $0x20] sm:$0xff]   ;;  %v4037_v55 = vld [vmem:[%s4458_s7 + $0x28] sm:$0xff]  }
  0x3b   : > { %3625 = vmatpush3.bf16.msra.mxu0 %v4021_v39  ;;  %v4030_v48 = vld [vmem:[%s4458_s7 + $0x98] sm:$0xff]   ;;  %v4034_v52 = vld [vmem:[%s4458_s7 + $0xa0] sm:$0xff]   ;;  %v4038_v56 = vld [vmem:[%s4458_s7 + $0xa8] sm:$0xff]  }
  0x3c   : > { %3647 = vmatpush3.bf16.msra.mxu1 %v4022_v40  ;;  %3626 = vmatprep.subr.bf16.mxu0 %v4023_v41  ;;  %v4039_v57 = vld [vmem:[%s4458_s7 + $0x70] sm:$0xff]   ;;  %v4043_v61 = vld [vmem:[%s4458_s7 + $0x78] sm:$0xff]   ;;  %v4047_v9 = vld [vmem:[%s4458_s7 + $0x140] sm:$0xff]  }
  0x3d   : > { %3648 = vmatprep.subr.bf16.mxu1 %v4024_v42  ;;  %v4040_v58 = vld [vmem:[%s4458_s7 + $0xf0] sm:$0xff]   ;;  %v4044_v62 = vld [vmem:[%s4458_s7 + $0xf8] sm:$0xff]   ;;  %v4048_v10 = vld [vmem:[%s4458_s7 + $0x1c0] sm:$0xff]  }
  0x3e   : > { %v4041_v59 = vld [vmem:[%s4458_s7 + $0x30] sm:$0xff]   ;;  %v4045_v63 = vld [vmem:[%s4458_s7 + $0x38] sm:$0xff]   ;;  %v4049_v11 = vld [vmem:[%s4458_s7 + $0x100] sm:$0xff]  }
  0x3f   : > { %3627 = vmatpush3.bf16.msra.mxu0 %v4025_v43  ;;  %v4042_v60 = vld [vmem:[%s4458_s7 + $0xb0] sm:$0xff]   ;;  %v4046_v0 = vld [vmem:[%s4458_s7 + $0xb8] sm:$0xff]   ;;  %v4050_v12 = vld [vmem:[%s4458_s7 + $0x180] sm:$0xff]  }
  0x40   : > { %3649 = vmatpush3.bf16.msra.mxu1 %v4026_v44  ;;  %3628 = vmatprep.subr.bf16.mxu0 %v4027_v45  ;;  %v304_v1 = vld [vmem:[%s4460_s8] sm:$0xff]  ;;  %v305_v3 = vld [vmem:[%s4460_s8 + $0x8] sm:$0xff]  ;;  %v4051_v13 = vld [vmem:[%s4458_s7 + $0x148] sm:$0xff]  }
  0x41   : > { %3650 = vmatprep.subr.bf16.mxu1 %v4028_v46  ;;  %v320_v2 = vld [vmem:[%s4460_s8 + $0x80] sm:$0xff]  ;;  %v321_v6 = vld [vmem:[%s4460_s8 + $0x88] sm:$0xff]  ;;  %v4052_v14 = vld [vmem:[%s4458_s7 + $0x1c8] sm:$0xff]  }
  0x42   : > { %v3327_v4 = vcombine.low %v304_v1, %v320_v2  ;;  %v3328_v5 = vcombine.high %v304_v1, %v320_v2  ;;  %v3329_v7 = vcombine.low %v305_v3, %v321_v6  ;;  %v3330_v8 = vcombine.high %v305_v3, %v321_v6  ;;  %v4053_v15 = vld [vmem:[%s4458_s7 + $0x108] sm:$0xff]   ;;  %v4055_v17 = vld [vmem:[%s4458_s7 + $0x150] sm:$0xff]   ;;  %v4059_v21 = vld [vmem:[%s4458_s7 + $0x158] sm:$0xff]  }
  0x43   : > { %3629 = vmatpush3.bf16.msra.mxu0 %v4029_v47  ;;  %v4054_v16 = vld [vmem:[%s4458_s7 + $0x188] sm:$0xff]   ;;  %v4056_v18 = vld [vmem:[%s4458_s7 + $0x1d0] sm:$0xff]   ;;  %v4060_v22 = vld [vmem:[%s4458_s7 + $0x1d8] sm:$0xff]  }
  0x44   : > { %3651 = vmatpush3.bf16.msra.mxu1 %v4030_v48  ;;  %3630 = vmatprep.subr.bf16.mxu0 %v4031_v49  ;;  %v4057_v19 = vld [vmem:[%s4458_s7 + $0x110] sm:$0xff]   ;;  %v4061_v23 = vld [vmem:[%s4458_s7 + $0x118] sm:$0xff]   ;;  %v4063_v25 = vld [vmem:[%s4458_s7 + $0x160] sm:$0xff]  }
  0x45   : > { %3652 = vmatprep.subr.bf16.mxu1 %v4032_v50  ;;  %2576 = vmatprep.mubr.bf16.mxu0 %v3328_v5  ;;  %v4058_v20 = vld [vmem:[%s4458_s7 + $0x190] sm:$0xff]   ;;  %v4062_v24 = vld [vmem:[%s4458_s7 + $0x198] sm:$0xff]   ;;  %v4064_v26 = vld [vmem:[%s4458_s7 + $0x1e0] sm:$0xff]  }
  0x46   : > { %2617 = vmatprep.mubr.bf16.mxu1 %v3330_v8  ;;  %v4065_v27 = vld [vmem:[%s4458_s7 + $0x120] sm:$0xff]   ;;  %v4067_v29 = vld [vmem:[%s4458_s7 + $0x168] sm:$0xff]   ;;  %v4071_v33 = vld [vmem:[%s4458_s7 + $0x170] sm:$0xff]  }
  0x47   : > { %3631 = vmatpush3.bf16.msra.mxu0 %v4033_v51  ;;  %v4066_v28 = vld [vmem:[%s4458_s7 + $0x1a0] sm:$0xff]   ;;  %v4068_v30 = vld [vmem:[%s4458_s7 + $0x1e8] sm:$0xff]   ;;  %v4072_v34 = vld [vmem:[%s4458_s7 + $0x1f0] sm:$0xff]  }
  0x48   : > { %3653 = vmatpush3.bf16.msra.mxu1 %v4034_v52  ;;  %3632 = vmatprep.subr.bf16.mxu0 %v4035_v53  ;;  %v4069_v31 = vld [vmem:[%s4458_s7 + $0x128] sm:$0xff]   ;;  %v4073_v35 = vld [vmem:[%s4458_s7 + $0x130] sm:$0xff]   ;;  %v4075_v37 = vld [vmem:[%s4458_s7 + $0x178] sm:$0xff]  }
  0x49   : > { %3654 = vmatprep.subr.bf16.mxu1 %v4036_v54  ;;  %v4070_v32 = vld [vmem:[%s4458_s7 + $0x1a8] sm:$0xff]   ;;  %v4074_v36 = vld [vmem:[%s4458_s7 + $0x1b0] sm:$0xff]   ;;  %v4076_v38 = vld [vmem:[%s4458_s7 + $0x1f8] sm:$0xff]  }
  0x4a   : > { %v4077_v39 = vld [vmem:[%s4458_s7 + $0x138] sm:$0xff]   ;;  %v306_v41 = vld [vmem:[%s4460_s8 + $0x10] sm:$0xff]  ;;  %v307_v45 = vld [vmem:[%s4460_s8 + $0x18] sm:$0xff] }
  0x4b   : > { %3633 = vmatpush3.bf16.msra.mxu0 %v4037_v55  ;;  %v4078_v40 = vld [vmem:[%s4458_s7 + $0x1b8] sm:$0xff]   ;;  %v322_v42 = vld [vmem:[%s4460_s8 + $0x90] sm:$0xff]  ;;  %v323_v46 = vld [vmem:[%s4460_s8 + $0x98] sm:$0xff] }
  0x4c   : > { %3655 = vmatpush3.bf16.msra.mxu1 %v4038_v56  ;;  %3634 = vmatprep.subr.bf16.mxu0 %v4039_v57  ;;  %v3331_v43 = vcombine.low %v306_v41, %v322_v42  ;;  %v3332_v44 = vcombine.high %v306_v41, %v322_v42  ;;  %v3333_v47 = vcombine.low %v307_v45, %v323_v46  ;;  %v4079_v49 = vld [vmem:[%s4458_s7 + $0x240] sm:$0xff]   ;;  %v4083_v53 = vld [vmem:[%s4458_s7 + $0x248] sm:$0xff]   ;;  %v4087_v57 = vld [vmem:[%s4458_s7 + $0x250] sm:$0xff]  }
  0x4d   : > { %3656 = vmatprep.subr.bf16.mxu1 %v4040_v58  ;;  %v3334_v48 = vcombine.high %v307_v45, %v323_v46  ;;  %v4080_v50 = vld [vmem:[%s4458_s7 + $0x2c0] sm:$0xff]   ;;  %v4084_v54 = vld [vmem:[%s4458_s7 + $0x2c8] sm:$0xff]   ;;  %v4088_v58 = vld [vmem:[%s4458_s7 + $0x2d0] sm:$0xff]  }
  0x4e   : > { %v4081_v51 = vld [vmem:[%s4458_s7 + $0x200] sm:$0xff]   ;;  %v4085_v55 = vld [vmem:[%s4458_s7 + $0x208] sm:$0xff]  }
  0x4f   : > { %3635 = vmatpush3.bf16.msra.mxu0 %v4041_v59  ;;  %v4082_v52 = vld [vmem:[%s4458_s7 + $0x280] sm:$0xff]   ;;  %v4086_v56 = vld [vmem:[%s4458_s7 + $0x288] sm:$0xff]   ;;  %v4089_v59 = vld [vmem:[%s4458_s7 + $0x210] sm:$0xff]  }
  0x50   : > { %3657 = vmatpush3.bf16.msra.mxu1 %v4042_v60  ;;  %3636 = vmatprep.subr.bf16.mxu0 %v4043_v61  ;;  %v4090_v60 = vld [vmem:[%s4458_s7 + $0x290] sm:$0xff]   ;;  %v4091_v61 = vld [vmem:[%s4458_s7 + $0x258] sm:$0xff]   ;;  %v4095_v1 = vld [vmem:[%s4458_s7 + $0x260] sm:$0xff]  }
  0x51   : > { %3658 = vmatprep.subr.bf16.mxu1 %v4044_v62  ;;  %v4092_v62 = vld [vmem:[%s4458_s7 + $0x2d8] sm:$0xff]   ;;  %v4096_v2 = vld [vmem:[%s4458_s7 + $0x2e0] sm:$0xff]   ;;  %v4099_v5 = vld [vmem:[%s4458_s7 + $0x268] sm:$0xff]  }
  0x52   : > { %v4097_v3 = vld [vmem:[%s4458_s7 + $0x220] sm:$0xff]   ;;  %v4100_v6 = vld [vmem:[%s4458_s7 + $0x2e8] sm:$0xff]  }
  0x53   : > { %3637 = vmatpush3.bf16.msra.mxu0 %v4045_v63  ;;  %v4093_v63 = vld [vmem:[%s4458_s7 + $0x218] sm:$0xff]   ;;  %v4102_v8 = vld [vmem:[%s4458_s7 + $0x2a8] sm:$0xff]   ;;  %v4127_v41 = vld [vmem:[%s4458_s7 + $0x360] sm:$0xff]  }
  0x54   : > { %3659 = vmatpush3.bf16.msra.mxu1 %v4046_v0  ;;  %3666 = vmatprep.subr.bf16.mxu0 %v4047_v9  ;;  %v4094_v0 = vld [vmem:[%s4458_s7 + $0x298] sm:$0xff]   ;;  %v4103_v9 = vld [vmem:[%s4458_s7 + $0x270] sm:$0xff]   ;;  %v4128_v42 = vld [vmem:[%s4458_s7 + $0x3e0] sm:$0xff]  }
  0x55   : > { %3688 = vmatprep.subr.bf16.mxu1 %v4048_v10  ;;  %v4104_v10 = vld [vmem:[%s4458_s7 + $0x2f0] sm:$0xff]   ;;  %v4131_v45 = vld [vmem:[%s4458_s7 + $0x368] sm:$0xff]  }
  0x56   : > { %2577 = vmatmul.mubr.bf16.vlgmr.msra.gmra.mrb[0].mxu0 %v3327_v4  ;;  %v4098_v4 = vld [vmem:[%s4458_s7 + $0x2a0] sm:$0xff]   ;;  %v4132_v46 = vld [vmem:[%s4458_s7 + $0x3e8] sm:$0xff]  }
  0x57   : > { %2618 = vmatmul.mubr.bf16.vlgmr.msra.gmra.mrb[0].mxu1 %v3329_v7  ;;  %3667 = vmatpush3.bf16.msra.mxu0 %v4049_v11  ;;  %v4101_v7 = vld [vmem:[%s4458_s7 + $0x228] sm:$0xff]   ;;  %v4105_v11 = vld [vmem:[%s4458_s7 + $0x230] sm:$0xff]  }
  0x58   : > { %3689 = vmatpush3.bf16.msra.mxu1 %v4050_v12  ;;  %3668 = vmatprep.subr.bf16.mxu0 %v4051_v13  ;;  %v4106_v12 = vld [vmem:[%s4458_s7 + $0x2b0] sm:$0xff]   ;;  %v4107_v13 = vld [vmem:[%s4458_s7 + $0x278] sm:$0xff]  }
  0x59   : > { %3690 = vmatprep.subr.bf16.mxu1 %v4052_v14  ;;  %2658 = vmatprep.mubr.bf16.mxu0 %v3332_v44  ;;  %v4108_v14 = vld [vmem:[%s4458_s7 + $0x2f8] sm:$0xff]   ;;  %v4130_v44 = vld [vmem:[%s4458_s7 + $0x3a0] sm:$0xff]  }
  0x5a   : > { %2699 = vmatprep.mubr.bf16.mxu1 %v3334_v48  ;;  %v4134_v48 = vld [vmem:[%s4458_s7 + $0x3a8] sm:$0xff]  }
  0x5b   : > { %3669 = vmatpush3.bf16.msra.mxu0 %v4053_v15  ;;  %v4109_v15 = vld [vmem:[%s4458_s7 + $0x238] sm:$0xff]  }
  0x5c   : > { %3691 = vmatpush3.bf16.msra.mxu1 %v4054_v16  ;;  %3670 = vmatprep.subr.bf16.mxu0 %v4055_v17  ;;  %v4110_v16 = vld [vmem:[%s4458_s7 + $0x2b8] sm:$0xff]   ;;  %v308_v17 = vld [vmem:[%s4460_s8 + $0x20] sm:$0xff] }
  0x5d   : > { %3692 = vmatprep.subr.bf16.mxu1 %v4056_v18  ;;  %v324_v18 = vld [vmem:[%s4460_s8 + $0xa0] sm:$0xff] }
  0x5f   : > { %3671 = vmatpush3.bf16.msra.mxu0 %v4057_v19  ;;  %v309_v19 = vld [vmem:[%s4460_s8 + $0x28] sm:$0xff] }
  0x60   : > { %3693 = vmatpush3.bf16.msra.mxu1 %v4058_v20  ;;  %3672 = vmatprep.subr.bf16.mxu0 %v4059_v21  ;;  %v325_v20 = vld [vmem:[%s4460_s8 + $0xa8] sm:$0xff]  ;;  %v3335_v21 = vcombine.low %v308_v17, %v324_v18 }
  0x61   : > { %3694 = vmatprep.subr.bf16.mxu1 %v4060_v22  ;;  %v3336_v22 = vcombine.high %v308_v17, %v324_v18  ;;  %v4159_v17 = vld [vmem:[%s4458_s7 + $0x460] sm:$0xff]  }
  0x62   : > { %v4160_v18 = vld [vmem:[%s4458_s7 + $0x4e0] sm:$0xff]  }
  0x63   : > { %3673 = vmatpush3.bf16.msra.mxu0 %v4061_v23  ;;  %v3337_v23 = vcombine.low %v309_v19, %v325_v20 }
  0x64   : > { %3695 = vmatpush3.bf16.msra.mxu1 %v4062_v24  ;;  %3674 = vmatprep.subr.bf16.mxu0 %v4063_v25  ;;  %v3338_v24 = vcombine.high %v309_v19, %v325_v20  ;;  %v4111_v25 = vld [vmem:[%s4458_s7 + $0x340] sm:$0xff]  }
  0x65   : > { %3696 = vmatprep.subr.bf16.mxu1 %v4064_v26  ;;  %v4112_v26 = vld [vmem:[%s4458_s7 + $0x3c0] sm:$0xff]  }
  0x66   : > { %v4161_v19 = vld [vmem:[%s4458_s7 + $0x420] sm:$0xff]  }
  0x67   : > { %3675 = vmatpush3.bf16.msra.mxu0 %v4065_v27  ;;  %v4113_v27 = vld [vmem:[%s4458_s7 + $0x300] sm:$0xff]  }
  0x68   : > { %3697 = vmatpush3.bf16.msra.mxu1 %v4066_v28  ;;  %3676 = vmatprep.subr.bf16.mxu0 %v4067_v29  ;;  %v4114_v28 = vld [vmem:[%s4458_s7 + $0x380] sm:$0xff]   ;;  %v4115_v29 = vld [vmem:[%s4458_s7 + $0x348] sm:$0xff]  }
  0x69   : > { %3698 = vmatprep.subr.bf16.mxu1 %v4068_v30  ;;  %v4116_v30 = vld [vmem:[%s4458_s7 + $0x3c8] sm:$0xff]   ;;  %v4162_v20 = vld [vmem:[%s4458_s7 + $0x4a0] sm:$0xff]  }
  0x6b   : > { %3677 = vmatpush3.bf16.msra.mxu0 %v4069_v31  ;;  %v4117_v31 = vld [vmem:[%s4458_s7 + $0x308] sm:$0xff]  }
  0x6c   : > { %3699 = vmatpush3.bf16.msra.mxu1 %v4070_v32  ;;  %3678 = vmatprep.subr.bf16.mxu0 %v4071_v33  ;;  %v4118_v32 = vld [vmem:[%s4458_s7 + $0x388] sm:$0xff]   ;;  %v4119_v33 = vld [vmem:[%s4458_s7 + $0x350] sm:$0xff]  }
  0x6d   : > { %3700 = vmatprep.subr.bf16.mxu1 %v4072_v34  ;;  %v4120_v34 = vld [vmem:[%s4458_s7 + $0x3d0] sm:$0xff]  }
  0x6f   : > { %3679 = vmatpush3.bf16.msra.mxu0 %v4073_v35  ;;  %v4121_v35 = vld [vmem:[%s4458_s7 + $0x310] sm:$0xff]  }
  0x70   : > { %3701 = vmatpush3.bf16.msra.mxu1 %v4074_v36  ;;  %3680 = vmatprep.subr.bf16.mxu0 %v4075_v37  ;;  %v4122_v36 = vld [vmem:[%s4458_s7 + $0x390] sm:$0xff]   ;;  %v4123_v37 = vld [vmem:[%s4458_s7 + $0x358] sm:$0xff]  }
  0x71   : > { %3702 = vmatprep.subr.bf16.mxu1 %v4076_v38  ;;  %v4124_v38 = vld [vmem:[%s4458_s7 + $0x3d8] sm:$0xff]  }
  0x73   : > { %3681 = vmatpush3.bf16.msra.mxu0 %v4077_v39  ;;  %v4125_v39 = vld [vmem:[%s4458_s7 + $0x318] sm:$0xff]  }
  0x74   : > { %3703 = vmatpush3.bf16.msra.mxu1 %v4078_v40  ;;  %3710 = vmatprep.subr.bf16.mxu0 %v4079_v49  ;;  %v4126_v40 = vld [vmem:[%s4458_s7 + $0x398] sm:$0xff]   ;;  %v4135_v49 = vld [vmem:[%s4458_s7 + $0x370] sm:$0xff]  }
  0x75   : > { %3732 = vmatprep.subr.bf16.mxu1 %v4080_v50  ;;  %v4136_v50 = vld [vmem:[%s4458_s7 + $0x3f0] sm:$0xff]  }
  0x76   : > { %2659 = vmatmul.mubr.bf16.vlgmr.msra.gmra.mrb[4].mxu0 %v3331_v43  ;;  %v4129_v43 = vld [vmem:[%s4458_s7 + $0x320] sm:$0xff]  }
  0x77   : > { %2700 = vmatmul.mubr.bf16.vlgmr.msra.gmra.mrb[4].mxu1 %v3333_v47  ;;  %3711 = vmatpush3.bf16.msra.mxu0 %v4081_v51  ;;  %v4133_v47 = vld [vmem:[%s4458_s7 + $0x328] sm:$0xff]   ;;  %v4137_v51 = vld [vmem:[%s4458_s7 + $0x330] sm:$0xff]  }
  0x78   : > { %3733 = vmatpush3.bf16.msra.mxu1 %v4082_v52  ;;  %3712 = vmatprep.subr.bf16.mxu0 %v4083_v53  ;;  %v4138_v52 = vld [vmem:[%s4458_s7 + $0x3b0] sm:$0xff]   ;;  %v4139_v53 = vld [vmem:[%s4458_s7 + $0x378] sm:$0xff]  }
  0x79   : > { %3734 = vmatprep.subr.bf16.mxu1 %v4084_v54  ;;  %2740 = vmatprep.mubr.bf16.mxu0 %v3336_v22  ;;  %v4140_v54 = vld [vmem:[%s4458_s7 + $0x3f8] sm:$0xff]   ;;  %v4164_v22 = vld [vmem:[%s4458_s7 + $0x4e8] sm:$0xff]  }
  0x7a   : > { %2781 = vmatprep.mubr.bf16.mxu1 %v3338_v24  ;;  %v4166_v24 = vld [vmem:[%s4458_s7 + $0x4a8] sm:$0xff]  }
  0x7b   : > { %3713 = vmatpush3.bf16.msra.mxu0 %v4085_v55  ;;  %v4141_v55 = vld [vmem:[%s4458_s7 + $0x338] sm:$0xff]  }
  0x7c   : > { %3735 = vmatpush3.bf16.msra.mxu1 %v4086_v56  ;;  %3714 = vmatprep.subr.bf16.mxu0 %v4087_v57  ;;  %v4142_v56 = vld [vmem:[%s4458_s7 + $0x3b8] sm:$0xff]   ;;  %v310_v57 = vld [vmem:[%s4460_s8 + $0x30] sm:$0xff] }
  0x7d   : > { %3736 = vmatprep.subr.bf16.mxu1 %v4088_v58  ;;  %v326_v58 = vld [vmem:[%s4460_s8 + $0xb0] sm:$0xff] }
  0x7f   : > { %3715 = vmatpush3.bf16.msra.mxu0 %v4089_v59  ;;  %v311_v59 = vld [vmem:[%s4460_s8 + $0x38] sm:$0xff] }
  0x80   : > { %3737 = vmatpush3.bf16.msra.mxu1 %v4090_v60  ;;  %3716 = vmatprep.subr.bf16.mxu0 %v4091_v61  ;;  %v3339_v60 = vcombine.low %v310_v57, %v326_v58  ;;  %v3340_v61 = vcombine.high %v310_v57, %v326_v58  ;;  %v4191_v57 = vld [vmem:[%s4458_s7 + $0x560] sm:$0xff]  }
  0x81   : > { %3738 = vmatprep.subr.bf16.mxu1 %v4092_v62  ;;  %v327_v62 = vld [vmem:[%s4460_s8 + $0xb8] sm:$0xff]  ;;  %v4192_v58 = vld [vmem:[%s4458_s7 + $0x5e0] sm:$0xff]  }
  0x83   : > { %3717 = vmatpush3.bf16.msra.mxu0 %v4093_v63  ;;  %v3341_v63 = vcombine.low %v311_v59, %v327_v62 }
  0x84   : > { %3739 = vmatpush3.bf16.msra.mxu1 %v4094_v0  ;;  %3718 = vmatprep.subr.bf16.mxu0 %v4095_v1  ;;  %v3342_v0 = vcombine.high %v311_v59, %v327_v62  ;;  %v4143_v1 = vld [vmem:[%s4458_s7 + $0x440] sm:$0xff]   ;;  %v4196_v62 = vld [vmem:[%s4458_s7 + $0x5e8] sm:$0xff]  }
  0x85   : > { %3740 = vmatprep.subr.bf16.mxu1 %v4096_v2  ;;  %v4144_v2 = vld [vmem:[%s4458_s7 + $0x4c0] sm:$0xff]  }
  0x86   : > { %v4193_v59 = vld [vmem:[%s4458_s7 + $0x520] sm:$0xff]  }
  0x87   : > { %3719 = vmatpush3.bf16.msra.mxu0 %v4097_v3  ;;  %v4145_v3 = vld [vmem:[%s4458_s7 + $0x400] sm:$0xff]  }
  0x88   : > { %3741 = vmatpush3.bf16.msra.mxu1 %v4098_v4  ;;  %3720 = vmatprep.subr.bf16.mxu0 %v4099_v5  ;;  %v4146_v4 = vld [vmem:[%s4458_s7 + $0x480] sm:$0xff]   ;;  %v4147_v5 = vld [vmem:[%s4458_s7 + $0x448] sm:$0xff]  }
  0x89   : > { %3742 = vmatprep.subr.bf16.mxu1 %v4100_v6  ;;  %v4148_v6 = vld [vmem:[%s4458_s7 + $0x4c8] sm:$0xff]  }
  0x8b   : > { %3721 = vmatpush3.bf16.msra.mxu0 %v4101_v7  ;;  %v4149_v7 = vld [vmem:[%s4458_s7 + $0x408] sm:$0xff]  }
  0x8c   : > { %3743 = vmatpush3.bf16.msra.mxu1 %v4102_v8  ;;  %3722 = vmatprep.subr.bf16.mxu0 %v4103_v9  ;;  %v4150_v8 = vld [vmem:[%s4458_s7 + $0x488] sm:$0xff]   ;;  %v4151_v9 = vld [vmem:[%s4458_s7 + $0x450] sm:$0xff]  }
  0x8d   : > { %3744 = vmatprep.subr.bf16.mxu1 %v4104_v10  ;;  %v4152_v10 = vld [vmem:[%s4458_s7 + $0x4d0] sm:$0xff]  }
  0x8f   : > { %3723 = vmatpush3.bf16.msra.mxu0 %v4105_v11  ;;  %v4153_v11 = vld [vmem:[%s4458_s7 + $0x410] sm:$0xff]  }
  0x90   : > { %3745 = vmatpush3.bf16.msra.mxu1 %v4106_v12  ;;  %3724 = vmatprep.subr.bf16.mxu0 %v4107_v13  ;;  %v4154_v12 = vld [vmem:[%s4458_s7 + $0x490] sm:$0xff]   ;;  %v4155_v13 = vld [vmem:[%s4458_s7 + $0x458] sm:$0xff]  }
  0x91   : > { %3746 = vmatprep.subr.bf16.mxu1 %v4108_v14  ;;  %v4156_v14 = vld [vmem:[%s4458_s7 + $0x4d8] sm:$0xff]  }
  0x93   : > { %3725 = vmatpush3.bf16.msra.mxu0 %v4109_v15  ;;  %v4157_v15 = vld [vmem:[%s4458_s7 + $0x418] sm:$0xff]  }
  0x94   : > { %3747 = vmatpush3.bf16.msra.mxu1 %v4110_v16  ;;  %3754 = vmatprep.subr.bf16.mxu0 %v4111_v25  ;;  %v4158_v16 = vld [vmem:[%s4458_s7 + $0x498] sm:$0xff]   ;;  %v4167_v25 = vld [vmem:[%s4458_s7 + $0x470] sm:$0xff]  }
  0x95   : > { %3776 = vmatprep.subr.bf16.mxu1 %v4112_v26  ;;  %v4168_v26 = vld [vmem:[%s4458_s7 + $0x4f0] sm:$0xff]  }
  0x96   : > { %2741 = vmatmul.mubr.bf16.vlgmr.msra.gmra.mrb[8].mxu0 %v3335_v21  ;;  %v4163_v21 = vld [vmem:[%s4458_s7 + $0x468] sm:$0xff]  }
  0x97   : > { %2782 = vmatmul.mubr.bf16.vlgmr.msra.gmra.mrb[8].mxu1 %v3337_v23  ;;  %3755 = vmatpush3.bf16.msra.mxu0 %v4113_v27  ;;  %v4165_v23 = vld [vmem:[%s4458_s7 + $0x428] sm:$0xff]   ;;  %v4169_v27 = vld [vmem:[%s4458_s7 + $0x430] sm:$0xff]  }
  0x98   : > { %3777 = vmatpush3.bf16.msra.mxu1 %v4114_v28  ;;  %3756 = vmatprep.subr.bf16.mxu0 %v4115_v29  ;;  %v4170_v28 = vld [vmem:[%s4458_s7 + $0x4b0] sm:$0xff]   ;;  %v4171_v29 = vld [vmem:[%s4458_s7 + $0x478] sm:$0xff]  }
  0x99   : > { %3778 = vmatprep.subr.bf16.mxu1 %v4116_v30  ;;  %2822 = vmatprep.mubr.bf16.mxu0 %v3340_v61  ;;  %v4172_v30 = vld [vmem:[%s4458_s7 + $0x4f8] sm:$0xff]   ;;  %v4195_v61 = vld [vmem:[%s4458_s7 + $0x568] sm:$0xff]  }
  0x9a   : > { %2863 = vmatprep.mubr.bf16.mxu1 %v3342_v0  ;;  %v4198_v0 = vld [vmem:[%s4458_s7 + $0x5a8] sm:$0xff]  }
  0x9b   : > { %3757 = vmatpush3.bf16.msra.mxu0 %v4117_v31  ;;  %v4173_v31 = vld [vmem:[%s4458_s7 + $0x438] sm:$0xff]  }
  0x9c   : > { %3779 = vmatpush3.bf16.msra.mxu1 %v4118_v32  ;;  %3758 = vmatprep.subr.bf16.mxu0 %v4119_v33  ;;  %v4174_v32 = vld [vmem:[%s4458_s7 + $0x4b8] sm:$0xff]   ;;  %v312_v33 = vld [vmem:[%s4460_s8 + $0x40] sm:$0xff] }
  0x9d   : > { %3780 = vmatprep.subr.bf16.mxu1 %v4120_v34  ;;  %v328_v34 = vld [vmem:[%s4460_s8 + $0xc0] sm:$0xff] }
  0x9f   : > { %3759 = vmatpush3.bf16.msra.mxu0 %v4121_v35  ;;  %v3343_v35 = vcombine.low %v312_v33, %v328_v34 }
  0xa0   : > { %3781 = vmatpush3.bf16.msra.mxu1 %v4122_v36  ;;  %3760 = vmatprep.subr.bf16.mxu0 %v4123_v37  ;;  %v3344_v36 = vcombine.high %v312_v33, %v328_v34  ;;  %v313_v37 = vld [vmem:[%s4460_s8 + $0x48] sm:$0xff]  ;;  %v4223_v33 = vld [vmem:[%s4458_s7 + $0x660] sm:$0xff]  }
  0xa1   : > { %3782 = vmatprep.subr.bf16.mxu1 %v4124_v38  ;;  %v329_v38 = vld [vmem:[%s4460_s8 + $0xc8] sm:$0xff]  ;;  %v4224_v34 = vld [vmem:[%s4458_s7 + $0x6e0] sm:$0xff]  }
  0xa3   : > { %3761 = vmatpush3.bf16.msra.mxu0 %v4125_v39  ;;  %v3345_v39 = vcombine.low %v313_v37, %v329_v38 }
  0xa4   : > { %3783 = vmatpush3.bf16.msra.mxu1 %v4126_v40  ;;  %3762 = vmatprep.subr.bf16.mxu0 %v4127_v41  ;;  %v3346_v40 = vcombine.high %v313_v37, %v329_v38  ;;  %v4175_v41 = vld [vmem:[%s4458_s7 + $0x540] sm:$0xff]   ;;  %v4227_v37 = vld [vmem:[%s4458_s7 + $0x668] sm:$0xff]  }
  0xa5   : > { %3784 = vmatprep.subr.bf16.mxu1 %v4128_v42  ;;  %v4176_v42 = vld [vmem:[%s4458_s7 + $0x5c0] sm:$0xff]   ;;  %v4228_v38 = vld [vmem:[%s4458_s7 + $0x6e8] sm:$0xff]  }
  0xa7   : > { %3763 = vmatpush3.bf16.msra.mxu0 %v4129_v43  ;;  %v4177_v43 = vld [vmem:[%s4458_s7 + $0x500] sm:$0xff]  }
  0xa8   : > { %3785 = vmatpush3.bf16.msra.mxu1 %v4130_v44  ;;  %3764 = vmatprep.subr.bf16.mxu0 %v4131_v45  ;;  %v4178_v44 = vld [vmem:[%s4458_s7 + $0x580] sm:$0xff]   ;;  %v4179_v45 = vld [vmem:[%s4458_s7 + $0x548] sm:$0xff]  }
  0xa9   : > { %3786 = vmatprep.subr.bf16.mxu1 %v4132_v46  ;;  %v4180_v46 = vld [vmem:[%s4458_s7 + $0x5c8] sm:$0xff]  }
  0xab   : > { %3765 = vmatpush3.bf16.msra.mxu0 %v4133_v47  ;;  %v4181_v47 = vld [vmem:[%s4458_s7 + $0x508] sm:$0xff]  }
  0xac   : > { %3787 = vmatpush3.bf16.msra.mxu1 %v4134_v48  ;;  %3766 = vmatprep.subr.bf16.mxu0 %v4135_v49  ;;  %v4182_v48 = vld [vmem:[%s4458_s7 + $0x588] sm:$0xff]   ;;  %v4183_v49 = vld [vmem:[%s4458_s7 + $0x550] sm:$0xff]  }
  0xad   : > { %3788 = vmatprep.subr.bf16.mxu1 %v4136_v50  ;;  %v4184_v50 = vld [vmem:[%s4458_s7 + $0x5d0] sm:$0xff]  }
  0xaf   : > { %3767 = vmatpush3.bf16.msra.mxu0 %v4137_v51  ;;  %v4185_v51 = vld [vmem:[%s4458_s7 + $0x510] sm:$0xff]  }
  0xb0   : > { %3789 = vmatpush3.bf16.msra.mxu1 %v4138_v52  ;;  %3768 = vmatprep.subr.bf16.mxu0 %v4139_v53  ;;  %v4186_v52 = vld [vmem:[%s4458_s7 + $0x590] sm:$0xff]   ;;  %v4187_v53 = vld [vmem:[%s4458_s7 + $0x558] sm:$0xff]  }
  0xb1   : > { %3790 = vmatprep.subr.bf16.mxu1 %v4140_v54  ;;  %v4188_v54 = vld [vmem:[%s4458_s7 + $0x5d8] sm:$0xff]  }
  0xb3   : > { %3769 = vmatpush3.bf16.msra.mxu0 %v4141_v55  ;;  %v4189_v55 = vld [vmem:[%s4458_s7 + $0x518] sm:$0xff]  }
  0xb4   : > { %3791 = vmatpush3.bf16.msra.mxu1 %v4142_v56  ;;  %3798 = vmatprep.subr.bf16.mxu0 %v4143_v1  ;;  %v4190_v56 = vld [vmem:[%s4458_s7 + $0x598] sm:$0xff]   ;;  %v4199_v1 = vld [vmem:[%s4458_s7 + $0x570] sm:$0xff]  }
  0xb5   : > { %3820 = vmatprep.subr.bf16.mxu1 %v4144_v2  ;;  %v4200_v2 = vld [vmem:[%s4458_s7 + $0x5f0] sm:$0xff]  }
  0xb6   : > { %2823 = vmatmul.mubr.bf16.vlgmr.msra.gmra.mrb[12].mxu0 %v3339_v60  ;;  %v4194_v60 = vld [vmem:[%s4458_s7 + $0x5a0] sm:$0xff]  }
  0xb7   : > { %2864 = vmatmul.mubr.bf16.vlgmr.msra.gmra.mrb[12].mxu1 %v3341_v63  ;;  %3799 = vmatpush3.bf16.msra.mxu0 %v4145_v3  ;;  %v4197_v63 = vld [vmem:[%s4458_s7 + $0x528] sm:$0xff]   ;;  %v4201_v3 = vld [vmem:[%s4458_s7 + $0x530] sm:$0xff]  }
  0xb8   : > { %3821 = vmatpush3.bf16.msra.mxu1 %v4146_v4  ;;  %3800 = vmatprep.subr.bf16.mxu0 %v4147_v5  ;;  %v4202_v4 = vld [vmem:[%s4458_s7 + $0x5b0] sm:$0xff]   ;;  %v4203_v5 = vld [vmem:[%s4458_s7 + $0x578] sm:$0xff]  }
  0xb9   : > { %3822 = vmatprep.subr.bf16.mxu1 %v4148_v6  ;;  %2904 = vmatprep.mubr.bf16.mxu0 %v3344_v36  ;;  %v4204_v6 = vld [vmem:[%s4458_s7 + $0x5f8] sm:$0xff]   ;;  %v4226_v36 = vld [vmem:[%s4458_s7 + $0x6a0] sm:$0xff]  }
  0xba   : > { %2945 = vmatprep.mubr.bf16.mxu1 %v3346_v40  ;;  %v4230_v40 = vld [vmem:[%s4458_s7 + $0x6a8] sm:$0xff]  }
  0xbb   : > { %3801 = vmatpush3.bf16.msra.mxu0 %v4149_v7  ;;  %v4205_v7 = vld [vmem:[%s4458_s7 + $0x538] sm:$0xff]  }
  0xbc   : > { %3823 = vmatpush3.bf16.msra.mxu1 %v4150_v8  ;;  %3802 = vmatprep.subr.bf16.mxu0 %v4151_v9  ;;  %v4206_v8 = vld [vmem:[%s4458_s7 + $0x5b8] sm:$0xff]   ;;  %v314_v9 = vld [vmem:[%s4460_s8 + $0x50] sm:$0xff] }
  0xbd   : > { %3824 = vmatprep.subr.bf16.mxu1 %v4152_v10  ;;  %v330_v10 = vld [vmem:[%s4460_s8 + $0xd0] sm:$0xff] }
  0xbf   : > { %3803 = vmatpush3.bf16.msra.mxu0 %v4153_v11  ;;  %v315_v11 = vld [vmem:[%s4460_s8 + $0x58] sm:$0xff] }
  0xc0   : > { %3825 = vmatpush3.bf16.msra.mxu1 %v4154_v12  ;;  %3804 = vmatprep.subr.bf16.mxu0 %v4155_v13  ;;  %v331_v12 = vld [vmem:[%s4460_s8 + $0xd8] sm:$0xff]  ;;  %v3347_v13 = vcombine.low %v314_v9, %v330_v10 }
  0xc1   : > { %3826 = vmatprep.subr.bf16.mxu1 %v4156_v14  ;;  %v3348_v14 = vcombine.high %v314_v9, %v330_v10  ;;  %v4254_v10 = vld [vmem:[%s4458_s7 + $0x798] sm:$0xff]  }
  0xc3   : > { %3805 = vmatpush3.bf16.msra.mxu0 %v4157_v15  ;;  %v3349_v15 = vcombine.low %v315_v11, %v331_v12 }
  0xc4   : > { %3827 = vmatpush3.bf16.msra.mxu1 %v4158_v16  ;;  %3806 = vmatprep.subr.bf16.mxu0 %v4159_v17  ;;  %v3350_v16 = vcombine.high %v315_v11, %v331_v12  ;;  %v4207_v17 = vld [vmem:[%s4458_s7 + $0x640] sm:$0xff]  }
  0xc5   : > { %3828 = vmatprep.subr.bf16.mxu1 %v4160_v18  ;;  %v4208_v18 = vld [vmem:[%s4458_s7 + $0x6c0] sm:$0xff]  }
  0xc6   : > { %v4255_v12 = vld [vmem:[%s4458_s7 + $0x760] sm:$0xff]  }
  0xc7   : > { %3807 = vmatpush3.bf16.msra.mxu0 %v4161_v19  ;;  %v4209_v19 = vld [vmem:[%s4458_s7 + $0x600] sm:$0xff]  }
  0xc8   : > { %3829 = vmatpush3.bf16.msra.mxu1 %v4162_v20  ;;  %3808 = vmatprep.subr.bf16.mxu0 %v4163_v21  ;;  %v4210_v20 = vld [vmem:[%s4458_s7 + $0x680] sm:$0xff]   ;;  %v4211_v21 = vld [vmem:[%s4458_s7 + $0x648] sm:$0xff]  }
  0xc9   : > { %3830 = vmatprep.subr.bf16.mxu1 %v4164_v22  ;;  %v4212_v22 = vld [vmem:[%s4458_s7 + $0x6c8] sm:$0xff]  }
  0xcb   : > { %3809 = vmatpush3.bf16.msra.mxu0 %v4165_v23  ;;  %v4213_v23 = vld [vmem:[%s4458_s7 + $0x608] sm:$0xff]  }
  0xcc   : > { %3831 = vmatpush3.bf16.msra.mxu1 %v4166_v24  ;;  %3810 = vmatprep.subr.bf16.mxu0 %v4167_v25  ;;  %v4214_v24 = vld [vmem:[%s4458_s7 + $0x688] sm:$0xff]   ;;  %v4215_v25 = vld [vmem:[%s4458_s7 + $0x650] sm:$0xff]  }
  0xcd   : > { %3832 = vmatprep.subr.bf16.mxu1 %v4168_v26  ;;  %v4216_v26 = vld [vmem:[%s4458_s7 + $0x6d0] sm:$0xff]  }
  0xcf   : > { %3811 = vmatpush3.bf16.msra.mxu0 %v4169_v27  ;;  %v4217_v27 = vld [vmem:[%s4458_s7 + $0x610] sm:$0xff]  }
  0xd0   : > { %3833 = vmatpush3.bf16.msra.mxu1 %v4170_v28  ;;  %3812 = vmatprep.subr.bf16.mxu0 %v4171_v29  ;;  %v4218_v28 = vld [vmem:[%s4458_s7 + $0x690] sm:$0xff]   ;;  %v4219_v29 = vld [vmem:[%s4458_s7 + $0x658] sm:$0xff]  }
  0xd1   : > { %3834 = vmatprep.subr.bf16.mxu1 %v4172_v30  ;;  %v4220_v30 = vld [vmem:[%s4458_s7 + $0x6d8] sm:$0xff]  }
  0xd3   : > { %3813 = vmatpush3.bf16.msra.mxu0 %v4173_v31  ;;  %v4221_v31 = vld [vmem:[%s4458_s7 + $0x618] sm:$0xff]  }
  0xd4   : > { %3835 = vmatpush3.bf16.msra.mxu1 %v4174_v32  ;;  %3842 = vmatprep.subr.bf16.mxu0 %v4175_v41  ;;  %v4222_v32 = vld [vmem:[%s4458_s7 + $0x698] sm:$0xff]   ;;  %v4231_v41 = vld [vmem:[%s4458_s7 + $0x670] sm:$0xff]  }
  0xd5   : > { %3864 = vmatprep.subr.bf16.mxu1 %v4176_v42  ;;  %v4232_v42 = vld [vmem:[%s4458_s7 + $0x6f0] sm:$0xff]  }
  0xd6   : > { %2905 = vmatmul.mubr.bf16.vlgmr.msra.gmra.mrb[16].mxu0 %v3343_v35  ;;  %v4225_v35 = vld [vmem:[%s4458_s7 + $0x620] sm:$0xff]  }
  0xd7   : > { %2946 = vmatmul.mubr.bf16.vlgmr.msra.gmra.mrb[16].mxu1 %v3345_v39  ;;  %3843 = vmatpush3.bf16.msra.mxu0 %v4177_v43  ;;  %v4229_v39 = vld [vmem:[%s4458_s7 + $0x628] sm:$0xff]   ;;  %v4233_v43 = vld [vmem:[%s4458_s7 + $0x630] sm:$0xff]  }
  0xd8   : > { %3865 = vmatpush3.bf16.msra.mxu1 %v4178_v44  ;;  %3844 = vmatprep.subr.bf16.mxu0 %v4179_v45  ;;  %v4234_v44 = vld [vmem:[%s4458_s7 + $0x6b0] sm:$0xff]   ;;  %v4235_v45 = vld [vmem:[%s4458_s7 + $0x678] sm:$0xff]  }
  0xd9   : > { %3866 = vmatprep.subr.bf16.mxu1 %v4180_v46  ;;  %2986 = vmatprep.mubr.bf16.mxu0 %v3348_v14  ;;  %v4236_v46 = vld [vmem:[%s4458_s7 + $0x6f8] sm:$0xff]  }
  0xda   : > { %3027 = vmatprep.mubr.bf16.mxu1 %v3350_v16 }
  0xdb   : > { %3845 = vmatpush3.bf16.msra.mxu0 %v4181_v47  ;;  %v4237_v47 = vld [vmem:[%s4458_s7 + $0x638] sm:$0xff]  }
  0xdc   : > { %3867 = vmatpush3.bf16.msra.mxu1 %v4182_v48  ;;  %3846 = vmatprep.subr.bf16.mxu0 %v4183_v49  ;;  %v4238_v48 = vld [vmem:[%s4458_s7 + $0x6b8] sm:$0xff]   ;;  %v316_v49 = vld [vmem:[%s4460_s8 + $0x60] sm:$0xff] }
  0xdd   : > { %3868 = vmatprep.subr.bf16.mxu1 %v4184_v50  ;;  %v332_v50 = vld [vmem:[%s4460_s8 + $0xe0] sm:$0xff] }
  0xdf   : > { %3847 = vmatpush3.bf16.msra.mxu0 %v4185_v51  ;;  %v317_v51 = vld [vmem:[%s4460_s8 + $0x68] sm:$0xff] }
  0xe0   : > { %3869 = vmatpush3.bf16.msra.mxu1 %v4186_v52  ;;  %3848 = vmatprep.subr.bf16.mxu0 %v4187_v53  ;;  %v3351_v52 = vcombine.low %v316_v49, %v332_v50  ;;  %v3352_v53 = vcombine.high %v316_v49, %v332_v50 }
  0xe1   : > { %3870 = vmatprep.subr.bf16.mxu1 %v4188_v54  ;;  %v333_v54 = vld [vmem:[%s4460_s8 + $0xe8] sm:$0xff] }
  0xe3   : > { %3849 = vmatpush3.bf16.msra.mxu0 %v4189_v55  ;;  %v3353_v55 = vcombine.low %v317_v51, %v333_v54 }
  0xe4   : > { %3871 = vmatpush3.bf16.msra.mxu1 %v4190_v56  ;;  %3850 = vmatprep.subr.bf16.mxu0 %v4191_v57  ;;  %v3354_v56 = vcombine.high %v317_v51, %v333_v54  ;;  %v4239_v57 = vld [vmem:[%s4458_s7 + $0x740] sm:$0xff]  }
  0xe5   : > { %3872 = vmatprep.subr.bf16.mxu1 %v4192_v58  ;;  %v4240_v58 = vld [vmem:[%s4458_s7 + $0x7c0] sm:$0xff]  }
  0xe7   : > { %3851 = vmatpush3.bf16.msra.mxu0 %v4193_v59  ;;  %v4241_v59 = vld [vmem:[%s4458_s7 + $0x700] sm:$0xff]  }
  0xe8   : > { %3873 = vmatpush3.bf16.msra.mxu1 %v4194_v60  ;;  %3852 = vmatprep.subr.bf16.mxu0 %v4195_v61  ;;  %v4242_v60 = vld [vmem:[%s4458_s7 + $0x780] sm:$0xff]   ;;  %v4243_v61 = vld [vmem:[%s4458_s7 + $0x748] sm:$0xff]  }
  0xe9   : > { %3874 = vmatprep.subr.bf16.mxu1 %v4196_v62  ;;  %v4244_v62 = vld [vmem:[%s4458_s7 + $0x7c8] sm:$0xff]  }
  0xeb   : > { %3853 = vmatpush3.bf16.msra.mxu0 %v4197_v63  ;;  %v4245_v63 = vld [vmem:[%s4458_s7 + $0x708] sm:$0xff]  }
  0xec   : > { %3875 = vmatpush3.bf16.msra.mxu1 %v4198_v0  ;;  %3854 = vmatprep.subr.bf16.mxu0 %v4199_v1  ;;  %v4246_v0 = vld [vmem:[%s4458_s7 + $0x788] sm:$0xff]   ;;  %v4247_v1 = vld [vmem:[%s4458_s7 + $0x750] sm:$0xff]  }
  0xed   : > { %3876 = vmatprep.subr.bf16.mxu1 %v4200_v2  ;;  %v4248_v2 = vld [vmem:[%s4458_s7 + $0x7d0] sm:$0xff]  }
  0xef   : > { %3855 = vmatpush3.bf16.msra.mxu0 %v4201_v3  ;;  %v4249_v3 = vld [vmem:[%s4458_s7 + $0x710] sm:$0xff]  }
  0xf0   : > { %3877 = vmatpush3.bf16.msra.mxu1 %v4202_v4  ;;  %3856 = vmatprep.subr.bf16.mxu0 %v4203_v5  ;;  %v4250_v4 = vld [vmem:[%s4458_s7 + $0x790] sm:$0xff]   ;;  %v4251_v5 = vld [vmem:[%s4458_s7 + $0x758] sm:$0xff]  }
  0xf1   : > { %3878 = vmatprep.subr.bf16.mxu1 %v4204_v6  ;;  %v4252_v6 = vld [vmem:[%s4458_s7 + $0x7d8] sm:$0xff]  }
  0xf3   : > { %3857 = vmatpush3.bf16.msra.mxu0 %v4205_v7 }
  0xf4   : > { %3879 = vmatpush3.bf16.msra.mxu1 %v4206_v8  ;;  %3886 = vmatprep.subr.bf16.mxu0 %v4207_v17  ;;  %v4253_v8 = vld [vmem:[%s4458_s7 + $0x718] sm:$0xff]  }
  0xf5   : > { %3908 = vmatprep.subr.bf16.mxu1 %v4208_v18  ;;  %v4257_v18 = vld [vmem:[%s4458_s7 + $0x720] sm:$0xff]  }
  0xf6   : > { %2987 = vmatmul.mubr.bf16.vlgmr.msra.gmra.mrb[20].mxu0 %v3347_v13 }
  0xf7   : > { %3028 = vmatmul.mubr.bf16.vlgmr.msra.gmra.mrb[20].mxu1 %v3349_v15  ;;  %3887 = vmatpush3.bf16.msra.mxu0 %v4209_v19  ;;  %v4256_v15 = vld [vmem:[%s4458_s7 + $0x7e0] sm:$0xff]  }
  0xf8   : > { %3909 = vmatpush3.bf16.msra.mxu1 %v4210_v20  ;;  %3888 = vmatprep.subr.bf16.mxu0 %v4211_v21  ;;  %v4258_v20 = vld [vmem:[%s4458_s7 + $0x7a0] sm:$0xff]  }
  0xf9   : > { %3910 = vmatprep.subr.bf16.mxu1 %v4212_v22  ;;  %3068 = vmatprep.mubr.bf16.mxu0 %v3352_v53 }
  0xfa   : > { %3109 = vmatprep.mubr.bf16.mxu1 %v3354_v56 }
  0xfb   : > { %3889 = vmatpush3.bf16.msra.mxu0 %v4213_v23  ;;  %v4259_v23 = vld [vmem:[%s4458_s7 + $0x768] sm:$0xff]  }
  0xfc   : > { %3911 = vmatpush3.bf16.msra.mxu1 %v4214_v24  ;;  %3890 = vmatprep.subr.bf16.mxu0 %v4215_v25 }
  0xfd   : > { %3912 = vmatprep.subr.bf16.mxu1 %v4216_v26  ;;  %v4260_v26 = vld [vmem:[%s4458_s7 + $0x7e8] sm:$0xff]  }
  0xff   : > { %3891 = vmatpush3.bf16.msra.mxu0 %v4217_v27 }
 0x100   : > { %3913 = vmatpush3.bf16.msra.mxu1 %v4218_v28  ;;  %3892 = vmatprep.subr.bf16.mxu0 %v4219_v29  ;;  %v4261_v28 = vld [vmem:[%s4458_s7 + $0x728] sm:$0xff]  }
 0x101   : > { %3914 = vmatprep.subr.bf16.mxu1 %v4220_v30  ;;  %v4262_v29 = vld [vmem:[%s4458_s7 + $0x7a8] sm:$0xff]  }
 0x103   : > { %3893 = vmatpush3.bf16.msra.mxu0 %v4221_v31  ;;  %v4263_v31 = vld [vmem:[%s4458_s7 + $0x770] sm:$0xff]  }
 0x104   : > { %3915 = vmatpush3.bf16.msra.mxu1 %v4222_v32  ;;  %3894 = vmatprep.subr.bf16.mxu0 %v4223_v33  ;;  %v4264_v32 = vld [vmem:[%s4458_s7 + $0x7f0] sm:$0xff]  }
 0x105   : > { %3916 = vmatprep.subr.bf16.mxu1 %v4224_v34  ;;  %v4265_v33 = vld [vmem:[%s4458_s7 + $0x730] sm:$0xff]  }
 0x106   : > { %v4266_v34 = vld [vmem:[%s4458_s7 + $0x7b0] sm:$0xff]  }
 0x107   : > { %3895 = vmatpush3.bf16.msra.mxu0 %v4225_v35  ;;  %v4267_v35 = vld [vmem:[%s4458_s7 + $0x778] sm:$0xff]  }
 0x108   : > { %3917 = vmatpush3.bf16.msra.mxu1 %v4226_v36  ;;  %3896 = vmatprep.subr.bf16.mxu0 %v4227_v37  ;;  %v4268_v36 = vld [vmem:[%s4458_s7 + $0x7f8] sm:$0xff]  }
 0x109   : > { %3918 = vmatprep.subr.bf16.mxu1 %v4228_v38  ;;  %v4269_v37 = vld [vmem:[%s4458_s7 + $0x738] sm:$0xff]  }
 0x10a   : > { %v4270_v38 = vld [vmem:[%s4458_s7 + $0x7b8] sm:$0xff]  }
 0x10b   : > { %3897 = vmatpush3.bf16.msra.mxu0 %v4229_v39  ;;  %v318_v39 = vld [vmem:[%s4460_s8 + $0x70] sm:$0xff] }
 0x10c   : > { %3919 = vmatpush3.bf16.msra.mxu1 %v4230_v40  ;;  %3898 = vmatprep.subr.bf16.mxu0 %v4231_v41  ;;  %v334_v40 = vld [vmem:[%s4460_s8 + $0xf0] sm:$0xff] }
 0x10d   : > { %3920 = vmatprep.subr.bf16.mxu1 %v4232_v42  ;;  %v3355_v41 = vcombine.low %v318_v39, %v334_v40  ;;  %v3356_v42 = vcombine.high %v318_v39, %v334_v40 }
 0x10f   : > { %3899 = vmatpush3.bf16.msra.mxu0 %v4233_v43  ;;  %v319_v43 = vld [vmem:[%s4460_s8 + $0x78] sm:$0xff] }
 0x110   : > { %3921 = vmatpush3.bf16.msra.mxu1 %v4234_v44  ;;  %3900 = vmatprep.subr.bf16.mxu0 %v4235_v45  ;;  %v335_v44 = vld [vmem:[%s4460_s8 + $0xf8] sm:$0xff] }
 0x111   : > { %3922 = vmatprep.subr.bf16.mxu1 %v4236_v46  ;;  %v3357_v45 = vcombine.low %v319_v43, %v335_v44  ;;  %v3358_v46 = vcombine.high %v319_v43, %v335_v44 }
 0x113   : > { %3901 = vmatpush3.bf16.msra.mxu0 %v4237_v47 }
 0x114   : > { %3923 = vmatpush3.bf16.msra.mxu1 %v4238_v48  ;;  %3930 = vmatprep.subr.bf16.mxu0 %v4239_v57 }
 0x115   : > { %3952 = vmatprep.subr.bf16.mxu1 %v4240_v58 }
 0x116   : > { %3069 = vmatmul.mubr.bf16.vlgmr.msra.gmra.mrb[24].mxu0 %v3351_v52 }
 0x117   : > { %3110 = vmatmul.mubr.bf16.vlgmr.msra.gmra.mrb[24].mxu1 %v3353_v55  ;;  %3931 = vmatpush3.bf16.msra.mxu0 %v4241_v59 }
 0x118   : > { %3953 = vmatpush3.bf16.msra.mxu1 %v4242_v60  ;;  %3932 = vmatprep.subr.bf16.mxu0 %v4243_v61 }
 0x119   : > { %3954 = vmatprep.subr.bf16.mxu1 %v4244_v62  ;;  %3150 = vmatprep.mubr.bf16.mxu0 %v3356_v42 }
 0x11a   : > { %3191 = vmatprep.mubr.bf16.mxu1 %v3358_v46 }
 0x11b   : > { %3933 = vmatpush3.bf16.msra.mxu0 %v4245_v63 }
 0x11c   : > { %3955 = vmatpush3.bf16.msra.mxu1 %v4246_v0  ;;  %3934 = vmatprep.subr.bf16.mxu0 %v4247_v1 }
 0x11d   : > { %3956 = vmatprep.subr.bf16.mxu1 %v4248_v2 }
 0x11f   : > { %3935 = vmatpush3.bf16.msra.mxu0 %v4249_v3 }
 0x120   : > { %3957 = vmatpush3.bf16.msra.mxu1 %v4250_v4  ;;  %3936 = vmatprep.subr.bf16.mxu0 %v4251_v5 }
 0x121   : > { %3958 = vmatprep.subr.bf16.mxu1 %v4252_v6 }
 0x123   : > { %3937 = vmatpush3.bf16.msra.mxu0 %v4253_v8 }
 0x124   : > { %3959 = vmatpush3.bf16.msra.mxu1 %v4254_v10  ;;  %3938 = vmatprep.subr.bf16.mxu0 %v4255_v12 }
 0x125   : > { %3960 = vmatprep.subr.bf16.mxu1 %v4256_v15 }
 0x127   : > { %3939 = vmatpush3.bf16.msra.mxu0 %v4257_v18 }
 0x128   : > { %3961 = vmatpush3.bf16.msra.mxu1 %v4258_v20  ;;  %3940 = vmatprep.subr.bf16.mxu0 %v4259_v23 }
 0x129   : > { %v3638_v7 = vpop.f32.mrb[0].mxu0  ;;  %3962 = vmatprep.subr.bf16.mxu1 %v4260_v26 }
 0x12a   : > { %v3660_v9 = vpop.f32.mrb[0].mxu1  ;;  %v3639_v11 = vpop.f32.mrb[1].mxu0 }
 0x12b   : > { %v3640_v13 = vadd.f32 %v3639_v11, %v3638_v7  ;;  %v3661_v14 = vpop.f32.mrb[1].mxu1  ;;  %v3641_v17 = vpop.f32.mrb[2].mxu0  ;;  %3941 = vmatpush3.bf16.msra.mxu0 %v4261_v28 }
 0x12c   : > { %v3662_v16 = vadd.f32 %v3661_v14, %v3660_v9  ;;  %v3663_v19 = vpop.f32.mrb[2].mxu1  ;;  %v3642_v22 = vpop.f32.mrb[3].mxu0  ;;  %3963 = vmatpush3.bf16.msra.mxu1 %v4262_v29  ;;  %3942 = vmatprep.subr.bf16.mxu0 %v4263_v31 }
 0x12d   : > { %v3643_v24 = vadd.f32 %v3642_v22, %v3641_v17  ;;  %v3664_v25 = vpop.f32.mrb[3].mxu1  ;;  %3964 = vmatprep.subr.bf16.mxu1 %v4264_v32 }
 0x12e   : > { %v2620_v21 = vadd.f32 %v3662_v16, %v3640_v13  ;;  %v3665_v27 = vadd.f32 %v3664_v25, %v3663_v19 }
 0x12f   : > { %3943 = vmatpush3.bf16.msra.mxu0 %v4265_v33 }
 0x130   : > { %v2623_v30 = vadd.f32 %v3665_v27, %v3643_v24  ;;  %3965 = vmatpush3.bf16.msra.mxu1 %v4266_v34  ;;  %3944 = vmatprep.subr.bf16.mxu0 %v4267_v35 }
 0x131   : > { %3966 = vmatprep.subr.bf16.mxu1 %v4268_v36 }
 0x133   : > { %3945 = vmatpush3.bf16.msra.mxu0 %v4269_v37 }
 0x134   : > { %3967 = vmatpush3.bf16.msra.mxu1 %v4270_v38 }
 0x136   : > { %3151 = vmatmul.mubr.bf16.vlgmr.msra.gmra.mrb[28].mxu0 %v3355_v41 }
 0x137   : > { %3192 = vmatmul.mubr.bf16.vlgmr.msra.gmra.mrb[28].mxu1 %v3357_v45 }
 0x149   : > { %v3682_v47 = vpop.f32.mrb[4].mxu0 }
 0x14a   : > { %v3704_v48 = vpop.f32.mrb[4].mxu1  ;;  %v3683_v49 = vpop.f32.mrb[5].mxu0 }
 0x14b   : > { %v3684_v50 = vadd.f32 %v3683_v49, %v3682_v47  ;;  %v3705_v51 = vpop.f32.mrb[5].mxu1  ;;  %v3685_v52 = vpop.f32.mrb[6].mxu0 }
 0x14c   : > { %v3706_v53 = vadd.f32 %v3705_v51, %v3704_v48  ;;  %v3707_v54 = vpop.f32.mrb[6].mxu1  ;;  %v3686_v55 = vpop.f32.mrb[7].mxu0 }
 0x14d   : > { %v2661_v56 = vadd.f32 %v3684_v50, %v2620_v21  ;;  %v3687_v57 = vadd.f32 %v3686_v55, %v3685_v52  ;;  %v3708_v58 = vpop.f32.mrb[7].mxu1 }
 0x14e   : > { %v3709_v59 = vadd.f32 %v3708_v58, %v3707_v54 }
 0x14f   : > { %v2702_v60 = vadd.f32 %v3706_v53, %v2661_v56  ;;  %v2664_v61 = vadd.f32 %v3687_v57, %v2623_v30 }
 0x151   : > { %v2705_v62 = vadd.f32 %v3709_v59, %v2664_v61 }
 0x169   : > { %v3726_v63 = vpop.f32.mrb[8].mxu0 }
 0x16a   : > { %v3748_v0 = vpop.f32.mrb[8].mxu1  ;;  %v3727_v1 = vpop.f32.mrb[9].mxu0 }
 0x16b   : > { %v3749_v2 = vpop.f32.mrb[9].mxu1  ;;  %v3728_v3 = vadd.f32 %v3727_v1, %v3726_v63  ;;  %v3729_v5 = vpop.f32.mrb[10].mxu0 }
 0x16c   : > { %v3750_v4 = vadd.f32 %v3749_v2, %v3748_v0  ;;  %v3751_v6 = vpop.f32.mrb[10].mxu1  ;;  %v3730_v7 = vpop.f32.mrb[11].mxu0 }
 0x16d   : > { %v3752_v8 = vpop.f32.mrb[11].mxu1  ;;  %v2743_v9 = vadd.f32 %v3728_v3, %v2702_v60  ;;  %v3731_v10 = vadd.f32 %v3730_v7, %v3729_v5 }
 0x16e   : > { %v3753_v11 = vadd.f32 %v3752_v8, %v3751_v6 }
 0x16f   : > { %v2784_v12 = vadd.f32 %v3750_v4, %v2743_v9  ;;  %v2746_v13 = vadd.f32 %v3731_v10, %v2705_v62 }
 0x171   : > { %v2787_v14 = vadd.f32 %v3753_v11, %v2746_v13 }
 0x189   : > { %v3770_v15 = vpop.f32.mrb[12].mxu0 }
 0x18a   : > { %v3792_v16 = vpop.f32.mrb[12].mxu1  ;;  %v3771_v17 = vpop.f32.mrb[13].mxu0 }
 0x18b   : > { %v3772_v18 = vadd.f32 %v3771_v17, %v3770_v15  ;;  %v3793_v19 = vpop.f32.mrb[13].mxu1  ;;  %v3773_v20 = vpop.f32.mrb[14].mxu0 }
 0x18c   : > { %v3794_v21 = vadd.f32 %v3793_v19, %v3792_v16  ;;  %v3795_v22 = vpop.f32.mrb[14].mxu1  ;;  %v3774_v23 = vpop.f32.mrb[15].mxu0 }
 0x18d   : > { %v2825_v24 = vadd.f32 %v3772_v18, %v2784_v12  ;;  %v3775_v25 = vadd.f32 %v3774_v23, %v3773_v20  ;;  %v3796_v26 = vpop.f32.mrb[15].mxu1 }
 0x18e   : > { %v3797_v27 = vadd.f32 %v3796_v26, %v3795_v22 }
 0x18f   : > { %v2866_v28 = vadd.f32 %v3794_v21, %v2825_v24  ;;  %v2828_v29 = vadd.f32 %v3775_v25, %v2787_v14 }
 0x191   : > { %v2869_v30 = vadd.f32 %v3797_v27, %v2828_v29  ;;  %v302_v27 = vld [vmem:[#allocation2] sm:$0xff] }
 0x1a9   : > { %v3814_v31 = vpop.f32.mrb[16].mxu0 }
 0x1aa   : > { %v3836_v32 = vpop.f32.mrb[16].mxu1  ;;  %v3815_v33 = vpop.f32.mrb[17].mxu0 }
 0x1ab   : > { %v3816_v34 = vadd.f32 %v3815_v33, %v3814_v31  ;;  %v3837_v35 = vpop.f32.mrb[17].mxu1  ;;  %v3817_v36 = vpop.f32.mrb[18].mxu0  ;;  %v303_v31 = vld [vmem:[#allocation2 + $0x8] sm:$0xff] }
 0x1ac   : > { %v3838_v37 = vadd.f32 %v3837_v35, %v3836_v32  ;;  %v3839_v38 = vpop.f32.mrb[18].mxu1  ;;  %v3818_v39 = vpop.f32.mrb[19].mxu0 }
 0x1ad   : > { %v2907_v40 = vadd.f32 %v3816_v34, %v2866_v28  ;;  %v3819_v41 = vadd.f32 %v3818_v39, %v3817_v36  ;;  %v3840_v42 = vpop.f32.mrb[19].mxu1  ;;  %v3616_v36 = vld [vmem:[%s4778_s2] ss:$0 sm:$0xff] (!%p3615_p11) }
 0x1ae   : > { %v3841_v43 = vadd.f32 %v3840_v42, %v3839_v38 }
 0x1af   : > { %v2948_v44 = vadd.f32 %v3838_v37, %v2907_v40  ;;  %v2910_v45 = vadd.f32 %v3819_v41, %v2869_v30 }
 0x1b1   : > { %v2951_v46 = vadd.f32 %v3841_v43, %v2910_v45 }
 0x1c9   : > { %v3858_v47 = vpop.f32.mrb[20].mxu0 }
 0x1ca   : > { %v3880_v48 = vpop.f32.mrb[20].mxu1  ;;  %v3859_v49 = vpop.f32.mrb[21].mxu0 }
 0x1cb   : > { %v3881_v50 = vpop.f32.mrb[21].mxu1  ;;  %v3860_v51 = vadd.f32 %v3859_v49, %v3858_v47  ;;  %v3861_v53 = vpop.f32.mrb[22].mxu0 }
 0x1cc   : > { %v3882_v52 = vadd.f32 %v3881_v50, %v3880_v48  ;;  %v3883_v54 = vpop.f32.mrb[22].mxu1  ;;  %v3862_v55 = vpop.f32.mrb[23].mxu0 }
 0x1cd   : > { %v3884_v56 = vpop.f32.mrb[23].mxu1  ;;  %v2989_v57 = vadd.f32 %v3860_v51, %v2948_v44  ;;  %v3863_v58 = vadd.f32 %v3862_v55, %v3861_v53 }
 0x1ce   : > { %v3885_v59 = vadd.f32 %v3884_v56, %v3883_v54 }
 0x1cf   : > { %v3030_v60 = vadd.f32 %v3882_v52, %v2989_v57  ;;  %v2992_v61 = vadd.f32 %v3863_v58, %v2951_v46 }
 0x1d1   : > { %v3033_v62 = vadd.f32 %v3885_v59, %v2992_v61 }
 0x1e9   : > { %v3902_v63 = vpop.f32.mrb[24].mxu0 }
 0x1ea   : > { %v3924_v0 = vpop.f32.mrb[24].mxu1  ;;  %v3903_v1 = vpop.f32.mrb[25].mxu0 }
 0x1eb   : > { %v3904_v2 = vadd.f32 %v3903_v1, %v3902_v63  ;;  %v3925_v3 = vpop.f32.mrb[25].mxu1  ;;  %v3905_v4 = vpop.f32.mrb[26].mxu0 }
 0x1ec   : > { %v3926_v5 = vadd.f32 %v3925_v3, %v3924_v0  ;;  %v3927_v6 = vpop.f32.mrb[26].mxu1  ;;  %v3906_v7 = vpop.f32.mrb[27].mxu0 }
 0x1ed   : > { %v3071_v8 = vadd.f32 %v3904_v2, %v3030_v60  ;;  %v3907_v9 = vadd.f32 %v3906_v7, %v3905_v4  ;;  %v3928_v10 = vpop.f32.mrb[27].mxu1 }
 0x1ee   : > { %v3929_v11 = vadd.f32 %v3928_v10, %v3927_v6 }
 0x1ef   : > { %v3112_v12 = vadd.f32 %v3926_v5, %v3071_v8  ;;  %v3074_v13 = vadd.f32 %v3907_v9, %v3033_v62 }
 0x1f1   : > { %v3115_v14 = vadd.f32 %v3929_v11, %v3074_v13 }
 0x209   : > { %v3946_v15 = vpop.f32.mrb[28].mxu0 }
 0x20a   : > { %v3968_v16 = vpop.f32.mrb[28].mxu1  ;;  %v3947_v17 = vpop.f32.mrb[29].mxu0 }
 0x20b   : > { %v3948_v18 = vadd.f32 %v3947_v17, %v3946_v15  ;;  %v3969_v19 = vpop.f32.mrb[29].mxu1  ;;  %v3949_v20 = vpop.f32.mrb[30].mxu0 }
 0x20c   : > { %v3970_v21 = vadd.f32 %v3969_v19, %v3968_v16  ;;  %v3971_v22 = vpop.f32.mrb[30].mxu1  ;;  %v3950_v23 = vpop.f32.mrb[31].mxu0 }
 0x20d   : > { %v3153_v24 = vadd.f32 %v3948_v18, %v3112_v12  ;;  %v3951_v25 = vadd.f32 %v3950_v23, %v3949_v20  ;;  %v3972_v26 = vpop.f32.mrb[31].mxu1 }
 0x20e   : > { %v3973_v28 = vadd.f32 %v3972_v26, %v3971_v22 }
 0x20f   : > { %v3194_v29 = vadd.f32 %v3970_v21, %v3153_v24  ;;  %v3156_v30 = vadd.f32 %v3951_v25, %v3115_v14  ;;  %3207 = sbr.rel (%p3615_p11) target bundleno = 572 (0x23c), region = 63 }
 0x211   : > { %v3200_v32 = vadd.f32 %v3194_v29, %v302_v27  ;;  %v3197_v33 = vadd.f32 %v3973_v28, %v3156_v30 }
 0x213   : > { %3202 = vst [vmem:[#allocation2] sm:$0xff] %v3200_v32  ;;  %v3201_v34 = vadd.f32 %v3197_v33, %v303_v31 }
 0x215   : > { %3203 = vst [vmem:[#allocation2 + $0x8] sm:$0xff] %v3201_v34 }
 0x21a   : > { %v3208_v35 = vld [vmem:[#allocation2] sm:$0xff] }
 0x21b   : > { %v3217_v38 = vadd.f32 %v3616_v36, %v3208_v35 }
 0x21c   : > { %v3209_v37 = vld [vmem:[#allocation2 + $0x8] sm:$0xff] }
 0x21d   : > { %v3218_v39 = vadd.f32 %v3616_v36, %v3209_v37  ;;  %v3219_v40 = vsub.f32 0.0, %v3217_v38 }
 0x21f   : > { %v3220_v41 = vsub.f32 0.0, %v3218_v39  ;;  %v3221_v42 = vmul.f32 1.442695, %v3219_v40 }
 0x221   : > { %v3223_v43 = vmul.f32 1.442695, %v3220_v41  ;;  %4271 = vpow2.f32 %v3221_v42 }
 0x223   : > { %4273 = vpow2.f32 %v3223_v43 }
 0x22b   : > { %v4272_v44 = vpop.eup %4271 }
 0x22c   : > { %v3225_v46 = vadd.f32 1.0, %v4272_v44 }
 0x22d   : > { %v4274_v45 = vpop.eup %4273 }
 0x22e   : > { %v3226_v47 = vadd.f32 1.0, %v4274_v45  ;;  %4275 = vrcp.f32 %v3225_v46 }
 0x230   : > { %4277 = vrcp.f32 %v3226_v47 }
 0x238   : > { %v4276_v48 = vpop.eup %4275 }
 0x239   : > { %3231 = vst [vmem:[%s4779_s3] sm:$0xff] %v4276_v48 }
 0x23a   : > { %v4278_v49 = vpop.eup %4277 }
 0x23b   : > { %3232 = vst [vmem:[%s4779_s3 + $0x8] sm:$0xff] %v4278_v49 }
 0x23c PF: > { %s13_s16 = sadd.s32 1, %s4317_s16   ;;  %s4780_s12 = smov %s4305_s13 }
 0x23d   : > { %p10_p12 = scmp.ge.s32.totalorder %s13_s16, 6   ;;  %s4781_s13 = smov %s4375_s20 }
 0x23e   : > { %s4782_s14 = smov %s4313_s15  ;;  %s4783_s15 = smov %s4785_s17 }
 0x23f   :  { %12 = sbr.rel (!%p10_p12) target bundleno = 3 (0x3), region = 101 }

</bundles_post_ra>
